<compile_context>
chip_gen: v7x
topology: tpu7x:2x2x1
jax: 0.10.0
libtpu: 0.0.40
codegen_flags: <defaults>
</compile_context>

<pallas_src>
import functools

import jax
import jax.numpy as jnp
import numpy as np
from jax import lax
from jax.experimental import pallas as pl
from jax.experimental.pallas import tpu as pltpu

# ------------------------- configuration (small) -------------------------
MAX_DIM = 64 * 16          # 1024, as in the reference code
ENC_DIM = 16
ENC_LAYERS = 3
DEC_DIM = 16
DEC_LAYERS = 3
N_ATTRS = 13
SHORTCUT_LAYERS = 1
INJECT_LAYERS = 1
IMG_SIZE = 16
F_SIZE = IMG_SIZE // (2 ** ENC_LAYERS)
BN_EPS = 1e-5
LRELU_SLOPE = 0.01         # nn.LeakyReLU() default
LANE = 128


def _round_up(x, m):
    return ((x + m - 1) // m) * m


def _channel_plan():
    """Per-layer (n_in, n_out), mirroring the PyTorch Generator construction."""
    enc = []
    n_in = 3
    for i in range(ENC_LAYERS):
        n_out = min(ENC_DIM * 2 ** i, MAX_DIM)
        enc.append((n_in, n_out))
        n_in = n_out
    dec = []
    n_in = n_in + N_ATTRS
    for i in range(DEC_LAYERS):
        if i < DEC_LAYERS - 1:
            n_out = min(DEC_DIM * 2 ** (DEC_LAYERS - i - 1), MAX_DIM)
            dec.append((n_in, n_out))
            n_in = n_out
            n_in = n_in + n_in // 2 if SHORTCUT_LAYERS > i else n_in
            n_in = n_in + N_ATTRS if INJECT_LAYERS > i else n_in
        else:
            dec.append((n_in, 3))
    return enc, dec


ENC_CH, DEC_CH = _channel_plan()


# ------------------------------ Pallas kernel ------------------------------
def _apply_act(x, act):
    if act == 'none':
        return x
    if act == 'relu':
        return jnp.maximum(x, 0.0)
    if act == 'lrelu':
        return jnp.where(x > 0, x, LRELU_SLOPE * x)
    if act == 'tanh':
        return jnp.tanh(x)
    if act == 'sigmoid':
        return jax.nn.sigmoid(x)
    raise ValueError('Unsupported activation: ' + str(act))


def _fused_conv_kernel(x_ref, w_ref, mask_ref, gb_ref, o_ref, *,
                       offsets, act, use_bn, m_out, inv_count, eps):
    """Fused (shifted-window GEMMs) + BatchNorm(train) / bias + activation.

    x_ref   : (m_pad, K)                bf16  flat input rows (no im2col copy)
    w_ref   : (n_groups*n_taps, K, Cp)  bf16  tap-decomposed weights, Cp=128-pad
    mask_ref: (m_out, 1)                f32   1.0 on valid output rows (BN stats)
    gb_ref  : (2, Cp)                   f32   row0 = gamma, row1 = beta (or bias)
    o_ref   : (n_groups, m_out, Cp)     bf16
    """
    n_taps = len(offsets[0])

    # --- tap-decomposed matmuls on the MXU (bf16 in, f32 accumulate) ---
    accs = []
    for g, offs in enumerate(offsets):
        acc = None
        for t, off in enumerate(offs):
            xs = x_ref[pl.ds(off, m_out), :]          # already bf16, no cast
            part = jnp.dot(xs, w_ref[g * n_taps + t],
                           preferred_element_type=jnp.float32)
            acc = part if acc is None else acc + part
        accs.append(acc)

    # --- fused epilogue (all f32, stored as bf16) ---
    if use_bn:
        # Single-pass batch statistics: masked sum and sum-of-squares.
        mask = mask_ref[...]                                   # (m_out, 1)
        s1 = None
        s2 = None
        for acc in accs:
            am = acc * mask
            p1 = jnp.sum(am, axis=0, keepdims=True)            # (1, Cp)
            p2 = jnp.sum(am * acc, axis=0, keepdims=True)      # (1, Cp)
            s1 = p1 if s1 is None else s1 + p1
            s2 = p2 if s2 is None else s2 + p2
        mean = s1 * inv_count
        var = jnp.maximum(s2 * inv_count - mean * mean, 0.0)
        scale = gb_ref[0:1, :] * lax.rsqrt(var + eps)
        shift = gb_ref[1:2, :] - mean * scale
        for g, acc in enumerate(accs):
            o_ref[g] = _apply_act(acc * scale + shift, act).astype(o_ref.dtype)
    else:
        bias = gb_ref[1:2, :]
        for g, acc in enumerate(accs):
            o_ref[g] = _apply_act(acc + bias, act).astype(o_ref.dtype)


def _fused_block_call(x2, wt, mask, gb, offsets, m_out, valid_count,
                      act, use_bn):
    m_pad, k = x2.shape
    n_w, _, cp = wt.shape
    n_groups = len(offsets)
    kernel = functools.partial(
        _fused_conv_kernel, offsets=offsets, act=act, use_bn=use_bn,
        m_out=m_out, inv_count=1.0 / float(valid_count), eps=BN_EPS)
    return pl.pallas_call(
        kernel,
        out_shape=jax.ShapeDtypeStruct((n_groups, m_out, cp), jnp.bfloat16),
        grid=(1,),
        in_specs=[
            pl.BlockSpec((m_pad, k), lambda i: (0, 0)),
            pl.BlockSpec((n_w, wt.shape[1], cp), lambda i: (0, 0, 0)),
            pl.BlockSpec((m_out, 1), lambda i: (0, 0)),
            pl.BlockSpec((2, cp), lambda i: (0, 0)),
        ],
        out_specs=pl.BlockSpec((n_groups, m_out, cp), lambda i: (0, 0, 0)),
        compiler_params=pltpu.CompilerParams(
            dimension_semantics=("arbitrary",)),
    )(x2, wt, mask, gb)


def _valid_mask(n, hfull, wfull, hv, wv, m_out):
    """(m_out, 1) f32 mask of valid output rows (trace-time constant)."""
    v = np.zeros((n, hfull, wfull), np.float32)
    v[:, :hv, :wv] = 1.0
    m = np.zeros((m_out, 1), np.float32)
    m[:n * hfull * wfull, 0] = v.reshape(-1)
    return jnp.asarray(m)


# --------------------- fused conv / convT block wrappers ---------------------
def conv4x4s2_bn_act(x, wt, gb, n_out, act):
    """Conv2d(k=4, s=2, p=1, bias=False) + BatchNorm2d(train) + act, NHWC.

    Lowered via space-to-depth (factor 2) to a 2x2 stride-1 conv, i.e. 4
    shifted row-window matmuls inside one fused Pallas kernel.
    """
    n, h, w, c = x.shape
    ho, wo = h // 2, w // 2
    hs, ws = ho + 1, wo + 1
    xp = jnp.pad(x.astype(jnp.bfloat16), ((0, 0), (1, 1), (1, 1), (0, 0)))
    # space-to-depth: channel order (di, dj, ci), matching the weight prep.
    xs = xp.reshape(n, hs, 2, ws, 2, c).transpose(0, 1, 3, 2, 4, 5)
    x2 = xs.reshape(n * hs * ws, 4 * c)
    m_full = n * hs * ws
    m_out = _round_up(m_full, 8)               # dense stores
    max_off = ws + 1
    m_pad = _round_up(m_out + max_off, 16)
    x2 = jnp.pad(x2, ((0, m_pad - m_full), (0, 0)))
    mask = _valid_mask(n, hs, ws, ho, wo, m_out)
    offsets = ((0, 1, ws, ws + 1),)            # (dh, dw) taps
    out = _fused_block_call(x2, wt, mask, gb, offsets, m_out,
                            n * ho * wo, act, use_bn=True)
    return out[0, :m_full].reshape(n, hs, ws, -1)[:, :ho, :wo, :n_out]


def convt4x4s2_block(x, wt, gb, n_out, act, use_bn):
    """ConvTranspose2d(k=4, s=2, p=1) [+ BatchNorm2d(train)] + act, NHWC.

    4-phase output-parity decomposition: each parity is a 2x2 stride-1 conv
    on the 1-padded input (K = Cin per tap, no zero-dilated columns).
    """
    n, h, w, c = x.shape
    hp, wp = h + 2, w + 2
    xp = jnp.pad(x.astype(jnp.bfloat16), ((0, 0), (1, 1), (1, 1), (0, 0)))
    x2 = xp.reshape(n * hp * wp, c)
    m_full = n * hp * wp
    m_out = _round_up(m_full, 8)
    max_off = 2 * wp + 2
    m_pad = _round_up(m_out + max_off, 16)
    x2 = jnp.pad(x2, ((0, m_pad - m_full), (0, 0)))
    mask = _valid_mask(n, hp, wp, h, w, m_out)
    offsets = tuple(
        tuple((ph + dh) * wp + (pw + dw) for dh in (0, 1) for dw in (0, 1))
        for ph in (0, 1) for pw in (0, 1))
    out = _fused_block_call(x2, wt, mask, gb, offsets, m_out,
                            4 * n * h * w, act, use_bn)
    cp = out.shape[-1]
    out = out[:, :m_full].reshape(2, 2, n, hp, wp, cp)[:, :, :, :h, :w, :n_out]
    out = out.transpose(2, 3, 0, 4, 1, 5).reshape(n, 2 * h, 2 * w, n_out)
    return out


# --------------------------- weight preprocessing ---------------------------
def _prep_conv_weight(w, cp):
    """PyTorch Conv2d weight (Cout, Cin, 4, 4) -> (4, 4*Cin, Cp) bf16 taps.

    Tap index t = dh*2 + dw; K index = (di*2 + dj)*Cin + ci; kh = 2*dh + di.
    """
    cout, cin = w.shape[0], w.shape[1]
    w6 = w.reshape(cout, cin, 2, 2, 2, 2)            # (co, ci, dh, di, dw, dj)
    wt = w6.transpose(2, 4, 3, 5, 1, 0).reshape(4, 4 * cin, cout)
    wt = jnp.pad(wt, ((0, 0), (0, 0), (0, cp - cout)))
    return wt.astype(jnp.bfloat16)


def _prep_convt_weight(w, cp):
    """PyTorch ConvTranspose2d weight (Cin, Cout, 4, 4) -> (16, Cin, Cp) bf16.

    Entry g*4 + t with g = ph*2+pw (output parity), t = dh*2+dw (tap) reads
    the 1-padded input at (h+ph+dh, w+pw+dw) and uses kernel row/col
    KSEL[p][d] with KSEL = ((3, 1), (2, 0)).
    """
    cin, cout = w.shape[0], w.shape[1]
    ksel = ((3, 1), (2, 0))
    taps = [w[:, :, ksel[ph][dh], ksel[pw][dw]]
            for ph in (0, 1) for pw in (0, 1)
            for dh in (0, 1) for dw in (0, 1)]
    wt = jnp.stack(taps, axis=0)                     # (16, Cin, Cout)
    wt = jnp.pad(wt, ((0, 0), (0, 0), (0, cp - cout)))
    return wt.astype(jnp.bfloat16)


def _pad_vec(v, cp):
    return jnp.pad(v.astype(jnp.float32), (0, cp - v.shape[0])).reshape(1, cp)


# --------------------------- parameter construction ---------------------------
# TODO(synk): the original AttGAN.__init__ loads args/checkpoint from disk;
# parameters are initialized deterministically in-script instead.
def init_params(key):
    raw = {'enc': [], 'dec': []}
    keys = iter(jax.random.split(key, 4 * (ENC_LAYERS + DEC_LAYERS)))
    for (n_in, n_out) in ENC_CH:
        raw['enc'].append({
            'w': 0.02 * jax.random.normal(next(keys), (n_out, n_in, 4, 4),
                                          jnp.float32),
            'gamma': jnp.ones((n_out,), jnp.float32),
            'beta': jnp.zeros((n_out,), jnp.float32),
        })
    for i, (n_in, n_out) in enumerate(DEC_CH):
        w = 0.02 * jax.random.normal(next(keys), (n_in, n_out, 4, 4),
                                     jnp.float32)
        if i < DEC_LAYERS - 1:
            raw['dec'].append({'w': w,
                               'gamma': jnp.ones((n_out,), jnp.float32),
                               'beta': jnp.zeros((n_out,), jnp.float32)})
        else:
            b = 0.02 * jax.random.normal(next(keys), (n_out,), jnp.float32)
            raw['dec'].append({'w': w, 'b': b})
    return raw


def prepare_params(raw):
    """One-time: tap-decompose, lane-pad (->128), bf16-cast, pack gamma/beta."""
    prep = {'enc': [], 'dec': []}
    for lp in raw['enc']:
        n_out = lp['w'].shape[0]
        cp = _round_up(n_out, LANE)
        gb = jnp.concatenate([_pad_vec(lp['gamma'], cp),
                              _pad_vec(lp['beta'], cp)], axis=0)
        prep['enc'].append({'wt': _prep_conv_weight(lp['w'], cp), 'gb': gb})
    for lp in raw['dec']:
        n_out = lp['w'].shape[1]
        cp = _round_up(n_out, LANE)
        if 'gamma' in lp:
            gb = jnp.concatenate([_pad_vec(lp['gamma'], cp),
                                  _pad_vec(lp['beta'], cp)], axis=0)
        else:
            gb = jnp.concatenate([jnp.ones((1, cp), jnp.float32),
                                  _pad_vec(lp['b'], cp)], axis=0)
        prep['dec'].append({'wt': _prep_convt_weight(lp['w'], cp), 'gb': gb})
    return prep


# ------------------------------ AttGAN forward ------------------------------
def _generator_forward(img_nchw, attr, enc_block, dec_block, act_dtype):
    x = jnp.transpose(img_nchw, (0, 2, 3, 1)).astype(act_dtype)  # NCHW -> NHWC
    zs = []
    z = x
    for i in range(ENC_LAYERS):
        z = enc_block(z, i)
        zs.append(z)
    n = img_nchw.shape[0]
    n_attrs = attr.shape[1]
    a = attr.astype(act_dtype).reshape(n, 1, 1, n_attrs)
    z = jnp.concatenate(
        [zs[-1], jnp.broadcast_to(a, (n, F_SIZE, F_SIZE, n_attrs))], axis=-1)
    for i in range(DEC_LAYERS):
        z = dec_block(z, i)
        if SHORTCUT_LAYERS > i:
            z = jnp.concatenate([z, zs[DEC_LAYERS - 2 - i]], axis=-1)
        if INJECT_LAYERS > i:
            s = F_SIZE * 2 ** (i + 1)
            z = jnp.concatenate(
                [z, jnp.broadcast_to(a, (n, s, s, n_attrs))], axis=-1)
    return jnp.transpose(z, (0, 3, 1, 2))                # NHWC -> NCHW once


def attgan_forward(prep, img, attr):
    """Pallas path: one fused pallas_call per Conv/ConvT block, bf16 activations."""
    def enc_block(z, i):
        lp = prep['enc'][i]
        return conv4x4s2_bn_act(z, lp['wt'], lp['gb'], ENC_CH[i][1], 'lrelu')

    def dec_block(z, i):
        lp = prep['dec'][i]
        last = i == DEC_LAYERS - 1
        return convt4x4s2_block(z, lp['wt'], lp['gb'], DEC_CH[i][1],
                                'tanh' if last else 'relu', use_bn=not last)

    out = _generator_forward(img, attr, enc_block, dec_block, jnp.bfloat16)
    return out.astype(jnp.float32)


# ---------------------- pure-JAX reference (same numerics) ----------------------
def _ref_conv_bn_act(x, w, gamma, beta, act):
    y = lax.conv_general_dilated(
        x.astype(jnp.bfloat16), w.astype(jnp.bfloat16),
        window_strides=(2, 2), padding=((1, 1), (1, 1)),
        dimension_numbers=('NHWC', 'OIHW', 'NHWC'),
        preferred_element_type=jnp.float32)
    mean = jnp.mean(y, axis=(0, 1, 2), keepdims=True)
    var = jnp.mean(jnp.square(y - mean), axis=(0, 1, 2), keepdims=True)
    y = (y - mean) * lax.rsqrt(var + BN_EPS)
    y = y * gamma.reshape(1, 1, 1, -1) + beta.reshape(1, 1, 1, -1)
    return _apply_act(y, act)


def _ref_convt_block(x, w, gamma, beta, bias, act, use_bn):
    weq = jnp.flip(w, (2, 3)).transpose(1, 0, 2, 3)      # (Cout, Cin, 4, 4)
    y = lax.conv_general_dilated(
        x.astype(jnp.bfloat16), weq.astype(jnp.bfloat16),
        window_strides=(1, 1), padding=((2, 2), (2, 2)), lhs_dilation=(2, 2),
        dimension_numbers=('NHWC', 'OIHW', 'NHWC'),
        preferred_element_type=jnp.float32)
    if use_bn:
        mean = jnp.mean(y, axis=(0, 1, 2), keepdims=True)
        var = jnp.mean(jnp.square(y - mean), axis=(0, 1, 2), keepdims=True)
        y = (y - mean) * lax.rsqrt(var + BN_EPS)
        y = y * gamma.reshape(1, 1, 1, -1) + beta.reshape(1, 1, 1, -1)
    else:
        y = y + bias.reshape(1, 1, 1, -1)
    return _apply_act(y, act)


def attgan_forward_reference(raw, img, attr):
    def enc_block(z, i):
        lp = raw['enc'][i]
        return _ref_conv_bn_act(z, lp['w'], lp['gamma'], lp['beta'], 'lrelu')

    def dec_block(z, i):
        lp = raw['dec'][i]
        last = i == DEC_LAYERS - 1
        if last:
            return _ref_convt_block(z, lp['w'], None, None, lp['b'],
                                    'tanh', False)
        return _ref_convt_block(z, lp['w'], lp['gamma'], lp['beta'], None,
                                'relu', True)

    return _generator_forward(img, attr, enc_block, dec_block, jnp.float32)


# ----------------------------------- main -----------------------------------
if __name__ == "__main__":
    key = jax.random.PRNGKey(0)
    k_img, k_attr, k_param = jax.random.split(key, 3)

    n = 2
    img = jax.random.normal(k_img, (n, 3, IMG_SIZE, IMG_SIZE), jnp.float32)
    # attributes in [-1, 1] like AttGAN's shifted binary attributes
    attr = jax.random.uniform(k_attr, (n, N_ATTRS), jnp.float32) * 2.0 - 1.0

    raw = init_params(k_param)
    prep = prepare_params(raw)          # one-time weight preprocessing

    fwd = jax.jit(attgan_forward)
    out = jax.block_until_ready(fwd(prep, img, attr))

    assert out.shape == (n, 3, IMG_SIZE, IMG_SIZE), out.shape
    assert out.dtype == jnp.float32
    assert bool(jnp.all(jnp.isfinite(out)))

    ref = jax.block_until_ready(
        jax.jit(attgan_forward_reference)(raw, img, attr))
    max_err = float(jnp.max(jnp.abs(out - ref)))
    assert max_err < 8e-2, f"kernel/reference mismatch: max_err={max_err}"

    print("KERNEL_OK")
</pallas_src>

<mosaic_0001>
module attributes {stable_mosaic.version = 11 : i64} {
  func.func @_fused_conv_kernel(%arg0: i32, %arg1: memref<192x12xbf16, #tpu.memory_space<vmem>>, %arg2: memref<4x12x128xbf16, #tpu.memory_space<vmem>>, %arg3: memref<168x1xf32, #tpu.memory_space<vmem>>, %arg4: memref<2x128xf32, #tpu.memory_space<vmem>>, %arg5: memref<1x168x128xbf16, #tpu.memory_space<vmem>>) attributes {dimension_semantics = [#tpu.dimension_semantics<arbitrary>], iteration_bounds = array<i64: 1>, scalar_prefetch = 0 : i64, scratch_operands = 0 : i64, tpu.core_type = #tpu.core_type<tc>, window_params = [{pipeline_mode = #tpu.pipeline_mode<synchronous>, transform_indices = @transform_0, window_bounds = array<i64: 192, 12>}, {pipeline_mode = #tpu.pipeline_mode<synchronous>, transform_indices = @transform_1, window_bounds = array<i64: 4, 12, 128>}, {pipeline_mode = #tpu.pipeline_mode<synchronous>, transform_indices = @transform_2, window_bounds = array<i64: 168, 1>}, {pipeline_mode = #tpu.pipeline_mode<synchronous>, transform_indices = @transform_3, window_bounds = array<i64: 2, 128>}, {pipeline_mode = #tpu.pipeline_mode<synchronous>, transform_indices = @transform_4, window_bounds = array<i64: 1, 168, 128>}]} {
    %c0 = arith.constant 0 : index
    %c0_0 = arith.constant 0 : index
    %0 = vector.load %arg1[%c0, %c0_0] : memref<192x12xbf16, #tpu.memory_space<vmem>>, vector<168x12xbf16>
    %c0_1 = arith.constant 0 : index
    %c0_2 = arith.constant 0 : index
    %c0_3 = arith.constant 0 : index
    %1 = vector.load %arg2[%c0_1, %c0_2, %c0_3] : memref<4x12x128xbf16, #tpu.memory_space<vmem>>, vector<1x12x128xbf16>
    %2 = vector.shape_cast %1 : vector<1x12x128xbf16> to vector<12x128xbf16>
    %cst = arith.constant dense<0.000000e+00> : vector<168x128xf32>
    %3 = tpu.matmul %0, %2, %cst {dimension_numbers = #tpu.dot_dimension_numbers<[1], [0], [0], [1], [0, 0, 1, 1], [], []>} : vector<168x12xbf16>, vector<12x128xbf16>, vector<168x128xf32> -> vector<168x128xf32>
    %c1 = arith.constant 1 : index
    %c0_4 = arith.constant 0 : index
    %4 = vector.load %arg1[%c1, %c0_4] : memref<192x12xbf16, #tpu.memory_space<vmem>>, vector<168x12xbf16>
    %c1_5 = arith.constant 1 : index
    %c0_6 = arith.constant 0 : index
    %c0_7 = arith.constant 0 : index
    %5 = vector.load %arg2[%c1_5, %c0_6, %c0_7] : memref<4x12x128xbf16, #tpu.memory_space<vmem>>, vector<1x12x128xbf16>
    %6 = vector.shape_cast %5 : vector<1x12x128xbf16> to vector<12x128xbf16>
    %cst_8 = arith.constant dense<0.000000e+00> : vector<168x128xf32>
    %7 = tpu.matmul %4, %6, %cst_8 {dimension_numbers = #tpu.dot_dimension_numbers<[1], [0], [0], [1], [0, 0, 1, 1], [], []>} : vector<168x12xbf16>, vector<12x128xbf16>, vector<168x128xf32> -> vector<168x128xf32>
    %8 = arith.addf %3, %7 : vector<168x128xf32>
    %c9 = arith.constant 9 : index
    %c0_9 = arith.constant 0 : index
    %9 = vector.load %arg1[%c9, %c0_9] : memref<192x12xbf16, #tpu.memory_space<vmem>>, vector<168x12xbf16>
    %c2 = arith.constant 2 : index
    %c0_10 = arith.constant 0 : index
    %c0_11 = arith.constant 0 : index
    %10 = vector.load %arg2[%c2, %c0_10, %c0_11] : memref<4x12x128xbf16, #tpu.memory_space<vmem>>, vector<1x12x128xbf16>
    %11 = vector.shape_cast %10 : vector<1x12x128xbf16> to vector<12x128xbf16>
    %cst_12 = arith.constant dense<0.000000e+00> : vector<168x128xf32>
    %12 = tpu.matmul %9, %11, %cst_12 {dimension_numbers = #tpu.dot_dimension_numbers<[1], [0], [0], [1], [0, 0, 1, 1], [], []>} : vector<168x12xbf16>, vector<12x128xbf16>, vector<168x128xf32> -> vector<168x128xf32>
    %13 = arith.addf %8, %12 : vector<168x128xf32>
    %c10 = arith.constant 10 : index
    %c0_13 = arith.constant 0 : index
    %14 = vector.load %arg1[%c10, %c0_13] : memref<192x12xbf16, #tpu.memory_space<vmem>>, vector<168x12xbf16>
    %c3 = arith.constant 3 : index
    %c0_14 = arith.constant 0 : index
    %c0_15 = arith.constant 0 : index
    %15 = vector.load %arg2[%c3, %c0_14, %c0_15] : memref<4x12x128xbf16, #tpu.memory_space<vmem>>, vector<1x12x128xbf16>
    %16 = vector.shape_cast %15 : vector<1x12x128xbf16> to vector<12x128xbf16>
    %cst_16 = arith.constant dense<0.000000e+00> : vector<168x128xf32>
    %17 = tpu.matmul %14, %16, %cst_16 {dimension_numbers = #tpu.dot_dimension_numbers<[1], [0], [0], [1], [0, 0, 1, 1], [], []>} : vector<168x12xbf16>, vector<12x128xbf16>, vector<168x128xf32> -> vector<168x128xf32>
    %18 = arith.addf %13, %17 : vector<168x128xf32>
    %c0_17 = arith.constant 0 : index
    %c0_18 = arith.constant 0 : index
    %19 = vector.load %arg3[%c0_17, %c0_18] : memref<168x1xf32, #tpu.memory_space<vmem>>, vector<168x1xf32>
    %20 = vector.broadcast %19 : vector<168x1xf32> to vector<168x128xf32>
    %21 = arith.mulf %18, %20 : vector<168x128xf32>
    %cst_19 = arith.constant dense<0.000000e+00> : vector<128xf32>
    %22 = vector.multi_reduction <add>, %21, %cst_19 [0] : vector<168x128xf32> to vector<128xf32>
    %23 = vector.shape_cast %22 : vector<128xf32> to vector<1x128xf32>
    %24 = arith.mulf %21, %18 : vector<168x128xf32>
    %cst_20 = arith.constant dense<0.000000e+00> : vector<128xf32>
    %25 = vector.multi_reduction <add>, %24, %cst_20 [0] : vector<168x128xf32> to vector<128xf32>
    %26 = vector.shape_cast %25 : vector<128xf32> to vector<1x128xf32>
    %cst_21 = arith.constant 7.812500e-03 : f32
    %27 = vector.broadcast %cst_21 : f32 to vector<1x128xf32>
    %28 = arith.mulf %23, %27 : vector<1x128xf32>
    %cst_22 = arith.constant 7.812500e-03 : f32
    %29 = vector.broadcast %cst_22 : f32 to vector<1x128xf32>
    %30 = arith.mulf %26, %29 : vector<1x128xf32>
    %31 = arith.mulf %28, %28 : vector<1x128xf32>
    %32 = arith.subf %30, %31 : vector<1x128xf32>
    %cst_23 = arith.constant 0.000000e+00 : f32
    %33 = vector.broadcast %cst_23 : f32 to vector<1x128xf32>
    %34 = arith.maximumf %32, %33 : vector<1x128xf32>
    %c0_24 = arith.constant 0 : index
    %c0_25 = arith.constant 0 : index
    %35 = vector.load %arg4[%c0_24, %c0_25] : memref<2x128xf32, #tpu.memory_space<vmem>>, vector<1x128xf32>
    %cst_26 = arith.constant 9.99999974E-6 : f32
    %36 = vector.broadcast %cst_26 : f32 to vector<1x128xf32>
    %37 = arith.addf %34, %36 : vector<1x128xf32>
    %38 = math.rsqrt %37 : vector<1x128xf32>
    %39 = arith.mulf %35, %38 : vector<1x128xf32>
    %c1_27 = arith.constant 1 : index
    %c0_28 = arith.constant 0 : index
    %40 = vector.load %arg4[%c1_27, %c0_28] : memref<2x128xf32, #tpu.memory_space<vmem>>, vector<1x128xf32>
    %41 = arith.mulf %28, %39 : vector<1x128xf32>
    %42 = arith.subf %40, %41 : vector<1x128xf32>
    %43 = vector.broadcast %39 : vector<1x128xf32> to vector<168x128xf32>
    %44 = arith.mulf %18, %43 : vector<168x128xf32>
    %45 = vector.broadcast %42 : vector<1x128xf32> to vector<168x128xf32>
    %46 = arith.addf %44, %45 : vector<168x128xf32>
    %cst_29 = arith.constant 0.000000e+00 : f32
    %47 = vector.broadcast %cst_29 : f32 to vector<168x128xf32>
    %48 = arith.cmpf ogt, %46, %47 : vector<168x128xf32>
    %cst_30 = arith.constant 0.00999999977 : f32
    %49 = vector.broadcast %cst_30 : f32 to vector<168x128xf32>
    %50 = arith.mulf %49, %46 : vector<168x128xf32>
    %51 = arith.select %48, %46, %50 : vector<168x128xi1>, vector<168x128xf32>
    %52 = arith.truncf %51 : vector<168x128xf32> to vector<168x128xbf16>
    %c0_31 = arith.constant 0 : index
    %c0_32 = arith.constant 0 : index
    %c0_33 = arith.constant 0 : index
    %53 = vector.load %arg5[%c0_31, %c0_32, %c0_33] : memref<1x168x128xbf16, #tpu.memory_space<vmem>>, vector<1x168x128xbf16>
    %54 = vector.shape_cast %53 : vector<1x168x128xbf16> to vector<168x128xbf16>
    %55 = vector.shape_cast %52 : vector<168x128xbf16> to vector<1x168x128xbf16>
    tpu.vector_store %arg5[%c0_31, %c0_32, %c0_33], %55 {strides = array<i32>} : memref<1x168x128xbf16, #tpu.memory_space<vmem>>, vector<1x168x128xbf16>,
    return
  }
  func.func @transform_0(%arg0: i32) -> (i32, i32) {
    %c0_i32 = arith.constant 0 : i32
    %c0_i32_0 = arith.constant 0 : i32
    %c0_i32_1 = arith.constant 0 : i32
    return %c0_i32, %c0_i32_0 : i32, i32
  }
  func.func @transform_1(%arg0: i32) -> (i32, i32, i32) {
    %c0_i32 = arith.constant 0 : i32
    %c0_i32_0 = arith.constant 0 : i32
    %c0_i32_1 = arith.constant 0 : i32
    %c0_i32_2 = arith.constant 0 : i32
    return %c0_i32, %c0_i32_0, %c0_i32_1 : i32, i32, i32
  }
  func.func @transform_2(%arg0: i32) -> (i32, i32) {
    %c0_i32 = arith.constant 0 : i32
    %c0_i32_0 = arith.constant 0 : i32
    %c0_i32_1 = arith.constant 0 : i32
    return %c0_i32, %c0_i32_0 : i32, i32
  }
  func.func @transform_3(%arg0: i32) -> (i32, i32) {
    %c0_i32 = arith.constant 0 : i32
    %c0_i32_0 = arith.constant 0 : i32
    %c0_i32_1 = arith.constant 0 : i32
    return %c0_i32, %c0_i32_0 : i32, i32
  }
  func.func @transform_4(%arg0: i32) -> (i32, i32, i32) {
    %c0_i32 = arith.constant 0 : i32
    %c0_i32_0 = arith.constant 0 : i32
    %c0_i32_1 = arith.constant 0 : i32
    %c0_i32_2 = arith.constant 0 : i32
    return %c0_i32, %c0_i32_0, %c0_i32_1 : i32, i32, i32
  }
}

module attributes {stable_mosaic.version = 11 : i64} {
  func.func @_fused_conv_kernel(%arg0: i32, %arg1: memref<64x64xbf16, #tpu.memory_space<vmem>>, %arg2: memref<4x64x128xbf16, #tpu.memory_space<vmem>>, %arg3: memref<56x1xf32, #tpu.memory_space<vmem>>, %arg4: memref<2x128xf32, #tpu.memory_space<vmem>>, %arg5: memref<1x56x128xbf16, #tpu.memory_space<vmem>>) attributes {dimension_semantics = [#tpu.dimension_semantics<arbitrary>], iteration_bounds = array<i64: 1>, scalar_prefetch = 0 : i64, scratch_operands = 0 : i64, tpu.core_type = #tpu.core_type<tc>, window_params = [{pipeline_mode = #tpu.pipeline_mode<synchronous>, transform_indices = @transform_0, window_bounds = array<i64: 64, 64>}, {pipeline_mode = #tpu.pipeline_mode<synchronous>, transform_indices = @transform_1, window_bounds = array<i64: 4, 64, 128>}, {pipeline_mode = #tpu.pipeline_mode<synchronous>, transform_indices = @transform_2, window_bounds = array<i64: 56, 1>}, {pipeline_mode = #tpu.pipeline_mode<synchronous>, transform_indices = @transform_3, window_bounds = array<i64: 2, 128>}, {pipeline_mode = #tpu.pipeline_mode<synchronous>, transform_indices = @transform_4, window_bounds = array<i64: 1, 56, 128>}]} {
    %c0 = arith.constant 0 : index
    %c0_0 = arith.constant 0 : index
    %0 = vector.load %arg1[%c0, %c0_0] : memref<64x64xbf16, #tpu.memory_space<vmem>>, vector<56x64xbf16>
    %c0_1 = arith.constant 0 : index
    %c0_2 = arith.constant 0 : index
    %c0_3 = arith.constant 0 : index
    %1 = vector.load %arg2[%c0_1, %c0_2, %c0_3] : memref<4x64x128xbf16, #tpu.memory_space<vmem>>, vector<1x64x128xbf16>
    %2 = vector.shape_cast %1 : vector<1x64x128xbf16> to vector<64x128xbf16>
    %cst = arith.constant dense<0.000000e+00> : vector<56x128xf32>
    %3 = tpu.matmul %0, %2, %cst {dimension_numbers = #tpu.dot_dimension_numbers<[1], [0], [0], [1], [0, 0, 1, 1], [], []>} : vector<56x64xbf16>, vector<64x128xbf16>, vector<56x128xf32> -> vector<56x128xf32>
    %c1 = arith.constant 1 : index
    %c0_4 = arith.constant 0 : index
    %4 = vector.load %arg1[%c1, %c0_4] : memref<64x64xbf16, #tpu.memory_space<vmem>>, vector<56x64xbf16>
    %c1_5 = arith.constant 1 : index
    %c0_6 = arith.constant 0 : index
    %c0_7 = arith.constant 0 : index
    %5 = vector.load %arg2[%c1_5, %c0_6, %c0_7] : memref<4x64x128xbf16, #tpu.memory_space<vmem>>, vector<1x64x128xbf16>
    %6 = vector.shape_cast %5 : vector<1x64x128xbf16> to vector<64x128xbf16>
    %cst_8 = arith.constant dense<0.000000e+00> : vector<56x128xf32>
    %7 = tpu.matmul %4, %6, %cst_8 {dimension_numbers = #tpu.dot_dimension_numbers<[1], [0], [0], [1], [0, 0, 1, 1], [], []>} : vector<56x64xbf16>, vector<64x128xbf16>, vector<56x128xf32> -> vector<56x128xf32>
    %8 = arith.addf %3, %7 : vector<56x128xf32>
    %c5 = arith.constant 5 : index
    %c0_9 = arith.constant 0 : index
    %9 = vector.load %arg1[%c5, %c0_9] : memref<64x64xbf16, #tpu.memory_space<vmem>>, vector<56x64xbf16>
    %c2 = arith.constant 2 : index
    %c0_10 = arith.constant 0 : index
    %c0_11 = arith.constant 0 : index
    %10 = vector.load %arg2[%c2, %c0_10, %c0_11] : memref<4x64x128xbf16, #tpu.memory_space<vmem>>, vector<1x64x128xbf16>
    %11 = vector.shape_cast %10 : vector<1x64x128xbf16> to vector<64x128xbf16>
    %cst_12 = arith.constant dense<0.000000e+00> : vector<56x128xf32>
    %12 = tpu.matmul %9, %11, %cst_12 {dimension_numbers = #tpu.dot_dimension_numbers<[1], [0], [0], [1], [0, 0, 1, 1], [], []>} : vector<56x64xbf16>, vector<64x128xbf16>, vector<56x128xf32> -> vector<56x128xf32>
    %13 = arith.addf %8, %12 : vector<56x128xf32>
    %c6 = arith.constant 6 : index
    %c0_13 = arith.constant 0 : index
    %14 = vector.load %arg1[%c6, %c0_13] : memref<64x64xbf16, #tpu.memory_space<vmem>>, vector<56x64xbf16>
    %c3 = arith.constant 3 : index
    %c0_14 = arith.constant 0 : index
    %c0_15 = arith.constant 0 : index
    %15 = vector.load %arg2[%c3, %c0_14, %c0_15] : memref<4x64x128xbf16, #tpu.memory_space<vmem>>, vector<1x64x128xbf16>
    %16 = vector.shape_cast %15 : vector<1x64x128xbf16> to vector<64x128xbf16>
    %cst_16 = arith.constant dense<0.000000e+00> : vector<56x128xf32>
    %17 = tpu.matmul %14, %16, %cst_16 {dimension_numbers = #tpu.dot_dimension_numbers<[1], [0], [0], [1], [0, 0, 1, 1], [], []>} : vector<56x64xbf16>, vector<64x128xbf16>, vector<56x128xf32> -> vector<56x128xf32>
    %18 = arith.addf %13, %17 : vector<56x128xf32>
    %c0_17 = arith.constant 0 : index
    %c0_18 = arith.constant 0 : index
    %19 = vector.load %arg3[%c0_17, %c0_18] : memref<56x1xf32, #tpu.memory_space<vmem>>, vector<56x1xf32>
    %20 = vector.broadcast %19 : vector<56x1xf32> to vector<56x128xf32>
    %21 = arith.mulf %18, %20 : vector<56x128xf32>
    %cst_19 = arith.constant dense<0.000000e+00> : vector<128xf32>
    %22 = vector.multi_reduction <add>, %21, %cst_19 [0] : vector<56x128xf32> to vector<128xf32>
    %23 = vector.shape_cast %22 : vector<128xf32> to vector<1x128xf32>
    %24 = arith.mulf %21, %18 : vector<56x128xf32>
    %cst_20 = arith.constant dense<0.000000e+00> : vector<128xf32>
    %25 = vector.multi_reduction <add>, %24, %cst_20 [0] : vector<56x128xf32> to vector<128xf32>
    %26 = vector.shape_cast %25 : vector<128xf32> to vector<1x128xf32>
    %cst_21 = arith.constant 3.125000e-02 : f32
    %27 = vector.broadcast %cst_21 : f32 to vector<1x128xf32>
    %28 = arith.mulf %23, %27 : vector<1x128xf32>
    %cst_22 = arith.constant 3.125000e-02 : f32
    %29 = vector.broadcast %cst_22 : f32 to vector<1x128xf32>
    %30 = arith.mulf %26, %29 : vector<1x128xf32>
    %31 = arith.mulf %28, %28 : vector<1x128xf32>
    %32 = arith.subf %30, %31 : vector<1x128xf32>
    %cst_23 = arith.constant 0.000000e+00 : f32
    %33 = vector.broadcast %cst_23 : f32 to vector<1x128xf32>
    %34 = arith.maximumf %32, %33 : vector<1x128xf32>
    %c0_24 = arith.constant 0 : index
    %c0_25 = arith.constant 0 : index
    %35 = vector.load %arg4[%c0_24, %c0_25] : memref<2x128xf32, #tpu.memory_space<vmem>>, vector<1x128xf32>
    %cst_26 = arith.constant 9.99999974E-6 : f32
    %36 = vector.broadcast %cst_26 : f32 to vector<1x128xf32>
    %37 = arith.addf %34, %36 : vector<1x128xf32>
    %38 = math.rsqrt %37 : vector<1x128xf32>
    %39 = arith.mulf %35, %38 : vector<1x128xf32>
    %c1_27 = arith.constant 1 : index
    %c0_28 = arith.constant 0 : index
    %40 = vector.load %arg4[%c1_27, %c0_28] : memref<2x128xf32, #tpu.memory_space<vmem>>, vector<1x128xf32>
    %41 = arith.mulf %28, %39 : vector<1x128xf32>
    %42 = arith.subf %40, %41 : vector<1x128xf32>
    %43 = vector.broadcast %39 : vector<1x128xf32> to vector<56x128xf32>
    %44 = arith.mulf %18, %43 : vector<56x128xf32>
    %45 = vector.broadcast %42 : vector<1x128xf32> to vector<56x128xf32>
    %46 = arith.addf %44, %45 : vector<56x128xf32>
    %cst_29 = arith.constant 0.000000e+00 : f32
    %47 = vector.broadcast %cst_29 : f32 to vector<56x128xf32>
    %48 = arith.cmpf ogt, %46, %47 : vector<56x128xf32>
    %cst_30 = arith.constant 0.00999999977 : f32
    %49 = vector.broadcast %cst_30 : f32 to vector<56x128xf32>
    %50 = arith.mulf %49, %46 : vector<56x128xf32>
    %51 = arith.select %48, %46, %50 : vector<56x128xi1>, vector<56x128xf32>
    %52 = arith.truncf %51 : vector<56x128xf32> to vector<56x128xbf16>
    %c0_31 = arith.constant 0 : index
    %c0_32 = arith.constant 0 : index
    %c0_33 = arith.constant 0 : index
    %53 = vector.load %arg5[%c0_31, %c0_32, %c0_33] : memref<1x56x128xbf16, #tpu.memory_space<vmem>>, vector<1x56x128xbf16>
    %54 = vector.shape_cast %53 : vector<1x56x128xbf16> to vector<56x128xbf16>
    %55 = vector.shape_cast %52 : vector<56x128xbf16> to vector<1x56x128xbf16>
    tpu.vector_store %arg5[%c0_31, %c0_32, %c0_33], %55 {strides = array<i32>} : memref<1x56x128xbf16, #tpu.memory_space<vmem>>, vector<1x56x128xbf16>,
    return
  }
  func.func @transform_0(%arg0: i32) -> (i32, i32) {
    %c0_i32 = arith.constant 0 : i32
    %c0_i32_0 = arith.constant 0 : i32
    %c0_i32_1 = arith.constant 0 : i32
    return %c0_i32, %c0_i32_0 : i32, i32
  }
  func.func @transform_1(%arg0: i32) -> (i32, i32, i32) {
    %c0_i32 = arith.constant 0 : i32
    %c0_i32_0 = arith.constant 0 : i32
    %c0_i32_1 = arith.constant 0 : i32
    %c0_i32_2 = arith.constant 0 : i32
    return %c0_i32, %c0_i32_0, %c0_i32_1 : i32, i32, i32
  }
  func.func @transform_2(%arg0: i32) -> (i32, i32) {
    %c0_i32 = arith.constant 0 : i32
    %c0_i32_0 = arith.constant 0 : i32
    %c0_i32_1 = arith.constant 0 : i32
    return %c0_i32, %c0_i32_0 : i32, i32
  }
  func.func @transform_3(%arg0: i32) -> (i32, i32) {
    %c0_i32 = arith.constant 0 : i32
    %c0_i32_0 = arith.constant 0 : i32
    %c0_i32_1 = arith.constant 0 : i32
    return %c0_i32, %c0_i32_0 : i32, i32
  }
  func.func @transform_4(%arg0: i32) -> (i32, i32, i32) {
    %c0_i32 = arith.constant 0 : i32
    %c0_i32_0 = arith.constant 0 : i32
    %c0_i32_1 = arith.constant 0 : i32
    %c0_i32_2 = arith.constant 0 : i32
    return %c0_i32, %c0_i32_0, %c0_i32_1 : i32, i32, i32
  }
}

module attributes {stable_mosaic.version = 11 : i64} {
  func.func @_fused_conv_kernel(%arg0: i32, %arg1: memref<32x128xbf16, #tpu.memory_space<vmem>>, %arg2: memref<4x128x128xbf16, #tpu.memory_space<vmem>>, %arg3: memref<24x1xf32, #tpu.memory_space<vmem>>, %arg4: memref<2x128xf32, #tpu.memory_space<vmem>>, %arg5: memref<1x24x128xbf16, #tpu.memory_space<vmem>>) attributes {dimension_semantics = [#tpu.dimension_semantics<arbitrary>], iteration_bounds = array<i64: 1>, scalar_prefetch = 0 : i64, scratch_operands = 0 : i64, tpu.core_type = #tpu.core_type<tc>, window_params = [{pipeline_mode = #tpu.pipeline_mode<synchronous>, transform_indices = @transform_0, window_bounds = array<i64: 32, 128>}, {pipeline_mode = #tpu.pipeline_mode<synchronous>, transform_indices = @transform_1, window_bounds = array<i64: 4, 128, 128>}, {pipeline_mode = #tpu.pipeline_mode<synchronous>, transform_indices = @transform_2, window_bounds = array<i64: 24, 1>}, {pipeline_mode = #tpu.pipeline_mode<synchronous>, transform_indices = @transform_3, window_bounds = array<i64: 2, 128>}, {pipeline_mode = #tpu.pipeline_mode<synchronous>, transform_indices = @transform_4, window_bounds = array<i64: 1, 24, 128>}]} {
    %c0 = arith.constant 0 : index
    %c0_0 = arith.constant 0 : index
    %0 = vector.load %arg1[%c0, %c0_0] : memref<32x128xbf16, #tpu.memory_space<vmem>>, vector<24x128xbf16>
    %c0_1 = arith.constant 0 : index
    %c0_2 = arith.constant 0 : index
    %c0_3 = arith.constant 0 : index
    %1 = vector.load %arg2[%c0_1, %c0_2, %c0_3] : memref<4x128x128xbf16, #tpu.memory_space<vmem>>, vector<1x128x128xbf16>
    %2 = vector.shape_cast %1 : vector<1x128x128xbf16> to vector<128x128xbf16>
    %cst = arith.constant dense<0.000000e+00> : vector<24x128xf32>
    %3 = tpu.matmul %0, %2, %cst {dimension_numbers = #tpu.dot_dimension_numbers<[1], [0], [0], [1], [0, 0, 1, 1], [], []>} : vector<24x128xbf16>, vector<128x128xbf16>, vector<24x128xf32> -> vector<24x128xf32>
    %c1 = arith.constant 1 : index
    %c0_4 = arith.constant 0 : index
    %4 = vector.load %arg1[%c1, %c0_4] : memref<32x128xbf16, #tpu.memory_space<vmem>>, vector<24x128xbf16>
    %c1_5 = arith.constant 1 : index
    %c0_6 = arith.constant 0 : index
    %c0_7 = arith.constant 0 : index
    %5 = vector.load %arg2[%c1_5, %c0_6, %c0_7] : memref<4x128x128xbf16, #tpu.memory_space<vmem>>, vector<1x128x128xbf16>
    %6 = vector.shape_cast %5 : vector<1x128x128xbf16> to vector<128x128xbf16>
    %cst_8 = arith.constant dense<0.000000e+00> : vector<24x128xf32>
    %7 = tpu.matmul %4, %6, %cst_8 {dimension_numbers = #tpu.dot_dimension_numbers<[1], [0], [0], [1], [0, 0, 1, 1], [], []>} : vector<24x128xbf16>, vector<128x128xbf16>, vector<24x128xf32> -> vector<24x128xf32>
    %8 = arith.addf %3, %7 : vector<24x128xf32>
    %c3 = arith.constant 3 : index
    %c0_9 = arith.constant 0 : index
    %9 = vector.load %arg1[%c3, %c0_9] : memref<32x128xbf16, #tpu.memory_space<vmem>>, vector<24x128xbf16>
    %c2 = arith.constant 2 : index
    %c0_10 = arith.constant 0 : index
    %c0_11 = arith.constant 0 : index
    %10 = vector.load %arg2[%c2, %c0_10, %c0_11] : memref<4x128x128xbf16, #tpu.memory_space<vmem>>, vector<1x128x128xbf16>
    %11 = vector.shape_cast %10 : vector<1x128x128xbf16> to vector<128x128xbf16>
    %cst_12 = arith.constant dense<0.000000e+00> : vector<24x128xf32>
    %12 = tpu.matmul %9, %11, %cst_12 {dimension_numbers = #tpu.dot_dimension_numbers<[1], [0], [0], [1], [0, 0, 1, 1], [], []>} : vector<24x128xbf16>, vector<128x128xbf16>, vector<24x128xf32> -> vector<24x128xf32>
    %13 = arith.addf %8, %12 : vector<24x128xf32>
    %c4 = arith.constant 4 : index
    %c0_13 = arith.constant 0 : index
    %14 = vector.load %arg1[%c4, %c0_13] : memref<32x128xbf16, #tpu.memory_space<vmem>>, vector<24x128xbf16>
    %c3_14 = arith.constant 3 : index
    %c0_15 = arith.constant 0 : index
    %c0_16 = arith.constant 0 : index
    %15 = vector.load %arg2[%c3_14, %c0_15, %c0_16] : memref<4x128x128xbf16, #tpu.memory_space<vmem>>, vector<1x128x128xbf16>
    %16 = vector.shape_cast %15 : vector<1x128x128xbf16> to vector<128x128xbf16>
    %cst_17 = arith.constant dense<0.000000e+00> : vector<24x128xf32>
    %17 = tpu.matmul %14, %16, %cst_17 {dimension_numbers = #tpu.dot_dimension_numbers<[1], [0], [0], [1], [0, 0, 1, 1], [], []>} : vector<24x128xbf16>, vector<128x128xbf16>, vector<24x128xf32> -> vector<24x128xf32>
    %18 = arith.addf %13, %17 : vector<24x128xf32>
    %c0_18 = arith.constant 0 : index
    %c0_19 = arith.constant 0 : index
    %19 = vector.load %arg3[%c0_18, %c0_19] : memref<24x1xf32, #tpu.memory_space<vmem>>, vector<24x1xf32>
    %20 = vector.broadcast %19 : vector<24x1xf32> to vector<24x128xf32>
    %21 = arith.mulf %18, %20 : vector<24x128xf32>
    %cst_20 = arith.constant dense<0.000000e+00> : vector<128xf32>
    %22 = vector.multi_reduction <add>, %21, %cst_20 [0] : vector<24x128xf32> to vector<128xf32>
    %23 = vector.shape_cast %22 : vector<128xf32> to vector<1x128xf32>
    %24 = arith.mulf %21, %18 : vector<24x128xf32>
    %cst_21 = arith.constant dense<0.000000e+00> : vector<128xf32>
    %25 = vector.multi_reduction <add>, %24, %cst_21 [0] : vector<24x128xf32> to vector<128xf32>
    %26 = vector.shape_cast %25 : vector<128xf32> to vector<1x128xf32>
    %cst_22 = arith.constant 1.250000e-01 : f32
    %27 = vector.broadcast %cst_22 : f32 to vector<1x128xf32>
    %28 = arith.mulf %23, %27 : vector<1x128xf32>
    %cst_23 = arith.constant 1.250000e-01 : f32
    %29 = vector.broadcast %cst_23 : f32 to vector<1x128xf32>
    %30 = arith.mulf %26, %29 : vector<1x128xf32>
    %31 = arith.mulf %28, %28 : vector<1x128xf32>
    %32 = arith.subf %30, %31 : vector<1x128xf32>
    %cst_24 = arith.constant 0.000000e+00 : f32
    %33 = vector.broadcast %cst_24 : f32 to vector<1x128xf32>
    %34 = arith.maximumf %32, %33 : vector<1x128xf32>
    %c0_25 = arith.constant 0 : index
    %c0_26 = arith.constant 0 : index
    %35 = vector.load %arg4[%c0_25, %c0_26] : memref<2x128xf32, #tpu.memory_space<vmem>>, vector<1x128xf32>
    %cst_27 = arith.constant 9.99999974E-6 : f32
    %36 = vector.broadcast %cst_27 : f32 to vector<1x128xf32>
    %37 = arith.addf %34, %36 : vector<1x128xf32>
    %38 = math.rsqrt %37 : vector<1x128xf32>
    %39 = arith.mulf %35, %38 : vector<1x128xf32>
    %c1_28 = arith.constant 1 : index
    %c0_29 = arith.constant 0 : index
    %40 = vector.load %arg4[%c1_28, %c0_29] : memref<2x128xf32, #tpu.memory_space<vmem>>, vector<1x128xf32>
    %41 = arith.mulf %28, %39 : vector<1x128xf32>
    %42 = arith.subf %40, %41 : vector<1x128xf32>
    %43 = vector.broadcast %39 : vector<1x128xf32> to vector<24x128xf32>
    %44 = arith.mulf %18, %43 : vector<24x128xf32>
    %45 = vector.broadcast %42 : vector<1x128xf32> to vector<24x128xf32>
    %46 = arith.addf %44, %45 : vector<24x128xf32>
    %cst_30 = arith.constant 0.000000e+00 : f32
    %47 = vector.broadcast %cst_30 : f32 to vector<24x128xf32>
    %48 = arith.cmpf ogt, %46, %47 : vector<24x128xf32>
    %cst_31 = arith.constant 0.00999999977 : f32
    %49 = vector.broadcast %cst_31 : f32 to vector<24x128xf32>
    %50 = arith.mulf %49, %46 : vector<24x128xf32>
    %51 = arith.select %48, %46, %50 : vector<24x128xi1>, vector<24x128xf32>
    %52 = arith.truncf %51 : vector<24x128xf32> to vector<24x128xbf16>
    %c0_32 = arith.constant 0 : index
    %c0_33 = arith.constant 0 : index
    %c0_34 = arith.constant 0 : index
    %53 = vector.load %arg5[%c0_32, %c0_33, %c0_34] : memref<1x24x128xbf16, #tpu.memory_space<vmem>>, vector<1x24x128xbf16>
    %54 = vector.shape_cast %53 : vector<1x24x128xbf16> to vector<24x128xbf16>
    %55 = vector.shape_cast %52 : vector<24x128xbf16> to vector<1x24x128xbf16>
    tpu.vector_store %arg5[%c0_32, %c0_33, %c0_34], %55 {strides = array<i32>} : memref<1x24x128xbf16, #tpu.memory_space<vmem>>, vector<1x24x128xbf16>,
    return
  }
  func.func @transform_0(%arg0: i32) -> (i32, i32) {
    %c0_i32 = arith.constant 0 : i32
    %c0_i32_0 = arith.constant 0 : i32
    %c0_i32_1 = arith.constant 0 : i32
    return %c0_i32, %c0_i32_0 : i32, i32
  }
  func.func @transform_1(%arg0: i32) -> (i32, i32, i32) {
    %c0_i32 = arith.constant 0 : i32
    %c0_i32_0 = arith.constant 0 : i32
    %c0_i32_1 = arith.constant 0 : i32
    %c0_i32_2 = arith.constant 0 : i32
    return %c0_i32, %c0_i32_0, %c0_i32_1 : i32, i32, i32
  }
  func.func @transform_2(%arg0: i32) -> (i32, i32) {
    %c0_i32 = arith.constant 0 : i32
    %c0_i32_0 = arith.constant 0 : i32
    %c0_i32_1 = arith.constant 0 : i32
    return %c0_i32, %c0_i32_0 : i32, i32
  }
  func.func @transform_3(%arg0: i32) -> (i32, i32) {
    %c0_i32 = arith.constant 0 : i32
    %c0_i32_0 = arith.constant 0 : i32
    %c0_i32_1 = arith.constant 0 : i32
    return %c0_i32, %c0_i32_0 : i32, i32
  }
  func.func @transform_4(%arg0: i32) -> (i32, i32, i32) {
    %c0_i32 = arith.constant 0 : i32
    %c0_i32_0 = arith.constant 0 : i32
    %c0_i32_1 = arith.constant 0 : i32
    %c0_i32_2 = arith.constant 0 : i32
    return %c0_i32, %c0_i32_0, %c0_i32_1 : i32, i32, i32
  }
}

module attributes {stable_mosaic.version = 11 : i64} {
  func.func @_fused_conv_kernel(%arg0: i32, %arg1: memref<48x77xbf16, #tpu.memory_space<vmem>>, %arg2: memref<16x77x128xbf16, #tpu.memory_space<vmem>>, %arg3: memref<32x1xf32, #tpu.memory_space<vmem>>, %arg4: memref<2x128xf32, #tpu.memory_space<vmem>>, %arg5: memref<4x32x128xbf16, #tpu.memory_space<vmem>>) attributes {dimension_semantics = [#tpu.dimension_semantics<arbitrary>], iteration_bounds = array<i64: 1>, scalar_prefetch = 0 : i64, scratch_operands = 0 : i64, tpu.core_type = #tpu.core_type<tc>, window_params = [{pipeline_mode = #tpu.pipeline_mode<synchronous>, transform_indices = @transform_0, window_bounds = array<i64: 48, 77>}, {pipeline_mode = #tpu.pipeline_mode<synchronous>, transform_indices = @transform_1, window_bounds = array<i64: 16, 77, 128>}, {pipeline_mode = #tpu.pipeline_mode<synchronous>, transform_indices = @transform_2, window_bounds = array<i64: 32, 1>}, {pipeline_mode = #tpu.pipeline_mode<synchronous>, transform_indices = @transform_3, window_bounds = array<i64: 2, 128>}, {pipeline_mode = #tpu.pipeline_mode<synchronous>, transform_indices = @transform_4, window_bounds = array<i64: 4, 32, 128>}]} {
    %c0 = arith.constant 0 : index
    %c0_0 = arith.constant 0 : index
    %0 = vector.load %arg1[%c0, %c0_0] : memref<48x77xbf16, #tpu.memory_space<vmem>>, vector<32x77xbf16>
    %c0_1 = arith.constant 0 : index
    %c0_2 = arith.constant 0 : index
    %c0_3 = arith.constant 0 : index
    %1 = vector.load %arg2[%c0_1, %c0_2, %c0_3] : memref<16x77x128xbf16, #tpu.memory_space<vmem>>, vector<1x77x128xbf16>
    %2 = vector.shape_cast %1 : vector<1x77x128xbf16> to vector<77x128xbf16>
    %cst = arith.constant dense<0.000000e+00> : vector<32x128xf32>
    %3 = tpu.matmul %0, %2, %cst {dimension_numbers = #tpu.dot_dimension_numbers<[1], [0], [0], [1], [0, 0, 1, 1], [], []>} : vector<32x77xbf16>, vector<77x128xbf16>, vector<32x128xf32> -> vector<32x128xf32>
    %c1 = arith.constant 1 : index
    %c0_4 = arith.constant 0 : index
    %4 = vector.load %arg1[%c1, %c0_4] : memref<48x77xbf16, #tpu.memory_space<vmem>>, vector<32x77xbf16>
    %c1_5 = arith.constant 1 : index
    %c0_6 = arith.constant 0 : index
    %c0_7 = arith.constant 0 : index
    %5 = vector.load %arg2[%c1_5, %c0_6, %c0_7] : memref<16x77x128xbf16, #tpu.memory_space<vmem>>, vector<1x77x128xbf16>
    %6 = vector.shape_cast %5 : vector<1x77x128xbf16> to vector<77x128xbf16>
    %cst_8 = arith.constant dense<0.000000e+00> : vector<32x128xf32>
    %7 = tpu.matmul %4, %6, %cst_8 {dimension_numbers = #tpu.dot_dimension_numbers<[1], [0], [0], [1], [0, 0, 1, 1], [], []>} : vector<32x77xbf16>, vector<77x128xbf16>, vector<32x128xf32> -> vector<32x128xf32>
    %8 = arith.addf %3, %7 : vector<32x128xf32>
    %c4 = arith.constant 4 : index
    %c0_9 = arith.constant 0 : index
    %9 = vector.load %arg1[%c4, %c0_9] : memref<48x77xbf16, #tpu.memory_space<vmem>>, vector<32x77xbf16>
    %c2 = arith.constant 2 : index
    %c0_10 = arith.constant 0 : index
    %c0_11 = arith.constant 0 : index
    %10 = vector.load %arg2[%c2, %c0_10, %c0_11] : memref<16x77x128xbf16, #tpu.memory_space<vmem>>, vector<1x77x128xbf16>
    %11 = vector.shape_cast %10 : vector<1x77x128xbf16> to vector<77x128xbf16>
    %cst_12 = arith.constant dense<0.000000e+00> : vector<32x128xf32>
    %12 = tpu.matmul %9, %11, %cst_12 {dimension_numbers = #tpu.dot_dimension_numbers<[1], [0], [0], [1], [0, 0, 1, 1], [], []>} : vector<32x77xbf16>, vector<77x128xbf16>, vector<32x128xf32> -> vector<32x128xf32>
    %13 = arith.addf %8, %12 : vector<32x128xf32>
    %c5 = arith.constant 5 : index
    %c0_13 = arith.constant 0 : index
    %14 = vector.load %arg1[%c5, %c0_13] : memref<48x77xbf16, #tpu.memory_space<vmem>>, vector<32x77xbf16>
    %c3 = arith.constant 3 : index
    %c0_14 = arith.constant 0 : index
    %c0_15 = arith.constant 0 : index
    %15 = vector.load %arg2[%c3, %c0_14, %c0_15] : memref<16x77x128xbf16, #tpu.memory_space<vmem>>, vector<1x77x128xbf16>
    %16 = vector.shape_cast %15 : vector<1x77x128xbf16> to vector<77x128xbf16>
    %cst_16 = arith.constant dense<0.000000e+00> : vector<32x128xf32>
    %17 = tpu.matmul %14, %16, %cst_16 {dimension_numbers = #tpu.dot_dimension_numbers<[1], [0], [0], [1], [0, 0, 1, 1], [], []>} : vector<32x77xbf16>, vector<77x128xbf16>, vector<32x128xf32> -> vector<32x128xf32>
    %18 = arith.addf %13, %17 : vector<32x128xf32>
    %c1_17 = arith.constant 1 : index
    %c0_18 = arith.constant 0 : index
    %19 = vector.load %arg1[%c1_17, %c0_18] : memref<48x77xbf16, #tpu.memory_space<vmem>>, vector<32x77xbf16>
    %c4_19 = arith.constant 4 : index
    %c0_20 = arith.constant 0 : index
    %c0_21 = arith.constant 0 : index
    %20 = vector.load %arg2[%c4_19, %c0_20, %c0_21] : memref<16x77x128xbf16, #tpu.memory_space<vmem>>, vector<1x77x128xbf16>
    %21 = vector.shape_cast %20 : vector<1x77x128xbf16> to vector<77x128xbf16>
    %cst_22 = arith.constant dense<0.000000e+00> : vector<32x128xf32>
    %22 = tpu.matmul %19, %21, %cst_22 {dimension_numbers = #tpu.dot_dimension_numbers<[1], [0], [0], [1], [0, 0, 1, 1], [], []>} : vector<32x77xbf16>, vector<77x128xbf16>, vector<32x128xf32> -> vector<32x128xf32>
    %c2_23 = arith.constant 2 : index
    %c0_24 = arith.constant 0 : index
    %23 = vector.load %arg1[%c2_23, %c0_24] : memref<48x77xbf16, #tpu.memory_space<vmem>>, vector<32x77xbf16>
    %c5_25 = arith.constant 5 : index
    %c0_26 = arith.constant 0 : index
    %c0_27 = arith.constant 0 : index
    %24 = vector.load %arg2[%c5_25, %c0_26, %c0_27] : memref<16x77x128xbf16, #tpu.memory_space<vmem>>, vector<1x77x128xbf16>
    %25 = vector.shape_cast %24 : vector<1x77x128xbf16> to vector<77x128xbf16>
    %cst_28 = arith.constant dense<0.000000e+00> : vector<32x128xf32>
    %26 = tpu.matmul %23, %25, %cst_28 {dimension_numbers = #tpu.dot_dimension_numbers<[1], [0], [0], [1], [0, 0, 1, 1], [], []>} : vector<32x77xbf16>, vector<77x128xbf16>, vector<32x128xf32> -> vector<32x128xf32>
    %27 = arith.addf %22, %26 : vector<32x128xf32>
    %c5_29 = arith.constant 5 : index
    %c0_30 = arith.constant 0 : index
    %28 = vector.load %arg1[%c5_29, %c0_30] : memref<48x77xbf16, #tpu.memory_space<vmem>>, vector<32x77xbf16>
    %c6 = arith.constant 6 : index
    %c0_31 = arith.constant 0 : index
    %c0_32 = arith.constant 0 : index
    %29 = vector.load %arg2[%c6, %c0_31, %c0_32] : memref<16x77x128xbf16, #tpu.memory_space<vmem>>, vector<1x77x128xbf16>
    %30 = vector.shape_cast %29 : vector<1x77x128xbf16> to vector<77x128xbf16>
    %cst_33 = arith.constant dense<0.000000e+00> : vector<32x128xf32>
    %31 = tpu.matmul %28, %30, %cst_33 {dimension_numbers = #tpu.dot_dimension_numbers<[1], [0], [0], [1], [0, 0, 1, 1], [], []>} : vector<32x77xbf16>, vector<77x128xbf16>, vector<32x128xf32> -> vector<32x128xf32>
    %32 = arith.addf %27, %31 : vector<32x128xf32>
    %c6_34 = arith.constant 6 : index
    %c0_35 = arith.constant 0 : index
    %33 = vector.load %arg1[%c6_34, %c0_35] : memref<48x77xbf16, #tpu.memory_space<vmem>>, vector<32x77xbf16>
    %c7 = arith.constant 7 : index
    %c0_36 = arith.constant 0 : index
    %c0_37 = arith.constant 0 : index
    %34 = vector.load %arg2[%c7, %c0_36, %c0_37] : memref<16x77x128xbf16, #tpu.memory_space<vmem>>, vector<1x77x128xbf16>
    %35 = vector.shape_cast %34 : vector<1x77x128xbf16> to vector<77x128xbf16>
    %cst_38 = arith.constant dense<0.000000e+00> : vector<32x128xf32>
    %36 = tpu.matmul %33, %35, %cst_38 {dimension_numbers = #tpu.dot_dimension_numbers<[1], [0], [0], [1], [0, 0, 1, 1], [], []>} : vector<32x77xbf16>, vector<77x128xbf16>, vector<32x128xf32> -> vector<32x128xf32>
    %37 = arith.addf %32, %36 : vector<32x128xf32>
    %c4_39 = arith.constant 4 : index
    %c0_40 = arith.constant 0 : index
    %38 = vector.load %arg1[%c4_39, %c0_40] : memref<48x77xbf16, #tpu.memory_space<vmem>>, vector<32x77xbf16>
    %c8 = arith.constant 8 : index
    %c0_41 = arith.constant 0 : index
    %c0_42 = arith.constant 0 : index
    %39 = vector.load %arg2[%c8, %c0_41, %c0_42] : memref<16x77x128xbf16, #tpu.memory_space<vmem>>, vector<1x77x128xbf16>
    %40 = vector.shape_cast %39 : vector<1x77x128xbf16> to vector<77x128xbf16>
    %cst_43 = arith.constant dense<0.000000e+00> : vector<32x128xf32>
    %41 = tpu.matmul %38, %40, %cst_43 {dimension_numbers = #tpu.dot_dimension_numbers<[1], [0], [0], [1], [0, 0, 1, 1], [], []>} : vector<32x77xbf16>, vector<77x128xbf16>, vector<32x128xf32> -> vector<32x128xf32>
    %c5_44 = arith.constant 5 : index
    %c0_45 = arith.constant 0 : index
    %42 = vector.load %arg1[%c5_44, %c0_45] : memref<48x77xbf16, #tpu.memory_space<vmem>>, vector<32x77xbf16>
    %c9 = arith.constant 9 : index
    %c0_46 = arith.constant 0 : index
    %c0_47 = arith.constant 0 : index
    %43 = vector.load %arg2[%c9, %c0_46, %c0_47] : memref<16x77x128xbf16, #tpu.memory_space<vmem>>, vector<1x77x128xbf16>
    %44 = vector.shape_cast %43 : vector<1x77x128xbf16> to vector<77x128xbf16>
    %cst_48 = arith.constant dense<0.000000e+00> : vector<32x128xf32>
    %45 = tpu.matmul %42, %44, %cst_48 {dimension_numbers = #tpu.dot_dimension_numbers<[1], [0], [0], [1], [0, 0, 1, 1], [], []>} : vector<32x77xbf16>, vector<77x128xbf16>, vector<32x128xf32> -> vector<32x128xf32>
    %46 = arith.addf %41, %45 : vector<32x128xf32>
    %c8_49 = arith.constant 8 : index
    %c0_50 = arith.constant 0 : index
    %47 = vector.load %arg1[%c8_49, %c0_50] : memref<48x77xbf16, #tpu.memory_space<vmem>>, vector<32x77xbf16>
    %c10 = arith.constant 10 : index
    %c0_51 = arith.constant 0 : index
    %c0_52 = arith.constant 0 : index
    %48 = vector.load %arg2[%c10, %c0_51, %c0_52] : memref<16x77x128xbf16, #tpu.memory_space<vmem>>, vector<1x77x128xbf16>
    %49 = vector.shape_cast %48 : vector<1x77x128xbf16> to vector<77x128xbf16>
    %cst_53 = arith.constant dense<0.000000e+00> : vector<32x128xf32>
    %50 = tpu.matmul %47, %49, %cst_53 {dimension_numbers = #tpu.dot_dimension_numbers<[1], [0], [0], [1], [0, 0, 1, 1], [], []>} : vector<32x77xbf16>, vector<77x128xbf16>, vector<32x128xf32> -> vector<32x128xf32>
    %51 = arith.addf %46, %50 : vector<32x128xf32>
    %c9_54 = arith.constant 9 : index
    %c0_55 = arith.constant 0 : index
    %52 = vector.load %arg1[%c9_54, %c0_55] : memref<48x77xbf16, #tpu.memory_space<vmem>>, vector<32x77xbf16>
    %c11 = arith.constant 11 : index
    %c0_56 = arith.constant 0 : index
    %c0_57 = arith.constant 0 : index
    %53 = vector.load %arg2[%c11, %c0_56, %c0_57] : memref<16x77x128xbf16, #tpu.memory_space<vmem>>, vector<1x77x128xbf16>
    %54 = vector.shape_cast %53 : vector<1x77x128xbf16> to vector<77x128xbf16>
    %cst_58 = arith.constant dense<0.000000e+00> : vector<32x128xf32>
    %55 = tpu.matmul %52, %54, %cst_58 {dimension_numbers = #tpu.dot_dimension_numbers<[1], [0], [0], [1], [0, 0, 1, 1], [], []>} : vector<32x77xbf16>, vector<77x128xbf16>, vector<32x128xf32> -> vector<32x128xf32>
    %56 = arith.addf %51, %55 : vector<32x128xf32>
    %c5_59 = arith.constant 5 : index
    %c0_60 = arith.constant 0 : index
    %57 = vector.load %arg1[%c5_59, %c0_60] : memref<48x77xbf16, #tpu.memory_space<vmem>>, vector<32x77xbf16>
    %c12 = arith.constant 12 : index
    %c0_61 = arith.constant 0 : index
    %c0_62 = arith.constant 0 : index
    %58 = vector.load %arg2[%c12, %c0_61, %c0_62] : memref<16x77x128xbf16, #tpu.memory_space<vmem>>, vector<1x77x128xbf16>
    %59 = vector.shape_cast %58 : vector<1x77x128xbf16> to vector<77x128xbf16>
    %cst_63 = arith.constant dense<0.000000e+00> : vector<32x128xf32>
    %60 = tpu.matmul %57, %59, %cst_63 {dimension_numbers = #tpu.dot_dimension_numbers<[1], [0], [0], [1], [0, 0, 1, 1], [], []>} : vector<32x77xbf16>, vector<77x128xbf16>, vector<32x128xf32> -> vector<32x128xf32>
    %c6_64 = arith.constant 6 : index
    %c0_65 = arith.constant 0 : index
    %61 = vector.load %arg1[%c6_64, %c0_65] : memref<48x77xbf16, #tpu.memory_space<vmem>>, vector<32x77xbf16>
    %c13 = arith.constant 13 : index
    %c0_66 = arith.constant 0 : index
    %c0_67 = arith.constant 0 : index
    %62 = vector.load %arg2[%c13, %c0_66, %c0_67] : memref<16x77x128xbf16, #tpu.memory_space<vmem>>, vector<1x77x128xbf16>
    %63 = vector.shape_cast %62 : vector<1x77x128xbf16> to vector<77x128xbf16>
    %cst_68 = arith.constant dense<0.000000e+00> : vector<32x128xf32>
    %64 = tpu.matmul %61, %63, %cst_68 {dimension_numbers = #tpu.dot_dimension_numbers<[1], [0], [0], [1], [0, 0, 1, 1], [], []>} : vector<32x77xbf16>, vector<77x128xbf16>, vector<32x128xf32> -> vector<32x128xf32>
    %65 = arith.addf %60, %64 : vector<32x128xf32>
    %c9_69 = arith.constant 9 : index
    %c0_70 = arith.constant 0 : index
    %66 = vector.load %arg1[%c9_69, %c0_70] : memref<48x77xbf16, #tpu.memory_space<vmem>>, vector<32x77xbf16>
    %c14 = arith.constant 14 : index
    %c0_71 = arith.constant 0 : index
    %c0_72 = arith.constant 0 : index
    %67 = vector.load %arg2[%c14, %c0_71, %c0_72] : memref<16x77x128xbf16, #tpu.memory_space<vmem>>, vector<1x77x128xbf16>
    %68 = vector.shape_cast %67 : vector<1x77x128xbf16> to vector<77x128xbf16>
    %cst_73 = arith.constant dense<0.000000e+00> : vector<32x128xf32>
    %69 = tpu.matmul %66, %68, %cst_73 {dimension_numbers = #tpu.dot_dimension_numbers<[1], [0], [0], [1], [0, 0, 1, 1], [], []>} : vector<32x77xbf16>, vector<77x128xbf16>, vector<32x128xf32> -> vector<32x128xf32>
    %70 = arith.addf %65, %69 : vector<32x128xf32>
    %c10_74 = arith.constant 10 : index
    %c0_75 = arith.constant 0 : index
    %71 = vector.load %arg1[%c10_74, %c0_75] : memref<48x77xbf16, #tpu.memory_space<vmem>>, vector<32x77xbf16>
    %c15 = arith.constant 15 : index
    %c0_76 = arith.constant 0 : index
    %c0_77 = arith.constant 0 : index
    %72 = vector.load %arg2[%c15, %c0_76, %c0_77] : memref<16x77x128xbf16, #tpu.memory_space<vmem>>, vector<1x77x128xbf16>
    %73 = vector.shape_cast %72 : vector<1x77x128xbf16> to vector<77x128xbf16>
    %cst_78 = arith.constant dense<0.000000e+00> : vector<32x128xf32>
    %74 = tpu.matmul %71, %73, %cst_78 {dimension_numbers = #tpu.dot_dimension_numbers<[1], [0], [0], [1], [0, 0, 1, 1], [], []>} : vector<32x77xbf16>, vector<77x128xbf16>, vector<32x128xf32> -> vector<32x128xf32>
    %75 = arith.addf %70, %74 : vector<32x128xf32>
    %c0_79 = arith.constant 0 : index
    %c0_80 = arith.constant 0 : index
    %76 = vector.load %arg3[%c0_79, %c0_80] : memref<32x1xf32, #tpu.memory_space<vmem>>, vector<32x1xf32>
    %77 = vector.broadcast %76 : vector<32x1xf32> to vector<32x128xf32>
    %78 = arith.mulf %18, %77 : vector<32x128xf32>
    %cst_81 = arith.constant dense<0.000000e+00> : vector<128xf32>
    %79 = vector.multi_reduction <add>, %78, %cst_81 [0] : vector<32x128xf32> to vector<128xf32>
    %80 = vector.shape_cast %79 : vector<128xf32> to vector<1x128xf32>
    %81 = arith.mulf %78, %18 : vector<32x128xf32>
    %cst_82 = arith.constant dense<0.000000e+00> : vector<128xf32>
    %82 = vector.multi_reduction <add>, %81, %cst_82 [0] : vector<32x128xf32> to vector<128xf32>
    %83 = vector.shape_cast %82 : vector<128xf32> to vector<1x128xf32>
    %84 = vector.broadcast %76 : vector<32x1xf32> to vector<32x128xf32>
    %85 = arith.mulf %37, %84 : vector<32x128xf32>
    %cst_83 = arith.constant dense<0.000000e+00> : vector<128xf32>
    %86 = vector.multi_reduction <add>, %85, %cst_83 [0] : vector<32x128xf32> to vector<128xf32>
    %87 = vector.shape_cast %86 : vector<128xf32> to vector<1x128xf32>
    %88 = arith.mulf %85, %37 : vector<32x128xf32>
    %cst_84 = arith.constant dense<0.000000e+00> : vector<128xf32>
    %89 = vector.multi_reduction <add>, %88, %cst_84 [0] : vector<32x128xf32> to vector<128xf32>
    %90 = vector.shape_cast %89 : vector<128xf32> to vector<1x128xf32>
    %91 = arith.addf %80, %87 : vector<1x128xf32>
    %92 = arith.addf %83, %90 : vector<1x128xf32>
    %93 = vector.broadcast %76 : vector<32x1xf32> to vector<32x128xf32>
    %94 = arith.mulf %56, %93 : vector<32x128xf32>
    %cst_85 = arith.constant dense<0.000000e+00> : vector<128xf32>
    %95 = vector.multi_reduction <add>, %94, %cst_85 [0] : vector<32x128xf32> to vector<128xf32>
    %96 = vector.shape_cast %95 : vector<128xf32> to vector<1x128xf32>
    %97 = arith.mulf %94, %56 : vector<32x128xf32>
    %cst_86 = arith.constant dense<0.000000e+00> : vector<128xf32>
    %98 = vector.multi_reduction <add>, %97, %cst_86 [0] : vector<32x128xf32> to vector<128xf32>
    %99 = vector.shape_cast %98 : vector<128xf32> to vector<1x128xf32>
    %100 = arith.addf %91, %96 : vector<1x128xf32>
    %101 = arith.addf %92, %99 : vector<1x128xf32>
    %102 = vector.broadcast %76 : vector<32x1xf32> to vector<32x128xf32>
    %103 = arith.mulf %75, %102 : vector<32x128xf32>
    %cst_87 = arith.constant dense<0.000000e+00> : vector<128xf32>
    %104 = vector.multi_reduction <add>, %103, %cst_87 [0] : vector<32x128xf32> to vector<128xf32>
    %105 = vector.shape_cast %104 : vector<128xf32> to vector<1x128xf32>
    %106 = arith.mulf %103, %75 : vector<32x128xf32>
    %cst_88 = arith.constant dense<0.000000e+00> : vector<128xf32>
    %107 = vector.multi_reduction <add>, %106, %cst_88 [0] : vector<32x128xf32> to vector<128xf32>
    %108 = vector.shape_cast %107 : vector<128xf32> to vector<1x128xf32>
    %109 = arith.addf %100, %105 : vector<1x128xf32>
    %110 = arith.addf %101, %108 : vector<1x128xf32>
    %cst_89 = arith.constant 3.125000e-02 : f32
    %111 = vector.broadcast %cst_89 : f32 to vector<1x128xf32>
    %112 = arith.mulf %109, %111 : vector<1x128xf32>
    %cst_90 = arith.constant 3.125000e-02 : f32
    %113 = vector.broadcast %cst_90 : f32 to vector<1x128xf32>
    %114 = arith.mulf %110, %113 : vector<1x128xf32>
    %115 = arith.mulf %112, %112 : vector<1x128xf32>
    %116 = arith.subf %114, %115 : vector<1x128xf32>
    %cst_91 = arith.constant 0.000000e+00 : f32
    %117 = vector.broadcast %cst_91 : f32 to vector<1x128xf32>
    %118 = arith.maximumf %116, %117 : vector<1x128xf32>
    %c0_92 = arith.constant 0 : index
    %c0_93 = arith.constant 0 : index
    %119 = vector.load %arg4[%c0_92, %c0_93] : memref<2x128xf32, #tpu.memory_space<vmem>>, vector<1x128xf32>
    %cst_94 = arith.constant 9.99999974E-6 : f32
    %120 = vector.broadcast %cst_94 : f32 to vector<1x128xf32>
    %121 = arith.addf %118, %120 : vector<1x128xf32>
    %122 = math.rsqrt %121 : vector<1x128xf32>
    %123 = arith.mulf %119, %122 : vector<1x128xf32>
    %c1_95 = arith.constant 1 : index
    %c0_96 = arith.constant 0 : index
    %124 = vector.load %arg4[%c1_95, %c0_96] : memref<2x128xf32, #tpu.memory_space<vmem>>, vector<1x128xf32>
    %125 = arith.mulf %112, %123 : vector<1x128xf32>
    %126 = arith.subf %124, %125 : vector<1x128xf32>
    %127 = vector.broadcast %123 : vector<1x128xf32> to vector<32x128xf32>
    %128 = arith.mulf %18, %127 : vector<32x128xf32>
    %129 = vector.broadcast %126 : vector<1x128xf32> to vector<32x128xf32>
    %130 = arith.addf %128, %129 : vector<32x128xf32>
    %cst_97 = arith.constant 0.000000e+00 : f32
    %131 = vector.broadcast %cst_97 : f32 to vector<32x128xf32>
    %132 = arith.maximumf %130, %131 : vector<32x128xf32>
    %133 = arith.truncf %132 : vector<32x128xf32> to vector<32x128xbf16>
    %c0_98 = arith.constant 0 : index
    %c0_99 = arith.constant 0 : index
    %c0_100 = arith.constant 0 : index
    %134 = vector.load %arg5[%c0_98, %c0_99, %c0_100] : memref<4x32x128xbf16, #tpu.memory_space<vmem>>, vector<1x32x128xbf16>
    %135 = vector.shape_cast %134 : vector<1x32x128xbf16> to vector<32x128xbf16>
    %136 = vector.shape_cast %133 : vector<32x128xbf16> to vector<1x32x128xbf16>
    tpu.vector_store %arg5[%c0_98, %c0_99, %c0_100], %136 {strides = array<i32>} : memref<4x32x128xbf16, #tpu.memory_space<vmem>>, vector<1x32x128xbf16>,
    %137 = vector.broadcast %123 : vector<1x128xf32> to vector<32x128xf32>
    %138 = arith.mulf %37, %137 : vector<32x128xf32>
    %139 = vector.broadcast %126 : vector<1x128xf32> to vector<32x128xf32>
    %140 = arith.addf %138, %139 : vector<32x128xf32>
    %cst_101 = arith.constant 0.000000e+00 : f32
    %141 = vector.broadcast %cst_101 : f32 to vector<32x128xf32>
    %142 = arith.maximumf %140, %141 : vector<32x128xf32>
    %143 = arith.truncf %142 : vector<32x128xf32> to vector<32x128xbf16>
    %c1_102 = arith.constant 1 : index
    %c0_103 = arith.constant 0 : index
    %c0_104 = arith.constant 0 : index
    %144 = vector.load %arg5[%c1_102, %c0_103, %c0_104] : memref<4x32x128xbf16, #tpu.memory_space<vmem>>, vector<1x32x128xbf16>
    %145 = vector.shape_cast %144 : vector<1x32x128xbf16> to vector<32x128xbf16>
    %146 = vector.shape_cast %143 : vector<32x128xbf16> to vector<1x32x128xbf16>
    tpu.vector_store %arg5[%c1_102, %c0_103, %c0_104], %146 {strides = array<i32>} : memref<4x32x128xbf16, #tpu.memory_space<vmem>>, vector<1x32x128xbf16>,
    %147 = vector.broadcast %123 : vector<1x128xf32> to vector<32x128xf32>
    %148 = arith.mulf %56, %147 : vector<32x128xf32>
    %149 = vector.broadcast %126 : vector<1x128xf32> to vector<32x128xf32>
    %150 = arith.addf %148, %149 : vector<32x128xf32>
    %cst_105 = arith.constant 0.000000e+00 : f32
    %151 = vector.broadcast %cst_105 : f32 to vector<32x128xf32>
    %152 = arith.maximumf %150, %151 : vector<32x128xf32>
    %153 = arith.truncf %152 : vector<32x128xf32> to vector<32x128xbf16>
    %c2_106 = arith.constant 2 : index
    %c0_107 = arith.constant 0 : index
    %c0_108 = arith.constant 0 : index
    %154 = vector.load %arg5[%c2_106, %c0_107, %c0_108] : memref<4x32x128xbf16, #tpu.memory_space<vmem>>, vector<1x32x128xbf16>
    %155 = vector.shape_cast %154 : vector<1x32x128xbf16> to vector<32x128xbf16>
    %156 = vector.shape_cast %153 : vector<32x128xbf16> to vector<1x32x128xbf16>
    tpu.vector_store %arg5[%c2_106, %c0_107, %c0_108], %156 {strides = array<i32>} : memref<4x32x128xbf16, #tpu.memory_space<vmem>>, vector<1x32x128xbf16>,
    %157 = vector.broadcast %123 : vector<1x128xf32> to vector<32x128xf32>
    %158 = arith.mulf %75, %157 : vector<32x128xf32>
    %159 = vector.broadcast %126 : vector<1x128xf32> to vector<32x128xf32>
    %160 = arith.addf %158, %159 : vector<32x128xf32>
    %cst_109 = arith.constant 0.000000e+00 : f32
    %161 = vector.broadcast %cst_109 : f32 to vector<32x128xf32>
    %162 = arith.maximumf %160, %161 : vector<32x128xf32>
    %163 = arith.truncf %162 : vector<32x128xf32> to vector<32x128xbf16>
    %c3_110 = arith.constant 3 : index
    %c0_111 = arith.constant 0 : index
    %c0_112 = arith.constant 0 : index
    %164 = vector.load %arg5[%c3_110, %c0_111, %c0_112] : memref<4x32x128xbf16, #tpu.memory_space<vmem>>, vector<1x32x128xbf16>
    %165 = vector.shape_cast %164 : vector<1x32x128xbf16> to vector<32x128xbf16>
    %166 = vector.shape_cast %163 : vector<32x128xbf16> to vector<1x32x128xbf16>
    tpu.vector_store %arg5[%c3_110, %c0_111, %c0_112], %166 {strides = array<i32>} : memref<4x32x128xbf16, #tpu.memory_space<vmem>>, vector<1x32x128xbf16>,
    return
  }
  func.func @transform_0(%arg0: i32) -> (i32, i32) {
    %c0_i32 = arith.constant 0 : i32
    %c0_i32_0 = arith.constant 0 : i32
    %c0_i32_1 = arith.constant 0 : i32
    return %c0_i32, %c0_i32_0 : i32, i32
  }
  func.func @transform_1(%arg0: i32) -> (i32, i32, i32) {
    %c0_i32 = arith.constant 0 : i32
    %c0_i32_0 = arith.constant 0 : i32
    %c0_i32_1 = arith.constant 0 : i32
    %c0_i32_2 = arith.constant 0 : i32
    return %c0_i32, %c0_i32_0, %c0_i32_1 : i32, i32, i32
  }
  func.func @transform_2(%arg0: i32) -> (i32, i32) {
    %c0_i32 = arith.constant 0 : i32
    %c0_i32_0 = arith.constant 0 : i32
    %c0_i32_1 = arith.constant 0 : i32
    return %c0_i32, %c0_i32_0 : i32, i32
  }
  func.func @transform_3(%arg0: i32) -> (i32, i32) {
    %c0_i32 = arith.constant 0 : i32
    %c0_i32_0 = arith.constant 0 : i32
    %c0_i32_1 = arith.constant 0 : i32
    return %c0_i32, %c0_i32_0 : i32, i32
  }
  func.func @transform_4(%arg0: i32) -> (i32, i32, i32) {
    %c0_i32 = arith.constant 0 : i32
    %c0_i32_0 = arith.constant 0 : i32
    %c0_i32_1 = arith.constant 0 : i32
    %c0_i32_2 = arith.constant 0 : i32
    return %c0_i32, %c0_i32_0, %c0_i32_1 : i32, i32, i32
  }
}

module attributes {stable_mosaic.version = 11 : i64} {
  func.func @_fused_conv_kernel(%arg0: i32, %arg1: memref<96x109xbf16, #tpu.memory_space<vmem>>, %arg2: memref<16x109x128xbf16, #tpu.memory_space<vmem>>, %arg3: memref<72x1xf32, #tpu.memory_space<vmem>>, %arg4: memref<2x128xf32, #tpu.memory_space<vmem>>, %arg5: memref<4x72x128xbf16, #tpu.memory_space<vmem>>) attributes {dimension_semantics = [#tpu.dimension_semantics<arbitrary>], iteration_bounds = array<i64: 1>, scalar_prefetch = 0 : i64, scratch_operands = 0 : i64, tpu.core_type = #tpu.core_type<tc>, window_params = [{pipeline_mode = #tpu.pipeline_mode<synchronous>, transform_indices = @transform_0, window_bounds = array<i64: 96, 109>}, {pipeline_mode = #tpu.pipeline_mode<synchronous>, transform_indices = @transform_1, window_bounds = array<i64: 16, 109, 128>}, {pipeline_mode = #tpu.pipeline_mode<synchronous>, transform_indices = @transform_2, window_bounds = array<i64: 72, 1>}, {pipeline_mode = #tpu.pipeline_mode<synchronous>, transform_indices = @transform_3, window_bounds = array<i64: 2, 128>}, {pipeline_mode = #tpu.pipeline_mode<synchronous>, transform_indices = @transform_4, window_bounds = array<i64: 4, 72, 128>}]} {
    %c0 = arith.constant 0 : index
    %c0_0 = arith.constant 0 : index
    %0 = vector.load %arg1[%c0, %c0_0] : memref<96x109xbf16, #tpu.memory_space<vmem>>, vector<72x109xbf16>
    %c0_1 = arith.constant 0 : index
    %c0_2 = arith.constant 0 : index
    %c0_3 = arith.constant 0 : index
    %1 = vector.load %arg2[%c0_1, %c0_2, %c0_3] : memref<16x109x128xbf16, #tpu.memory_space<vmem>>, vector<1x109x128xbf16>
    %2 = vector.shape_cast %1 : vector<1x109x128xbf16> to vector<109x128xbf16>
    %cst = arith.constant dense<0.000000e+00> : vector<72x128xf32>
    %3 = tpu.matmul %0, %2, %cst {dimension_numbers = #tpu.dot_dimension_numbers<[1], [0], [0], [1], [0, 0, 1, 1], [], []>} : vector<72x109xbf16>, vector<109x128xbf16>, vector<72x128xf32> -> vector<72x128xf32>
    %c1 = arith.constant 1 : index
    %c0_4 = arith.constant 0 : index
    %4 = vector.load %arg1[%c1, %c0_4] : memref<96x109xbf16, #tpu.memory_space<vmem>>, vector<72x109xbf16>
    %c1_5 = arith.constant 1 : index
    %c0_6 = arith.constant 0 : index
    %c0_7 = arith.constant 0 : index
    %5 = vector.load %arg2[%c1_5, %c0_6, %c0_7] : memref<16x109x128xbf16, #tpu.memory_space<vmem>>, vector<1x109x128xbf16>
    %6 = vector.shape_cast %5 : vector<1x109x128xbf16> to vector<109x128xbf16>
    %cst_8 = arith.constant dense<0.000000e+00> : vector<72x128xf32>
    %7 = tpu.matmul %4, %6, %cst_8 {dimension_numbers = #tpu.dot_dimension_numbers<[1], [0], [0], [1], [0, 0, 1, 1], [], []>} : vector<72x109xbf16>, vector<109x128xbf16>, vector<72x128xf32> -> vector<72x128xf32>
    %8 = arith.addf %3, %7 : vector<72x128xf32>
    %c6 = arith.constant 6 : index
    %c0_9 = arith.constant 0 : index
    %9 = vector.load %arg1[%c6, %c0_9] : memref<96x109xbf16, #tpu.memory_space<vmem>>, vector<72x109xbf16>
    %c2 = arith.constant 2 : index
    %c0_10 = arith.constant 0 : index
    %c0_11 = arith.constant 0 : index
    %10 = vector.load %arg2[%c2, %c0_10, %c0_11] : memref<16x109x128xbf16, #tpu.memory_space<vmem>>, vector<1x109x128xbf16>
    %11 = vector.shape_cast %10 : vector<1x109x128xbf16> to vector<109x128xbf16>
    %cst_12 = arith.constant dense<0.000000e+00> : vector<72x128xf32>
    %12 = tpu.matmul %9, %11, %cst_12 {dimension_numbers = #tpu.dot_dimension_numbers<[1], [0], [0], [1], [0, 0, 1, 1], [], []>} : vector<72x109xbf16>, vector<109x128xbf16>, vector<72x128xf32> -> vector<72x128xf32>
    %13 = arith.addf %8, %12 : vector<72x128xf32>
    %c7 = arith.constant 7 : index
    %c0_13 = arith.constant 0 : index
    %14 = vector.load %arg1[%c7, %c0_13] : memref<96x109xbf16, #tpu.memory_space<vmem>>, vector<72x109xbf16>
    %c3 = arith.constant 3 : index
    %c0_14 = arith.constant 0 : index
    %c0_15 = arith.constant 0 : index
    %15 = vector.load %arg2[%c3, %c0_14, %c0_15] : memref<16x109x128xbf16, #tpu.memory_space<vmem>>, vector<1x109x128xbf16>
    %16 = vector.shape_cast %15 : vector<1x109x128xbf16> to vector<109x128xbf16>
    %cst_16 = arith.constant dense<0.000000e+00> : vector<72x128xf32>
    %17 = tpu.matmul %14, %16, %cst_16 {dimension_numbers = #tpu.dot_dimension_numbers<[1], [0], [0], [1], [0, 0, 1, 1], [], []>} : vector<72x109xbf16>, vector<109x128xbf16>, vector<72x128xf32> -> vector<72x128xf32>
    %18 = arith.addf %13, %17 : vector<72x128xf32>
    %c1_17 = arith.constant 1 : index
    %c0_18 = arith.constant 0 : index
    %19 = vector.load %arg1[%c1_17, %c0_18] : memref<96x109xbf16, #tpu.memory_space<vmem>>, vector<72x109xbf16>
    %c4 = arith.constant 4 : index
    %c0_19 = arith.constant 0 : index
    %c0_20 = arith.constant 0 : index
    %20 = vector.load %arg2[%c4, %c0_19, %c0_20] : memref<16x109x128xbf16, #tpu.memory_space<vmem>>, vector<1x109x128xbf16>
    %21 = vector.shape_cast %20 : vector<1x109x128xbf16> to vector<109x128xbf16>
    %cst_21 = arith.constant dense<0.000000e+00> : vector<72x128xf32>
    %22 = tpu.matmul %19, %21, %cst_21 {dimension_numbers = #tpu.dot_dimension_numbers<[1], [0], [0], [1], [0, 0, 1, 1], [], []>} : vector<72x109xbf16>, vector<109x128xbf16>, vector<72x128xf32> -> vector<72x128xf32>
    %c2_22 = arith.constant 2 : index
    %c0_23 = arith.constant 0 : index
    %23 = vector.load %arg1[%c2_22, %c0_23] : memref<96x109xbf16, #tpu.memory_space<vmem>>, vector<72x109xbf16>
    %c5 = arith.constant 5 : index
    %c0_24 = arith.constant 0 : index
    %c0_25 = arith.constant 0 : index
    %24 = vector.load %arg2[%c5, %c0_24, %c0_25] : memref<16x109x128xbf16, #tpu.memory_space<vmem>>, vector<1x109x128xbf16>
    %25 = vector.shape_cast %24 : vector<1x109x128xbf16> to vector<109x128xbf16>
    %cst_26 = arith.constant dense<0.000000e+00> : vector<72x128xf32>
    %26 = tpu.matmul %23, %25, %cst_26 {dimension_numbers = #tpu.dot_dimension_numbers<[1], [0], [0], [1], [0, 0, 1, 1], [], []>} : vector<72x109xbf16>, vector<109x128xbf16>, vector<72x128xf32> -> vector<72x128xf32>
    %27 = arith.addf %22, %26 : vector<72x128xf32>
    %c7_27 = arith.constant 7 : index
    %c0_28 = arith.constant 0 : index
    %28 = vector.load %arg1[%c7_27, %c0_28] : memref<96x109xbf16, #tpu.memory_space<vmem>>, vector<72x109xbf16>
    %c6_29 = arith.constant 6 : index
    %c0_30 = arith.constant 0 : index
    %c0_31 = arith.constant 0 : index
    %29 = vector.load %arg2[%c6_29, %c0_30, %c0_31] : memref<16x109x128xbf16, #tpu.memory_space<vmem>>, vector<1x109x128xbf16>
    %30 = vector.shape_cast %29 : vector<1x109x128xbf16> to vector<109x128xbf16>
    %cst_32 = arith.constant dense<0.000000e+00> : vector<72x128xf32>
    %31 = tpu.matmul %28, %30, %cst_32 {dimension_numbers = #tpu.dot_dimension_numbers<[1], [0], [0], [1], [0, 0, 1, 1], [], []>} : vector<72x109xbf16>, vector<109x128xbf16>, vector<72x128xf32> -> vector<72x128xf32>
    %32 = arith.addf %27, %31 : vector<72x128xf32>
    %c8 = arith.constant 8 : index
    %c0_33 = arith.constant 0 : index
    %33 = vector.load %arg1[%c8, %c0_33] : memref<96x109xbf16, #tpu.memory_space<vmem>>, vector<72x109xbf16>
    %c7_34 = arith.constant 7 : index
    %c0_35 = arith.constant 0 : index
    %c0_36 = arith.constant 0 : index
    %34 = vector.load %arg2[%c7_34, %c0_35, %c0_36] : memref<16x109x128xbf16, #tpu.memory_space<vmem>>, vector<1x109x128xbf16>
    %35 = vector.shape_cast %34 : vector<1x109x128xbf16> to vector<109x128xbf16>
    %cst_37 = arith.constant dense<0.000000e+00> : vector<72x128xf32>
    %36 = tpu.matmul %33, %35, %cst_37 {dimension_numbers = #tpu.dot_dimension_numbers<[1], [0], [0], [1], [0, 0, 1, 1], [], []>} : vector<72x109xbf16>, vector<109x128xbf16>, vector<72x128xf32> -> vector<72x128xf32>
    %37 = arith.addf %32, %36 : vector<72x128xf32>
    %c6_38 = arith.constant 6 : index
    %c0_39 = arith.constant 0 : index
    %38 = vector.load %arg1[%c6_38, %c0_39] : memref<96x109xbf16, #tpu.memory_space<vmem>>, vector<72x109xbf16>
    %c8_40 = arith.constant 8 : index
    %c0_41 = arith.constant 0 : index
    %c0_42 = arith.constant 0 : index
    %39 = vector.load %arg2[%c8_40, %c0_41, %c0_42] : memref<16x109x128xbf16, #tpu.memory_space<vmem>>, vector<1x109x128xbf16>
    %40 = vector.shape_cast %39 : vector<1x109x128xbf16> to vector<109x128xbf16>
    %cst_43 = arith.constant dense<0.000000e+00> : vector<72x128xf32>
    %41 = tpu.matmul %38, %40, %cst_43 {dimension_numbers = #tpu.dot_dimension_numbers<[1], [0], [0], [1], [0, 0, 1, 1], [], []>} : vector<72x109xbf16>, vector<109x128xbf16>, vector<72x128xf32> -> vector<72x128xf32>
    %c7_44 = arith.constant 7 : index
    %c0_45 = arith.constant 0 : index
    %42 = vector.load %arg1[%c7_44, %c0_45] : memref<96x109xbf16, #tpu.memory_space<vmem>>, vector<72x109xbf16>
    %c9 = arith.constant 9 : index
    %c0_46 = arith.constant 0 : index
    %c0_47 = arith.constant 0 : index
    %43 = vector.load %arg2[%c9, %c0_46, %c0_47] : memref<16x109x128xbf16, #tpu.memory_space<vmem>>, vector<1x109x128xbf16>
    %44 = vector.shape_cast %43 : vector<1x109x128xbf16> to vector<109x128xbf16>
    %cst_48 = arith.constant dense<0.000000e+00> : vector<72x128xf32>
    %45 = tpu.matmul %42, %44, %cst_48 {dimension_numbers = #tpu.dot_dimension_numbers<[1], [0], [0], [1], [0, 0, 1, 1], [], []>} : vector<72x109xbf16>, vector<109x128xbf16>, vector<72x128xf32> -> vector<72x128xf32>
    %46 = arith.addf %41, %45 : vector<72x128xf32>
    %c12 = arith.constant 12 : index
    %c0_49 = arith.constant 0 : index
    %47 = vector.load %arg1[%c12, %c0_49] : memref<96x109xbf16, #tpu.memory_space<vmem>>, vector<72x109xbf16>
    %c10 = arith.constant 10 : index
    %c0_50 = arith.constant 0 : index
    %c0_51 = arith.constant 0 : index
    %48 = vector.load %arg2[%c10, %c0_50, %c0_51] : memref<16x109x128xbf16, #tpu.memory_space<vmem>>, vector<1x109x128xbf16>
    %49 = vector.shape_cast %48 : vector<1x109x128xbf16> to vector<109x128xbf16>
    %cst_52 = arith.constant dense<0.000000e+00> : vector<72x128xf32>
    %50 = tpu.matmul %47, %49, %cst_52 {dimension_numbers = #tpu.dot_dimension_numbers<[1], [0], [0], [1], [0, 0, 1, 1], [], []>} : vector<72x109xbf16>, vector<109x128xbf16>, vector<72x128xf32> -> vector<72x128xf32>
    %51 = arith.addf %46, %50 : vector<72x128xf32>
    %c13 = arith.constant 13 : index
    %c0_53 = arith.constant 0 : index
    %52 = vector.load %arg1[%c13, %c0_53] : memref<96x109xbf16, #tpu.memory_space<vmem>>, vector<72x109xbf16>
    %c11 = arith.constant 11 : index
    %c0_54 = arith.constant 0 : index
    %c0_55 = arith.constant 0 : index
    %53 = vector.load %arg2[%c11, %c0_54, %c0_55] : memref<16x109x128xbf16, #tpu.memory_space<vmem>>, vector<1x109x128xbf16>
    %54 = vector.shape_cast %53 : vector<1x109x128xbf16> to vector<109x128xbf16>
    %cst_56 = arith.constant dense<0.000000e+00> : vector<72x128xf32>
    %55 = tpu.matmul %52, %54, %cst_56 {dimension_numbers = #tpu.dot_dimension_numbers<[1], [0], [0], [1], [0, 0, 1, 1], [], []>} : vector<72x109xbf16>, vector<109x128xbf16>, vector<72x128xf32> -> vector<72x128xf32>
    %56 = arith.addf %51, %55 : vector<72x128xf32>
    %c7_57 = arith.constant 7 : index
    %c0_58 = arith.constant 0 : index
    %57 = vector.load %arg1[%c7_57, %c0_58] : memref<96x109xbf16, #tpu.memory_space<vmem>>, vector<72x109xbf16>
    %c12_59 = arith.constant 12 : index
    %c0_60 = arith.constant 0 : index
    %c0_61 = arith.constant 0 : index
    %58 = vector.load %arg2[%c12_59, %c0_60, %c0_61] : memref<16x109x128xbf16, #tpu.memory_space<vmem>>, vector<1x109x128xbf16>
    %59 = vector.shape_cast %58 : vector<1x109x128xbf16> to vector<109x128xbf16>
    %cst_62 = arith.constant dense<0.000000e+00> : vector<72x128xf32>
    %60 = tpu.matmul %57, %59, %cst_62 {dimension_numbers = #tpu.dot_dimension_numbers<[1], [0], [0], [1], [0, 0, 1, 1], [], []>} : vector<72x109xbf16>, vector<109x128xbf16>, vector<72x128xf32> -> vector<72x128xf32>
    %c8_63 = arith.constant 8 : index
    %c0_64 = arith.constant 0 : index
    %61 = vector.load %arg1[%c8_63, %c0_64] : memref<96x109xbf16, #tpu.memory_space<vmem>>, vector<72x109xbf16>
    %c13_65 = arith.constant 13 : index
    %c0_66 = arith.constant 0 : index
    %c0_67 = arith.constant 0 : index
    %62 = vector.load %arg2[%c13_65, %c0_66, %c0_67] : memref<16x109x128xbf16, #tpu.memory_space<vmem>>, vector<1x109x128xbf16>
    %63 = vector.shape_cast %62 : vector<1x109x128xbf16> to vector<109x128xbf16>
    %cst_68 = arith.constant dense<0.000000e+00> : vector<72x128xf32>
    %64 = tpu.matmul %61, %63, %cst_68 {dimension_numbers = #tpu.dot_dimension_numbers<[1], [0], [0], [1], [0, 0, 1, 1], [], []>} : vector<72x109xbf16>, vector<109x128xbf16>, vector<72x128xf32> -> vector<72x128xf32>
    %65 = arith.addf %60, %64 : vector<72x128xf32>
    %c13_69 = arith.constant 13 : index
    %c0_70 = arith.constant 0 : index
    %66 = vector.load %arg1[%c13_69, %c0_70] : memref<96x109xbf16, #tpu.memory_space<vmem>>, vector<72x109xbf16>
    %c14 = arith.constant 14 : index
    %c0_71 = arith.constant 0 : index
    %c0_72 = arith.constant 0 : index
    %67 = vector.load %arg2[%c14, %c0_71, %c0_72] : memref<16x109x128xbf16, #tpu.memory_space<vmem>>, vector<1x109x128xbf16>
    %68 = vector.shape_cast %67 : vector<1x109x128xbf16> to vector<109x128xbf16>
    %cst_73 = arith.constant dense<0.000000e+00> : vector<72x128xf32>
    %69 = tpu.matmul %66, %68, %cst_73 {dimension_numbers = #tpu.dot_dimension_numbers<[1], [0], [0], [1], [0, 0, 1, 1], [], []>} : vector<72x109xbf16>, vector<109x128xbf16>, vector<72x128xf32> -> vector<72x128xf32>
    %70 = arith.addf %65, %69 : vector<72x128xf32>
    %c14_74 = arith.constant 14 : index
    %c0_75 = arith.constant 0 : index
    %71 = vector.load %arg1[%c14_74, %c0_75] : memref<96x109xbf16, #tpu.memory_space<vmem>>, vector<72x109xbf16>
    %c15 = arith.constant 15 : index
    %c0_76 = arith.constant 0 : index
    %c0_77 = arith.constant 0 : index
    %72 = vector.load %arg2[%c15, %c0_76, %c0_77] : memref<16x109x128xbf16, #tpu.memory_space<vmem>>, vector<1x109x128xbf16>
    %73 = vector.shape_cast %72 : vector<1x109x128xbf16> to vector<109x128xbf16>
    %cst_78 = arith.constant dense<0.000000e+00> : vector<72x128xf32>
    %74 = tpu.matmul %71, %73, %cst_78 {dimension_numbers = #tpu.dot_dimension_numbers<[1], [0], [0], [1], [0, 0, 1, 1], [], []>} : vector<72x109xbf16>, vector<109x128xbf16>, vector<72x128xf32> -> vector<72x128xf32>
    %75 = arith.addf %70, %74 : vector<72x128xf32>
    %c0_79 = arith.constant 0 : index
    %c0_80 = arith.constant 0 : index
    %76 = vector.load %arg3[%c0_79, %c0_80] : memref<72x1xf32, #tpu.memory_space<vmem>>, vector<72x1xf32>
    %77 = vector.broadcast %76 : vector<72x1xf32> to vector<72x128xf32>
    %78 = arith.mulf %18, %77 : vector<72x128xf32>
    %cst_81 = arith.constant dense<0.000000e+00> : vector<128xf32>
    %79 = vector.multi_reduction <add>, %78, %cst_81 [0] : vector<72x128xf32> to vector<128xf32>
    %80 = vector.shape_cast %79 : vector<128xf32> to vector<1x128xf32>
    %81 = arith.mulf %78, %18 : vector<72x128xf32>
    %cst_82 = arith.constant dense<0.000000e+00> : vector<128xf32>
    %82 = vector.multi_reduction <add>, %81, %cst_82 [0] : vector<72x128xf32> to vector<128xf32>
    %83 = vector.shape_cast %82 : vector<128xf32> to vector<1x128xf32>
    %84 = vector.broadcast %76 : vector<72x1xf32> to vector<72x128xf32>
    %85 = arith.mulf %37, %84 : vector<72x128xf32>
    %cst_83 = arith.constant dense<0.000000e+00> : vector<128xf32>
    %86 = vector.multi_reduction <add>, %85, %cst_83 [0] : vector<72x128xf32> to vector<128xf32>
    %87 = vector.shape_cast %86 : vector<128xf32> to vector<1x128xf32>
    %88 = arith.mulf %85, %37 : vector<72x128xf32>
    %cst_84 = arith.constant dense<0.000000e+00> : vector<128xf32>
    %89 = vector.multi_reduction <add>, %88, %cst_84 [0] : vector<72x128xf32> to vector<128xf32>
    %90 = vector.shape_cast %89 : vector<128xf32> to vector<1x128xf32>
    %91 = arith.addf %80, %87 : vector<1x128xf32>
    %92 = arith.addf %83, %90 : vector<1x128xf32>
    %93 = vector.broadcast %76 : vector<72x1xf32> to vector<72x128xf32>
    %94 = arith.mulf %56, %93 : vector<72x128xf32>
    %cst_85 = arith.constant dense<0.000000e+00> : vector<128xf32>
    %95 = vector.multi_reduction <add>, %94, %cst_85 [0] : vector<72x128xf32> to vector<128xf32>
    %96 = vector.shape_cast %95 : vector<128xf32> to vector<1x128xf32>
    %97 = arith.mulf %94, %56 : vector<72x128xf32>
    %cst_86 = arith.constant dense<0.000000e+00> : vector<128xf32>
    %98 = vector.multi_reduction <add>, %97, %cst_86 [0] : vector<72x128xf32> to vector<128xf32>
    %99 = vector.shape_cast %98 : vector<128xf32> to vector<1x128xf32>
    %100 = arith.addf %91, %96 : vector<1x128xf32>
    %101 = arith.addf %92, %99 : vector<1x128xf32>
    %102 = vector.broadcast %76 : vector<72x1xf32> to vector<72x128xf32>
    %103 = arith.mulf %75, %102 : vector<72x128xf32>
    %cst_87 = arith.constant dense<0.000000e+00> : vector<128xf32>
    %104 = vector.multi_reduction <add>, %103, %cst_87 [0] : vector<72x128xf32> to vector<128xf32>
    %105 = vector.shape_cast %104 : vector<128xf32> to vector<1x128xf32>
    %106 = arith.mulf %103, %75 : vector<72x128xf32>
    %cst_88 = arith.constant dense<0.000000e+00> : vector<128xf32>
    %107 = vector.multi_reduction <add>, %106, %cst_88 [0] : vector<72x128xf32> to vector<128xf32>
    %108 = vector.shape_cast %107 : vector<128xf32> to vector<1x128xf32>
    %109 = arith.addf %100, %105 : vector<1x128xf32>
    %110 = arith.addf %101, %108 : vector<1x128xf32>
    %cst_89 = arith.constant 7.812500e-03 : f32
    %111 = vector.broadcast %cst_89 : f32 to vector<1x128xf32>
    %112 = arith.mulf %109, %111 : vector<1x128xf32>
    %cst_90 = arith.constant 7.812500e-03 : f32
    %113 = vector.broadcast %cst_90 : f32 to vector<1x128xf32>
    %114 = arith.mulf %110, %113 : vector<1x128xf32>
    %115 = arith.mulf %112, %112 : vector<1x128xf32>
    %116 = arith.subf %114, %115 : vector<1x128xf32>
    %cst_91 = arith.constant 0.000000e+00 : f32
    %117 = vector.broadcast %cst_91 : f32 to vector<1x128xf32>
    %118 = arith.maximumf %116, %117 : vector<1x128xf32>
    %c0_92 = arith.constant 0 : index
    %c0_93 = arith.constant 0 : index
    %119 = vector.load %arg4[%c0_92, %c0_93] : memref<2x128xf32, #tpu.memory_space<vmem>>, vector<1x128xf32>
    %cst_94 = arith.constant 9.99999974E-6 : f32
    %120 = vector.broadcast %cst_94 : f32 to vector<1x128xf32>
    %121 = arith.addf %118, %120 : vector<1x128xf32>
    %122 = math.rsqrt %121 : vector<1x128xf32>
    %123 = arith.mulf %119, %122 : vector<1x128xf32>
    %c1_95 = arith.constant 1 : index
    %c0_96 = arith.constant 0 : index
    %124 = vector.load %arg4[%c1_95, %c0_96] : memref<2x128xf32, #tpu.memory_space<vmem>>, vector<1x128xf32>
    %125 = arith.mulf %112, %123 : vector<1x128xf32>
    %126 = arith.subf %124, %125 : vector<1x128xf32>
    %127 = vector.broadcast %123 : vector<1x128xf32> to vector<72x128xf32>
    %128 = arith.mulf %18, %127 : vector<72x128xf32>
    %129 = vector.broadcast %126 : vector<1x128xf32> to vector<72x128xf32>
    %130 = arith.addf %128, %129 : vector<72x128xf32>
    %cst_97 = arith.constant 0.000000e+00 : f32
    %131 = vector.broadcast %cst_97 : f32 to vector<72x128xf32>
    %132 = arith.maximumf %130, %131 : vector<72x128xf32>
    %133 = arith.truncf %132 : vector<72x128xf32> to vector<72x128xbf16>
    %c0_98 = arith.constant 0 : index
    %c0_99 = arith.constant 0 : index
    %c0_100 = arith.constant 0 : index
    %134 = vector.load %arg5[%c0_98, %c0_99, %c0_100] : memref<4x72x128xbf16, #tpu.memory_space<vmem>>, vector<1x72x128xbf16>
    %135 = vector.shape_cast %134 : vector<1x72x128xbf16> to vector<72x128xbf16>
    %136 = vector.shape_cast %133 : vector<72x128xbf16> to vector<1x72x128xbf16>
    tpu.vector_store %arg5[%c0_98, %c0_99, %c0_100], %136 {strides = array<i32>} : memref<4x72x128xbf16, #tpu.memory_space<vmem>>, vector<1x72x128xbf16>,
    %137 = vector.broadcast %123 : vector<1x128xf32> to vector<72x128xf32>
    %138 = arith.mulf %37, %137 : vector<72x128xf32>
    %139 = vector.broadcast %126 : vector<1x128xf32> to vector<72x128xf32>
    %140 = arith.addf %138, %139 : vector<72x128xf32>
    %cst_101 = arith.constant 0.000000e+00 : f32
    %141 = vector.broadcast %cst_101 : f32 to vector<72x128xf32>
    %142 = arith.maximumf %140, %141 : vector<72x128xf32>
    %143 = arith.truncf %142 : vector<72x128xf32> to vector<72x128xbf16>
    %c1_102 = arith.constant 1 : index
    %c0_103 = arith.constant 0 : index
    %c0_104 = arith.constant 0 : index
    %144 = vector.load %arg5[%c1_102, %c0_103, %c0_104] : memref<4x72x128xbf16, #tpu.memory_space<vmem>>, vector<1x72x128xbf16>
    %145 = vector.shape_cast %144 : vector<1x72x128xbf16> to vector<72x128xbf16>
    %146 = vector.shape_cast %143 : vector<72x128xbf16> to vector<1x72x128xbf16>
    tpu.vector_store %arg5[%c1_102, %c0_103, %c0_104], %146 {strides = array<i32>} : memref<4x72x128xbf16, #tpu.memory_space<vmem>>, vector<1x72x128xbf16>,
    %147 = vector.broadcast %123 : vector<1x128xf32> to vector<72x128xf32>
    %148 = arith.mulf %56, %147 : vector<72x128xf32>
    %149 = vector.broadcast %126 : vector<1x128xf32> to vector<72x128xf32>
    %150 = arith.addf %148, %149 : vector<72x128xf32>
    %cst_105 = arith.constant 0.000000e+00 : f32
    %151 = vector.broadcast %cst_105 : f32 to vector<72x128xf32>
    %152 = arith.maximumf %150, %151 : vector<72x128xf32>
    %153 = arith.truncf %152 : vector<72x128xf32> to vector<72x128xbf16>
    %c2_106 = arith.constant 2 : index
    %c0_107 = arith.constant 0 : index
    %c0_108 = arith.constant 0 : index
    %154 = vector.load %arg5[%c2_106, %c0_107, %c0_108] : memref<4x72x128xbf16, #tpu.memory_space<vmem>>, vector<1x72x128xbf16>
    %155 = vector.shape_cast %154 : vector<1x72x128xbf16> to vector<72x128xbf16>
    %156 = vector.shape_cast %153 : vector<72x128xbf16> to vector<1x72x128xbf16>
    tpu.vector_store %arg5[%c2_106, %c0_107, %c0_108], %156 {strides = array<i32>} : memref<4x72x128xbf16, #tpu.memory_space<vmem>>, vector<1x72x128xbf16>,
    %157 = vector.broadcast %123 : vector<1x128xf32> to vector<72x128xf32>
    %158 = arith.mulf %75, %157 : vector<72x128xf32>
    %159 = vector.broadcast %126 : vector<1x128xf32> to vector<72x128xf32>
    %160 = arith.addf %158, %159 : vector<72x128xf32>
    %cst_109 = arith.constant 0.000000e+00 : f32
    %161 = vector.broadcast %cst_109 : f32 to vector<72x128xf32>
    %162 = arith.maximumf %160, %161 : vector<72x128xf32>
    %163 = arith.truncf %162 : vector<72x128xf32> to vector<72x128xbf16>
    %c3_110 = arith.constant 3 : index
    %c0_111 = arith.constant 0 : index
    %c0_112 = arith.constant 0 : index
    %164 = vector.load %arg5[%c3_110, %c0_111, %c0_112] : memref<4x72x128xbf16, #tpu.memory_space<vmem>>, vector<1x72x128xbf16>
    %165 = vector.shape_cast %164 : vector<1x72x128xbf16> to vector<72x128xbf16>
    %166 = vector.shape_cast %163 : vector<72x128xbf16> to vector<1x72x128xbf16>
    tpu.vector_store %arg5[%c3_110, %c0_111, %c0_112], %166 {strides = array<i32>} : memref<4x72x128xbf16, #tpu.memory_space<vmem>>, vector<1x72x128xbf16>,
    return
  }
  func.func @transform_0(%arg0: i32) -> (i32, i32) {
    %c0_i32 = arith.constant 0 : i32
    %c0_i32_0 = arith.constant 0 : i32
    %c0_i32_1 = arith.constant 0 : i32
    return %c0_i32, %c0_i32_0 : i32, i32
  }
  func.func @transform_1(%arg0: i32) -> (i32, i32, i32) {
    %c0_i32 = arith.constant 0 : i32
    %c0_i32_0 = arith.constant 0 : i32
    %c0_i32_1 = arith.constant 0 : i32
    %c0_i32_2 = arith.constant 0 : i32
    return %c0_i32, %c0_i32_0, %c0_i32_1 : i32, i32, i32
  }
  func.func @transform_2(%arg0: i32) -> (i32, i32) {
    %c0_i32 = arith.constant 0 : i32
    %c0_i32_0 = arith.constant 0 : i32
    %c0_i32_1 = arith.constant 0 : i32
    return %c0_i32, %c0_i32_0 : i32, i32
  }
  func.func @transform_3(%arg0: i32) -> (i32, i32) {
    %c0_i32 = arith.constant 0 : i32
    %c0_i32_0 = arith.constant 0 : i32
    %c0_i32_1 = arith.constant 0 : i32
    return %c0_i32, %c0_i32_0 : i32, i32
  }
  func.func @transform_4(%arg0: i32) -> (i32, i32, i32) {
    %c0_i32 = arith.constant 0 : i32
    %c0_i32_0 = arith.constant 0 : i32
    %c0_i32_1 = arith.constant 0 : i32
    %c0_i32_2 = arith.constant 0 : i32
    return %c0_i32, %c0_i32_0, %c0_i32_1 : i32, i32, i32
  }
}

module attributes {stable_mosaic.version = 11 : i64} {
  func.func @_fused_conv_kernel(%arg0: i32, %arg1: memref<224x32xbf16, #tpu.memory_space<vmem>>, %arg2: memref<16x32x128xbf16, #tpu.memory_space<vmem>>, %arg3: memref<200x1xf32, #tpu.memory_space<vmem>>, %arg4: memref<2x128xf32, #tpu.memory_space<vmem>>, %arg5: memref<4x200x128xbf16, #tpu.memory_space<vmem>>) attributes {dimension_semantics = [#tpu.dimension_semantics<arbitrary>], iteration_bounds = array<i64: 1>, scalar_prefetch = 0 : i64, scratch_operands = 0 : i64, tpu.core_type = #tpu.core_type<tc>, window_params = [{pipeline_mode = #tpu.pipeline_mode<synchronous>, transform_indices = @transform_0, window_bounds = array<i64: 224, 32>}, {pipeline_mode = #tpu.pipeline_mode<synchronous>, transform_indices = @transform_1, window_bounds = array<i64: 16, 32, 128>}, {pipeline_mode = #tpu.pipeline_mode<synchronous>, transform_indices = @transform_2, window_bounds = array<i64: 200, 1>}, {pipeline_mode = #tpu.pipeline_mode<synchronous>, transform_indices = @transform_3, window_bounds = array<i64: 2, 128>}, {pipeline_mode = #tpu.pipeline_mode<synchronous>, transform_indices = @transform_4, window_bounds = array<i64: 4, 200, 128>}]} {
    %c0 = arith.constant 0 : index
    %c0_0 = arith.constant 0 : index
    %0 = vector.load %arg1[%c0, %c0_0] : memref<224x32xbf16, #tpu.memory_space<vmem>>, vector<200x32xbf16>
    %c0_1 = arith.constant 0 : index
    %c0_2 = arith.constant 0 : index
    %c0_3 = arith.constant 0 : index
    %1 = vector.load %arg2[%c0_1, %c0_2, %c0_3] : memref<16x32x128xbf16, #tpu.memory_space<vmem>>, vector<1x32x128xbf16>
    %2 = vector.shape_cast %1 : vector<1x32x128xbf16> to vector<32x128xbf16>
    %cst = arith.constant dense<0.000000e+00> : vector<200x128xf32>
    %3 = tpu.matmul %0, %2, %cst {dimension_numbers = #tpu.dot_dimension_numbers<[1], [0], [0], [1], [0, 0, 1, 1], [], []>} : vector<200x32xbf16>, vector<32x128xbf16>, vector<200x128xf32> -> vector<200x128xf32>
    %c1 = arith.constant 1 : index
    %c0_4 = arith.constant 0 : index
    %4 = vector.load %arg1[%c1, %c0_4] : memref<224x32xbf16, #tpu.memory_space<vmem>>, vector<200x32xbf16>
    %c1_5 = arith.constant 1 : index
    %c0_6 = arith.constant 0 : index
    %c0_7 = arith.constant 0 : index
    %5 = vector.load %arg2[%c1_5, %c0_6, %c0_7] : memref<16x32x128xbf16, #tpu.memory_space<vmem>>, vector<1x32x128xbf16>
    %6 = vector.shape_cast %5 : vector<1x32x128xbf16> to vector<32x128xbf16>
    %cst_8 = arith.constant dense<0.000000e+00> : vector<200x128xf32>
    %7 = tpu.matmul %4, %6, %cst_8 {dimension_numbers = #tpu.dot_dimension_numbers<[1], [0], [0], [1], [0, 0, 1, 1], [], []>} : vector<200x32xbf16>, vector<32x128xbf16>, vector<200x128xf32> -> vector<200x128xf32>
    %8 = arith.addf %3, %7 : vector<200x128xf32>
    %c10 = arith.constant 10 : index
    %c0_9 = arith.constant 0 : index
    %9 = vector.load %arg1[%c10, %c0_9] : memref<224x32xbf16, #tpu.memory_space<vmem>>, vector<200x32xbf16>
    %c2 = arith.constant 2 : index
    %c0_10 = arith.constant 0 : index
    %c0_11 = arith.constant 0 : index
    %10 = vector.load %arg2[%c2, %c0_10, %c0_11] : memref<16x32x128xbf16, #tpu.memory_space<vmem>>, vector<1x32x128xbf16>
    %11 = vector.shape_cast %10 : vector<1x32x128xbf16> to vector<32x128xbf16>
    %cst_12 = arith.constant dense<0.000000e+00> : vector<200x128xf32>
    %12 = tpu.matmul %9, %11, %cst_12 {dimension_numbers = #tpu.dot_dimension_numbers<[1], [0], [0], [1], [0, 0, 1, 1], [], []>} : vector<200x32xbf16>, vector<32x128xbf16>, vector<200x128xf32> -> vector<200x128xf32>
    %13 = arith.addf %8, %12 : vector<200x128xf32>
    %c11 = arith.constant 11 : index
    %c0_13 = arith.constant 0 : index
    %14 = vector.load %arg1[%c11, %c0_13] : memref<224x32xbf16, #tpu.memory_space<vmem>>, vector<200x32xbf16>
    %c3 = arith.constant 3 : index
    %c0_14 = arith.constant 0 : index
    %c0_15 = arith.constant 0 : index
    %15 = vector.load %arg2[%c3, %c0_14, %c0_15] : memref<16x32x128xbf16, #tpu.memory_space<vmem>>, vector<1x32x128xbf16>
    %16 = vector.shape_cast %15 : vector<1x32x128xbf16> to vector<32x128xbf16>
    %cst_16 = arith.constant dense<0.000000e+00> : vector<200x128xf32>
    %17 = tpu.matmul %14, %16, %cst_16 {dimension_numbers = #tpu.dot_dimension_numbers<[1], [0], [0], [1], [0, 0, 1, 1], [], []>} : vector<200x32xbf16>, vector<32x128xbf16>, vector<200x128xf32> -> vector<200x128xf32>
    %18 = arith.addf %13, %17 : vector<200x128xf32>
    %c1_17 = arith.constant 1 : index
    %c0_18 = arith.constant 0 : index
    %19 = vector.load %arg1[%c1_17, %c0_18] : memref<224x32xbf16, #tpu.memory_space<vmem>>, vector<200x32xbf16>
    %c4 = arith.constant 4 : index
    %c0_19 = arith.constant 0 : index
    %c0_20 = arith.constant 0 : index
    %20 = vector.load %arg2[%c4, %c0_19, %c0_20] : memref<16x32x128xbf16, #tpu.memory_space<vmem>>, vector<1x32x128xbf16>
    %21 = vector.shape_cast %20 : vector<1x32x128xbf16> to vector<32x128xbf16>
    %cst_21 = arith.constant dense<0.000000e+00> : vector<200x128xf32>
    %22 = tpu.matmul %19, %21, %cst_21 {dimension_numbers = #tpu.dot_dimension_numbers<[1], [0], [0], [1], [0, 0, 1, 1], [], []>} : vector<200x32xbf16>, vector<32x128xbf16>, vector<200x128xf32> -> vector<200x128xf32>
    %c2_22 = arith.constant 2 : index
    %c0_23 = arith.constant 0 : index
    %23 = vector.load %arg1[%c2_22, %c0_23] : memref<224x32xbf16, #tpu.memory_space<vmem>>, vector<200x32xbf16>
    %c5 = arith.constant 5 : index
    %c0_24 = arith.constant 0 : index
    %c0_25 = arith.constant 0 : index
    %24 = vector.load %arg2[%c5, %c0_24, %c0_25] : memref<16x32x128xbf16, #tpu.memory_space<vmem>>, vector<1x32x128xbf16>
    %25 = vector.shape_cast %24 : vector<1x32x128xbf16> to vector<32x128xbf16>
    %cst_26 = arith.constant dense<0.000000e+00> : vector<200x128xf32>
    %26 = tpu.matmul %23, %25, %cst_26 {dimension_numbers = #tpu.dot_dimension_numbers<[1], [0], [0], [1], [0, 0, 1, 1], [], []>} : vector<200x32xbf16>, vector<32x128xbf16>, vector<200x128xf32> -> vector<200x128xf32>
    %27 = arith.addf %22, %26 : vector<200x128xf32>
    %c11_27 = arith.constant 11 : index
    %c0_28 = arith.constant 0 : index
    %28 = vector.load %arg1[%c11_27, %c0_28] : memref<224x32xbf16, #tpu.memory_space<vmem>>, vector<200x32xbf16>
    %c6 = arith.constant 6 : index
    %c0_29 = arith.constant 0 : index
    %c0_30 = arith.constant 0 : index
    %29 = vector.load %arg2[%c6, %c0_29, %c0_30] : memref<16x32x128xbf16, #tpu.memory_space<vmem>>, vector<1x32x128xbf16>
    %30 = vector.shape_cast %29 : vector<1x32x128xbf16> to vector<32x128xbf16>
    %cst_31 = arith.constant dense<0.000000e+00> : vector<200x128xf32>
    %31 = tpu.matmul %28, %30, %cst_31 {dimension_numbers = #tpu.dot_dimension_numbers<[1], [0], [0], [1], [0, 0, 1, 1], [], []>} : vector<200x32xbf16>, vector<32x128xbf16>, vector<200x128xf32> -> vector<200x128xf32>
    %32 = arith.addf %27, %31 : vector<200x128xf32>
    %c12 = arith.constant 12 : index
    %c0_32 = arith.constant 0 : index
    %33 = vector.load %arg1[%c12, %c0_32] : memref<224x32xbf16, #tpu.memory_space<vmem>>, vector<200x32xbf16>
    %c7 = arith.constant 7 : index
    %c0_33 = arith.constant 0 : index
    %c0_34 = arith.constant 0 : index
    %34 = vector.load %arg2[%c7, %c0_33, %c0_34] : memref<16x32x128xbf16, #tpu.memory_space<vmem>>, vector<1x32x128xbf16>
    %35 = vector.shape_cast %34 : vector<1x32x128xbf16> to vector<32x128xbf16>
    %cst_35 = arith.constant dense<0.000000e+00> : vector<200x128xf32>
    %36 = tpu.matmul %33, %35, %cst_35 {dimension_numbers = #tpu.dot_dimension_numbers<[1], [0], [0], [1], [0, 0, 1, 1], [], []>} : vector<200x32xbf16>, vector<32x128xbf16>, vector<200x128xf32> -> vector<200x128xf32>
    %37 = arith.addf %32, %36 : vector<200x128xf32>
    %c10_36 = arith.constant 10 : index
    %c0_37 = arith.constant 0 : index
    %38 = vector.load %arg1[%c10_36, %c0_37] : memref<224x32xbf16, #tpu.memory_space<vmem>>, vector<200x32xbf16>
    %c8 = arith.constant 8 : index
    %c0_38 = arith.constant 0 : index
    %c0_39 = arith.constant 0 : index
    %39 = vector.load %arg2[%c8, %c0_38, %c0_39] : memref<16x32x128xbf16, #tpu.memory_space<vmem>>, vector<1x32x128xbf16>
    %40 = vector.shape_cast %39 : vector<1x32x128xbf16> to vector<32x128xbf16>
    %cst_40 = arith.constant dense<0.000000e+00> : vector<200x128xf32>
    %41 = tpu.matmul %38, %40, %cst_40 {dimension_numbers = #tpu.dot_dimension_numbers<[1], [0], [0], [1], [0, 0, 1, 1], [], []>} : vector<200x32xbf16>, vector<32x128xbf16>, vector<200x128xf32> -> vector<200x128xf32>
    %c11_41 = arith.constant 11 : index
    %c0_42 = arith.constant 0 : index
    %42 = vector.load %arg1[%c11_41, %c0_42] : memref<224x32xbf16, #tpu.memory_space<vmem>>, vector<200x32xbf16>
    %c9 = arith.constant 9 : index
    %c0_43 = arith.constant 0 : index
    %c0_44 = arith.constant 0 : index
    %43 = vector.load %arg2[%c9, %c0_43, %c0_44] : memref<16x32x128xbf16, #tpu.memory_space<vmem>>, vector<1x32x128xbf16>
    %44 = vector.shape_cast %43 : vector<1x32x128xbf16> to vector<32x128xbf16>
    %cst_45 = arith.constant dense<0.000000e+00> : vector<200x128xf32>
    %45 = tpu.matmul %42, %44, %cst_45 {dimension_numbers = #tpu.dot_dimension_numbers<[1], [0], [0], [1], [0, 0, 1, 1], [], []>} : vector<200x32xbf16>, vector<32x128xbf16>, vector<200x128xf32> -> vector<200x128xf32>
    %46 = arith.addf %41, %45 : vector<200x128xf32>
    %c20 = arith.constant 20 : index
    %c0_46 = arith.constant 0 : index
    %47 = vector.load %arg1[%c20, %c0_46] : memref<224x32xbf16, #tpu.memory_space<vmem>>, vector<200x32xbf16>
    %c10_47 = arith.constant 10 : index
    %c0_48 = arith.constant 0 : index
    %c0_49 = arith.constant 0 : index
    %48 = vector.load %arg2[%c10_47, %c0_48, %c0_49] : memref<16x32x128xbf16, #tpu.memory_space<vmem>>, vector<1x32x128xbf16>
    %49 = vector.shape_cast %48 : vector<1x32x128xbf16> to vector<32x128xbf16>
    %cst_50 = arith.constant dense<0.000000e+00> : vector<200x128xf32>
    %50 = tpu.matmul %47, %49, %cst_50 {dimension_numbers = #tpu.dot_dimension_numbers<[1], [0], [0], [1], [0, 0, 1, 1], [], []>} : vector<200x32xbf16>, vector<32x128xbf16>, vector<200x128xf32> -> vector<200x128xf32>
    %51 = arith.addf %46, %50 : vector<200x128xf32>
    %c21 = arith.constant 21 : index
    %c0_51 = arith.constant 0 : index
    %52 = vector.load %arg1[%c21, %c0_51] : memref<224x32xbf16, #tpu.memory_space<vmem>>, vector<200x32xbf16>
    %c11_52 = arith.constant 11 : index
    %c0_53 = arith.constant 0 : index
    %c0_54 = arith.constant 0 : index
    %53 = vector.load %arg2[%c11_52, %c0_53, %c0_54] : memref<16x32x128xbf16, #tpu.memory_space<vmem>>, vector<1x32x128xbf16>
    %54 = vector.shape_cast %53 : vector<1x32x128xbf16> to vector<32x128xbf16>
    %cst_55 = arith.constant dense<0.000000e+00> : vector<200x128xf32>
    %55 = tpu.matmul %52, %54, %cst_55 {dimension_numbers = #tpu.dot_dimension_numbers<[1], [0], [0], [1], [0, 0, 1, 1], [], []>} : vector<200x32xbf16>, vector<32x128xbf16>, vector<200x128xf32> -> vector<200x128xf32>
    %56 = arith.addf %51, %55 : vector<200x128xf32>
    %c11_56 = arith.constant 11 : index
    %c0_57 = arith.constant 0 : index
    %57 = vector.load %arg1[%c11_56, %c0_57] : memref<224x32xbf16, #tpu.memory_space<vmem>>, vector<200x32xbf16>
    %c12_58 = arith.constant 12 : index
    %c0_59 = arith.constant 0 : index
    %c0_60 = arith.constant 0 : index
    %58 = vector.load %arg2[%c12_58, %c0_59, %c0_60] : memref<16x32x128xbf16, #tpu.memory_space<vmem>>, vector<1x32x128xbf16>
    %59 = vector.shape_cast %58 : vector<1x32x128xbf16> to vector<32x128xbf16>
    %cst_61 = arith.constant dense<0.000000e+00> : vector<200x128xf32>
    %60 = tpu.matmul %57, %59, %cst_61 {dimension_numbers = #tpu.dot_dimension_numbers<[1], [0], [0], [1], [0, 0, 1, 1], [], []>} : vector<200x32xbf16>, vector<32x128xbf16>, vector<200x128xf32> -> vector<200x128xf32>
    %c12_62 = arith.constant 12 : index
    %c0_63 = arith.constant 0 : index
    %61 = vector.load %arg1[%c12_62, %c0_63] : memref<224x32xbf16, #tpu.memory_space<vmem>>, vector<200x32xbf16>
    %c13 = arith.constant 13 : index
    %c0_64 = arith.constant 0 : index
    %c0_65 = arith.constant 0 : index
    %62 = vector.load %arg2[%c13, %c0_64, %c0_65] : memref<16x32x128xbf16, #tpu.memory_space<vmem>>, vector<1x32x128xbf16>
    %63 = vector.shape_cast %62 : vector<1x32x128xbf16> to vector<32x128xbf16>
    %cst_66 = arith.constant dense<0.000000e+00> : vector<200x128xf32>
    %64 = tpu.matmul %61, %63, %cst_66 {dimension_numbers = #tpu.dot_dimension_numbers<[1], [0], [0], [1], [0, 0, 1, 1], [], []>} : vector<200x32xbf16>, vector<32x128xbf16>, vector<200x128xf32> -> vector<200x128xf32>
    %65 = arith.addf %60, %64 : vector<200x128xf32>
    %c21_67 = arith.constant 21 : index
    %c0_68 = arith.constant 0 : index
    %66 = vector.load %arg1[%c21_67, %c0_68] : memref<224x32xbf16, #tpu.memory_space<vmem>>, vector<200x32xbf16>
    %c14 = arith.constant 14 : index
    %c0_69 = arith.constant 0 : index
    %c0_70 = arith.constant 0 : index
    %67 = vector.load %arg2[%c14, %c0_69, %c0_70] : memref<16x32x128xbf16, #tpu.memory_space<vmem>>, vector<1x32x128xbf16>
    %68 = vector.shape_cast %67 : vector<1x32x128xbf16> to vector<32x128xbf16>
    %cst_71 = arith.constant dense<0.000000e+00> : vector<200x128xf32>
    %69 = tpu.matmul %66, %68, %cst_71 {dimension_numbers = #tpu.dot_dimension_numbers<[1], [0], [0], [1], [0, 0, 1, 1], [], []>} : vector<200x32xbf16>, vector<32x128xbf16>, vector<200x128xf32> -> vector<200x128xf32>
    %70 = arith.addf %65, %69 : vector<200x128xf32>
    %c22 = arith.constant 22 : index
    %c0_72 = arith.constant 0 : index
    %71 = vector.load %arg1[%c22, %c0_72] : memref<224x32xbf16, #tpu.memory_space<vmem>>, vector<200x32xbf16>
    %c15 = arith.constant 15 : index
    %c0_73 = arith.constant 0 : index
    %c0_74 = arith.constant 0 : index
    %72 = vector.load %arg2[%c15, %c0_73, %c0_74] : memref<16x32x128xbf16, #tpu.memory_space<vmem>>, vector<1x32x128xbf16>
    %73 = vector.shape_cast %72 : vector<1x32x128xbf16> to vector<32x128xbf16>
    %cst_75 = arith.constant dense<0.000000e+00> : vector<200x128xf32>
    %74 = tpu.matmul %71, %73, %cst_75 {dimension_numbers = #tpu.dot_dimension_numbers<[1], [0], [0], [1], [0, 0, 1, 1], [], []>} : vector<200x32xbf16>, vector<32x128xbf16>, vector<200x128xf32> -> vector<200x128xf32>
    %75 = arith.addf %70, %74 : vector<200x128xf32>
    %c1_76 = arith.constant 1 : index
    %c0_77 = arith.constant 0 : index
    %76 = vector.load %arg4[%c1_76, %c0_77] : memref<2x128xf32, #tpu.memory_space<vmem>>, vector<1x128xf32>
    %77 = vector.broadcast %76 : vector<1x128xf32> to vector<200x128xf32>
    %78 = arith.addf %18, %77 : vector<200x128xf32>
    %79 = math.tanh %78 : vector<200x128xf32>
    %80 = arith.truncf %79 : vector<200x128xf32> to vector<200x128xbf16>
    %c0_78 = arith.constant 0 : index
    %c0_79 = arith.constant 0 : index
    %c0_80 = arith.constant 0 : index
    %81 = vector.load %arg5[%c0_78, %c0_79, %c0_80] : memref<4x200x128xbf16, #tpu.memory_space<vmem>>, vector<1x200x128xbf16>
    %82 = vector.shape_cast %81 : vector<1x200x128xbf16> to vector<200x128xbf16>
    %83 = vector.shape_cast %80 : vector<200x128xbf16> to vector<1x200x128xbf16>
    tpu.vector_store %arg5[%c0_78, %c0_79, %c0_80], %83 {strides = array<i32>} : memref<4x200x128xbf16, #tpu.memory_space<vmem>>, vector<1x200x128xbf16>,
    %84 = vector.broadcast %76 : vector<1x128xf32> to vector<200x128xf32>
    %85 = arith.addf %37, %84 : vector<200x128xf32>
    %86 = math.tanh %85 : vector<200x128xf32>
    %87 = arith.truncf %86 : vector<200x128xf32> to vector<200x128xbf16>
    %c1_81 = arith.constant 1 : index
    %c0_82 = arith.constant 0 : index
    %c0_83 = arith.constant 0 : index
    %88 = vector.load %arg5[%c1_81, %c0_82, %c0_83] : memref<4x200x128xbf16, #tpu.memory_space<vmem>>, vector<1x200x128xbf16>
    %89 = vector.shape_cast %88 : vector<1x200x128xbf16> to vector<200x128xbf16>
    %90 = vector.shape_cast %87 : vector<200x128xbf16> to vector<1x200x128xbf16>
    tpu.vector_store %arg5[%c1_81, %c0_82, %c0_83], %90 {strides = array<i32>} : memref<4x200x128xbf16, #tpu.memory_space<vmem>>, vector<1x200x128xbf16>,
    %91 = vector.broadcast %76 : vector<1x128xf32> to vector<200x128xf32>
    %92 = arith.addf %56, %91 : vector<200x128xf32>
    %93 = math.tanh %92 : vector<200x128xf32>
    %94 = arith.truncf %93 : vector<200x128xf32> to vector<200x128xbf16>
    %c2_84 = arith.constant 2 : index
    %c0_85 = arith.constant 0 : index
    %c0_86 = arith.constant 0 : index
    %95 = vector.load %arg5[%c2_84, %c0_85, %c0_86] : memref<4x200x128xbf16, #tpu.memory_space<vmem>>, vector<1x200x128xbf16>
    %96 = vector.shape_cast %95 : vector<1x200x128xbf16> to vector<200x128xbf16>
    %97 = vector.shape_cast %94 : vector<200x128xbf16> to vector<1x200x128xbf16>
    tpu.vector_store %arg5[%c2_84, %c0_85, %c0_86], %97 {strides = array<i32>} : memref<4x200x128xbf16, #tpu.memory_space<vmem>>, vector<1x200x128xbf16>,
    %98 = vector.broadcast %76 : vector<1x128xf32> to vector<200x128xf32>
    %99 = arith.addf %75, %98 : vector<200x128xf32>
    %100 = math.tanh %99 : vector<200x128xf32>
    %101 = arith.truncf %100 : vector<200x128xf32> to vector<200x128xbf16>
    %c3_87 = arith.constant 3 : index
    %c0_88 = arith.constant 0 : index
    %c0_89 = arith.constant 0 : index
    %102 = vector.load %arg5[%c3_87, %c0_88, %c0_89] : memref<4x200x128xbf16, #tpu.memory_space<vmem>>, vector<1x200x128xbf16>
    %103 = vector.shape_cast %102 : vector<1x200x128xbf16> to vector<200x128xbf16>
    %104 = vector.shape_cast %101 : vector<200x128xbf16> to vector<1x200x128xbf16>
    tpu.vector_store %arg5[%c3_87, %c0_88, %c0_89], %104 {strides = array<i32>} : memref<4x200x128xbf16, #tpu.memory_space<vmem>>, vector<1x200x128xbf16>,
    return
  }
  func.func @transform_0(%arg0: i32) -> (i32, i32) {
    %c0_i32 = arith.constant 0 : i32
    %c0_i32_0 = arith.constant 0 : i32
    %c0_i32_1 = arith.constant 0 : i32
    return %c0_i32, %c0_i32_0 : i32, i32
  }
  func.func @transform_1(%arg0: i32) -> (i32, i32, i32) {
    %c0_i32 = arith.constant 0 : i32
    %c0_i32_0 = arith.constant 0 : i32
    %c0_i32_1 = arith.constant 0 : i32
    %c0_i32_2 = arith.constant 0 : i32
    return %c0_i32, %c0_i32_0, %c0_i32_1 : i32, i32, i32
  }
  func.func @transform_2(%arg0: i32) -> (i32, i32) {
    %c0_i32 = arith.constant 0 : i32
    %c0_i32_0 = arith.constant 0 : i32
    %c0_i32_1 = arith.constant 0 : i32
    return %c0_i32, %c0_i32_0 : i32, i32
  }
  func.func @transform_3(%arg0: i32) -> (i32, i32) {
    %c0_i32 = arith.constant 0 : i32
    %c0_i32_0 = arith.constant 0 : i32
    %c0_i32_1 = arith.constant 0 : i32
    return %c0_i32, %c0_i32_0 : i32, i32
  }
  func.func @transform_4(%arg0: i32) -> (i32, i32, i32) {
    %c0_i32 = arith.constant 0 : i32
    %c0_i32_0 = arith.constant 0 : i32
    %c0_i32_1 = arith.constant 0 : i32
    %c0_i32_2 = arith.constant 0 : i32
    return %c0_i32, %c0_i32_0, %c0_i32_1 : i32, i32, i32
  }
}

</mosaic_0001>

<bundles_post_ra>
// kernel: squeeze.3
= control target key start
LH: loop header
LB: loop body
LE: loop exit
PB: predicated region body
PF: predicated region fallthrough
CT: control target
= control target key end

     0   :  { %s1070_s0 = inlined_call_operand.vmem [shape: bf16[1,162,128], index: 0, kind: input, shape index: {}]   ;;  %s1071_s1 = inlined_call_operand.vmem [shape: bf16[2,9,9,128], index: 1, kind: output, shape index: {}]  }
   0x1   :  { %v754_v0 = vld [vmem:[%s1070_s0 + $0x50] sm:$0xf]  ;;  %v981_v1 = vld [vmem:[%s1070_s0 + $0x48] sm:$0xff]   ;;  %v940_v2 = vld [vmem:[%s1070_s0 + $0x40] sm:$0xff]  }
   0x2   :  { %v17_v3 = vunpack.c.l.bf16 %v754_v0  ;;  %v811_v4 = vunpack.c.l.bf16 %v981_v1  ;;  %v812_v5 = vunpack.c.h.bf16 %v981_v1  ;;  %v815_v6 = vunpack.c.l.bf16 %v940_v2  ;;  %v941_v7 = vld [vmem:[%s1070_s0 + $0x38] sm:$0xff]   ;;  %v942_v8 = vld [vmem:[%s1070_s0 + $0x30] sm:$0xff]   ;;  %v943_v9 = vld [vmem:[%s1070_s0 + $0x28] sm:$0xff]  }
   0x3   :  { %v816_v10 = vunpack.c.h.bf16 %v940_v2  ;;  %v819_v11 = vunpack.c.l.bf16 %v941_v7  ;;  %v820_v12 = vunpack.c.h.bf16 %v941_v7  ;;  %v823_v13 = vunpack.c.l.bf16 %v942_v8  ;;  %v944_v14 = vld [vmem:[%s1070_s0 + $0x20] sm:$0xff]   ;;  %v945_v15 = vld [vmem:[%s1070_s0 + $0x18] sm:$0xff]   ;;  %v946_v16 = vld [vmem:[%s1070_s0 + $0x10] sm:$0xff]  }
   0x4   :  { %20 = vst [vmem:[#allocation1 + $0xa0] sm:$0xff] %v17_v3  ;;  %v824_v17 = vunpack.c.h.bf16 %v942_v8  ;;  %v827_v18 = vunpack.c.l.bf16 %v943_v9  ;;  %v828_v19 = vunpack.c.h.bf16 %v943_v9  ;;  %v831_v20 = vunpack.c.l.bf16 %v944_v14  ;;  %v947_v21 = vld [vmem:[%s1070_s0 + $0x8] sm:$0xff]   ;;  %v1012_v22 = vld [vmem:[%s1070_s0] sm:$0xff]   ;;  %428 = vst [vmem:[#allocation0 + $0xe2] sm:$0x7f] %v815_v6  }
   0x5   :  { %430 = vst [vmem:[#allocation0 + $0xe9] sm:$0x80] %v815_v6   ;;  %442 = vst [vmem:[#allocation0 + $0x108] ss:$8 sm:$0x3] %v812_v5   ;;  %v832_v23 = vunpack.c.h.bf16 %v944_v14  ;;  %v835_v24 = vunpack.c.l.bf16 %v945_v15  ;;  %v836_v25 = vunpack.c.h.bf16 %v945_v15  ;;  %v839_v26 = vunpack.c.l.bf16 %v946_v16 }
   0x6   :  { %444 = vst [vmem:[#allocation0 + $0x10f] sm:$0xfc] %v812_v5   ;;  %404 = vst [vmem:[#allocation0 + $0xa6] sm:$0x7] %v823_v13   ;;  %v840_v27 = vunpack.c.h.bf16 %v946_v16  ;;  %v843_v28 = vunpack.c.l.bf16 %v947_v21  ;;  %v844_v29 = vunpack.c.h.bf16 %v947_v21  ;;  %v847_v30 = vunpack.c.l.bf16 %v1012_v22 }
   0x7   :  { %406 = vst [vmem:[#allocation0 + $0xad] sm:$0xf8] %v823_v13   ;;  %416 = vst [vmem:[#allocation0 + $0xc4] sm:$0x1f] %v819_v11   ;;  %v848_v31 = vunpack.c.h.bf16 %v1012_v22 }
   0x8   :  { %418 = vst [vmem:[#allocation0 + $0xcb] sm:$0xe0] %v819_v11   ;;  %422 = vst [vmem:[#allocation0 + $0xd3] sm:$0x3f] %v820_v12  }
   0x9   :  { %424 = vst [vmem:[#allocation0 + $0xda] sm:$0xc0] %v820_v12   ;;  %434 = vst [vmem:[#allocation0 + $0xf1] sm:$0xff] %v816_v10  }
   0xa   :  { %384 = vst [vmem:[#allocation0 + $0x71] sm:$0xff] %v831_v20   ;;  %392 = vst [vmem:[#allocation0 + $0x88] ss:$8 sm:$0x3] %v827_v18  }
   0xb   :  { %394 = vst [vmem:[#allocation0 + $0x8f] sm:$0xfc] %v827_v18   ;;  %398 = vst [vmem:[#allocation0 + $0x97] sm:$0x3] %v828_v19   ;;  %v446_v32 = vld [vmem:[#allocation1 + $0xa0] sm:$0x3]  }
   0xc   :  { %400 = vst [vmem:[#allocation0 + $0x9e] sm:$0xfc] %v828_v19   ;;  %410 = vst [vmem:[#allocation0 + $0xb5] ss:$11 sps:$4 sm:$0xff] %v824_v17   ;;  %v681_v33 = vld [vmem:[#allocation0 + $0x108] sm:$0xff] }
   0xd   :  { %360 = vst [vmem:[#allocation0 + $0x35] ss:$11 sps:$4 sm:$0xff] %v839_v26   ;;  %372 = vst [vmem:[#allocation0 + $0x53] sm:$0x3f] %v835_v24   ;;  %v932_v34 = vpack.c.bf16 %v681_v33, %v811_v4  ;;  %v597_v45 = vld [vmem:[#allocation0 + $0xa8] sm:$0xff] }
   0xe   :  { %374 = vst [vmem:[#allocation0 + $0x5a] sm:$0xc0] %v835_v24   ;;  %378 = vst [vmem:[#allocation0 + $0x62] sm:$0x7f] %v836_v25   ;;  %v625_v50 = vld [vmem:[#allocation0 + $0xc8] sm:$0xff] }
   0xf   :  { %380 = vst [vmem:[#allocation0 + $0x69] sm:$0x80] %v836_v25   ;;  %348 = vst [vmem:[#allocation0 + $0x17] sm:$0x3] %v843_v28   ;;  %v632_v51 = vld [vmem:[#allocation0 + $0xd0] sm:$0xff]  ;;  %v653_v52 = vld [vmem:[#allocation0 + $0xe8] sm:$0xff] }
  0x10   :  { %350 = vst [vmem:[#allocation0 + $0x1e] sm:$0xfc] %v843_v28   ;;  %354 = vst [vmem:[#allocation0 + $0x26] sm:$0x7] %v844_v29   ;;  %v639_v9 = vld [vmem:[#allocation0 + $0xd8] sm:$0xff]  ;;  %v646_v10 = vld [vmem:[#allocation0 + $0xe0] sm:$0xff] }
  0x11   :  { %356 = vst [vmem:[#allocation0 + $0x2d] sm:$0xf8] %v844_v29   ;;  %366 = vst [vmem:[#allocation0 + $0x44] sm:$0x1f] %v840_v27   ;;  %v569_v35 = vld [vmem:[#allocation0 + $0x88] sm:$0xff]  ;;  %v555_v39 = vld [vmem:[#allocation0 + $0x78] sm:$0xff]  ;;  %v917_v12 = vpack.c.bf16 %v639_v9, %v632_v51  ;;  %v922_v13 = vpack.c.bf16 %v653_v52, %v646_v10 }
  0x12   :  { %368 = vst [vmem:[#allocation0 + $0x4b] sm:$0xe0] %v840_v27   ;;  %342 = vst [vmem:[#allocation0 + $0x8] ss:$8 sm:$0x3] %v848_v31   ;;  %v892_v40 = vpack.c.bf16 %v569_v35, %v832_v23  ;;  %v576_v41 = vld [vmem:[#allocation0 + $0x90] sm:$0xff] }
  0x13   :  { %344 = vst [vmem:[#allocation0 + $0xf] sm:$0xfc] %v848_v31   ;;  %448 = vst [vmem:[#allocation0 + $0x117] sm:$0x3] %v446_v32   ;;  %v583_v63 = vld [vmem:[#allocation0 + $0x98] sm:$0xff]  ;;  %v590_v3 = vld [vmem:[#allocation0 + $0xa0] sm:$0xff] }
  0x14   :  { %v499_v36 = vld [vmem:[#allocation0 + $0x38] sm:$0xff]  ;;  %963 = vst [vmem:[%s1071_s1 + $0x80] sm:$0xff] %v932_v34   ;;  %955 = vst [vmem:[%s1071_s1 + $0x40] sm:$0xff] %v892_v40   ;;  %v897_v2 = vpack.c.bf16 %v583_v63, %v576_v41  ;;  %v604_v4 = vld [vmem:[#allocation0 + $0xb0] sm:$0xff]  ;;  %v902_v6 = vpack.c.bf16 %v597_v45, %v590_v3 }
  0x15   :  { %v527_v37 = vld [vmem:[#allocation0 + $0x58] sm:$0xff]  ;;  %v534_v38 = vld [vmem:[#allocation0 + $0x60] sm:$0xff]  ;;  %v541_v61 = vld [vmem:[#allocation0 + $0x68] sm:$0xff]  ;;  %960 = vst [vmem:[%s1071_s1 + $0x68] sm:$0xff] %v917_v12  }
  0x16   :  { %v471_v42 = vld [vmem:[#allocation0 + $0x18] sm:$0xff]  ;;  %v548_v62 = vld [vmem:[#allocation0 + $0x70] sm:$0xff]  ;;  %v882_v0 = vpack.c.bf16 %v541_v61, %v534_v38  ;;  %v618_v8 = vld [vmem:[#allocation0 + $0xc0] sm:$0xff]  ;;  %956 = vst [vmem:[%s1071_s1 + $0x48] sm:$0xff] %v897_v2  }
  0x17   :  { %v478_v43 = vld [vmem:[#allocation0 + $0x20] sm:$0xff]  ;;  %v485_v44 = vld [vmem:[#allocation0 + $0x28] sm:$0xff]  ;;  %v887_v1 = vpack.c.bf16 %v555_v39, %v548_v62  ;;  %v611_v5 = vld [vmem:[#allocation0 + $0xb8] sm:$0xff]  ;;  %v912_v11 = vpack.c.bf16 %v625_v50, %v618_v8  ;;  %957 = vst [vmem:[%s1071_s1 + $0x50] sm:$0xff] %v902_v6  }
  0x18   :  { %v862_v48 = vpack.c.bf16 %v485_v44, %v478_v43  ;;  %v492_v49 = vld [vmem:[#allocation0 + $0x30] sm:$0xff]  ;;  %v506_v56 = vld [vmem:[#allocation0 + $0x40] sm:$0xff]  ;;  %v513_v57 = vld [vmem:[#allocation0 + $0x48] sm:$0xff]  ;;  %v907_v7 = vpack.c.bf16 %v611_v5, %v604_v4  ;;  %953 = vst [vmem:[%s1071_s1 + $0x30] sm:$0xff] %v882_v0  }
  0x19   :  { %v458_v46 = vld [vmem:[#allocation0 + $0x8] sm:$0xff]  ;;  %v867_v55 = vpack.c.bf16 %v499_v36, %v492_v49  ;;  %v520_v58 = vld [vmem:[#allocation0 + $0x50] sm:$0xff]  ;;  %v872_v59 = vpack.c.bf16 %v513_v57, %v506_v56  ;;  %954 = vst [vmem:[%s1071_s1 + $0x38] sm:$0xff] %v887_v1   ;;  %v667_v15 = vld [vmem:[#allocation0 + $0xf8] sm:$0xff] }
  0x1a   :  { %v464_v47 = vld [vmem:[#allocation0 + $0x10] sm:$0xff]  ;;  %v852_v53 = vpack.c.bf16 %v458_v46, %v847_v30  ;;  %949 = vst [vmem:[%s1071_s1 + $0x10] sm:$0xff] %v862_v48   ;;  %v877_v60 = vpack.c.bf16 %v527_v37, %v520_v58  ;;  %958 = vst [vmem:[%s1071_s1 + $0x58] sm:$0xff] %v907_v7   ;;  %v695_v18 = vld [vmem:[#allocation0 + $0x118] sm:$0xff] }
  0x1b   :  { %v857_v54 = vpack.c.bf16 %v471_v42, %v464_v47  ;;  %950 = vst [vmem:[%s1071_s1 + $0x18] sm:$0xff] %v867_v55   ;;  %951 = vst [vmem:[%s1071_s1 + $0x20] sm:$0xff] %v872_v59   ;;  %v660_v14 = vld [vmem:[#allocation0 + $0xf0] sm:$0xff] }
  0x1c   :  { %853 = vst [vmem:[%s1071_s1] sm:$0xff] %v852_v53   ;;  %952 = vst [vmem:[%s1071_s1 + $0x28] sm:$0xff] %v877_v60   ;;  %v688_v16 = vld [vmem:[#allocation0 + $0x110] sm:$0xff]  ;;  %v927_v17 = vpack.c.bf16 %v667_v15, %v660_v14 }
  0x1d   :  { %948 = vst [vmem:[%s1071_s1 + $0x8] sm:$0xff] %v857_v54   ;;  %959 = vst [vmem:[%s1071_s1 + $0x60] sm:$0xff] %v912_v11   ;;  %v937_v19 = vpack.c.bf16 %v695_v18, %v688_v16 }
  0x1e   :  { %961 = vst [vmem:[%s1071_s1 + $0x70] sm:$0xff] %v922_v13   ;;  %962 = vst [vmem:[%s1071_s1 + $0x78] sm:$0xff] %v927_v17  }
  0x1f   :  { %964 = vst [vmem:[%s1071_s1 + $0x88] sm:$0xff] %v937_v19  }

// kernel: squeeze.4
= control target key start
LH: loop header
LB: loop body
LE: loop exit
PB: predicated region body
PF: predicated region fallthrough
CT: control target
= control target key end

     0   :  { %s333_s0 = inlined_call_operand.vmem [shape: bf16[1,50,128], index: 0, kind: input, shape index: {}]   ;;  %s334_s1 = inlined_call_operand.vmem [shape: bf16[2,5,5,128], index: 1, kind: output, shape index: {}]  }
   0x1   :  { %v238_v0 = vld [vmem:[%s333_s0 + $0x18] sm:$0xf]  ;;  %v290_v1 = vld [vmem:[%s333_s0 + $0x10] sm:$0xff]   ;;  %v291_v2 = vld [vmem:[%s333_s0 + $0x8] sm:$0xff]  }
   0x2   :  { %v17_v3 = vunpack.c.l.bf16 %v238_v0  ;;  %v255_v4 = vunpack.c.l.bf16 %v290_v1  ;;  %v256_v5 = vunpack.c.h.bf16 %v290_v1  ;;  %v259_v6 = vunpack.c.l.bf16 %v291_v2  ;;  %v262_v7 = vld [vmem:[%s333_s0] sm:$0xff]  }
   0x3   :  { %v260_v8 = vunpack.c.h.bf16 %v291_v2  ;;  %v263_v9 = vunpack.c.l.bf16 %v262_v7  ;;  %v264_v10 = vunpack.c.h.bf16 %v262_v7 }
   0x4   :  { %20 = vst [vmem:[#allocation1 + $0x30] sm:$0xff] %v17_v3  ;;  %128 = vst [vmem:[#allocation0 + $0x19] ss:$7 sps:$4 sm:$0xff] %v259_v6  }
   0x5   :  { %142 = vst [vmem:[#allocation0 + $0x32] sm:$0x7] %v255_v4   ;;  %144 = vst [vmem:[#allocation0 + $0x35] sm:$0xf8] %v255_v4  }
   0x6   :  { %148 = vst [vmem:[#allocation0 + $0x40] sm:$0x1f] %v256_v5   ;;  %150 = vst [vmem:[#allocation0 + $0x43] sm:$0xe0] %v256_v5  }
   0x7   :  { %114 = vst [vmem:[#allocation0] sm:$0x1f] %v263_v9   ;;  %116 = vst [vmem:[#allocation0 + $0x3] sm:$0xe0] %v263_v9  }
   0x8   :  { %120 = vst [vmem:[#allocation0 + $0xb] ss:$10 sps:$4 sm:$0x83] %v264_v10   ;;  %122 = vst [vmem:[#allocation0 + $0xe] sm:$0x7c] %v264_v10  }
   0x9   :  { %134 = vst [vmem:[#allocation0 + $0x24] ss:$4 sm:$0x3] %v260_v8   ;;  %136 = vst [vmem:[#allocation0 + $0x27] sm:$0x3c] %v260_v8  }
   0xa   :  { %138 = vst [vmem:[#allocation0 + $0x2a] sm:$0xc0] %v260_v8  }
   0xb   :  { %v152_v11 = vld [vmem:[#allocation1 + $0x30] sm:$0x3]  }
   0xc   :  { %v205_v12 = vld [vmem:[#allocation0 + $0x38] sm:$0xff]  ;;  %154 = vst [vmem:[#allocation0 + $0x4b] sm:$0x3] %v152_v11  }
   0xd   :  { %v212_v24 = vld [vmem:[#allocation0 + $0x40] sm:$0xff] }
   0xe   :  { %v159_v13 = vld [vmem:[#allocation0] sm:$0xff] }
   0xf   :  { %v164_v14 = vld [vmem:[#allocation0 + $0x8] sm:$0xff]  ;;  %v170_v15 = vld [vmem:[#allocation0 + $0x10] sm:$0xff]  ;;  %v177_v17 = vld [vmem:[#allocation0 + $0x18] sm:$0xff] }
  0x10   :  { %v268_v16 = vpack.c.bf16 %v164_v14, %v159_v13  ;;  %v184_v18 = vld [vmem:[#allocation0 + $0x20] sm:$0xff]  ;;  %v191_v19 = vld [vmem:[#allocation0 + $0x28] sm:$0xff]  ;;  %v273_v20 = vpack.c.bf16 %v177_v17, %v170_v15 }
  0x11   :  { %v278_v21 = vpack.c.bf16 %v191_v19, %v184_v18  ;;  %v198_v22 = vld [vmem:[#allocation0 + $0x30] sm:$0xff] }
  0x12   :  { %269 = vst [vmem:[%s334_s1] sm:$0xff] %v268_v16   ;;  %v283_v23 = vpack.c.bf16 %v205_v12, %v198_v22  ;;  %292 = vst [vmem:[%s334_s1 + $0x8] sm:$0xff] %v273_v20  }
  0x13   :  { %293 = vst [vmem:[%s334_s1 + $0x10] sm:$0xff] %v278_v21   ;;  %v219_v25 = vld [vmem:[#allocation0 + $0x48] sm:$0xff] }
  0x14   :  { %294 = vst [vmem:[%s334_s1 + $0x18] sm:$0xff] %v283_v23   ;;  %v288_v26 = vpack.c.bf16 %v219_v25, %v212_v24 }
  0x16   :  { %295 = vst [vmem:[%s334_s1 + $0x20] sm:$0xff] %v288_v26  }

// kernel: attgan_forward.6
= control target key start
LH: loop header
LB: loop body
LE: loop exit
PB: predicated region body
PF: predicated region fallthrough
CT: control target
= control target key end

     0   :  { %vm227_vm0 = vcmask 1045504   ;;  %vm100_vm1 = vsmask.f32 7424  ;;  %v2073_v0 = vmov 0.0   ;;  %vm2074_vm2 = vmmov 0   ;;  %s2850_s1 = inlined_call_operand.vmem [shape: bf16[4,12,128], index: 1, kind: input, shape index: {}]   ;;  %s2851_s0 = inlined_call_operand.vmem [shape: bf16[192,12], index: 0, kind: input, shape index: {}]   ;;  %s2852_s2 = inlined_call_operand.vmem [shape: f32[168,1], index: 2, kind: input, shape index: {}]   ;;  %s2853_s3 = inlined_call_operand.vmem [shape: f32[2,128], index: 3, kind: input, shape index: {}]   ;;  %s2854_s4 = inlined_call_operand.vmem [shape: bf16[1,168,128], index: 4, kind: output, shape index: {}]  }
   0x1   :  { %1745 = vmatprep.subr.bf16.mxu1 %v2073_v0  ;;  %1837 = vmatprep.subr.bf16.mxu0 %v2073_v0  ;;  %v2043_v1 = vld [vmem:[%s2850_s1 + $0x8] sm:$0x3f]   ;;  %v2044_v2 = vld [vmem:[%s2850_s1 + $0x10] sm:$0x3f]   ;;  %v2117_v4 = vld [vmem:[%s2851_s0] sm:$0xff]   ;;  %vm193_vm3 = vcmask 97280  }
   0x2   :  { %1747 = vmatprep.mubr.msk.bf16.mxu1 %vm2074_vm2, %v2073_v0  ;;  %1839 = vmatprep.mubr.msk.bf16.mxu0 %vm2074_vm2, %v2073_v0  ;;  %v229_v3 = vsel %vm227_vm0, %v2043_v1, 0  ;;  %v709_v5 = vsel %vm227_vm0, %v2044_v2, 0  ;;  %v2123_v6 = vld [vmem:[%s2851_s0 + $0x8] sm:$0xff]   ;;  %v102_v7 = vshrl.u32 %v2117_v4, 16  ;;  %v104_v8 = vshll.u32 %v2117_v4, 16  ;;  %v2149_v15 = vld [vmem:[%s2851_s0 + $0x10] sm:$0xff]  }
   0x3   :  { %1746 = vmatpush3.bf16.msra.mxu1 %v229_v3  ;;  %1838 = vmatpush3.bf16.msra.mxu0 %v709_v5  ;;  %v2131_v9 = vld [vmem:[%s2851_s0 + $0xc] sm:$0xff]   ;;  %v109_v10 = vshll.u32 %v2123_v6, 16  ;;  %v2047_v11 = vld [vmem:[%s2850_s1] sm:$0x3f]   ;;  %v2144_v14 = vld [vmem:[%s2851_s0 + $0x8] sm:$0xf] }
   0x4   :  { %1791 = vmatprep.subr.bf16.mxu1 %v2073_v0  ;;  %1883 = vmatprep.subr.bf16.mxu0 %v2073_v0  ;;  %v106_v12 = vrot.slane %v104_v8, 1  ;;  %v503_v13 = vld [vmem:[%s2851_s0 + $0x4] sm:$0xf]  ;;  %v591_v18 = vshll.u32 %v2131_v9, 16  ;;  %v381_v20 = vsel %vm227_vm0, %v2047_v11, 0  ;;  %v113_v21 = vshrl.u32 %v2123_v6, 16 }
   0x5   :  { %v111_v16 = vrot.slane %v109_v10, 1  ;;  %v1558_v17 = vcombine.low %v503_v13, %v2144_v14  ;;  %v2050_v24 = vld [vmem:[%s2850_s1 + $0x18] sm:$0x3f]   ;;  %v117_v26 = vshll.u32 %v2149_v15, 16  ;;  %v595_v34 = vshrl.u32 %v2131_v9, 16  ;;  %v2191_v44 = vld [vmem:[%s2851_s0 + $0x20] sm:$0xff]  }
   0x6   :  { %v107_v19 = vor.u32 %v106_v12, %v102_v7  ;;  %v2163_v27 = vld [vmem:[%s2851_s0 + $0x14] sm:$0xff]   ;;  %v593_v29 = vrot.slane %v591_v18, 1  ;;  %v920_v36 = vsel %vm227_vm0, %v2050_v24, 0  ;;  %v121_v39 = vshrl.u32 %v2149_v15, 16  ;;  %v2186_v43 = vld [vmem:[%s2851_s0 + $0x1c] sm:$0xff]   ;;  %v2199_v47 = vld [vmem:[%s2851_s0 + $0x24] sm:$0xff]  }
   0x7   :  { %v584_v22 = vshrl.u32 %v1558_v17, 16  ;;  %v586_v23 = vshll.u32 %v1558_v17, 16  ;;  %v115_v30 = vor.u32 %v113_v21, %v111_v16  ;;  %v119_v31 = vrot.slane %v117_v26, 1  ;;  %v2171_v32 = vld [vmem:[%s2851_s0 + $0x18] sm:$0xff]   ;;  %v2209_v53 = vld [vmem:[%s2851_s0 + $0x28] sm:$0xff]   ;;  %v2247_v10 = vld [vmem:[%s2851_s0 + $0x30] sm:$0xff]  }
   0x8   :  { %v112_v25 = vsel %vm100_vm1, %v107_v19, %v111_v16  ;;  %v599_v35 = vshll.u32 %v2163_v27, 16  ;;  %v125_v40 = vshll.u32 %v2171_v32, 16  ;;  %v597_v41 = vor.u32 %v595_v34, %v593_v29  ;;  %v2223_v63 = vld [vmem:[%s2851_s0 + $0x44] sm:$0xff]   ;;  %v2235_v3 = vld [vmem:[%s2851_s0 + $0x2c] sm:$0xff]   ;;  %v41_v18 = vld [vmem:[%s2851_s0 + $0x54] sm:$0x1] }
   0x9   :  { %1748 = vmatmul.mubr.msk.bf16.vlgmr.msra.gmra.mrb[0].mxu1 %vm193_vm3, %v112_v25  ;;  %v588_v28 = vrot.slane %v586_v23, 1  ;;  %v120_v38 = vsel %vm100_vm1, %v115_v30, %v119_v31  ;;  %v123_v45 = vor.u32 %v121_v39, %v119_v31  ;;  %v603_v49 = vshrl.u32 %v2163_v27, 16  ;;  %v2228_v1 = vld [vmem:[%s2851_s0 + $0x48] sm:$0xff]   ;;  %v2256_v17 = vld [vmem:[%s2851_s0 + $0x50] sm:$0xf] }
   0xa   :  { %1792 = vmatpush3.bf16.msra.mxu1 %v381_v20  ;;  %1751 = vmatprep.mubr.msk.bf16.mxu1 %vm2074_vm2, %v2073_v0  ;;  %v601_v42 = vrot.slane %v599_v35, 1  ;;  %v127_v46 = vrot.slane %v125_v40, 1  ;;  %v607_v50 = vshll.u32 %v2186_v43, 16  ;;  %v129_v51 = vshrl.u32 %v2171_v32, 16  ;;  %v2241_v7 = vld [vmem:[%s2851_s0 + $0x4c] sm:$0xff]  }
   0xb   :  { %v589_v33 = vor.u32 %v588_v28, %v584_v22  ;;  %v133_v52 = vshll.u32 %v2191_v44, 16  ;;  %v615_v55 = vshll.u32 %v2199_v47, 16  ;;  %v611_v60 = vshrl.u32 %v2186_v43, 16  ;;  %v2274_v26 = vld [vmem:[%s2851_s0 + $0x54] sm:$0x1f]  }
   0xc   :  { %v602_v48 = vsel %vm100_vm1, %v597_v41, %v601_v42  ;;  %v128_v54 = vsel %vm100_vm1, %v123_v45, %v127_v46  ;;  %v605_v56 = vor.u32 %v603_v49, %v601_v42  ;;  %v609_v57 = vrot.slane %v607_v50, 1  ;;  %v852_v34 = vld [vmem:[%s2851_s0 + $0x4] sm:$0xe] }
   0xd   :  { %v594_v37 = vsel %vm100_vm1, %v589_v33, %v593_v29  ;;  %v131_v58 = vor.u32 %v129_v51, %v127_v46  ;;  %v135_v59 = vrot.slane %v133_v52, 1  ;;  %v137_v61 = vshrl.u32 %v2191_v44, 16 }
   0xe   :  { %1840 = vmatmul.mubr.msk.bf16.vlgmr.msra.gmra.mrb[0].mxu0 %vm193_vm3, %v594_v37  ;;  %v141_v62 = vshll.u32 %v2209_v53, 16  ;;  %v617_v2 = vrot.slane %v615_v55, 1  ;;  %v619_v5 = vshrl.u32 %v2199_v47, 16  ;;  %v610_v8 = vsel %vm100_vm1, %v605_v56, %v609_v57  ;;  %v2060_v56 = vld [vmem:[%s2851_s0 + $0x34] sm:$0xff]  }
   0xf   :  { %1884 = vmatpush3.bf16.msra.mxu0 %v920_v36  ;;  %1843 = vmatprep.mubr.msk.bf16.mxu0 %vm2074_vm2, %v2073_v0  ;;  %v647_v11 = vshll.u32 %v2223_v63, 16  ;;  %v136_v12 = vsel %vm100_vm1, %v131_v58, %v135_v59  ;;  %v173_v13 = vshll.u32 %v2228_v1, 16  ;;  %v651_v16 = vshrl.u32 %v2223_v63, 16 }
  0x10   :  { %v613_v19 = vor.u32 %v611_v60, %v609_v57  ;;  %v139_v20 = vor.u32 %v137_v61, %v135_v59  ;;  %v655_v22 = vshll.u32 %v2241_v7, 16  ;;  %v2268_v24 = vcombine.low %v2256_v17, %v41_v18 }
  0x11   :  { %1752 = vmatmul.mubr.msk.bf16.gmra.mrb[4].mxu1 %vm193_vm3, %v120_v38  ;;  %v2261_v21 = vrot.slane %v647_v11, 1  ;;  %v2265_v23 = vrot.slane %v173_v13, 1  ;;  %v177_v25 = vshrl.u32 %v2228_v1, 16  ;;  %v659_v28 = vshrl.u32 %v2241_v7, 16 }
  0x12   :  { %1755 = vmatprep.mubr.msk.bf16.mxu1 %vm2074_vm2, %v2073_v0  ;;  %v143_v29 = vrot.slane %v141_v62, 1  ;;  %v623_v30 = vshll.u32 %v2235_v3, 16  ;;  %v657_v33 = vrot.slane %v655_v22, 1  ;;  %v145_v35 = vshrl.u32 %v2209_v53, 16 }
  0x13   :  { %v653_v31 = vor.u32 %v651_v16, %v2261_v21  ;;  %v179_v36 = vor.u32 %v177_v25, %v2265_v23  ;;  %v181_v37 = vshll.u32 %v2268_v24, 16  ;;  %v663_v38 = vshll.u32 %v2274_v26, 16 }
  0x14   :  { %v618_v39 = vsel %vm100_vm1, %v613_v19, %v617_v2  ;;  %v149_v40 = vshll.u32 %v2247_v10, 16  ;;  %v661_v42 = vor.u32 %v659_v28, %v657_v33  ;;  %v861_v49 = vrot.slane %v2131_v9, 1 }
  0x15   :  { %v2292_v41 = vsel %vm100_vm1, %v653_v31, %v657_v33  ;;  %v2296_v45 = vrot.slane %v181_v37, 1  ;;  %v2298_v46 = vrot.slane %v663_v38, 1  ;;  %v863_v50 = vrot.slane %v2163_v27, 1  ;;  %v2384_v37 = vld [vmem:[%s2851_s0 + $0x40] sm:$0xff]  }
  0x16   :  { %1844 = vmatmul.mubr.msk.bf16.gmra.mrb[4].mxu0 %vm193_vm3, %v602_v48  ;;  %v1583_v48 = vcombine.low %v852_v34, %v2144_v14  ;;  %v865_v51 = vrot.slane %v2186_v43, 1  ;;  %v867_v52 = vrot.slane %v2199_v47, 1  ;;  %v144_v55 = vsel %vm100_vm1, %v139_v20, %v143_v29  ;;  %v2313_v14 = vld [vmem:[%s2851_s0 + $0x3c] sm:$0xff]  }
  0x17   :  { %1847 = vmatprep.mubr.msk.bf16.mxu0 %vm2074_vm2, %v2073_v0  ;;  %v2317_v9 = vsel %vm100_vm1, %v179_v36, %v2296_v45  ;;  %v2321_v27 = vsel %vm100_vm1, %v661_v42, %v2298_v46  ;;  %vm859_vm4 = vcmask 1046528   ;;  %v871_v60 = vrot.slane %v2060_v56, 1  ;;  %v2363_v20 = vld [vmem:[%s2851_s0 + $0x38] sm:$0xff]  }
  0x18   :  { %v860_v43 = vrot.slane %v1583_v48, 1  ;;  %v2324_v47 = vsel %vm859_vm4, %v861_v49, %v863_v50  ;;  %v2327_v57 = vsel %vm859_vm4, %v863_v50, %v865_v51  ;;  %v2330_v58 = vsel %vm859_vm4, %v865_v51, %v867_v52 }
  0x19   :  { %1756 = vmatmul.mubr.msk.bf16.gmra.mrb[8].mxu1 %vm193_vm3, %v128_v54  ;;  %v869_v54 = vrot.slane %v2235_v3, 1  ;;  %v873_v61 = vrot.slane %v2313_v14, 1  ;;  %v875_v62 = vrot.slane %v2223_v63, 1  ;;  %v625_v11 = vrot.slane %v623_v30, 1 }
  0x1a   :  { %1759 = vmatprep.mubr.msk.bf16.mxu1 %vm2074_vm2, %v2073_v0  ;;  %v877_v13 = vrot.slane %v2241_v7, 1  ;;  %v151_v7 = vrot.slane %v149_v40, 1  ;;  %v627_v25 = vshrl.u32 %v2235_v3, 16  ;;  %v631_v28 = vshll.u32 %v2060_v56, 16 }
  0x1b   :  { %v2334_v59 = vsel %vm859_vm4, %v867_v52, %v869_v54  ;;  %v2345_v16 = vsel %vm859_vm4, %v869_v54, %v871_v60  ;;  %v2348_v18 = vsel %vm859_vm4, %v871_v60, %v873_v61  ;;  %v2351_v19 = vsel %vm859_vm4, %v873_v61, %v875_v62  ;;  %v1063_v54 = vld [vmem:[%s2852_s2] sm:$0xff]  ;;  %v1066_v61 = vld [vmem:[%s2852_s2 + $0x18] sm:$0xff] }
  0x1c   :  { %v2355_v63 = vsel %vm859_vm4, %v875_v62, %v877_v13  ;;  %v153_v31 = vshrl.u32 %v2247_v10, 16  ;;  %v157_v33 = vshll.u32 %v2363_v20, 16  ;;  %v629_v34 = vor.u32 %v627_v25, %v625_v11 }
  0x1d   :  { %v639_v40 = vshll.u32 %v2313_v14, 16  ;;  %v161_v48 = vshrl.u32 %v2363_v20, 16  ;;  %v2075_v52 = vmov 0  }
  0x1e   :  { %1848 = vmatmul.mubr.msk.bf16.gmra.mrb[8].mxu0 %vm193_vm3, %v610_v8  ;;  %v621_v8 = vor.u32 %v619_v5, %v617_v2  ;;  %v879_v2 = vrot.slane %v2274_v26, 1  ;;  %v147_v5 = vor.u32 %v145_v35, %v143_v29  ;;  %v633_v35 = vrot.slane %v631_v28, 1  ;;  %2041 = vset.pattern.permute.xlu0 %v2075_v52  ;;  %v1070_v28 = vld [vmem:[%s2852_s2 + $0x38] sm:$0xff] }
  0x1f   :  { %1851 = vmatprep.mubr.msk.bf16.mxu0 %vm2074_vm2, %v2073_v0  ;;  %v155_v3 = vor.u32 %v153_v31, %v151_v7  ;;  %v159_v36 = vrot.slane %v157_v33, 1  ;;  %v641_v51 = vrot.slane %v639_v40, 1  ;;  %1086 = vperm.xlu0 %2041, %v1063_v54   ;;  %v1071_v31 = vld [vmem:[%s2852_s2 + $0x40] sm:$0xff]  ;;  %v1080_v40 = vld [vmem:[%s2852_s2 + $0x88] sm:$0xff] }
  0x20   :  { %v626_v22 = vsel %vm100_vm1, %v621_v8, %v625_v11  ;;  %v2370_v30 = vsel %vm859_vm4, %v877_v13, %v879_v2  ;;  %v152_v29 = vsel %vm100_vm1, %v147_v5, %v151_v7  ;;  %v634_v38 = vsel %vm100_vm1, %v629_v34, %v633_v35  ;;  %2042 = vset.pattern.permute.xlu1 %v2075_v52  ;;  %v1067_v11 = vld [vmem:[%s2852_s2 + $0x20] sm:$0xff]  ;;  %v1068_v7 = vld [vmem:[%s2852_s2 + $0x28] sm:$0xff] }
  0x21   :  { %1760 = vmatmul.mubr.msk.bf16.gmra.mrb[12].mxu1 %vm193_vm3, %v136_v12  ;;  %v2341_v12 = vsel %vm859_vm4, %v860_v43, %v861_v49  ;;  %v160_v42 = vsel %vm100_vm1, %v155_v3, %v159_v36  ;;  %v165_v49 = vshll.u32 %v2384_v37, 16  ;;  %v163_v43 = vor.u32 %v161_v48, %v159_v36  ;;  %v1072_v34 = vld [vmem:[%s2852_s2 + $0x48] sm:$0xff]  ;;  %v1083_v48 = vld [vmem:[%s2852_s2 + $0xa0] sm:$0xff] }
  0x22   :  { %1763 = vmatprep.mubr.msk.bf16.mxu1 %vm2074_vm2, %v2073_v0  ;;  %v643_v8 = vshrl.u32 %v2313_v14, 16  ;;  %v169_v5 = vshrl.u32 %v2384_v37, 16  ;;  %v1076_v3 = vld [vmem:[%s2852_s2 + $0x68] sm:$0xff]  ;;  %v185_v36 = vshrl.u32 %v2268_v24, 16  ;;  %v667_v24 = vshrl.u32 %v2274_v26, 16 }
  0x23   :  { %v167_v60 = vrot.slane %v165_v49, 1 }
  0x24   :  { %v645_v14 = vor.u32 %v643_v8, %v641_v51 }
  0x25   :  { %v168_v13 = vsel %vm100_vm1, %v163_v43, %v167_v60  ;;  %v171_v25 = vor.u32 %v169_v5, %v167_v60 }
  0x26   :  { %1852 = vmatmul.mubr.msk.bf16.gmra.mrb[12].mxu0 %vm193_vm3, %v618_v39  ;;  %v635_v39 = vshrl.u32 %v2060_v56, 16  ;;  %v1064_v56 = vld [vmem:[%s2852_s2 + $0x8] sm:$0xff] }
  0x27   :  { %1855 = vmatprep.mubr.msk.bf16.mxu0 %vm2074_vm2, %v2073_v0  ;;  %1091 = vperm.xlu0 %2041, %v1064_v56   ;;  %v176_v33 = vsel %vm100_vm1, %v171_v25, %v2265_v23  ;;  %v1074_v23 = vld [vmem:[%s2852_s2 + $0x58] sm:$0xff] }
  0x28   :  { %v637_v50 = vor.u32 %v635_v39, %v633_v35  ;;  %v1075_v35 = vld [vmem:[%s2852_s2 + $0x60] sm:$0xff]  ;;  %v187_v39 = vor.u32 %v185_v36, %v2296_v45  ;;  %v1081_v45 = vld [vmem:[%s2852_s2 + $0x90] sm:$0xff] }
  0x29   :  { %1764 = vmatmul.mubr.msk.bf16.gmra.mrb[16].mxu1 %vm193_vm3, %v144_v55  ;;  %v1065_v55 = vld [vmem:[%s2852_s2 + $0x10] sm:$0xff] }
  0x2a   :  { %1767 = vmatprep.mubr.msk.bf16.mxu1 %vm2074_vm2, %v2073_v0  ;;  %1096 = vperm.xlu1 %2042, %v1065_v55   ;;  %v642_v62 = vsel %vm100_vm1, %v637_v50, %v641_v51 }
  0x2b   :  { %1106 = vperm.xlu0 %2041, %v1067_v11  }
  0x2e   :  { %1856 = vmatmul.mubr.msk.bf16.gmra.mrb[16].mxu0 %vm193_vm3, %v626_v22  ;;  %1101 = vperm.xlu1 %2042, %v1066_v61   ;;  %v1069_v22 = vld [vmem:[%s2852_s2 + $0x30] sm:$0xff] }
  0x2f   :  { %1859 = vmatprep.mubr.msk.bf16.mxu0 %vm2074_vm2, %v2073_v0  ;;  %1116 = vperm.xlu0 %2041, %v1069_v22  }
  0x31   :  { %1768 = vmatmul.mubr.msk.bf16.gmra.mrb[20].mxu1 %vm193_vm3, %v152_v29  ;;  %v650_v29 = vsel %vm100_vm1, %v645_v14, %v2261_v21  ;;  %v1073_v21 = vld [vmem:[%s2852_s2 + $0x50] sm:$0xff] }
  0x32   :  { %1771 = vmatprep.mubr.msk.bf16.mxu1 %vm2074_vm2, %v2073_v0  ;;  %1111 = vperm.xlu1 %2042, %v1068_v7  }
  0x33   :  { %1126 = vperm.xlu0 %2041, %v1071_v31  }
  0x36   :  { %1860 = vmatmul.mubr.msk.bf16.gmra.mrb[20].mxu0 %vm193_vm3, %v634_v38  ;;  %1121 = vperm.xlu1 %2042, %v1070_v28   ;;  %v1077_v38 = vld [vmem:[%s2852_s2 + $0x70] sm:$0xff] }
  0x37   :  { %1863 = vmatprep.mubr.msk.bf16.mxu0 %vm2074_vm2, %v2073_v0  ;;  %1136 = vperm.xlu0 %2041, %v1073_v21  }
  0x39   :  { %1772 = vmatmul.mubr.msk.bf16.gmra.mrb[24].mxu1 %vm193_vm3, %v160_v42  ;;  %v669_v42 = vor.u32 %v667_v24, %v2298_v46 }
  0x3a   :  { %1775 = vmatprep.mubr.msk.bf16.mxu1 %vm2074_vm2, %v2073_v0  ;;  %1131 = vperm.xlu1 %2042, %v1072_v34  }
  0x3b   :  { %1146 = vperm.xlu0 %2041, %v1075_v35  }
  0x3e   :  { %1864 = vmatmul.mubr.msk.bf16.gmra.mrb[24].mxu0 %vm193_vm3, %v642_v62  ;;  %1141 = vperm.xlu1 %2042, %v1074_v23  }
  0x3f   :  { %1867 = vmatprep.mubr.msk.bf16.mxu0 %vm2074_vm2, %v2073_v0  ;;  %1156 = vperm.xlu0 %2041, %v1077_v38  }
  0x41   :  { %1776 = vmatmul.mubr.msk.bf16.gmra.mrb[28].mxu1 %vm193_vm3, %v168_v13 }
  0x42   :  { %1779 = vmatprep.mubr.msk.bf16.mxu1 %vm2074_vm2, %v2073_v0  ;;  %1151 = vperm.xlu1 %2042, %v1076_v3  }
  0x46   :  { %1868 = vmatmul.mubr.msk.bf16.gmra.mrb[28].mxu0 %vm193_vm3, %v650_v29 }
  0x47   :  { %1871 = vmatprep.mubr.msk.bf16.mxu0 %vm2074_vm2, %v2073_v0 }
  0x49   :  { %1780 = vmatmul.mubr.msk.bf16.gmra.mrb[32].mxu1 %vm193_vm3, %v176_v33 }
  0x4a   :  { %1783 = vmatprep.mubr.msk.bf16.mxu1 %vm2074_vm2, %v2073_v0 }
  0x4e   :  { %1872 = vmatmul.mubr.msk.bf16.gmra.mrb[32].mxu0 %vm193_vm3, %v2292_v41  ;;  %v1078_v41 = vld [vmem:[%s2852_s2 + $0x78] sm:$0xff] }
  0x4f   :  { %1875 = vmatprep.mubr.msk.bf16.mxu0 %vm2074_vm2, %v2073_v0  ;;  %1161 = vperm.xlu1 %2042, %v1078_v41  }
  0x51   :  { %1784 = vmatmul.mubr.msk.bf16.gmra.mrb[36].mxu1 %vm193_vm3, %v2317_v9  ;;  %v1079_v9 = vld [vmem:[%s2852_s2 + $0x80] sm:$0xff] }
  0x52   :  { %1787 = vmatprep.mubr.msk.bf16.mxu1 %vm2074_vm2, %v2073_v0  ;;  %1166 = vperm.xlu0 %2041, %v1079_v9  }
  0x53   :  { %1171 = vperm.xlu1 %2042, %v1080_v40  }
  0x56   :  { %1876 = vmatmul.mubr.msk.bf16.gmra.mrb[36].mxu0 %vm193_vm3, %v2321_v27  ;;  %v1082_v27 = vld [vmem:[%s2852_s2 + $0x98] sm:$0xff]  ;;  %1176 = vperm.xlu0 %2041, %v1081_v45  }
  0x57   :  { %1879 = vmatprep.mubr.msk.bf16.mxu0 %vm2074_vm2, %v2073_v0  ;;  %1181 = vperm.xlu1 %2042, %v1082_v27  }
  0x59   :  { %1788 = vmatmul.mubr.msk.bf16.gmra.mrb[40].mxu1 %vm193_vm3, %v187_v39 }
  0x5a   :  { %1793 = vmatprep.mubr.msk.bf16.mxu1 %vm2074_vm2, %v2073_v0  ;;  %1186 = vperm.xlu0 %2041, %v1083_v48  }
  0x5e   :  { %1880 = vmatmul.mubr.msk.bf16.gmra.mrb[40].mxu0 %vm193_vm3, %v669_v42 }
  0x5f   :  { %1885 = vmatprep.mubr.msk.bf16.mxu0 %vm2074_vm2, %v2073_v0 }
  0x61   :  { %1794 = vmatmul.mubr.msk.bf16.vlgmr.msra.gmra.mrb[0].mxu1 %vm193_vm3, %v2117_v4  ;;  %v1543_v4 = vcombine.low %v2256_v17, %v2256_v17 }
  0x62   :  { %1797 = vmatprep.mubr.msk.bf16.mxu1 %vm2074_vm2, %v2073_v0 }
  0x66   :  { %1886 = vmatmul.mubr.msk.bf16.vlgmr.msra.gmra.mrb[0].mxu0 %vm193_vm3, %v2341_v12 }
  0x67   :  { %1889 = vmatprep.mubr.msk.bf16.mxu0 %vm2074_vm2, %v2073_v0 }
  0x69   :  { %1798 = vmatmul.mubr.msk.bf16.gmra.mrb[4].mxu1 %vm193_vm3, %v2123_v6 }
  0x6a   :  { %1801 = vmatprep.mubr.msk.bf16.mxu1 %vm2074_vm2, %v2073_v0 }
  0x6e   :  { %1890 = vmatmul.mubr.msk.bf16.gmra.mrb[4].mxu0 %vm193_vm3, %v2324_v47 }
  0x6f   :  { %1893 = vmatprep.mubr.msk.bf16.mxu0 %vm2074_vm2, %v2073_v0 }
  0x71   :  { %1802 = vmatmul.mubr.msk.bf16.gmra.mrb[8].mxu1 %vm193_vm3, %v2149_v15 }
  0x72   :  { %1805 = vmatprep.mubr.msk.bf16.mxu1 %vm2074_vm2, %v2073_v0 }
  0x76   :  { %1894 = vmatmul.mubr.msk.bf16.gmra.mrb[8].mxu0 %vm193_vm3, %v2327_v57 }
  0x77   :  { %1897 = vmatprep.mubr.msk.bf16.mxu0 %vm2074_vm2, %v2073_v0 }
  0x79   :  { %1806 = vmatmul.mubr.msk.bf16.gmra.mrb[12].mxu1 %vm193_vm3, %v2171_v32 }
  0x7a   :  { %1809 = vmatprep.mubr.msk.bf16.mxu1 %vm2074_vm2, %v2073_v0 }
  0x7e   :  { %1898 = vmatmul.mubr.msk.bf16.gmra.mrb[12].mxu0 %vm193_vm3, %v2330_v58 }
  0x7f   :  { %1901 = vmatprep.mubr.msk.bf16.mxu0 %vm2074_vm2, %v2073_v0 }
  0x81   :  { %1810 = vmatmul.mubr.msk.bf16.gmra.mrb[16].mxu1 %vm193_vm3, %v2191_v44 }
  0x82   :  { %1813 = vmatprep.mubr.msk.bf16.mxu1 %vm2074_vm2, %v2073_v0 }
  0x86   :  { %1902 = vmatmul.mubr.msk.bf16.gmra.mrb[16].mxu0 %vm193_vm3, %v2334_v59 }
  0x87   :  { %1905 = vmatprep.mubr.msk.bf16.mxu0 %vm2074_vm2, %v2073_v0 }
  0x89   :  { %1814 = vmatmul.mubr.msk.bf16.gmra.mrb[20].mxu1 %vm193_vm3, %v2209_v53 }
  0x8a   :  { %1817 = vmatprep.mubr.msk.bf16.mxu1 %vm2074_vm2, %v2073_v0 }
  0x8e   :  { %1906 = vmatmul.mubr.msk.bf16.gmra.mrb[20].mxu0 %vm193_vm3, %v2345_v16 }
  0x8f   :  { %1909 = vmatprep.mubr.msk.bf16.mxu0 %vm2074_vm2, %v2073_v0 }
  0x91   :  { %1818 = vmatmul.mubr.msk.bf16.gmra.mrb[24].mxu1 %vm193_vm3, %v2247_v10 }
  0x92   :  { %1821 = vmatprep.mubr.msk.bf16.mxu1 %vm2074_vm2, %v2073_v0 }
  0x96   :  { %1910 = vmatmul.mubr.msk.bf16.gmra.mrb[24].mxu0 %vm193_vm3, %v2348_v18 }
  0x97   :  { %1913 = vmatprep.mubr.msk.bf16.mxu0 %vm2074_vm2, %v2073_v0 }
  0x99   :  { %1822 = vmatmul.mubr.msk.bf16.gmra.mrb[28].mxu1 %vm193_vm3, %v2363_v20 }
  0x9a   :  { %1825 = vmatprep.mubr.msk.bf16.mxu1 %vm2074_vm2, %v2073_v0 }
  0x9e   :  { %1914 = vmatmul.mubr.msk.bf16.gmra.mrb[28].mxu0 %vm193_vm3, %v2351_v19  ;;  %v1087_v17 = vpop.permute.xlu0 %1086 }
  0x9f   :  { %1917 = vmatprep.mubr.msk.bf16.mxu0 %vm2074_vm2, %v2073_v0 }
  0xa1   :  { %1826 = vmatmul.mubr.msk.bf16.gmra.mrb[32].mxu1 %vm193_vm3, %v2384_v37 }
  0xa2   :  { %1829 = vmatprep.mubr.msk.bf16.mxu1 %vm2074_vm2, %v2073_v0 }
  0xa6   :  { %1918 = vmatmul.mubr.msk.bf16.gmra.mrb[32].mxu0 %vm193_vm3, %v2355_v63  ;;  %v1092_v16 = vpop.permute.xlu0 %1091 }
  0xa7   :  { %1921 = vmatprep.mubr.msk.bf16.mxu0 %vm2074_vm2, %v2073_v0 }
  0xa9   :  { %1830 = vmatmul.mubr.msk.bf16.gmra.mrb[36].mxu1 %vm193_vm3, %v2228_v1  ;;  %v1097_v63 = vpop.permute.xlu1 %1096 }
  0xaa   :  { %1833 = vmatprep.mubr.msk.bf16.mxu1 %vm2074_vm2, %v2073_v0  ;;  %v1107_v28 = vpop.permute.xlu0 %1106 }
  0xad   :  { %v1102_v56 = vpop.permute.xlu1 %1101 }
  0xae   :  { %1922 = vmatmul.mubr.msk.bf16.gmra.mrb[36].mxu0 %vm193_vm3, %v2370_v30  ;;  %v1117_v45 = vpop.permute.xlu0 %1116 }
  0xaf   :  { %1925 = vmatprep.mubr.msk.bf16.mxu0 %vm2074_vm2, %v2073_v0 }
  0xb1   :  { %1834 = vmatmul.mubr.msk.bf16.gmra.mrb[40].mxu1 %vm193_vm3, %v1543_v4  ;;  %v1112_v36 = vpop.permute.xlu1 %1111 }
  0xb6   :  { %1926 = vmatmul.mubr.msk.bf16.gmra.mrb[40].mxu0 %vm193_vm3, %v879_v2 }
 0x134   :  { %v417_v6 = vpop.f32.mrb[0].mxu1 }
 0x135   :  { %v1795_v15 = vpop.f32.mrb[1].mxu1 }
 0x136   :  { %v420_v32 = vpop.f32.mrb[2].mxu1 }
 0x137   :  { %v1796_v44 = vpop.f32.mrb[3].mxu1 }
 0x139   :  { %v956_v53 = vpop.f32.mrb[0].mxu0 }
 0x13a   :  { %v2588_v1 = vadd.f32 %v956_v53, %v417_v6  ;;  %v1887_v10 = vpop.f32.mrb[1].mxu0 }
 0x13b   :  { %v959_v46 = vpop.f32.mrb[2].mxu0 }
 0x13c   :  { %v2590_v47 = vadd.f32 %v959_v46, %v420_v32  ;;  %v1888_v57 = vpop.f32.mrb[3].mxu0  ;;  %v425_v0 = vpop.f32.mrb[4].mxu1  ;;  %v1189_v52 = vmul.f32 %v2588_v1, %v1087_v17 }
 0x13d   :  { %v1799_v58 = vpop.f32.mrb[5].mxu1  ;;  %v1122_v46 = vpop.permute.xlu1 %1121 }
 0x13e   :  { %v428_v59 = vpop.f32.mrb[6].mxu1  ;;  %v1190_v50 = vmul.f32 %v2590_v47, %v1092_v16  ;;  %v1236_v8 = vmul.f32 %v2588_v1, %v1189_v52 }
 0x13f   :  { %v1800_v12 = vpop.f32.mrb[7].mxu1 }
 0x140   :  { %v1237_v60 = vmul.f32 %v2590_v47, %v1190_v50  ;;  %v1210_v13 = vadd.f32 %v1190_v50, %v1189_v52 }
 0x141   :  { %v964_v26 = vpop.f32.mrb[4].mxu0 }
 0x142   :  { %v2592_v18 = vadd.f32 %v964_v26, %v425_v0  ;;  %v1891_v19 = vpop.f32.mrb[5].mxu0  ;;  %v1257_v31 = vadd.f32 %v1237_v60, %v1236_v8 }
 0x143   :  { %v967_v2 = vpop.f32.mrb[6].mxu0 }
 0x144   :  { %v2594_v20 = vadd.f32 %v967_v2, %v428_v59  ;;  %v1892_v30 = vpop.f32.mrb[7].mxu0  ;;  %v433_v37 = vpop.f32.mrb[8].mxu1  ;;  %v1191_v55 = vmul.f32 %v2592_v18, %v1097_v63 }
 0x145   :  { %v1803_v49 = vpop.f32.mrb[9].mxu1  ;;  %v1127_v2 = vpop.permute.xlu0 %1126 }
 0x146   :  { %v436_v51 = vpop.f32.mrb[10].mxu1  ;;  %v1238_v5 = vmul.f32 %v2592_v18, %v1191_v55  ;;  %v1192_v7 = vmul.f32 %v2594_v20, %v1102_v56  ;;  %v1211_v33 = vadd.f32 %v1210_v13, %v1191_v55  ;;  %v1132_v55 = vpop.permute.xlu1 %1131 }
 0x147   :  { %v1804_v54 = vpop.f32.mrb[11].mxu1 }
 0x148   :  { %v1239_v35 = vmul.f32 %v2594_v20, %v1192_v7  ;;  %v1258_v3 = vadd.f32 %v1257_v31, %v1238_v5  ;;  %v1212_v41 = vadd.f32 %v1211_v33, %v1192_v7 }
 0x149   :  { %v972_v43 = vpop.f32.mrb[8].mxu0  ;;  %v1137_v31 = vpop.permute.xlu0 %1136 }
 0x14a   :  { %v2600_v61 = vadd.f32 %v972_v43, %v433_v37  ;;  %v1895_v62 = vpop.f32.mrb[9].mxu0  ;;  %v1259_v27 = vadd.f32 %v1258_v3, %v1239_v35 }
 0x14b   :  { %v975_v11 = vpop.f32.mrb[10].mxu0 }
 0x14c   :  { %v2605_v14 = vadd.f32 %v975_v11, %v436_v51  ;;  %v1896_v22 = vpop.f32.mrb[11].mxu0  ;;  %v441_v25 = vpop.f32.mrb[12].mxu1  ;;  %v1193_v34 = vmul.f32 %v2600_v61, %v1107_v28 }
 0x14d   :  { %v1807_v29 = vpop.f32.mrb[13].mxu1 }
 0x14e   :  { %v444_v21 = vpop.f32.mrb[14].mxu1  ;;  %v1240_v39 = vmul.f32 %v2600_v61, %v1193_v34  ;;  %v1194_v9 = vmul.f32 %v2605_v14, %v1112_v36  ;;  %v1213_v48 = vadd.f32 %v1212_v41, %v1193_v34  ;;  %v1142_v36 = vpop.permute.xlu1 %1141 }
 0x14f   :  { %v1808_v23 = vpop.f32.mrb[15].mxu1 }
 0x150   :  { %v1260_v53 = vadd.f32 %v1259_v27, %v1240_v39  ;;  %v1241_v10 = vmul.f32 %v2605_v14, %v1194_v9  ;;  %v1214_v0 = vadd.f32 %v1213_v48, %v1194_v9 }
 0x151   :  { %v980_v38 = vpop.f32.mrb[12].mxu0 }
 0x152   :  { %v2611_v24 = vadd.f32 %v980_v38, %v441_v25  ;;  %v1899_v40 = vpop.f32.mrb[13].mxu0  ;;  %v1261_v26 = vadd.f32 %v1260_v53, %v1241_v10  ;;  %v1147_v10 = vpop.permute.xlu0 %1146 }
 0x153   :  { %v983_v42 = vpop.f32.mrb[14].mxu0 }
 0x154   :  { %v1195_v4 = vmul.f32 %v2611_v24, %v1117_v45  ;;  %v2614_v6 = vadd.f32 %v983_v42, %v444_v21  ;;  %v1900_v15 = vpop.f32.mrb[15].mxu0  ;;  %v449_v32 = vpop.f32.mrb[16].mxu1 }
 0x155   :  { %v1811_v44 = vpop.f32.mrb[17].mxu1 }
 0x156   :  { %v452_v17 = vpop.f32.mrb[18].mxu1  ;;  %v1242_v58 = vmul.f32 %v2611_v24, %v1195_v4  ;;  %v1196_v59 = vmul.f32 %v2614_v6, %v1122_v46  ;;  %v1215_v16 = vadd.f32 %v1214_v0, %v1195_v4 }
 0x157   :  { %v1812_v57 = vpop.f32.mrb[19].mxu1 }
 0x158   :  { %v1262_v37 = vadd.f32 %v1261_v26, %v1242_v58  ;;  %v1243_v49 = vmul.f32 %v2614_v6, %v1196_v59  ;;  %v1216_v43 = vadd.f32 %v1215_v16, %v1196_v59  ;;  %v1152_v59 = vpop.permute.xlu1 %1151 }
 0x159   :  { %v988_v12 = vpop.f32.mrb[16].mxu0 }
 0x15a   :  { %v2619_v19 = vadd.f32 %v988_v12, %v449_v32  ;;  %v1903_v63 = vpop.f32.mrb[17].mxu0  ;;  %v1263_v13 = vadd.f32 %v1262_v37, %v1243_v49 }
 0x15b   :  { %v991_v30 = vpop.f32.mrb[18].mxu0 }
 0x15c   :  { %v1197_v50 = vmul.f32 %v2619_v19, %v1127_v2  ;;  %v2623_v51 = vadd.f32 %v991_v30, %v452_v17  ;;  %v1904_v52 = vpop.f32.mrb[19].mxu0  ;;  %v457_v54 = vpop.f32.mrb[20].mxu1 }
 0x15d   :  { %v1815_v56 = vpop.f32.mrb[21].mxu1 }
 0x15e   :  { %v1244_v60 = vmul.f32 %v2619_v19, %v1197_v50  ;;  %v1198_v62 = vmul.f32 %v2623_v51, %v1132_v55  ;;  %v460_v8 = vpop.f32.mrb[22].mxu1  ;;  %v1217_v5 = vadd.f32 %v1216_v43, %v1197_v50  ;;  %v1157_v43 = vpop.permute.xlu0 %1156 }
 0x15f   :  { %v1816_v11 = vpop.f32.mrb[23].mxu1 }
 0x160   :  { %v1264_v22 = vadd.f32 %v1263_v13, %v1244_v60  ;;  %v1245_v25 = vmul.f32 %v2623_v51, %v1198_v62  ;;  %v1218_v34 = vadd.f32 %v1217_v5, %v1198_v62  ;;  %v1162_v5 = vpop.permute.xlu1 %1161 }
 0x161   :  { %v996_v7 = vpop.f32.mrb[20].mxu0 }
 0x162   :  { %v2628_v28 = vadd.f32 %v996_v7, %v457_v54  ;;  %v1907_v29 = vpop.f32.mrb[21].mxu0  ;;  %v1265_v41 = vadd.f32 %v1264_v22, %v1245_v25 }
 0x163   :  { %v999_v33 = vpop.f32.mrb[22].mxu0 }
 0x164   :  { %v1199_v21 = vmul.f32 %v2628_v28, %v1137_v31  ;;  %v2631_v23 = vadd.f32 %v999_v33, %v460_v8  ;;  %v1908_v35 = vpop.f32.mrb[23].mxu0  ;;  %v465_v3 = vpop.f32.mrb[24].mxu1 }
 0x165   :  { %v1819_v38 = vpop.f32.mrb[25].mxu1 }
 0x166   :  { %v1219_v39 = vadd.f32 %v1218_v34, %v1199_v21  ;;  %v1246_v9 = vmul.f32 %v2628_v28, %v1199_v21  ;;  %v1200_v40 = vmul.f32 %v2631_v23, %v1142_v36  ;;  %v468_v45 = vpop.f32.mrb[26].mxu1 }
 0x167   :  { %v1820_v42 = vpop.f32.mrb[27].mxu1 }
 0x168   :  { %v1266_v27 = vadd.f32 %v1265_v41, %v1246_v9  ;;  %v1220_v48 = vadd.f32 %v1219_v39, %v1200_v40  ;;  %v1247_v4 = vmul.f32 %v2631_v23, %v1200_v40  ;;  %v1167_v39 = vpop.permute.xlu0 %1166 }
 0x169   :  { %v1004_v15 = vpop.f32.mrb[24].mxu0 }
 0x16a   :  { %v1267_v32 = vadd.f32 %v1266_v27, %v1247_v4  ;;  %v2636_v44 = vadd.f32 %v1004_v15, %v465_v3  ;;  %v1911_v53 = vpop.f32.mrb[25].mxu0 }
 0x16b   :  { %v1007_v17 = vpop.f32.mrb[26].mxu0 }
 0x16c   :  { %v1201_v46 = vmul.f32 %v2636_v44, %v1147_v10  ;;  %v2639_v57 = vadd.f32 %v1007_v17, %v468_v45  ;;  %v1912_v0 = vpop.f32.mrb[27].mxu0  ;;  %v473_v58 = vpop.f32.mrb[28].mxu1 }
 0x16d   :  { %v1823_v12 = vpop.f32.mrb[29].mxu1 }
 0x16e   :  { %v1221_v26 = vadd.f32 %v1220_v48, %v1201_v46  ;;  %v1248_v16 = vmul.f32 %v2636_v44, %v1201_v46  ;;  %v1202_v63 = vmul.f32 %v2639_v57, %v1152_v59  ;;  %v476_v2 = vpop.f32.mrb[30].mxu1  ;;  %v1172_v48 = vpop.permute.xlu1 %1171 }
 0x16f   :  { %v1824_v30 = vpop.f32.mrb[31].mxu1 }
 0x170   :  { %v1268_v37 = vadd.f32 %v1267_v32, %v1248_v16  ;;  %v1222_v49 = vadd.f32 %v1221_v26, %v1202_v63  ;;  %v1249_v50 = vmul.f32 %v2639_v57, %v1202_v63  ;;  %v1177_v63 = vpop.permute.xlu0 %1176 }
 0x171   :  { %v1012_v52 = vpop.f32.mrb[28].mxu0 }
 0x172   :  { %v1269_v54 = vadd.f32 %v1268_v37, %v1249_v50  ;;  %v2644_v55 = vadd.f32 %v1012_v52, %v473_v58  ;;  %v1915_v56 = vpop.f32.mrb[29].mxu0  ;;  %v1182_v52 = vpop.permute.xlu1 %1181 }
 0x173   :  { %v1015_v60 = vpop.f32.mrb[30].mxu0 }
 0x174   :  { %v1203_v62 = vmul.f32 %v2644_v55, %v1157_v43  ;;  %v2647_v8 = vadd.f32 %v1015_v60, %v476_v2  ;;  %v1916_v11 = vpop.f32.mrb[31].mxu0  ;;  %v481_v13 = vpop.f32.mrb[32].mxu1 }
 0x175   :  { %v1827_v7 = vpop.f32.mrb[33].mxu1 }
 0x176   :  { %v1223_v22 = vadd.f32 %v1222_v49, %v1203_v62  ;;  %v1250_v25 = vmul.f32 %v2644_v55, %v1203_v62  ;;  %v1204_v29 = vmul.f32 %v2647_v8, %v1162_v5  ;;  %v484_v31 = vpop.f32.mrb[34].mxu1 }
 0x177   :  { %v1828_v33 = vpop.f32.mrb[35].mxu1 }
 0x178   :  { %v1270_v34 = vadd.f32 %v1269_v54, %v1250_v25  ;;  %v1224_v21 = vadd.f32 %v1223_v22, %v1204_v29  ;;  %v1251_v35 = vmul.f32 %v2647_v8, %v1204_v29  ;;  %v1187_v33 = vpop.permute.xlu0 %1186 }
 0x179   :  { %v1020_v3 = vpop.f32.mrb[32].mxu0 }
 0x17a   :  { %v1271_v36 = vadd.f32 %v1270_v34, %v1251_v35  ;;  %v2652_v38 = vadd.f32 %v1020_v3, %v481_v13  ;;  %v1919_v41 = vpop.f32.mrb[33].mxu0 }
 0x17b   :  { %v1023_v9 = vpop.f32.mrb[34].mxu0 }
 0x17c   :  { %v1205_v40 = vmul.f32 %v2652_v38, %v1167_v39  ;;  %v2655_v45 = vadd.f32 %v1023_v9, %v484_v31  ;;  %v1920_v42 = vpop.f32.mrb[35].mxu0  ;;  %v489_v27 = vpop.f32.mrb[36].mxu1 }
 0x17d   :  { %v1831_v4 = vpop.f32.mrb[37].mxu1 }
 0x17e   :  { %v1225_v15 = vadd.f32 %v1224_v21, %v1205_v40  ;;  %v1252_v32 = vmul.f32 %v2652_v38, %v1205_v40  ;;  %v1206_v53 = vmul.f32 %v2655_v45, %v1172_v48  ;;  %v492_v10 = vpop.f32.mrb[38].mxu1 }
 0x17f   :  { %v1832_v17 = vpop.f32.mrb[39].mxu1 }
 0x180   :  { %v1272_v46 = vadd.f32 %v1271_v36, %v1252_v32  ;;  %v1226_v0 = vadd.f32 %v1225_v15, %v1206_v53  ;;  %v1253_v58 = vmul.f32 %v2655_v45, %v1206_v53 }
 0x181   :  { %v1028_v59 = vpop.f32.mrb[36].mxu0 }
 0x182   :  { %v1273_v12 = vadd.f32 %v1272_v46, %v1253_v58  ;;  %v2660_v26 = vadd.f32 %v1028_v59, %v489_v27  ;;  %v1923_v16 = vpop.f32.mrb[37].mxu0 }
 0x183   :  { %v1031_v2 = vpop.f32.mrb[38].mxu0 }
 0x184   :  { %v1207_v30 = vmul.f32 %v2660_v26, %v1177_v63  ;;  %v2663_v37 = vadd.f32 %v1031_v2, %v492_v10  ;;  %v1924_v49 = vpop.f32.mrb[39].mxu0  ;;  %v497_v50 = vpop.f32.mrb[40].mxu1  ;;  %v1295_v63 = vlaneseq }
 0x185   :  { %v1835_v54 = vpop.f32.mrb[41].mxu1 }
 0x186   :  { %v1227_v56 = vadd.f32 %v1226_v0, %v1207_v30  ;;  %v1254_v43 = vmul.f32 %v2660_v26, %v1207_v30  ;;  %v1208_v60 = vmul.f32 %v2663_v37, %v1182_v52  ;;  %v500_v62 = vpop.f32.mrb[42].mxu1  ;;  %v1296_v2 = vshrl.u32 %v1295_v63, 7  ;;  %v1288_v30 = vld [vmem:[%s2853_s3] sm:$0x1]  ;;  %v1292_v54 = vld [vmem:[%s2853_s3 + $0x1] sm:$0x1] }
 0x187   :  { %v1836_v11 = vpop.f32.mrb[43].mxu1 }
 0x188   :  { %v1274_v13 = vadd.f32 %v1273_v12, %v1254_v43  ;;  %v1228_v5 = vadd.f32 %v1227_v56, %v1208_v60  ;;  %v1255_v7 = vmul.f32 %v2663_v37, %v1208_v60  ;;  %v1297_v49 = vsub.s32 0, %v1296_v2 }
 0x189   :  { %v1036_v22 = vpop.f32.mrb[40].mxu0 }
 0x18a   :  { %v1275_v25 = vadd.f32 %v1274_v13, %v1255_v7  ;;  %v1949_v29 = vadd.f32 %v1036_v22, %v497_v50  ;;  %v1927_v31 = vpop.f32.mrb[41].mxu0 }
 0x18b   :  { %v1039_v34 = vpop.f32.mrb[42].mxu0 }
 0x18c   :  { %v1209_v21 = vmul.f32 %v1949_v29, %v1187_v33  ;;  %v1928_v35 = vpop.f32.mrb[43].mxu0 }
 0x18e   :  { %v1229_v3 = vadd.f32 %v1228_v5, %v1209_v21  ;;  %v1256_v36 = vmul.f32 %v1949_v29, %v1209_v21 }
 0x190   :  { %v1230_v41 = vrot.slane %v1229_v3, 4  ;;  %v1276_v39 = vadd.f32 %v1275_v25, %v1256_v36 }
 0x192   :  { %v1231_v9 = vadd.f32 %v1230_v41, %v1229_v3  ;;  %v1277_v40 = vrot.slane %v1276_v39, 4 }
 0x194   :  { %v1232_v42 = vrot.slane %v1231_v9, 2  ;;  %v1278_v27 = vadd.f32 %v1277_v40, %v1276_v39 }
 0x196   :  { %v1233_v48 = vadd.f32 %v1232_v42, %v1231_v9  ;;  %v1279_v4 = vrot.slane %v1278_v27, 2 }
 0x198   :  { %v1234_v15 = vrot.slane %v1233_v48, 1  ;;  %v1280_v32 = vadd.f32 %v1279_v4, %v1278_v27 }
 0x19a   :  { %v1235_v53 = vadd.f32 %v1234_v15, %v1233_v48  ;;  %v1281_v10 = vrot.slane %v1280_v32, 1 }
 0x19c   :  { %v1282_v17 = vadd.f32 %v1281_v10, %v1280_v32  ;;  %v1283_v46 = vmul.f32 0.0078125, %v1235_v53 }
 0x19e   :  { %v1284_v0 = vmul.f32 0.0078125, %v1282_v17  ;;  %v1285_v58 = vmul.f32 %v1283_v46, %v1283_v46 }
 0x1a0   :  { %v1286_v59 = vsub.f32 %v1284_v0, %v1285_v58 }
 0x1a2   :  { %v1287_v12 = vmax.f32 %v1286_v59, 0.0 }
 0x1a4   :  { %v1289_v16 = vadd.f32 1e-05, %v1287_v12 }
 0x1a6   :  { %2071 = vrsqrt.f32 %v1289_v16 }
 0x1b0   :  { %v2072_v50 = vpop.eup %2071 }
 0x1b1   :  { %v1291_v52 = vmul.f32 %v2072_v50, %v1288_v30 }
 0x1b3   :  { %v1293_v56 = vmul.f32 %v1291_v52, %v1283_v46  ;;  %v1298_v43 = vrot.slane %v1291_v52, %v1297_v49 }
 0x1b5   :  { %v1294_v60 = vsub.f32 %v1292_v54, %v1293_v56  ;;  %v1299_v62 = vmul.f32 %v2588_v1, %v1298_v43  ;;  %v1300_v11 = vmul.f32 %v2590_v47, %v1298_v43  ;;  %v1301_v13 = vmul.f32 %v2592_v18, %v1298_v43 }
 0x1b6   :  { %v1302_v5 = vmul.f32 %v2594_v20, %v1298_v43  ;;  %v1303_v7 = vmul.f32 %v2600_v61, %v1298_v43  ;;  %v1309_v22 = vmul.f32 %v2628_v28, %v1298_v43  ;;  %v1310_v25 = vmul.f32 %v2631_v23, %v1298_v43 }
 0x1b7   :  { %v1311_v31 = vmul.f32 %v2636_v44, %v1298_v43  ;;  %v1312_v33 = vmul.f32 %v2639_v57, %v1298_v43  ;;  %v1313_v34 = vmul.f32 %v2644_v55, %v1298_v43  ;;  %v1314_v1 = vmul.f32 %v2647_v8, %v1298_v43 }
 0x1b8   :  { %v1315_v47 = vmul.f32 %v2652_v38, %v1298_v43  ;;  %v1316_v18 = vmul.f32 %v2655_v45, %v1298_v43  ;;  %v1317_v20 = vmul.f32 %v2660_v26, %v1298_v43  ;;  %v1304_v61 = vmul.f32 %v2605_v14, %v1298_v43 }
 0x1b9   :  { %v1318_v28 = vmul.f32 %v2663_v37, %v1298_v43  ;;  %v1319_v21 = vmul.f32 %v1949_v29, %v1298_v43  ;;  %v1323_v23 = vrot.slane %v1294_v60, %v1297_v49  ;;  %v1305_v44 = vmul.f32 %v2611_v24, %v1298_v43 }
 0x1ba   :  { %v1306_v57 = vmul.f32 %v2614_v6, %v1298_v43  ;;  %v1307_v55 = vmul.f32 %v2619_v19, %v1298_v43  ;;  %v1308_v8 = vmul.f32 %v2623_v51, %v1298_v43 }
 0x1bb   :  { %v1324_v35 = vadd.f32 %v1323_v23, %v1299_v62  ;;  %v1325_v38 = vadd.f32 %v1323_v23, %v1300_v11  ;;  %v1326_v3 = vadd.f32 %v1323_v23, %v1301_v13  ;;  %v1327_v45 = vadd.f32 %v1323_v23, %v1302_v5 }
 0x1bc   :  { %v2694_v36 = vadd.f32 %v1323_v23, %v1303_v7  ;;  %v2696_v26 = vadd.f32 %v1323_v23, %v1304_v61  ;;  %v2698_v14 = vadd.f32 %v1323_v23, %v1305_v44  ;;  %v2700_v37 = vadd.f32 %v1323_v23, %v1306_v57 }
 0x1bd   :  { %v2702_v29 = vadd.f32 %v1323_v23, %v1307_v55  ;;  %v2704_v24 = vadd.f32 %v1323_v23, %v1308_v8  ;;  %v2706_v6 = vadd.f32 %v1323_v23, %v1309_v22  ;;  %v2708_v19 = vadd.f32 %v1323_v23, %v1310_v25 }
 0x1be   :  { %v2710_v51 = vadd.f32 %v1323_v23, %v1311_v31  ;;  %v2712_v41 = vadd.f32 %v1323_v23, %v1312_v33  ;;  %v2714_v39 = vadd.f32 %v1323_v23, %v1313_v34  ;;  %v2716_v9 = vadd.f32 %v1323_v23, %v1314_v1 }
 0x1bf   :  { %v2718_v40 = vadd.f32 %v1323_v23, %v1315_v47  ;;  %v2720_v42 = vadd.f32 %v1323_v23, %v1316_v18  ;;  %v2722_v27 = vadd.f32 %v1323_v23, %v1317_v20  ;;  %v2724_v48 = vadd.f32 %v1323_v23, %v1318_v28 }
 0x1c0   :  { %v2726_v4 = vadd.f32 %v1323_v23, %v1319_v21  ;;  %vm1345_vm5 = vcmp.gt.f32.partialorder %v1324_v35, 0.0  ;;  %vm1346_vm6 = vcmp.gt.f32.partialorder %v1325_v38, 0.0  ;;  %vm1347_vm7 = vcmp.gt.f32.partialorder %v1326_v3, 0.0 }
 0x1c1   :  { %vm1348_vm8 = vcmp.gt.f32.partialorder %v1327_v45, 0.0  ;;  %vm1349_vm9 = vcmp.gt.f32.partialorder %v2694_v36, 0.0  ;;  %vm1350_vm10 = vcmp.gt.f32.partialorder %v2696_v26, 0.0  ;;  %vm1356_vm0 = vcmp.gt.f32.partialorder %v2708_v19, 0.0 }
 0x1c2   :  { %vm1357_vm1 = vcmp.gt.f32.partialorder %v2710_v51, 0.0  ;;  %vm1358_vm2 = vcmp.gt.f32.partialorder %v2712_v41, 0.0  ;;  %vm1359_vm3 = vcmp.gt.f32.partialorder %v2714_v39, 0.0  ;;  %vm1360_vm4 = vcmp.gt.f32.partialorder %v2716_v9, 0.0 }
 0x1c3   :  { %vm1361_vm11 = vcmp.gt.f32.partialorder %v2718_v40, 0.0  ;;  %vm1362_vm12 = vcmp.gt.f32.partialorder %v2720_v42, 0.0  ;;  %vm1363_vm13 = vcmp.gt.f32.partialorder %v2722_v27, 0.0  ;;  %vm1364_vm14 = vcmp.gt.f32.partialorder %v2724_v48, 0.0 }
 0x1c4   :  { %vm1365_vm15 = vcmp.gt.f32.partialorder %v2726_v4, 0.0  ;;  %v1366_v15 = vmul.f32 0.01, %v1324_v35  ;;  %v1367_v32 = vmul.f32 0.01, %v1325_v38 }
 0x1c5   :  { %v1368_v53 = vmul.f32 0.01, %v1326_v3  ;;  %v1369_v10 = vmul.f32 0.01, %v1327_v45  ;;  %v1370_v17 = vmul.f32 0.01, %v2694_v36 }
 0x1c6   :  { %v1371_v46 = vmul.f32 0.01, %v2696_v26  ;;  %v1372_v0 = vmul.f32 0.01, %v2698_v14  ;;  %v1373_v58 = vmul.f32 0.01, %v2700_v37  ;;  %v1387_v59 = vsel %vm1345_vm5, %v1324_v35, %v1366_v15 }
 0x1c7   :  { %v1374_v12 = vmul.f32 0.01, %v2702_v29  ;;  %v1375_v16 = vmul.f32 0.01, %v2704_v24  ;;  %v1376_v63 = vmul.f32 0.01, %v2706_v6  ;;  %v1388_v2 = vsel %vm1346_vm6, %v1325_v38, %v1367_v32 }
 0x1c8   :  { %v1377_v30 = vmul.f32 0.01, %v2708_v19  ;;  %v1378_v49 = vmul.f32 0.01, %v2710_v51  ;;  %v1379_v50 = vmul.f32 0.01, %v2712_v41  ;;  %v1389_v52 = vsel %vm1347_vm7, %v1326_v3, %v1368_v53 }
 0x1c9   :  { %v1380_v54 = vmul.f32 0.01, %v2714_v39  ;;  %v1381_v56 = vmul.f32 0.01, %v2716_v9  ;;  %v1382_v43 = vmul.f32 0.01, %v2718_v40  ;;  %v1390_v60 = vsel %vm1348_vm8, %v1327_v45, %v1369_v10 }
 0x1ca   :  { %v1383_v62 = vmul.f32 0.01, %v2720_v42  ;;  %v1384_v11 = vmul.f32 0.01, %v2722_v27  ;;  %v1385_v13 = vmul.f32 0.01, %v2724_v48  ;;  %v1391_v5 = vsel %vm1349_vm9, %v2694_v36, %v1370_v17 }
 0x1cb   :  { %v1386_v7 = vmul.f32 0.01, %v2726_v4  ;;  %v1392_v22 = vsel %vm1350_vm10, %v2696_v26, %v1371_v46  ;;  %vm2855_vm5 = vcmp.gt.f32.partialorder %v2698_v14, 0.0  ;;  %vm2856_vm6 = vcmp.gt.f32.partialorder %v2700_v37, 0.0 }
 0x1cc   :  { %v1393_v25 = vsel %vm2855_vm5, %v2698_v14, %v1372_v0  ;;  %v1394_v31 = vsel %vm2856_vm6, %v2700_v37, %v1373_v58  ;;  %vm2857_vm7 = vcmp.gt.f32.partialorder %v2702_v29, 0.0  ;;  %vm2858_vm8 = vcmp.gt.f32.partialorder %v2704_v24, 0.0 }
 0x1cd   :  { %v1395_v33 = vsel %vm2857_vm7, %v2702_v29, %v1374_v12  ;;  %v1396_v34 = vsel %vm2858_vm8, %v2704_v24, %v1375_v16  ;;  %vm2859_vm9 = vcmp.gt.f32.partialorder %v2706_v6, 0.0  ;;  %v1398_v47 = vsel %vm1356_vm0, %v2708_v19, %v1377_v30 }
 0x1ce   :  { %v1397_v1 = vsel %vm2859_vm9, %v2706_v6, %v1376_v63  ;;  %v1399_v18 = vsel %vm1357_vm1, %v2710_v51, %v1378_v49  ;;  %v1400_v20 = vsel %vm1358_vm2, %v2712_v41, %v1379_v50  ;;  %v1401_v61 = vsel %vm1359_vm3, %v2714_v39, %v1380_v54 }
 0x1cf   :  { %v1402_v28 = vsel %vm1360_vm4, %v2716_v9, %v1381_v56  ;;  %v1403_v21 = vsel %vm1361_vm11, %v2718_v40, %v1382_v43  ;;  %v1404_v23 = vsel %vm1362_vm12, %v2720_v42, %v1383_v62  ;;  %v1405_v44 = vsel %vm1363_vm13, %v2722_v27, %v1384_v11 }
 0x1d0   :  { %v1406_v57 = vsel %vm1364_vm14, %v2724_v48, %v1385_v13  ;;  %v1407_v55 = vsel %vm1365_vm15, %v2726_v4, %v1386_v7  ;;  %v1641_v8 = vpack.c.bf16 %v1388_v2, %v1387_v59  ;;  %v1646_v35 = vpack.c.bf16 %v1390_v60, %v1389_v52 }
 0x1d1   :  { %v1651_v38 = vpack.c.bf16 %v1392_v22, %v1391_v5  ;;  %v1637_v3 = vpack.c.bf16 %v1407_v55, %v1407_v55  ;;  %v1656_v45 = vpack.c.bf16 %v1394_v31, %v1393_v25  ;;  %v1661_v36 = vpack.c.bf16 %v1396_v34, %v1395_v33 }
 0x1d2   :  { %v1666_v26 = vpack.c.bf16 %v1398_v47, %v1397_v1  ;;  %1642 = vst [vmem:[%s2854_s4] sm:$0xff] %v1641_v8   ;;  %1688 = vst [vmem:[%s2854_s4 + $0x8] sm:$0xff] %v1646_v35   ;;  %v1671_v14 = vpack.c.bf16 %v1400_v20, %v1399_v18  ;;  %v1676_v37 = vpack.c.bf16 %v1402_v28, %v1401_v61 }
 0x1d3   :  { %1689 = vst [vmem:[%s2854_s4 + $0x10] sm:$0xff] %v1651_v38   ;;  %v1681_v29 = vpack.c.bf16 %v1404_v23, %v1403_v21  ;;  %v1686_v24 = vpack.c.bf16 %v1406_v57, %v1405_v44  ;;  %1690 = vst [vmem:[%s2854_s4 + $0x18] sm:$0xff] %v1656_v45  }
 0x1d4   :  { %1691 = vst [vmem:[%s2854_s4 + $0x20] sm:$0xff] %v1661_v36   ;;  %1692 = vst [vmem:[%s2854_s4 + $0x28] sm:$0xff] %v1666_v26  }
 0x1d5   :  { %1513 = vst [vmem:[%s2854_s4 + $0x50] sm:$0xf] %v1637_v3  ;;  %1693 = vst [vmem:[%s2854_s4 + $0x30] sm:$0xff] %v1671_v14  }
 0x1d6   :  { %1694 = vst [vmem:[%s2854_s4 + $0x38] sm:$0xff] %v1676_v37   ;;  %1695 = vst [vmem:[%s2854_s4 + $0x40] sm:$0xff] %v1681_v29  }
 0x1d7   :  { %1696 = vst [vmem:[%s2854_s4 + $0x48] sm:$0xff] %v1686_v24  }

// kernel: squeeze.5
= control target key start
LH: loop header
LB: loop body
LE: loop exit
PB: predicated region body
PF: predicated region fallthrough
CT: control target
= control target key end

     0   :  { %v128_v8 = vmov 0.0   ;;  %s163_s0 = inlined_call_operand.vmem [shape: bf16[1,18,128], index: 0, kind: input, shape index: {}]   ;;  %s164_s1 = inlined_call_operand.vmem [shape: bf16[2,3,3,128], index: 1, kind: output, shape index: {}]  }
   0x1   :  { %v116_v0 = vld [vmem:[%s163_s0 + $0x8] sm:$0xf]  ;;  %v124_v1 = vld [vmem:[%s163_s0] sm:$0xff]  }
   0x2   :  { %v17_v2 = vunpack.c.l.bf16 %v116_v0  ;;  %v125_v3 = vunpack.c.l.bf16 %v124_v1  ;;  %v126_v4 = vunpack.c.h.bf16 %v124_v1 }
   0x4   :  { %20 = vst [vmem:[#allocation1 + $0x10] sm:$0xff] %v17_v2  ;;  %50 = vst [vmem:[#allocation0] ss:$14 sps:$4 sm:$0xc7] %v125_v3  }
   0x5   :  { %52 = vst [vmem:[#allocation0 + $0x5] sm:$0x38] %v125_v3   ;;  %58 = vst [vmem:[#allocation0 + $0x12] ss:$6 sm:$0x3] %v126_v4  }
   0x6   :  { %60 = vst [vmem:[#allocation0 + $0x17] ss:$9 sps:$4 sm:$0x7c] %v126_v4   ;;  %64 = vst [vmem:[#allocation0 + $0x21] sm:$0x80] %v126_v4  }
   0xb   :  { %v66_v5 = vld [vmem:[#allocation1 + $0x10] sm:$0x3]  }
   0xc   :  { %v73_v6 = vld [vmem:[#allocation0] sm:$0xf]  ;;  %v78_v7 = vld [vmem:[#allocation0 + $0x8] sm:$0xf]  ;;  %68 = vst [vmem:[#allocation0 + $0x29] sm:$0x3] %v66_v5  }
   0xd   :  { %v74_v9 = vpack.c.bf16 %v128_v8, %v73_v6  ;;  %v79_v10 = vpack.c.bf16 %v128_v8, %v78_v7  ;;  %v84_v11 = vld [vmem:[#allocation0 + $0x10] sm:$0xf]  ;;  %v91_v12 = vld [vmem:[#allocation0 + $0x18] sm:$0xf]  ;;  %v98_v13 = vld [vmem:[#allocation0 + $0x20] sm:$0xf] }
   0xe   :  { %v85_v14 = vpack.c.bf16 %v128_v8, %v84_v11  ;;  %v92_v15 = vpack.c.bf16 %v128_v8, %v91_v12  ;;  %v99_v16 = vpack.c.bf16 %v128_v8, %v98_v13 }
   0xf   :  { %76 = vst [vmem:[%s164_s1] sm:$0x3] %v74_v9  ;;  %118 = vst [vmem:[%s164_s1 + $0x2] sm:$0x3] %v79_v10 }
  0x10   :  { %119 = vst [vmem:[%s164_s1 + $0x4] sm:$0x3] %v85_v14  ;;  %120 = vst [vmem:[%s164_s1 + $0x6] sm:$0x3] %v92_v15 }
  0x11   :  { %121 = vst [vmem:[%s164_s1 + $0x8] sm:$0x3] %v99_v16 }
  0x13   :  { %v105_v17 = vld [vmem:[#allocation0 + $0x28] sm:$0xf] }
  0x14   :  { %v106_v18 = vpack.c.bf16 %v128_v8, %v105_v17 }
  0x16   :  { %122 = vst [vmem:[%s164_s1 + $0xa] sm:$0x3] %v106_v18 }

// kernel: attgan_forward.7
= control target key start
LH: loop header
LB: loop body
LE: loop exit
PB: predicated region body
PF: predicated region fallthrough
CT: control target
= control target key end

     0   :  { %v990_v2 = vmov 0   ;;  %vm63_vm0 = vsmask.f32 7424  ;;  %vm311_vm1 = vsmask.f32 5376  ;;  %vm119_vm2 = vcmask 523264   ;;  %s1213_s1 = inlined_call_operand.vmem [shape: bf16[4,64,128], index: 1, kind: input, shape index: {}]   ;;  %s1214_s0 = inlined_call_operand.vmem [shape: bf16[64,64], index: 0, kind: input, shape index: {}]   ;;  %s1215_s2 = inlined_call_operand.vmem [shape: f32[56,1], index: 2, kind: input, shape index: {}]   ;;  %s1216_s3 = inlined_call_operand.vmem [shape: f32[2,128], index: 3, kind: input, shape index: {}]   ;;  %s1217_s4 = inlined_call_operand.vmem [shape: bf16[1,56,128], index: 4, kind: output, shape index: {}]  }
   0x1   :  { %v964_v0 = vld [vmem:[%s1213_s1 + $0x20] sm:$0xff]   ;;  %962 = vset.pattern.permute.xlu0 %v990_v2  ;;  %963 = vset.pattern.permute.xlu1 %v990_v2  ;;  %v966_v3 = vld [vmem:[%s1213_s1 + $0x28] sm:$0xff]   ;;  %v968_v5 = vld [vmem:[%s1213_s1 + $0x30] sm:$0xff]   ;;  %vm457_vm3 = vcmask 1044480  }
   0x2   :  { %v965_v1 = vld [vmem:[%s1213_s1 + $0x40] sm:$0xff]   ;;  %874 = vmatprep.subr.bf16.mxu1 %v964_v0  ;;  %v967_v4 = vld [vmem:[%s1213_s1 + $0x48] sm:$0xff]   ;;  %v969_v6 = vld [vmem:[%s1213_s1 + $0x50] sm:$0xff]  }
   0x3   :  { %906 = vmatprep.subr.bf16.mxu0 %v965_v1  ;;  %875 = vmatpush3.bf16.msra.mxu1 %v964_v0  ;;  %v970_v7 = vld [vmem:[%s1213_s1 + $0x38] sm:$0xff]   ;;  %v18_v9 = vld [vmem:[%s1214_s0] sm:$0xf]  ;;  %v1046_v10 = vld [vmem:[%s1214_s0 + $0x4] sm:$0xf] }
   0x4   :  { %907 = vmatpush3.bf16.msra.mxu0 %v965_v1  ;;  %876 = vmatprep.subr.bf16.mxu1 %v966_v3  ;;  %v971_v8 = vld [vmem:[%s1213_s1 + $0x58] sm:$0xff]   ;;  %v1049_v11 = vcombine.low %v18_v9, %v1046_v10  ;;  %v1054_v12 = vld [vmem:[%s1214_s0 + $0x8] sm:$0xff]   ;;  %v294_v13 = vld [vmem:[%s1214_s0] sm:$0xc] }
   0x5   :  { %908 = vmatprep.subr.bf16.mxu0 %v967_v4  ;;  %v784_v14 = vcombine.low %v294_v13, %v1046_v10  ;;  %v1063_v15 = vld [vmem:[%s1214_s0 + $0x10] sm:$0xff]   ;;  %v72_v18 = vshll.u32 %v1054_v12, 16  ;;  %v76_v19 = vshrl.u32 %v1054_v12, 16  ;;  %v976_v23 = vld [vmem:[%s1213_s1] sm:$0xff]   ;;  %v978_v41 = vld [vmem:[%s1213_s1 + $0x8] sm:$0xff]  }
   0x6   :  { %v65_v16 = vshrl.u32 %v1049_v11, 16  ;;  %v67_v17 = vshll.u32 %v1049_v11, 16  ;;  %v80_v22 = vshll.u32 %v1063_v15, 16  ;;  %v84_v31 = vshrl.u32 %v1063_v15, 16  ;;  %v977_v36 = vld [vmem:[%s1213_s1 + $0x60] sm:$0xff]   ;;  %v979_v48 = vld [vmem:[%s1213_s1 + $0x68] sm:$0xff]  }
   0x7   :  { %877 = vmatpush3.bf16.msra.mxu1 %v966_v3  ;;  %v313_v20 = vshrl.u32 %v784_v14, 16  ;;  %v316_v21 = vshll.u32 %v784_v14, 16  ;;  %v74_v25 = vrot.slane %v72_v18, 1  ;;  %v320_v26 = vrot.slane %v76_v19, 2  ;;  %v1085_v42 = vld [vmem:[%s1214_s0 + $0x18] sm:$0xf] }
   0x8   :  { %909 = vmatpush3.bf16.msra.mxu0 %v967_v4  ;;  %878 = vmatprep.subr.bf16.mxu1 %v968_v5  ;;  %v69_v24 = vrot.slane %v67_v17, 1  ;;  %v321_v27 = vrot.slane %v72_v18, 3  ;;  %v82_v30 = vrot.slane %v80_v22, 1  ;;  %v325_v35 = vrot.slane %v80_v22, 3  ;;  %v33_v43 = vld [vmem:[%s1214_s0 + $0x1c] sm:$0x1] }
   0x9   :  { %910 = vmatprep.subr.bf16.mxu0 %v969_v6  ;;  %v315_v28 = vrot.slane %v313_v20, 2  ;;  %v318_v29 = vrot.slane %v316_v21, 3  ;;  %v78_v33 = vor.u32 %v76_v19, %v74_v25  ;;  %v324_v38 = vrot.slane %v84_v31, 2  ;;  %v295_v47 = vld [vmem:[%s1214_s0 + $0x1c] sm:$0x7]  ;;  %v982_v54 = vld [vmem:[%s1213_s1 + $0x10] sm:$0xff]  }
   0xa   :  { %v70_v32 = vor.u32 %v69_v24, %v65_v16  ;;  %v322_v34 = vor.u32 %v321_v27, %v320_v26  ;;  %v758_v46 = vcombine.low %v1085_v42, %v33_v43  ;;  %v1102_v49 = vcombine.low %v1085_v42, %v295_v47  ;;  %v444_v58 = vld [vmem:[%s1214_s0] sm:$0x8]  ;;  %v983_v61 = vld [vmem:[%s1213_s1 + $0x70] sm:$0xff]   ;;  %v575_v14 = vld [vmem:[%s1215_s2 + $0x18] sm:$0xff] }
   0xb   :  { %879 = vmatpush3.bf16.msra.mxu1 %v968_v5  ;;  %v319_v37 = vor.u32 %v318_v29, %v315_v28  ;;  %v83_v40 = vsel %vm63_vm0, %v78_v33, %v82_v30  ;;  %v326_v45 = vor.u32 %v325_v35, %v324_v38  ;;  %v86_v51 = vor.u32 %v84_v31, %v82_v30  ;;  %v572_v63 = vld [vmem:[%s1215_s2] sm:$0xff]  ;;  %v574_v0 = vld [vmem:[%s1215_s2 + $0x10] sm:$0xff]  ;;  %v984_v5 = vld [vmem:[%s1213_s1 + $0x18] sm:$0xff]  }
   0xc   :  { %911 = vmatpush3.bf16.msra.mxu0 %v969_v6  ;;  %880 = vmatprep.subr.bf16.mxu1 %v970_v7  ;;  %v75_v39 = vsel %vm63_vm0, %v70_v32, %v74_v25  ;;  %v88_v52 = vshll.u32 %v758_v46, 16  ;;  %v92_v53 = vshrl.u32 %v758_v46, 16  ;;  %v329_v55 = vshrl.u32 %v1102_v49, 16  ;;  %v576_v17 = vld [vmem:[%s1215_s2 + $0x20] sm:$0xff]  ;;  %v577_v18 = vld [vmem:[%s1215_s2 + $0x28] sm:$0xff]  ;;  %v578_v20 = vld [vmem:[%s1215_s2 + $0x30] sm:$0xff] }
   0xd   :  { %912 = vmatprep.subr.bf16.mxu0 %v971_v8  ;;  %882 = vmatprep.mubr.msk.bf16.mxu1 %vm119_vm2, %v75_v39  ;;  %v323_v44 = vsel %vm311_vm1, %v319_v37, %v322_v34  ;;  %v327_v50 = vsel %vm311_vm1, %v322_v34, %v326_v45  ;;  %v332_v56 = vshll.u32 %v1102_v49, 16  ;;  %v802_v62 = vcombine.low %v444_v58, %v1046_v10  ;;  %v573_v10 = vld [vmem:[%s1215_s2 + $0x8] sm:$0xff] }
   0xe   :  { %914 = vmatprep.mubr.msk.bf16.mxu0 %vm119_vm2, %v323_v44  ;;  %v90_v57 = vrot.slane %v88_v52, 1  ;;  %v331_v59 = vrot.slane %v329_v55, 2  ;;  %v459_v3 = vrot.slane %v1054_v12, 3  ;;  %581 = vperm.xlu0 %962, %v572_v63   ;;  %v461_v13 = vrot.slane %v1063_v15, 3 }
   0xf   :  { %881 = vmatpush3.bf16.msra.mxu1 %v970_v7  ;;  %v334_v60 = vrot.slane %v332_v56, 3  ;;  %v458_v6 = vrot.slane %v802_v62, 3  ;;  %591 = vperm.xlu1 %963, %v574_v0   ;;  %v463_v16 = vrot.slane %v1102_v49, 3  ;;  %v767_v21 = vcombine.low %v1085_v42, %v1085_v42 }
  0x10   :  { %913 = vmatpush3.bf16.msra.mxu0 %v971_v8  ;;  %890 = vmatprep.subr.bf16.mxu1 %v976_v23  ;;  %v91_v1 = vsel %vm63_vm0, %v86_v51, %v90_v57  ;;  %v94_v2 = vor.u32 %v92_v53, %v90_v57  ;;  %v985_v8 = vld [vmem:[%s1213_s1 + $0x78] sm:$0xff]  }
  0x11   :  { %922 = vmatprep.subr.bf16.mxu0 %v977_v36  ;;  %v335_v4 = vor.u32 %v334_v60, %v331_v59  ;;  %v460_v9 = vsel %vm457_vm3, %v458_v6, %v459_v3  ;;  %v464_v19 = vsel %vm457_vm3, %v461_v13, %v463_v16 }
  0x12   :  { %883 = vmatmul.mubr.msk.bf16.vlgmr.msra.gmra.mrb[0].mxu1 %vm119_vm2, %v83_v40  ;;  %586 = vperm.xlu0 %962, %v573_v10  }
  0x13   :  { %891 = vmatpush3.bf16.msra.mxu1 %v976_v23  ;;  %915 = vmatmul.mubr.msk.bf16.vlgmr.msra.gmra.mrb[0].mxu0 %vm119_vm2, %v327_v50  ;;  %v336_v7 = vsel %vm311_vm1, %v326_v45, %v335_v4 }
  0x14   :  { %892 = vmatprep.subr.bf16.mxu1 %v978_v41  ;;  %923 = vmatpush3.bf16.msra.mxu0 %v977_v36 }
  0x15   :  { %924 = vmatprep.subr.bf16.mxu0 %v979_v48  ;;  %886 = vmatprep.mubr.msk.bf16.mxu1 %vm119_vm2, %v91_v1 }
  0x16   :  { %918 = vmatprep.mubr.msk.bf16.mxu0 %vm119_vm2, %v336_v7  ;;  %596 = vperm.xlu1 %963, %v575_v14  }
  0x17   :  { %893 = vmatpush3.bf16.msra.mxu1 %v978_v41  ;;  %601 = vperm.xlu0 %962, %v576_v17  }
  0x18   :  { %894 = vmatprep.subr.bf16.mxu1 %v982_v54  ;;  %925 = vmatpush3.bf16.msra.mxu0 %v979_v48 }
  0x19   :  { %926 = vmatprep.subr.bf16.mxu0 %v983_v61 }
  0x1a   :  { %887 = vmatmul.mubr.msk.bf16.gmra.mrb[4].mxu1 %vm119_vm2, %v94_v2  ;;  %606 = vperm.xlu1 %963, %v577_v18  }
  0x1b   :  { %895 = vmatpush3.bf16.msra.mxu1 %v982_v54  ;;  %919 = vmatmul.mubr.msk.bf16.gmra.mrb[4].mxu0 %vm119_vm2, %v335_v4 }
  0x1c   :  { %896 = vmatprep.subr.bf16.mxu1 %v984_v5  ;;  %927 = vmatpush3.bf16.msra.mxu0 %v983_v61 }
  0x1d   :  { %898 = vmatprep.mubr.msk.bf16.mxu1 %vm119_vm2, %v1049_v11  ;;  %928 = vmatprep.subr.bf16.mxu0 %v985_v8  ;;  %v462_v11 = vsel %vm457_vm3, %v459_v3, %v461_v13 }
  0x1e   :  { %930 = vmatprep.mubr.msk.bf16.mxu0 %vm119_vm2, %v460_v9  ;;  %611 = vperm.xlu0 %962, %v578_v20  }
  0x1f   :  { %897 = vmatpush3.bf16.msra.mxu1 %v984_v5 }
  0x20   :  { %929 = vmatpush3.bf16.msra.mxu0 %v985_v8 }
  0x22   :  { %899 = vmatmul.mubr.msk.bf16.vlgmr.msra.gmra.mrb[0].mxu1 %vm119_vm2, %v1054_v12 }
  0x23   :  { %902 = vmatprep.mubr.msk.bf16.mxu1 %vm119_vm2, %v1063_v15  ;;  %931 = vmatmul.mubr.msk.bf16.vlgmr.msra.gmra.mrb[0].mxu0 %vm119_vm2, %v462_v11 }
  0x24   :  { %934 = vmatprep.mubr.msk.bf16.mxu0 %vm119_vm2, %v464_v19 }
  0x2a   :  { %903 = vmatmul.mubr.msk.bf16.gmra.mrb[4].mxu1 %vm119_vm2, %v767_v21 }
  0x2b   :  { %935 = vmatmul.mubr.msk.bf16.gmra.mrb[4].mxu0 %vm119_vm2, %v463_v16 }
  0x8d   :  { %v582_v12 = vpop.permute.xlu0 %581 }
  0x8e   :  { %v592_v15 = vpop.permute.xlu1 %591 }
  0x91   :  { %v587_v23 = vpop.permute.xlu0 %586 }
  0x95   :  { %v597_v36 = vpop.permute.xlu1 %596 }
  0x96   :  { %v602_v37 = vpop.permute.xlu0 %601 }
  0x99   :  { %v607_v63 = vpop.permute.xlu1 %606 }
  0x9d   :  { %v612_v58 = vpop.permute.xlu0 %611 }
  0xf5   :  { %v900_v22 = vpop.f32.mrb[0].mxu1 }
  0xf6   :  { %v264_v24 = vpop.f32.mrb[1].mxu1  ;;  %v932_v25 = vpop.f32.mrb[0].mxu0 }
  0xf7   :  { %v901_v26 = vpop.f32.mrb[2].mxu1  ;;  %v1170_v27 = vadd.f32 %v932_v25, %v900_v22  ;;  %v535_v28 = vpop.f32.mrb[1].mxu0 }
  0xf8   :  { %v267_v29 = vpop.f32.mrb[3].mxu1  ;;  %v1172_v30 = vadd.f32 %v535_v28, %v264_v24  ;;  %v933_v31 = vpop.f32.mrb[2].mxu0 }
  0xf9   :  { %v1174_v32 = vadd.f32 %v933_v31, %v901_v26  ;;  %v538_v33 = vpop.f32.mrb[3].mxu0  ;;  %v616_v38 = vmul.f32 %v1170_v27, %v592_v15 }
  0xfa   :  { %v614_v34 = vmul.f32 %v1172_v30, %v582_v12  ;;  %v1177_v35 = vadd.f32 %v538_v33, %v267_v29  ;;  %v664_v33 = vlaneseq }
  0xfb   :  { %v617_v41 = vmul.f32 %v1174_v32, %v597_v36  ;;  %v635_v51 = vmul.f32 %v1170_v27, %v616_v38  ;;  %v657_v36 = vld [vmem:[%s1216_s3] sm:$0x1] }
  0xfc   :  { %v615_v39 = vmul.f32 %v1177_v35, %v587_v23  ;;  %v633_v43 = vmul.f32 %v1172_v30, %v614_v34 }
  0xfd   :  { %v904_v40 = vpop.f32.mrb[4].mxu1  ;;  %v636_v56 = vmul.f32 %v1174_v32, %v617_v41 }
  0xfe   :  { %v280_v42 = vpop.f32.mrb[5].mxu1  ;;  %v621_v44 = vadd.f32 %v615_v39, %v614_v34  ;;  %v634_v45 = vmul.f32 %v1177_v35, %v615_v39  ;;  %v936_v46 = vpop.f32.mrb[4].mxu0  ;;  %v665_v34 = vshrl.u32 %v664_v33, 7 }
  0xff   :  { %v905_v47 = vpop.f32.mrb[6].mxu1  ;;  %v1184_v48 = vadd.f32 %v936_v46, %v904_v40  ;;  %v551_v49 = vpop.f32.mrb[5].mxu0  ;;  %v661_v40 = vld [vmem:[%s1216_s3 + $0x1] sm:$0x1] }
 0x100   :  { %v283_v50 = vpop.f32.mrb[7].mxu1  ;;  %v622_v52 = vadd.f32 %v621_v44, %v616_v38  ;;  %v640_v53 = vadd.f32 %v634_v45, %v633_v43  ;;  %v943_v54 = vadd.f32 %v551_v49, %v280_v42  ;;  %v937_v55 = vpop.f32.mrb[6].mxu0 }
 0x101   :  { %v554_v57 = vpop.f32.mrb[7].mxu0  ;;  %v620_v0 = vmul.f32 %v1184_v48, %v612_v58 }
 0x102   :  { %v641_v59 = vadd.f32 %v640_v53, %v635_v51  ;;  %v618_v60 = vmul.f32 %v943_v54, %v602_v37  ;;  %v623_v61 = vadd.f32 %v622_v52, %v617_v41  ;;  %v944_v62 = vadd.f32 %v554_v57, %v283_v50 }
 0x103   :  { %v639_v8 = vmul.f32 %v1184_v48, %v620_v0  ;;  %v666_v37 = vsub.s32 0, %v665_v34 }
 0x104   :  { %v624_v1 = vadd.f32 %v623_v61, %v618_v60  ;;  %v637_v2 = vmul.f32 %v943_v54, %v618_v60  ;;  %v642_v3 = vadd.f32 %v641_v59, %v636_v56  ;;  %v619_v4 = vmul.f32 %v944_v62, %v607_v63 }
 0x106   :  { %v643_v5 = vadd.f32 %v642_v3, %v637_v2  ;;  %v625_v6 = vadd.f32 %v624_v1, %v619_v4  ;;  %v638_v7 = vmul.f32 %v944_v62, %v619_v4 }
 0x108   :  { %v626_v9 = vadd.f32 %v625_v6, %v620_v0  ;;  %v644_v10 = vadd.f32 %v643_v5, %v638_v7 }
 0x10a   :  { %v627_v13 = vrot.slane %v626_v9, 4  ;;  %v645_v14 = vadd.f32 %v644_v10, %v639_v8 }
 0x10c   :  { %v628_v16 = vadd.f32 %v627_v13, %v626_v9  ;;  %v646_v17 = vrot.slane %v645_v14, 4 }
 0x10e   :  { %v629_v11 = vrot.slane %v628_v16, 2  ;;  %v647_v18 = vadd.f32 %v646_v17, %v645_v14 }
 0x110   :  { %v630_v19 = vadd.f32 %v629_v11, %v628_v16  ;;  %v648_v20 = vrot.slane %v647_v18, 2 }
 0x112   :  { %v631_v21 = vrot.slane %v630_v19, 1  ;;  %v649_v12 = vadd.f32 %v648_v20, %v647_v18 }
 0x114   :  { %v632_v15 = vadd.f32 %v631_v21, %v630_v19  ;;  %v650_v22 = vrot.slane %v649_v12, 1 }
 0x116   :  { %v651_v23 = vadd.f32 %v650_v22, %v649_v12  ;;  %v652_v24 = vmul.f32 0.03125, %v632_v15 }
 0x118   :  { %v653_v25 = vmul.f32 0.03125, %v651_v23  ;;  %v654_v26 = vmul.f32 %v652_v24, %v652_v24 }
 0x11a   :  { %v655_v28 = vsub.f32 %v653_v25, %v654_v26 }
 0x11c   :  { %v656_v29 = vmax.f32 %v655_v28, 0.0 }
 0x11e   :  { %v658_v31 = vadd.f32 1e-05, %v656_v29 }
 0x120   :  { %988 = vrsqrt.f32 %v658_v31 }
 0x12a   :  { %v989_v38 = vpop.eup %988 }
 0x12b   :  { %v660_v39 = vmul.f32 %v989_v38, %v657_v36 }
 0x12d   :  { %v662_v41 = vmul.f32 %v660_v39, %v652_v24  ;;  %v667_v42 = vrot.slane %v660_v39, %v666_v37 }
 0x12f   :  { %v663_v43 = vsub.f32 %v661_v40, %v662_v41  ;;  %v668_v44 = vmul.f32 %v1172_v30, %v667_v42  ;;  %v669_v45 = vmul.f32 %v1177_v35, %v667_v42  ;;  %v670_v46 = vmul.f32 %v1170_v27, %v667_v42 }
 0x130   :  { %v671_v47 = vmul.f32 %v1174_v32, %v667_v42  ;;  %v672_v49 = vmul.f32 %v943_v54, %v667_v42  ;;  %v673_v50 = vmul.f32 %v944_v62, %v667_v42  ;;  %v674_v51 = vmul.f32 %v1184_v48, %v667_v42 }
 0x131   :  { %v678_v52 = vrot.slane %v663_v43, %v666_v37 }
 0x133   :  { %v679_v53 = vadd.f32 %v678_v52, %v668_v44  ;;  %v680_v55 = vadd.f32 %v678_v52, %v669_v45  ;;  %v681_v56 = vadd.f32 %v678_v52, %v670_v46  ;;  %v682_v57 = vadd.f32 %v678_v52, %v671_v47 }
 0x134   :  { %v683_v58 = vadd.f32 %v678_v52, %v672_v49  ;;  %v684_v59 = vadd.f32 %v678_v52, %v673_v50  ;;  %v685_v60 = vadd.f32 %v678_v52, %v674_v51 }
 0x135   :  { %vm686_vm4 = vcmp.gt.f32.partialorder %v679_v53, 0.0  ;;  %vm687_vm5 = vcmp.gt.f32.partialorder %v680_v55, 0.0  ;;  %vm688_vm6 = vcmp.gt.f32.partialorder %v681_v56, 0.0  ;;  %vm689_vm7 = vcmp.gt.f32.partialorder %v682_v57, 0.0 }
 0x136   :  { %vm690_vm8 = vcmp.gt.f32.partialorder %v683_v58, 0.0  ;;  %vm691_vm9 = vcmp.gt.f32.partialorder %v684_v59, 0.0  ;;  %vm692_vm10 = vcmp.gt.f32.partialorder %v685_v60, 0.0  ;;  %v693_v27 = vmul.f32 0.01, %v679_v53 }
 0x137   :  { %v694_v30 = vmul.f32 0.01, %v680_v55  ;;  %v695_v32 = vmul.f32 0.01, %v681_v56  ;;  %v696_v35 = vmul.f32 0.01, %v682_v57 }
 0x138   :  { %v697_v48 = vmul.f32 0.01, %v683_v58  ;;  %v698_v54 = vmul.f32 0.01, %v684_v59  ;;  %v699_v61 = vmul.f32 0.01, %v685_v60  ;;  %v700_v62 = vsel %vm686_vm4, %v679_v53, %v693_v27 }
 0x139   :  { %v701_v63 = vsel %vm687_vm5, %v680_v55, %v694_v30  ;;  %v702_v0 = vsel %vm688_vm6, %v681_v56, %v695_v32  ;;  %v703_v1 = vsel %vm689_vm7, %v682_v57, %v696_v35 }
 0x13a   :  { %v704_v2 = vsel %vm690_vm8, %v683_v58, %v697_v48  ;;  %v705_v3 = vsel %vm691_vm9, %v684_v59, %v698_v54  ;;  %v706_v4 = vsel %vm692_vm10, %v685_v60, %v699_v61  ;;  %v828_v5 = vpack.c.bf16 %v701_v63, %v700_v62 }
 0x13b   :  { %v824_v6 = vpack.c.bf16 %v706_v4, %v706_v4  ;;  %v833_v7 = vpack.c.bf16 %v703_v1, %v702_v0  ;;  %v838_v8 = vpack.c.bf16 %v705_v3, %v704_v2 }
 0x13c   :  { %829 = vst [vmem:[%s1217_s4] sm:$0xff] %v828_v5  }
 0x13d   :  { %840 = vst [vmem:[%s1217_s4 + $0x8] sm:$0xff] %v833_v7   ;;  %841 = vst [vmem:[%s1217_s4 + $0x10] sm:$0xff] %v838_v8  }
 0x13e   :  { %742 = vst [vmem:[%s1217_s4 + $0x18] sm:$0xf] %v824_v6 }

// kernel: attgan_forward.8
= control target key start
LH: loop header
LB: loop body
LE: loop exit
PB: predicated region body
PF: predicated region fallthrough
CT: control target
= control target key end

     0   :  { %v926_v1 = vmov 0   ;;  %vm68_vm0 = vsmask.f32 7424  ;;  %vm313_vm1 = vsmask.f32 6400  ;;  %vm453_vm2 = vcmask 1045504   ;;  %s1108_s1 = inlined_call_operand.vmem [shape: bf16[4,128,128], index: 1, kind: input, shape index: {}]   ;;  %s1109_s0 = inlined_call_operand.vmem [shape: bf16[32,128], index: 0, kind: input, shape index: {}]   ;;  %s1110_s2 = inlined_call_operand.vmem [shape: f32[24,1], index: 2, kind: input, shape index: {}]   ;;  %s1111_s3 = inlined_call_operand.vmem [shape: f32[2,128], index: 3, kind: input, shape index: {}]   ;;  %s1112_s4 = inlined_call_operand.vmem [shape: bf16[1,24,128], index: 4, kind: output, shape index: {}]  }
   0x1   :  { %v885_v0 = vld [vmem:[%s1108_s1 + $0x40] sm:$0xff]   ;;  %883 = vset.pattern.permute.xlu0 %v926_v1  ;;  %884 = vset.pattern.permute.xlu1 %v926_v1  ;;  %v887_v3 = vld [vmem:[%s1108_s1 + $0x48] sm:$0xff]   ;;  %v889_v5 = vld [vmem:[%s1108_s1 + $0x50] sm:$0xff]  }
   0x2   :  { %v886_v2 = vld [vmem:[%s1108_s1 + $0x80] sm:$0xff]   ;;  %791 = vmatprep.subr.bf16.mxu1 %v885_v0  ;;  %v888_v4 = vld [vmem:[%s1108_s1 + $0x88] sm:$0xff]   ;;  %v890_v6 = vld [vmem:[%s1108_s1 + $0x90] sm:$0xff]  }
   0x3   :  { %831 = vmatprep.subr.bf16.mxu0 %v886_v2  ;;  %792 = vmatpush3.bf16.msra.mxu1 %v885_v0  ;;  %v891_v7 = vld [vmem:[%s1108_s1 + $0x58] sm:$0xff]   ;;  %v893_v9 = vld [vmem:[%s1108_s1 + $0x60] sm:$0xff]   ;;  %v895_v11 = vld [vmem:[%s1108_s1 + $0x68] sm:$0xff]  }
   0x4   :  { %832 = vmatpush3.bf16.msra.mxu0 %v886_v2  ;;  %793 = vmatprep.subr.bf16.mxu1 %v887_v3  ;;  %v892_v8 = vld [vmem:[%s1108_s1 + $0x98] sm:$0xff]   ;;  %v894_v10 = vld [vmem:[%s1108_s1 + $0xa0] sm:$0xff]   ;;  %v896_v12 = vld [vmem:[%s1108_s1 + $0xa8] sm:$0xff]  }
   0x5   :  { %833 = vmatprep.subr.bf16.mxu0 %v888_v4  ;;  %v37_v13 = vld [vmem:[%s1109_s0] sm:$0xf]  ;;  %v994_v14 = vld [vmem:[%s1109_s0 + $0x4] sm:$0xf]  ;;  %v39_v15 = vld [vmem:[%s1109_s0 + $0x8] sm:$0xf] }
   0x6   :  { %v40_v16 = vld [vmem:[%s1109_s0 + $0xc] sm:$0x1]  ;;  %v669_v17 = vcombine.low %v37_v13, %v994_v14  ;;  %v288_v21 = vld [vmem:[%s1109_s0] sm:$0xe]  ;;  %v897_v25 = vld [vmem:[%s1108_s1 + $0x70] sm:$0xff]  }
   0x7   :  { %794 = vmatpush3.bf16.msra.mxu1 %v887_v3  ;;  %v289_v18 = vld [vmem:[%s1109_s0 + $0xc] sm:$0x3]  ;;  %v670_v19 = vcombine.low %v39_v15, %v40_v16  ;;  %v705_v24 = vcombine.low %v288_v21, %v994_v14  ;;  %v898_v29 = vld [vmem:[%s1108_s1 + $0xb0] sm:$0xff]   ;;  %v899_v33 = vld [vmem:[%s1108_s1 + $0x78] sm:$0xff]  }
   0x8   :  { %834 = vmatpush3.bf16.msra.mxu0 %v888_v4  ;;  %795 = vmatprep.subr.bf16.mxu1 %v889_v5  ;;  %v1006_v20 = vcombine.low %v39_v15, %v289_v18  ;;  %v70_v22 = vshrl.u32 %v669_v17, 16  ;;  %v72_v23 = vshll.u32 %v669_v17, 16  ;;  %v900_v41 = vld [vmem:[%s1108_s1 + $0xb8] sm:$0xff]   ;;  %v904_v46 = vld [vmem:[%s1108_s1] sm:$0xff]   ;;  %v907_v49 = vld [vmem:[%s1108_s1 + $0x8] sm:$0xff]  }
   0x9   :  { %835 = vmatprep.subr.bf16.mxu0 %v890_v6  ;;  %v77_v26 = vshll.u32 %v670_v19, 16  ;;  %v315_v31 = vshrl.u32 %v705_v24, 16  ;;  %v318_v32 = vshll.u32 %v705_v24, 16  ;;  %v81_v44 = vshrl.u32 %v670_v19, 16  ;;  %v906_v47 = vld [vmem:[%s1108_s1 + $0xc0] sm:$0xff]   ;;  %v908_v50 = vld [vmem:[%s1108_s1 + $0xc8] sm:$0xff]  }
   0xa   :  { %v323_v27 = vshrl.u32 %v1006_v20, 16  ;;  %v326_v28 = vshll.u32 %v1006_v20, 16  ;;  %v74_v30 = vrot.slane %v72_v23, 1  ;;  %v909_v51 = vld [vmem:[%s1108_s1 + $0x10] sm:$0xff]   ;;  %v921_v52 = vld [vmem:[%s1109_s0] sm:$0xff]   ;;  %v455_v56 = vrot.slane %v1006_v20, 2 }
   0xb   :  { %796 = vmatpush3.bf16.msra.mxu1 %v889_v5  ;;  %v79_v34 = vrot.slane %v77_v26, 1  ;;  %v317_v38 = vrot.slane %v315_v31, 1  ;;  %v320_v39 = vrot.slane %v318_v32, 2  ;;  %v432_v53 = vld [vmem:[%s1109_s0] sm:$0xc]  ;;  %v910_v54 = vld [vmem:[%s1108_s1 + $0xd0] sm:$0xff]  }
   0xc   :  { %836 = vmatpush3.bf16.msra.mxu0 %v890_v6  ;;  %797 = vmatprep.subr.bf16.mxu1 %v891_v7  ;;  %v325_v35 = vrot.slane %v323_v27, 1  ;;  %v328_v36 = vrot.slane %v326_v28, 2  ;;  %v75_v37 = vor.u32 %v74_v30, %v70_v22  ;;  %v731_v55 = vcombine.low %v432_v53, %v994_v14  ;;  %v558_v57 = vld [vmem:[%s1110_s2] sm:$0xff]  ;;  %v560_v58 = vld [vmem:[%s1110_s2 + $0x10] sm:$0xff]  ;;  %v559_v60 = vld [vmem:[%s1110_s2 + $0x8] sm:$0xff] }
   0xd   :  { %837 = vmatprep.subr.bf16.mxu0 %v892_v8  ;;  %v321_v43 = vor.u32 %v320_v39, %v317_v38  ;;  %v83_v48 = vor.u32 %v81_v44, %v79_v34  ;;  %563 = vperm.xlu0 %883, %v558_v57   ;;  %v911_v61 = vld [vmem:[%s1108_s1 + $0x18] sm:$0xff]   ;;  %v913_v0 = vld [vmem:[%s1108_s1 + $0x20] sm:$0xff]   ;;  %v915_v2 = vld [vmem:[%s1108_s1 + $0x28] sm:$0xff]  }
   0xe   :  { %v329_v40 = vor.u32 %v328_v36, %v325_v35  ;;  %v80_v42 = vsel %vm68_vm0, %v75_v37, %v79_v34  ;;  %v454_v59 = vrot.slane %v731_v55, 2  ;;  %573 = vperm.xlu1 %884, %v560_v58   ;;  %v912_v62 = vld [vmem:[%s1108_s1 + $0xd8] sm:$0xff]   ;;  %v914_v1 = vld [vmem:[%s1108_s1 + $0xe0] sm:$0xff]   ;;  %v916_v3 = vld [vmem:[%s1108_s1 + $0xe8] sm:$0xff]  }
   0xf   :  { %798 = vmatpush3.bf16.msra.mxu1 %v891_v7  ;;  %807 = vmatprep.mubr.bf16.mxu1 %v80_v42  ;;  %v917_v4 = vld [vmem:[%s1108_s1 + $0x30] sm:$0xff]   ;;  %v919_v6 = vld [vmem:[%s1108_s1 + $0x38] sm:$0xff]   ;;  %v603_v53 = vld [vmem:[%s1111_s3] sm:$0x1] }
  0x10   :  { %838 = vmatpush3.bf16.msra.mxu0 %v892_v8  ;;  %799 = vmatprep.subr.bf16.mxu1 %v893_v9  ;;  %v330_v45 = vsel %vm313_vm1, %v321_v43, %v329_v40  ;;  %v456_v63 = vsel %vm453_vm2, %v454_v59, %v455_v56  ;;  %v918_v5 = vld [vmem:[%s1108_s1 + $0xf0] sm:$0xff]   ;;  %v920_v7 = vld [vmem:[%s1108_s1 + $0xf8] sm:$0xff]   ;;  %v923_v8 = vld [vmem:[%s1109_s0 + $0x8] ss:$0 sps:$4 sm:$0xff]  }
  0x11   :  { %839 = vmatprep.subr.bf16.mxu0 %v894_v10  ;;  %847 = vmatprep.mubr.bf16.mxu0 %v330_v45  ;;  %v607_v57 = vld [vmem:[%s1111_s3 + $0x1] sm:$0x1] }
  0x12   :  { %568 = vperm.xlu0 %883, %v559_v60  }
  0x13   :  { %800 = vmatpush3.bf16.msra.mxu1 %v893_v9 }
  0x14   :  { %840 = vmatpush3.bf16.msra.mxu0 %v894_v10  ;;  %801 = vmatprep.subr.bf16.mxu1 %v895_v11 }
  0x15   :  { %841 = vmatprep.subr.bf16.mxu0 %v896_v12 }
  0x17   :  { %802 = vmatpush3.bf16.msra.mxu1 %v895_v11 }
  0x18   :  { %842 = vmatpush3.bf16.msra.mxu0 %v896_v12  ;;  %803 = vmatprep.subr.bf16.mxu1 %v897_v25 }
  0x19   :  { %843 = vmatprep.subr.bf16.mxu0 %v898_v29 }
  0x1b   :  { %804 = vmatpush3.bf16.msra.mxu1 %v897_v25 }
  0x1c   :  { %844 = vmatpush3.bf16.msra.mxu0 %v898_v29  ;;  %805 = vmatprep.subr.bf16.mxu1 %v899_v33 }
  0x1d   :  { %845 = vmatprep.subr.bf16.mxu0 %v900_v41 }
  0x1f   :  { %806 = vmatpush3.bf16.msra.mxu1 %v899_v33 }
  0x20   :  { %846 = vmatpush3.bf16.msra.mxu0 %v900_v41  ;;  %811 = vmatprep.subr.bf16.mxu1 %v904_v46 }
  0x21   :  { %851 = vmatprep.subr.bf16.mxu0 %v906_v47 }
  0x22   :  { %808 = vmatmul.mubr.bf16.vlgmr.msra.gmra.mrb[0].mxu1 %v83_v48 }
  0x23   :  { %812 = vmatpush3.bf16.msra.mxu1 %v904_v46  ;;  %848 = vmatmul.mubr.bf16.vlgmr.msra.gmra.mrb[0].mxu0 %v329_v40 }
  0x24   :  { %852 = vmatpush3.bf16.msra.mxu0 %v906_v47  ;;  %813 = vmatprep.subr.bf16.mxu1 %v907_v49 }
  0x25   :  { %853 = vmatprep.subr.bf16.mxu0 %v908_v50  ;;  %827 = vmatprep.mubr.bf16.mxu1 %v921_v52 }
  0x26   :  { %867 = vmatprep.mubr.bf16.mxu0 %v456_v63 }
  0x27   :  { %814 = vmatpush3.bf16.msra.mxu1 %v907_v49 }
  0x28   :  { %854 = vmatpush3.bf16.msra.mxu0 %v908_v50  ;;  %815 = vmatprep.subr.bf16.mxu1 %v909_v51 }
  0x29   :  { %855 = vmatprep.subr.bf16.mxu0 %v910_v54 }
  0x2b   :  { %816 = vmatpush3.bf16.msra.mxu1 %v909_v51  ;;  %v610_v51 = vlaneseq }
  0x2c   :  { %856 = vmatpush3.bf16.msra.mxu0 %v910_v54  ;;  %817 = vmatprep.subr.bf16.mxu1 %v911_v61 }
  0x2d   :  { %857 = vmatprep.subr.bf16.mxu0 %v912_v62  ;;  %v611_v52 = vshrl.u32 %v610_v51, 7 }
  0x2f   :  { %818 = vmatpush3.bf16.msra.mxu1 %v911_v61  ;;  %v612_v54 = vsub.s32 0, %v611_v52 }
  0x30   :  { %858 = vmatpush3.bf16.msra.mxu0 %v912_v62  ;;  %819 = vmatprep.subr.bf16.mxu1 %v913_v0 }
  0x31   :  { %859 = vmatprep.subr.bf16.mxu0 %v914_v1 }
  0x33   :  { %820 = vmatpush3.bf16.msra.mxu1 %v913_v0 }
  0x34   :  { %860 = vmatpush3.bf16.msra.mxu0 %v914_v1  ;;  %821 = vmatprep.subr.bf16.mxu1 %v915_v2 }
  0x35   :  { %861 = vmatprep.subr.bf16.mxu0 %v916_v3 }
  0x37   :  { %822 = vmatpush3.bf16.msra.mxu1 %v915_v2 }
  0x38   :  { %862 = vmatpush3.bf16.msra.mxu0 %v916_v3  ;;  %823 = vmatprep.subr.bf16.mxu1 %v917_v4 }
  0x39   :  { %863 = vmatprep.subr.bf16.mxu0 %v918_v5 }
  0x3b   :  { %824 = vmatpush3.bf16.msra.mxu1 %v917_v4 }
  0x3c   :  { %864 = vmatpush3.bf16.msra.mxu0 %v918_v5  ;;  %825 = vmatprep.subr.bf16.mxu1 %v919_v6 }
  0x3d   :  { %865 = vmatprep.subr.bf16.mxu0 %v920_v7 }
  0x3f   :  { %826 = vmatpush3.bf16.msra.mxu1 %v919_v6 }
  0x40   :  { %866 = vmatpush3.bf16.msra.mxu0 %v920_v7 }
  0x42   :  { %828 = vmatmul.mubr.bf16.vlgmr.msra.gmra.mrb[0].mxu1 %v923_v8 }
  0x43   :  { %868 = vmatmul.mubr.bf16.vlgmr.msra.gmra.mrb[0].mxu0 %v455_v56 }
  0x8c   :  { %v564_v9 = vpop.permute.xlu0 %563 }
  0x8d   :  { %v574_v19 = vpop.permute.xlu1 %573 }
  0x91   :  { %v569_v23 = vpop.permute.xlu0 %568 }
 0x115   :  { %v829_v10 = vpop.f32.mrb[0].mxu1 }
 0x116   :  { %v869_v11 = vpop.f32.mrb[0].mxu0  ;;  %v274_v12 = vpop.f32.mrb[1].mxu1 }
 0x117   :  { %v871_v13 = vadd.f32 %v869_v11, %v829_v10  ;;  %v541_v14 = vpop.f32.mrb[1].mxu0  ;;  %v830_v15 = vpop.f32.mrb[2].mxu1 }
 0x118   :  { %v872_v16 = vadd.f32 %v541_v14, %v274_v12  ;;  %v870_v17 = vpop.f32.mrb[2].mxu0  ;;  %v277_v18 = vpop.f32.mrb[3].mxu1 }
 0x119   :  { %v544_v20 = vpop.f32.mrb[3].mxu0  ;;  %v578_v24 = vmul.f32 %v871_v13, %v574_v19 }
 0x11a   :  { %v576_v21 = vmul.f32 %v872_v16, %v564_v9  ;;  %v873_v22 = vadd.f32 %v544_v20, %v277_v18 }
 0x11b   :  { %v589_v29 = vmul.f32 %v871_v13, %v578_v24 }
 0x11c   :  { %v577_v25 = vmul.f32 %v873_v22, %v569_v23  ;;  %v587_v26 = vmul.f32 %v872_v16, %v576_v21 }
 0x11e   :  { %v579_v27 = vadd.f32 %v577_v25, %v576_v21  ;;  %v588_v28 = vmul.f32 %v873_v22, %v577_v25 }
 0x120   :  { %v580_v30 = vadd.f32 %v579_v27, %v578_v24  ;;  %v590_v31 = vadd.f32 %v588_v28, %v587_v26 }
 0x122   :  { %v581_v32 = vrot.slane %v580_v30, 4  ;;  %v591_v33 = vadd.f32 %v590_v31, %v589_v29 }
 0x124   :  { %v582_v34 = vadd.f32 %v581_v32, %v580_v30  ;;  %v592_v35 = vrot.slane %v591_v33, 4 }
 0x126   :  { %v583_v36 = vrot.slane %v582_v34, 2  ;;  %v593_v37 = vadd.f32 %v592_v35, %v591_v33 }
 0x128   :  { %v584_v38 = vadd.f32 %v583_v36, %v582_v34  ;;  %v594_v39 = vrot.slane %v593_v37, 2 }
 0x12a   :  { %v585_v40 = vrot.slane %v584_v38, 1  ;;  %v595_v41 = vadd.f32 %v594_v39, %v593_v37 }
 0x12c   :  { %v586_v42 = vadd.f32 %v585_v40, %v584_v38  ;;  %v596_v43 = vrot.slane %v595_v41, 1 }
 0x12e   :  { %v597_v44 = vadd.f32 %v596_v43, %v595_v41  ;;  %v598_v45 = vmul.f32 0.125, %v586_v42 }
 0x130   :  { %v599_v46 = vmul.f32 0.125, %v597_v44  ;;  %v600_v47 = vmul.f32 %v598_v45, %v598_v45 }
 0x132   :  { %v601_v48 = vsub.f32 %v599_v46, %v600_v47 }
 0x134   :  { %v602_v49 = vmax.f32 %v601_v48, 0.0 }
 0x136   :  { %v604_v50 = vadd.f32 1e-05, %v602_v49 }
 0x138   :  { %924 = vrsqrt.f32 %v604_v50 }
 0x142   :  { %v925_v55 = vpop.eup %924 }
 0x143   :  { %v606_v56 = vmul.f32 %v925_v55, %v603_v53 }
 0x145   :  { %v608_v58 = vmul.f32 %v606_v56, %v598_v45  ;;  %v613_v59 = vrot.slane %v606_v56, %v612_v54 }
 0x147   :  { %v609_v60 = vsub.f32 %v607_v57, %v608_v58  ;;  %v614_v61 = vmul.f32 %v872_v16, %v613_v59  ;;  %v615_v62 = vmul.f32 %v873_v22, %v613_v59  ;;  %v616_v63 = vmul.f32 %v871_v13, %v613_v59 }
 0x149   :  { %v620_v0 = vrot.slane %v609_v60, %v612_v54 }
 0x14b   :  { %v621_v1 = vadd.f32 %v620_v0, %v614_v61  ;;  %v622_v2 = vadd.f32 %v620_v0, %v615_v62  ;;  %v623_v3 = vadd.f32 %v620_v0, %v616_v63 }
 0x14d   :  { %vm624_vm3 = vcmp.gt.f32.partialorder %v621_v1, 0.0  ;;  %vm625_vm4 = vcmp.gt.f32.partialorder %v622_v2, 0.0  ;;  %vm626_vm5 = vcmp.gt.f32.partialorder %v623_v3, 0.0  ;;  %v627_v4 = vmul.f32 0.01, %v621_v1 }
 0x14e   :  { %v628_v5 = vmul.f32 0.01, %v622_v2  ;;  %v629_v6 = vmul.f32 0.01, %v623_v3 }
 0x14f   :  { %v630_v7 = vsel %vm624_vm3, %v621_v1, %v627_v4 }
 0x150   :  { %v631_v8 = vsel %vm625_vm4, %v622_v2, %v628_v5  ;;  %v632_v9 = vsel %vm626_vm5, %v623_v3, %v629_v6 }
 0x151   :  { %v745_v10 = vpack.c.bf16 %v632_v9, %v632_v9  ;;  %v749_v11 = vpack.c.bf16 %v631_v8, %v630_v7 }
 0x153   :  { %750 = vst [vmem:[%s1112_s4] sm:$0xff] %v749_v11   ;;  %648 = vst [vmem:[%s1112_s4 + $0x8] sm:$0xf] %v745_v10 }

// kernel: attgan_forward.9
= control target key start
LH: loop header
LB: loop body
LE: loop exit
PB: predicated region body
PF: predicated region fallthrough
CT: control target
= control target key end

     0   :  { %vm114_vm0 = vcmask 1045504   ;;  %vm115_vm1 = vcmask 1046528   ;;  %v2869_v5 = vmov 65535   ;;  %vm57_vm2 = vsmask.f32 7424  ;;  %s3460_s1 = inlined_call_operand.vmem [shape: bf16[16,77,128], index: 1, kind: input, shape index: {}]   ;;  %s3461_s0 = inlined_call_operand.vmem [shape: bf16[48,77], index: 0, kind: input, shape index: {}]   ;;  %s3462_s2 = inlined_call_operand.vmem [shape: f32[32,1], index: 2, kind: input, shape index: {}]   ;;  %s3463_s3 = inlined_call_operand.vmem [shape: f32[2,128], index: 3, kind: input, shape index: {}]   ;;  %s3464_s4 = inlined_call_operand.vmem [shape: bf16[4,32,128], index: 4, kind: output, shape index: {}]  }
   0x1   :  { %v2773_v0 = vld [vmem:[%s3460_s1 + $0x28] sm:$0xff]   ;;  %v2775_v2 = vld [vmem:[%s3460_s1 + $0x30] sm:$0xff]   ;;  %v2777_v4 = vld [vmem:[%s3460_s1 + $0x38] sm:$0xff]   ;;  %v116_v6 = vsel %vm114_vm0, 4294967295, %v2869_v5  ;;  %vm107_vm3 = vcmask 629760   ;;  %vm810_vm5 = vcmask 1044480  }
   0x2   :  { %v2774_v1 = vld [vmem:[%s3460_s1 + $0xc8] sm:$0xff]   ;;  %2497 = vmatprep.subr.bf16.mxu0 %v2773_v0  ;;  %v2776_v3 = vld [vmem:[%s3460_s1 + $0xd0] sm:$0xff]   ;;  %v2778_v7 = vld [vmem:[%s3460_s1 + $0xd8] sm:$0xff]   ;;  %v2922_v10 = vsel %vm115_vm1, %v116_v6, 0  ;;  %vm386_vm4 = vsmask.f32 5376 }
   0x3   :  { %2553 = vmatprep.subr.bf16.mxu1 %v2774_v1  ;;  %2498 = vmatpush3.bf16.msra.mxu0 %v2773_v0  ;;  %v2779_v8 = vld [vmem:[%s3460_s1 + $0x40] sm:$0xff]   ;;  %v2781_v11 = vld [vmem:[%s3460_s1 + $0x48] sm:$0x7f]   ;;  %v2788_v32 = vld [vmem:[%s3461_s0 + $0x10] ss:$0 sps:$4 sm:$0x11]  }
   0x4   :  { %2554 = vmatpush3.bf16.msra.mxu1 %v2774_v1  ;;  %2499 = vmatprep.subr.bf16.mxu0 %v2775_v2  ;;  %v2780_v9 = vld [vmem:[%s3460_s1 + $0xe0] sm:$0xff]   ;;  %v2782_v12 = vld [vmem:[%s3460_s1 + $0xe8] sm:$0x7f]   ;;  %v119_v18 = vand.u32 %v2781_v11, %v2922_v10  ;;  %v74_v37 = vshll.u32 %v2788_v32, 16  ;;  %v529_v38 = vrot.slane %v2788_v32, 1  ;;  %v2791_v46 = vld [vmem:[%s3460_s1 + $0x10] sm:$0xff]  }
   0x5   :  { %2555 = vmatprep.subr.bf16.mxu1 %v2776_v3  ;;  %v18_v13 = vld [vmem:[%s3461_s0] sm:$0xf]  ;;  %v2936_v14 = vld [vmem:[%s3461_s0 + $0x4] sm:$0xf]  ;;  %v2941_v15 = vld [vmem:[%s3461_s0 + $0x8] sm:$0xf]  ;;  %v567_v22 = vand.u32 %v2782_v12, %v2922_v10 }
   0x6   :  { %v2946_v16 = vld [vmem:[%s3461_s0 + $0xc] sm:$0xf]  ;;  %v2028_v17 = vcombine.low %v18_v13, %v2936_v14  ;;  %v510_v20 = vld [vmem:[%s3461_s0] sm:$0xe]  ;;  %v2196_v21 = vcombine.low %v2936_v14, %v2941_v15  ;;  %v76_v41 = vrot.slane %v74_v37, 1  ;;  %v2792_v47 = vld [vmem:[%s3460_s1 + $0xb0] sm:$0xff]  }
   0x7   :  { %2500 = vmatpush3.bf16.msra.mxu0 %v2775_v2  ;;  %v2952_v19 = vcombine.low %v2941_v15, %v2946_v16  ;;  %v2102_v25 = vcombine.low %v510_v20, %v2936_v14  ;;  %v2785_v30 = vld [vmem:[%s3460_s1] sm:$0xff]   ;;  %v2789_v43 = vld [vmem:[%s3460_s1 + $0x8] sm:$0xff]   ;;  %v2793_v48 = vld [vmem:[%s3460_s1 + $0x18] sm:$0xff]  }
   0x8   :  { %2556 = vmatpush3.bf16.msra.mxu1 %v2776_v3  ;;  %2501 = vmatprep.subr.bf16.mxu0 %v2777_v4  ;;  %v59_v23 = vshrl.u32 %v2028_v17, 16  ;;  %v61_v24 = vshll.u32 %v2028_v17, 16  ;;  %v2787_v34 = vld [vmem:[%s3460_s1 + $0xa0] sm:$0xff]   ;;  %v2790_v45 = vld [vmem:[%s3460_s1 + $0xa8] sm:$0xff]   ;;  %v2794_v49 = vld [vmem:[%s3460_s1 + $0xb8] sm:$0xff]  }
   0x9   :  { %2557 = vmatprep.subr.bf16.mxu1 %v2778_v7  ;;  %v66_v26 = vshll.u32 %v2952_v19, 16  ;;  %v70_v27 = vshrl.u32 %v2952_v19, 16  ;;  %v527_v28 = vrot.slane %v2952_v19, 1  ;;  %v526_v31 = vrot.slane %v2102_v25, 1  ;;  %v2795_v50 = vld [vmem:[%s3460_s1 + $0x20] sm:$0x7f]  }
   0xa   :  { %v63_v29 = vrot.slane %v61_v24, 1  ;;  %v2796_v51 = vld [vmem:[%s3460_s1 + $0xc0] sm:$0x7f]   ;;  %v204_v52 = vand.u32 %v2795_v50, %v2922_v10  ;;  %v2797_v58 = vld [vmem:[%s3460_s1 + $0x50] sm:$0xff]   ;;  %v2799_v62 = vld [vmem:[%s3460_s1 + $0x58] sm:$0xff]   ;;  %v276_v0 = vrot.slane %v2952_v19, 2 }
   0xb   :  { %2502 = vmatpush3.bf16.msra.mxu0 %v2777_v4  ;;  %v68_v33 = vrot.slane %v66_v26, 1  ;;  %v528_v36 = vsel %vm115_vm1, %v526_v31, %v527_v28  ;;  %v530_v42 = vsel %vm115_vm1, %v527_v28, %v529_v38  ;;  %v648_v53 = vand.u32 %v2796_v51, %v2922_v10  ;;  %v255_v54 = vld [vmem:[%s3461_s0] sm:$0xc]  ;;  %v2798_v61 = vld [vmem:[%s3460_s1 + $0xf0] sm:$0xff]   ;;  %v2800_v3 = vld [vmem:[%s3460_s1 + $0xf8] sm:$0xff]  }
   0xc   :  { %2558 = vmatpush3.bf16.msra.mxu1 %v2778_v7  ;;  %2503 = vmatprep.subr.bf16.mxu0 %v2779_v8  ;;  %v64_v35 = vor.u32 %v63_v29, %v59_v23  ;;  %v2055_v55 = vcombine.low %v255_v54, %v2936_v14  ;;  %v396_v56 = vrot.slane %v66_v26, 3  ;;  %v395_v57 = vrot.slane %v70_v27, 2  ;;  %v3034_v7 = vld [vmem:[%s3461_s0 + $0x10] ss:$0 sps:$4 sm:$0x77]   ;;  %v2802_v11 = vld [vmem:[%s3460_s1 + $0x100] sm:$0xff]  }
   0xd   :  { %2559 = vmatprep.subr.bf16.mxu1 %v2780_v9  ;;  %v72_v39 = vor.u32 %v70_v27, %v68_v33  ;;  %2563 = vmatprep.mubr.msk.bf16.mxu1 %vm107_vm3, %v528_v36  ;;  %v2803_v12 = vld [vmem:[%s3460_s1 + $0x68] sm:$0xff]   ;;  %v400_v13 = vshrl.u32 %v3034_v7, 16  ;;  %v2805_v20 = vld [vmem:[%s3460_s1 + $0x70] sm:$0x7f]   ;;  %v2870_v24 = vmov 0   ;;  %v2808_v32 = vld [vmem:[%s3460_s1 + $0x78] sm:$0xff]  }
   0xe   :  { %v69_v40 = vsel %vm57_vm2, %v64_v35, %v68_v33  ;;  %v388_v59 = vshrl.u32 %v2055_v55, 16  ;;  %v391_v60 = vshll.u32 %v2055_v55, 16  ;;  %v275_v63 = vrot.slane %v2055_v55, 2  ;;  %v2810_v23 = vld [vmem:[%s3461_s0 + $0x10] ss:$0 sps:$4 sm:$0x33]   ;;  %2772 = vset.pattern.permute.xlu1 %v2870_v24  ;;  %2771 = vset.pattern.permute.xlu0 %v2870_v24 }
   0xf   :  { %2504 = vmatpush3.bf16.msra.mxu0 %v2779_v8  ;;  %2507 = vmatprep.mubr.msk.bf16.mxu0 %vm107_vm3, %v69_v40  ;;  %v77_v44 = vsel %vm57_vm2, %v72_v39, %v76_v41  ;;  %v397_v4 = vor.u32 %v396_v56, %v395_v57  ;;  %v402_v25 = vrot.slane %v400_v13, 2  ;;  %v316_v27 = vand.u32 %v2805_v20, %v2922_v10  ;;  %v795_v28 = vld [vmem:[%s3461_s0] sm:$0x8]  ;;  %v2814_v41 = vld [vmem:[%s3460_s1 + $0x88] sm:$0xff]   ;;  %v2824_v54 = vld [vmem:[%s3460_s1 + $0x210] sm:$0xff]  }
  0x10   :  { %2560 = vmatpush3.bf16.msra.mxu1 %v2780_v9  ;;  %2505 = vmatprep.subr.bf16.mxu0 %v119_v18  ;;  %v390_v1 = vrot.slane %v388_v59, 2  ;;  %v393_v2 = vrot.slane %v391_v60, 3  ;;  %v3029_v6 = vsel %vm114_vm0, %v275_v63, %v276_v0  ;;  %v2801_v9 = vld [vmem:[%s3460_s1 + $0x60] sm:$0xff]   ;;  %v2144_v31 = vcombine.low %v795_v28, %v2936_v14  ;;  %v2821_v50 = vld [vmem:[%s3460_s1 + $0x168] sm:$0xff]   ;;  %v2825_v55 = vld [vmem:[%s3460_s1 + $0x178] sm:$0xff]  }
  0x11   :  { %2561 = vmatprep.subr.bf16.mxu1 %v567_v22  ;;  %v812_v37 = vrot.slane %v2952_v19, 3  ;;  %v2812_v39 = vld [vmem:[%s3460_s1 + $0x80] sm:$0xff]   ;;  %v2822_v51 = vld [vmem:[%s3460_s1 + $0x208] sm:$0xff]   ;;  %v2826_v56 = vld [vmem:[%s3460_s1 + $0x218] sm:$0xff]  }
  0x12   :  { %v394_v5 = vor.u32 %v393_v2, %v390_v1  ;;  %v811_v36 = vrot.slane %v2144_v31, 3  ;;  %v2827_v57 = vld [vmem:[%s3460_s1 + $0x180] sm:$0xff]   ;;  %v2829_v59 = vld [vmem:[%s3460_s1 + $0x188] sm:$0x7f]   ;;  %v1732_v1 = vld [vmem:[%s3462_s2 + $0x18] sm:$0xff] }
  0x13   :  { %2506 = vmatpush3.bf16.msra.mxu0 %v119_v18  ;;  %v403_v18 = vshll.u32 %v3034_v7, 16  ;;  %v2830_v60 = vld [vmem:[%s3460_s1 + $0x228] sm:$0x7f]   ;;  %v959_v63 = vand.u32 %v2829_v59, %v2922_v10  ;;  %v2836_v13 = vld [vmem:[%s3460_s1 + $0x1f0] sm:$0xff]   ;;  %v2839_v20 = vld [vmem:[%s3460_s1 + $0x160] sm:$0x7f]  }
  0x14   :  { %2562 = vmatpush3.bf16.msra.mxu1 %v567_v22  ;;  %2511 = vmatprep.subr.bf16.mxu0 %v2785_v30  ;;  %v3038_v8 = vsel %vm386_vm4, %v394_v5, %v397_v4  ;;  %v2806_v22 = vld [vmem:[%s3460_s1 + $0x110] sm:$0x7f]   ;;  %v1730_v2 = vld [vmem:[%s3462_s2 + $0x8] sm:$0xff]  ;;  %v1040_v24 = vand.u32 %v2839_v20, %v2922_v10  ;;  %v2864_v59 = vld [vmem:[%s3460_s1 + $0x1d8] sm:$0x7f]  }
  0x15   :  { %2567 = vmatprep.subr.bf16.mxu1 %v2787_v34  ;;  %v405_v26 = vrot.slane %v403_v18, 3  ;;  %v740_v29 = vand.u32 %v2806_v22, %v2922_v10  ;;  %v2833_v5 = vld [vmem:[%s3460_s1 + $0x148] sm:$0xff]   ;;  %v2837_v18 = vld [vmem:[%s3460_s1 + $0x158] sm:$0xff]   ;;  %v2850_v15 = vld [vmem:[%s3460_s1 + $0x250] sm:$0x7f]  }
  0x16   :  { %2508 = vmatmul.mubr.msk.bf16.vlgmr.msra.gmra.mrb[0].mxu0 %vm107_vm3, %v77_v44  ;;  %v3221_v22 = vld [vmem:[%s3461_s0 + $0xc] sm:$0xff]  }
  0x17   :  { %2512 = vmatpush3.bf16.msra.mxu0 %v2785_v30  ;;  %2564 = vmatmul.mubr.msk.bf16.vlgmr.msra.gmra.mrb[0].mxu1 %vm107_vm3, %v530_v42  ;;  %v278_v30 = vrot.slane %v2810_v23, 2  ;;  %v406_v33 = vor.u32 %v405_v26, %v402_v25  ;;  %v2815_v42 = vld [vmem:[%s3460_s1 + $0x128] sm:$0xff]   ;;  %v1235_v28 = vshll.u32 %v3221_v22, 16 }
  0x18   :  { %2568 = vmatpush3.bf16.msra.mxu1 %v2787_v34  ;;  %2513 = vmatprep.subr.bf16.mxu0 %v2789_v43  ;;  %v2809_v34 = vld [vmem:[%s3460_s1 + $0x118] sm:$0xff]   ;;  %v2848_v14 = vld [vmem:[%s3460_s1 + $0x248] sm:$0xff]  }
  0x19   :  { %2569 = vmatprep.subr.bf16.mxu1 %v2790_v45  ;;  %2521 = vmatprep.mubr.msk.bf16.mxu0 %vm107_vm3, %v2028_v17  ;;  %v2804_v17 = vld [vmem:[%s3460_s1 + $0x108] sm:$0xff]   ;;  %v3080_v35 = vsel %vm114_vm0, %v276_v0, %v278_v30  ;;  %v3084_v38 = vsel %vm386_vm4, %v397_v4, %v406_v33  ;;  %v1390_v0 = vand.u32 %v2830_v60, %v2922_v10  ;;  %v2832_v4 = vld [vmem:[%s3460_s1 + $0x1e0] sm:$0xff]   ;;  %v2842_v30 = vld [vmem:[%s3460_s1 + $0x230] sm:$0xff]  }
  0x1a   :  { %2577 = vmatprep.mubr.msk.bf16.mxu1 %vm107_vm3, %v69_v40  ;;  %v2813_v40 = vld [vmem:[%s3460_s1 + $0x120] sm:$0xff]   ;;  %v2843_v33 = vld [vmem:[%s3460_s1 + $0x198] sm:$0xff]   ;;  %v2863_v60 = vld [vmem:[%s3460_s1 + $0x270] sm:$0xff]  }
  0x1b   :  { %2514 = vmatpush3.bf16.msra.mxu0 %v2789_v43  ;;  %v2816_v43 = vld [vmem:[%s3460_s1 + $0x90] sm:$0xff]  }
  0x1c   :  { %2570 = vmatpush3.bf16.msra.mxu1 %v2790_v45  ;;  %2515 = vmatprep.subr.bf16.mxu0 %v2791_v46  ;;  %v2818_v45 = vld [vmem:[%s3460_s1 + $0x98] sm:$0x7f]  }
  0x1d   :  { %2571 = vmatprep.subr.bf16.mxu1 %v2792_v47 }
  0x1f   :  { %2516 = vmatpush3.bf16.msra.mxu0 %v2791_v46  ;;  %v2819_v46 = vld [vmem:[%s3460_s1 + $0x138] sm:$0x7f]  }
  0x20   :  { %2572 = vmatpush3.bf16.msra.mxu1 %v2792_v47  ;;  %2517 = vmatprep.subr.bf16.mxu0 %v2793_v48  ;;  %v444_v47 = vand.u32 %v2818_v45, %v2922_v10 }
  0x21   :  { %2573 = vmatprep.subr.bf16.mxu1 %v2794_v49 }
  0x23   :  { %2518 = vmatpush3.bf16.msra.mxu0 %v2793_v48  ;;  %v852_v48 = vand.u32 %v2819_v46, %v2922_v10  ;;  %v2852_v46 = vld [vmem:[%s3460_s1 + $0x1b8] sm:$0xff]  }
  0x24   :  { %2574 = vmatpush3.bf16.msra.mxu1 %v2794_v49  ;;  %2519 = vmatprep.subr.bf16.mxu0 %v204_v52  ;;  %v814_v49 = vrot.slane %v3034_v7, 3  ;;  %v2834_v7 = vld [vmem:[%s3460_s1 + $0x1e8] sm:$0xff]  }
  0x25   :  { %2575 = vmatprep.subr.bf16.mxu1 %v648_v53 }
  0x27   :  { %2520 = vmatpush3.bf16.msra.mxu0 %v204_v52  ;;  %v815_v52 = vsel %vm810_vm5, %v812_v37, %v814_v49  ;;  %v2855_v49 = vld [vmem:[%s3460_s1 + $0x258] sm:$0xff]  }
  0x28   :  { %2576 = vmatpush3.bf16.msra.mxu1 %v648_v53  ;;  %2525 = vmatprep.subr.bf16.mxu0 %v2797_v58  ;;  %v2823_v53 = vld [vmem:[%s3460_s1 + $0x170] sm:$0xff]  }
  0x29   :  { %2581 = vmatprep.subr.bf16.mxu1 %v2798_v61 }
  0x2a   :  { %2522 = vmatmul.mubr.msk.bf16.vlgmr.msra.gmra.mrb[0].mxu0 %vm107_vm3, %v2952_v19  ;;  %v813_v19 = vsel %vm810_vm5, %v811_v36, %v812_v37  ;;  %v2845_v37 = vld [vmem:[%s3460_s1 + $0x1a0] sm:$0xff]  }
  0x2b   :  { %2526 = vmatpush3.bf16.msra.mxu0 %v2797_v58  ;;  %2578 = vmatmul.mubr.msk.bf16.vlgmr.msra.gmra.mrb[0].mxu1 %vm107_vm3, %v77_v44  ;;  %v2817_v44 = vld [vmem:[%s3460_s1 + $0x130] sm:$0xff]   ;;  %v2828_v58 = vld [vmem:[%s3460_s1 + $0x220] sm:$0xff]  }
  0x2c   :  { %2582 = vmatpush3.bf16.msra.mxu1 %v2798_v61  ;;  %2527 = vmatprep.subr.bf16.mxu0 %v2799_v62  ;;  %v1731_v61 = vld [vmem:[%s3462_s2 + $0x10] sm:$0xff] }
  0x2d   :  { %2583 = vmatprep.subr.bf16.mxu1 %v2800_v3  ;;  %2535 = vmatprep.mubr.msk.bf16.mxu0 %vm107_vm3, %v3029_v6 }
  0x2e   :  { %2591 = vmatprep.mubr.msk.bf16.mxu1 %vm107_vm3, %v3038_v8  ;;  %1745 = vperm.xlu1 %2772, %v1731_v61   ;;  %v2865_v61 = vld [vmem:[%s3460_s1 + $0x278] sm:$0x7f]  }
  0x2f   :  { %2528 = vmatpush3.bf16.msra.mxu0 %v2799_v62  ;;  %v1729_v62 = vld [vmem:[%s3462_s2] sm:$0xff] }
  0x30   :  { %2584 = vmatpush3.bf16.msra.mxu1 %v2800_v3  ;;  %2529 = vmatprep.subr.bf16.mxu0 %v2801_v9  ;;  %v2831_v3 = vld [vmem:[%s3460_s1 + $0x140] sm:$0xff]  }
  0x31   :  { %2585 = vmatprep.subr.bf16.mxu1 %v2802_v11  ;;  %1735 = vperm.xlu0 %2771, %v1729_v62   ;;  %v1283_v62 = vand.u32 %v2864_v59, %v2922_v10 }
  0x32   :  { %1750 = vperm.xlu1 %2772, %v1732_v1  }
  0x33   :  { %2530 = vmatpush3.bf16.msra.mxu0 %v2801_v9  ;;  %v2835_v9 = vld [vmem:[%s3460_s1 + $0x150] sm:$0xff]  }
  0x34   :  { %2586 = vmatpush3.bf16.msra.mxu1 %v2802_v11  ;;  %2531 = vmatprep.subr.bf16.mxu0 %v2803_v12  ;;  %v1198_v11 = vld [vmem:[%s3461_s0 + $0x4] sm:$0xf] }
  0x35   :  { %2587 = vmatprep.subr.bf16.mxu1 %v2804_v17  ;;  %1740 = vperm.xlu0 %2771, %v1730_v2  }
  0x37   :  { %2532 = vmatpush3.bf16.msra.mxu0 %v2803_v12  ;;  %v3196_v12 = vld [vmem:[%s3461_s0 + $0x8] sm:$0xf] }
  0x38   :  { %2588 = vmatpush3.bf16.msra.mxu1 %v2804_v17  ;;  %2533 = vmatprep.subr.bf16.mxu0 %v316_v27  ;;  %v2215_v17 = vcombine.low %v1198_v11, %v3196_v12 }
  0x39   :  { %2589 = vmatprep.subr.bf16.mxu1 %v740_v29 }
  0x3a   :  { %v1230_v23 = vshll.u32 %v2215_v17, 16  ;;  %v1228_v26 = vshrl.u32 %v2215_v17, 16 }
  0x3b   :  { %2534 = vmatpush3.bf16.msra.mxu0 %v316_v27 }
  0x3c   :  { %2590 = vmatpush3.bf16.msra.mxu1 %v740_v29  ;;  %2539 = vmatprep.subr.bf16.mxu0 %v2808_v32  ;;  %v1232_v27 = vrot.slane %v1230_v23, 1  ;;  %v2841_v29 = vld [vmem:[%s3460_s1 + $0x190] sm:$0xff]  }
  0x3d   :  { %2595 = vmatprep.subr.bf16.mxu1 %v2809_v34 }
  0x3e   :  { %2536 = vmatmul.mubr.msk.bf16.vlgmr.msra.gmra.mrb[0].mxu0 %vm107_vm3, %v3080_v35  ;;  %v1233_v31 = vor.u32 %v1232_v27, %v1228_v26 }
  0x3f   :  { %2540 = vmatpush3.bf16.msra.mxu0 %v2808_v32  ;;  %2592 = vmatmul.mubr.msk.bf16.vlgmr.msra.gmra.mrb[0].mxu1 %vm107_vm3, %v3084_v38  ;;  %v1237_v32 = vrot.slane %v1235_v28, 1 }
  0x40   :  { %2596 = vmatpush3.bf16.msra.mxu1 %v2809_v34  ;;  %2541 = vmatprep.subr.bf16.mxu0 %v2812_v39  ;;  %v2844_v34 = vld [vmem:[%s3460_s1 + $0x238] sm:$0xff]  }
  0x41   :  { %2597 = vmatprep.subr.bf16.mxu1 %v2813_v40  ;;  %2549 = vmatprep.mubr.msk.bf16.mxu0 %vm107_vm3, %v3038_v8  ;;  %v1238_v36 = vsel %vm57_vm2, %v1233_v31, %v1237_v32 }
  0x42   :  { %2605 = vmatprep.mubr.msk.bf16.mxu1 %vm107_vm3, %v813_v19 }
  0x43   :  { %2542 = vmatpush3.bf16.msra.mxu0 %v2812_v39  ;;  %v2846_v39 = vld [vmem:[%s3460_s1 + $0x240] sm:$0xff]  }
  0x44   :  { %2598 = vmatpush3.bf16.msra.mxu1 %v2813_v40  ;;  %2543 = vmatprep.subr.bf16.mxu0 %v2814_v41  ;;  %v3263_v40 = vld [vmem:[%s3461_s0 + $0x14] ss:$0 sps:$4 sm:$0x11]  }
  0x45   :  { %2599 = vmatprep.subr.bf16.mxu1 %v2815_v42 }
  0x47   :  { %2544 = vmatpush3.bf16.msra.mxu0 %v2814_v41  ;;  %v1243_v41 = vshll.u32 %v3263_v40, 16 }
  0x48   :  { %2600 = vmatpush3.bf16.msra.mxu1 %v2815_v42  ;;  %2545 = vmatprep.subr.bf16.mxu0 %v2816_v43  ;;  %v1618_v42 = vld [vmem:[%s3461_s0 + $0x4] sm:$0xe] }
  0x49   :  { %2601 = vmatprep.subr.bf16.mxu1 %v2817_v44  ;;  %v2286_v45 = vcombine.low %v1618_v42, %v3196_v12 }
  0x4b   :  { %2546 = vmatpush3.bf16.msra.mxu0 %v2816_v43  ;;  %v1563_v43 = vand.u32 %v2850_v15, %v2922_v10 }
  0x4c   :  { %2602 = vmatpush3.bf16.msra.mxu1 %v2817_v44  ;;  %2547 = vmatprep.subr.bf16.mxu0 %v444_v47  ;;  %v1091_v44 = vld [vmem:[%s3461_s0 + $0x10] sm:$0xf] }
  0x4d   :  { %2603 = vmatprep.subr.bf16.mxu1 %v852_v48 }
  0x4f   :  { %2548 = vmatpush3.bf16.msra.mxu0 %v444_v47 }
  0x50   :  { %2604 = vmatpush3.bf16.msra.mxu1 %v852_v48  ;;  %2609 = vmatprep.subr.bf16.mxu0 %v2821_v50  ;;  %v1245_v48 = vrot.slane %v1243_v41, 1 }
  0x51   :  { %2665 = vmatprep.subr.bf16.mxu1 %v2822_v51 }
  0x52   :  { %2550 = vmatmul.mubr.msk.bf16.vlgmr.msra.gmra.mrb[0].mxu0 %vm107_vm3, %v3084_v38 }
  0x53   :  { %2606 = vmatmul.mubr.msk.bf16.vlgmr.msra.gmra.mrb[0].mxu1 %vm107_vm3, %v815_v52  ;;  %2610 = vmatpush3.bf16.msra.mxu0 %v2821_v50  ;;  %v2197_v50 = vcombine.low %v2946_v16, %v1091_v44 }
  0x54   :  { %2666 = vmatpush3.bf16.msra.mxu1 %v2822_v51  ;;  %2611 = vmatprep.subr.bf16.mxu0 %v2823_v53  ;;  %v1633_v51 = vrot.slane %v2286_v45, 1 }
  0x55   :  { %2667 = vmatprep.subr.bf16.mxu1 %v2824_v54  ;;  %2619 = vmatprep.mubr.msk.bf16.mxu0 %vm107_vm3, %v3038_v8 }
  0x56   :  { %2675 = vmatprep.mubr.msk.bf16.mxu1 %vm107_vm3, %v813_v19  ;;  %v1239_v19 = vshrl.u32 %v3221_v22, 16 }
  0x57   :  { %2612 = vmatpush3.bf16.msra.mxu0 %v2823_v53 }
  0x58   :  { %2668 = vmatpush3.bf16.msra.mxu1 %v2824_v54  ;;  %2613 = vmatprep.subr.bf16.mxu0 %v2825_v55  ;;  %v1241_v47 = vor.u32 %v1239_v19, %v1237_v32  ;;  %v2858_v54 = vld [vmem:[%s3460_s1 + $0x1c0] sm:$0xff]  }
  0x59   :  { %2669 = vmatprep.subr.bf16.mxu1 %v2826_v56 }
  0x5a   :  { %v1246_v53 = vsel %vm57_vm2, %v1241_v47, %v1245_v48 }
  0x5b   :  { %2614 = vmatpush3.bf16.msra.mxu0 %v2825_v55  ;;  %v2859_v55 = vld [vmem:[%s3460_s1 + $0x260] sm:$0xff]  }
  0x5c   :  { %2670 = vmatpush3.bf16.msra.mxu1 %v2826_v56  ;;  %2615 = vmatprep.subr.bf16.mxu0 %v2827_v57  ;;  %v2860_v56 = vld [vmem:[%s3460_s1 + $0x1c8] sm:$0xff]  }
  0x5d   :  { %2671 = vmatprep.subr.bf16.mxu1 %v2828_v58 }
  0x5f   :  { %2616 = vmatpush3.bf16.msra.mxu0 %v2827_v57  ;;  %v2861_v57 = vld [vmem:[%s3460_s1 + $0x268] sm:$0xff]  }
  0x60   :  { %2672 = vmatpush3.bf16.msra.mxu1 %v2828_v58  ;;  %2617 = vmatprep.subr.bf16.mxu0 %v959_v63  ;;  %v2862_v58 = vld [vmem:[%s3460_s1 + $0x1d0] sm:$0xff]  }
  0x61   :  { %2673 = vmatprep.subr.bf16.mxu1 %v1390_v0 }
  0x63   :  { %2618 = vmatpush3.bf16.msra.mxu0 %v959_v63  ;;  %v1674_v63 = vand.u32 %v2865_v61, %v2922_v10 }
  0x64   :  { %2674 = vmatpush3.bf16.msra.mxu1 %v1390_v0  ;;  %2623 = vmatprep.subr.bf16.mxu0 %v2831_v3  ;;  %v1636_v0 = vrot.slane %v3263_v40, 1 }
  0x65   :  { %2679 = vmatprep.subr.bf16.mxu1 %v2832_v4 }
  0x66   :  { %2620 = vmatmul.mubr.msk.bf16.vlgmr.msra.gmra.mrb[4].mxu0 %vm107_vm3, %v3084_v38 }
  0x67   :  { %2624 = vmatpush3.bf16.msra.mxu0 %v2831_v3  ;;  %2676 = vmatmul.mubr.msk.bf16.vlgmr.msra.gmra.mrb[4].mxu1 %vm107_vm3, %v815_v52  ;;  %v1634_v52 = vrot.slane %v3221_v22, 1 }
  0x68   :  { %2680 = vmatpush3.bf16.msra.mxu1 %v2832_v4  ;;  %2625 = vmatprep.subr.bf16.mxu0 %v2833_v5 }
  0x69   :  { %2681 = vmatprep.subr.bf16.mxu1 %v2834_v7  ;;  %2633 = vmatprep.mubr.msk.bf16.mxu0 %vm107_vm3, %v3029_v6  ;;  %v2838_v6 = vld [vmem:[%s3460_s1 + $0x1f8] sm:$0xff]   ;;  %v1635_v16 = vsel %vm115_vm1, %v1633_v51, %v1634_v52  ;;  %v1637_v1 = vsel %vm115_vm1, %v1634_v52, %v1636_v0 }
  0x6a   :  { %2689 = vmatprep.mubr.msk.bf16.mxu1 %vm107_vm3, %v3038_v8  ;;  %v2840_v8 = vld [vmem:[%s3460_s1 + $0x200] sm:$0x7f]  }
  0x6b   :  { %2626 = vmatpush3.bf16.msra.mxu0 %v2833_v5  ;;  %v1471_v25 = vand.u32 %v2840_v8, %v2922_v10 }
  0x6c   :  { %2682 = vmatpush3.bf16.msra.mxu1 %v2834_v7  ;;  %2627 = vmatprep.subr.bf16.mxu0 %v2835_v9 }
  0x6d   :  { %2683 = vmatprep.subr.bf16.mxu1 %v2836_v13 }
  0x6f   :  { %2628 = vmatpush3.bf16.msra.mxu0 %v2835_v9 }
  0x70   :  { %2684 = vmatpush3.bf16.msra.mxu1 %v2836_v13  ;;  %2629 = vmatprep.subr.bf16.mxu0 %v2837_v18 }
  0x71   :  { %2685 = vmatprep.subr.bf16.mxu1 %v2838_v6 }
  0x73   :  { %2630 = vmatpush3.bf16.msra.mxu0 %v2837_v18 }
  0x74   :  { %2686 = vmatpush3.bf16.msra.mxu1 %v2838_v6  ;;  %2631 = vmatprep.subr.bf16.mxu0 %v1040_v24 }
  0x75   :  { %2687 = vmatprep.subr.bf16.mxu1 %v1471_v25 }
  0x77   :  { %2632 = vmatpush3.bf16.msra.mxu0 %v1040_v24 }
  0x78   :  { %2688 = vmatpush3.bf16.msra.mxu1 %v1471_v25  ;;  %2637 = vmatprep.subr.bf16.mxu0 %v2841_v29 }
  0x79   :  { %2693 = vmatprep.subr.bf16.mxu1 %v2842_v30 }
  0x7a   :  { %2634 = vmatmul.mubr.msk.bf16.vlgmr.msra.gmra.mrb[4].mxu0 %vm107_vm3, %v3080_v35  ;;  %v2847_v35 = vld [vmem:[%s3460_s1 + $0x1a8] sm:$0xff]  }
  0x7b   :  { %2638 = vmatpush3.bf16.msra.mxu0 %v2841_v29  ;;  %2690 = vmatmul.mubr.msk.bf16.vlgmr.msra.gmra.mrb[4].mxu1 %vm107_vm3, %v3084_v38  ;;  %v2849_v38 = vld [vmem:[%s3460_s1 + $0x1b0] sm:$0x7f]  }
  0x7c   :  { %2694 = vmatpush3.bf16.msra.mxu1 %v2842_v30  ;;  %2639 = vmatprep.subr.bf16.mxu0 %v2843_v33 }
  0x7d   :  { %2695 = vmatprep.subr.bf16.mxu1 %v2844_v34  ;;  %2647 = vmatprep.mubr.msk.bf16.mxu0 %vm107_vm3, %v2196_v21  ;;  %v1143_v21 = vand.u32 %v2849_v38, %v2922_v10 }
  0x7e   :  { %2703 = vmatprep.mubr.msk.bf16.mxu1 %vm107_vm3, %v1238_v36 }
  0x7f   :  { %2640 = vmatpush3.bf16.msra.mxu0 %v2843_v33 }
  0x80   :  { %2696 = vmatpush3.bf16.msra.mxu1 %v2844_v34  ;;  %2641 = vmatprep.subr.bf16.mxu0 %v2845_v37 }
  0x81   :  { %2697 = vmatprep.subr.bf16.mxu1 %v2846_v39 }
  0x83   :  { %2642 = vmatpush3.bf16.msra.mxu0 %v2845_v37 }
  0x84   :  { %2698 = vmatpush3.bf16.msra.mxu1 %v2846_v39  ;;  %2643 = vmatprep.subr.bf16.mxu0 %v2847_v35 }
  0x85   :  { %2699 = vmatprep.subr.bf16.mxu1 %v2848_v14 }
  0x87   :  { %2644 = vmatpush3.bf16.msra.mxu0 %v2847_v35 }
  0x88   :  { %2700 = vmatpush3.bf16.msra.mxu1 %v2848_v14  ;;  %2645 = vmatprep.subr.bf16.mxu0 %v1143_v21 }
  0x89   :  { %2701 = vmatprep.subr.bf16.mxu1 %v1563_v43 }
  0x8b   :  { %2646 = vmatpush3.bf16.msra.mxu0 %v1143_v21 }
  0x8c   :  { %2702 = vmatpush3.bf16.msra.mxu1 %v1563_v43  ;;  %2651 = vmatprep.subr.bf16.mxu0 %v2852_v46 }
  0x8d   :  { %2707 = vmatprep.subr.bf16.mxu1 %v2855_v49 }
  0x8e   :  { %2648 = vmatmul.mubr.msk.bf16.vlgmr.msra.gmra.mrb[4].mxu0 %vm107_vm3, %v2197_v50 }
  0x8f   :  { %2652 = vmatpush3.bf16.msra.mxu0 %v2852_v46  ;;  %2704 = vmatmul.mubr.msk.bf16.vlgmr.msra.gmra.mrb[4].mxu1 %vm107_vm3, %v1246_v53 }
  0x90   :  { %2708 = vmatpush3.bf16.msra.mxu1 %v2855_v49  ;;  %2653 = vmatprep.subr.bf16.mxu0 %v2858_v54 }
  0x91   :  { %2709 = vmatprep.subr.bf16.mxu1 %v2859_v55  ;;  %2661 = vmatprep.mubr.msk.bf16.mxu0 %vm107_vm3, %v1238_v36 }
  0x92   :  { %2717 = vmatprep.mubr.msk.bf16.mxu1 %vm107_vm3, %v1635_v16 }
  0x93   :  { %2654 = vmatpush3.bf16.msra.mxu0 %v2858_v54 }
  0x94   :  { %2710 = vmatpush3.bf16.msra.mxu1 %v2859_v55  ;;  %2655 = vmatprep.subr.bf16.mxu0 %v2860_v56 }
  0x95   :  { %2711 = vmatprep.subr.bf16.mxu1 %v2861_v57 }
  0x97   :  { %2656 = vmatpush3.bf16.msra.mxu0 %v2860_v56 }
  0x98   :  { %2712 = vmatpush3.bf16.msra.mxu1 %v2861_v57  ;;  %2657 = vmatprep.subr.bf16.mxu0 %v2862_v58 }
  0x99   :  { %2713 = vmatprep.subr.bf16.mxu1 %v2863_v60 }
  0x9b   :  { %2658 = vmatpush3.bf16.msra.mxu0 %v2862_v58 }
  0x9c   :  { %2714 = vmatpush3.bf16.msra.mxu1 %v2863_v60  ;;  %2659 = vmatprep.subr.bf16.mxu0 %v1283_v62 }
  0x9d   :  { %2715 = vmatprep.subr.bf16.mxu1 %v1674_v63 }
  0x9f   :  { %2660 = vmatpush3.bf16.msra.mxu0 %v1283_v62 }
  0xa0   :  { %2716 = vmatpush3.bf16.msra.mxu1 %v1674_v63 }
  0xa2   :  { %2662 = vmatmul.mubr.msk.bf16.vlgmr.msra.gmra.mrb[4].mxu0 %vm107_vm3, %v1246_v53 }
  0xa3   :  { %2718 = vmatmul.mubr.msk.bf16.vlgmr.msra.gmra.mrb[4].mxu1 %vm107_vm3, %v1637_v1 }
  0xad   :  { %v3326_v2 = vpop.permute.xlu1 %1745 }
  0xb0   :  { %v3328_v3 = vpop.permute.xlu0 %1735 }
  0xb1   :  { %v3330_v4 = vpop.permute.xlu1 %1750 }
  0xb4   :  { %v3334_v5 = vpop.permute.xlu0 %1740 }
 0x125   :  { %v3332_v10 = vpop.f32.mrb[0].mxu0 }
 0x126   :  { %v3336_v7 = vpop.f32.mrb[0].mxu1  ;;  %v3338_v9 = vpop.f32.mrb[1].mxu0  ;;  %v1755_v6 = vmul.f32 %v3332_v10, %v3326_v2 }
 0x127   :  { %v1753_v11 = vmul.f32 %v3328_v3, %v3338_v9  ;;  %v3342_v12 = vpop.f32.mrb[1].mxu1  ;;  %v3344_v13 = vpop.f32.mrb[2].mxu0  ;;  %v1781_v23 = vmul.f32 %v3336_v7, %v3326_v2 }
 0x128   :  { %v1779_v17 = vmul.f32 %v3328_v3, %v3342_v12  ;;  %v3348_v18 = vpop.f32.mrb[2].mxu1  ;;  %v3350_v20 = vpop.f32.mrb[3].mxu0  ;;  %v1756_v26 = vmul.f32 %v3344_v13, %v3330_v4  ;;  %v1768_v33 = vmul.f32 %v3332_v10, %v1755_v6 }
 0x129   :  { %v1754_v8 = vmul.f32 %v3334_v5, %v3350_v20  ;;  %v3356_v22 = vpop.f32.mrb[3].mxu1  ;;  %v1766_v25 = vmul.f32 %v1753_v11, %v3338_v9  ;;  %v1782_v30 = vmul.f32 %v3348_v18, %v3330_v4  ;;  %v1794_v37 = vmul.f32 %v3336_v7, %v1781_v23 }
 0x12a   :  { %v1780_v24 = vmul.f32 %v3334_v5, %v3356_v22  ;;  %v1792_v29 = vmul.f32 %v1779_v17, %v3342_v12  ;;  %v1769_v38 = vmul.f32 %v3344_v13, %v1756_v26 }
 0x12b   :  { %v1757_v27 = vadd.f32 %v1754_v8, %v1753_v11  ;;  %v1767_v28 = vmul.f32 %v1754_v8, %v3350_v20  ;;  %v1795_v15 = vmul.f32 %v3348_v18, %v1782_v30 }
 0x12c   :  { %v1783_v31 = vadd.f32 %v1780_v24, %v1779_v17  ;;  %v1793_v32 = vmul.f32 %v1780_v24, %v3356_v22 }
 0x12d   :  { %v1758_v34 = vadd.f32 %v1757_v27, %v1755_v6  ;;  %v1770_v36 = vadd.f32 %v1767_v28, %v1766_v25 }
 0x12e   :  { %v1784_v39 = vadd.f32 %v1783_v31, %v1781_v23  ;;  %v1796_v35 = vadd.f32 %v1793_v32, %v1792_v29 }
 0x12f   :  { %v1759_v40 = vadd.f32 %v1758_v34, %v1756_v26  ;;  %v1771_v14 = vadd.f32 %v1770_v36, %v1768_v33 }
 0x130   :  { %v1785_v21 = vadd.f32 %v1784_v39, %v1782_v30  ;;  %v1797_v19 = vadd.f32 %v1796_v35, %v1794_v37 }
 0x131   :  { %v1760_v41 = vrot.slane %v1759_v40, 4  ;;  %v1772_v42 = vadd.f32 %v1771_v14, %v1769_v38 }
 0x132   :  { %v1786_v43 = vrot.slane %v1785_v21, 4  ;;  %v1798_v44 = vadd.f32 %v1797_v19, %v1795_v15 }
 0x133   :  { %v1761_v45 = vadd.f32 %v1760_v41, %v1759_v40  ;;  %v1773_v46 = vrot.slane %v1772_v42, 4 }
 0x134   :  { %v1787_v47 = vadd.f32 %v1786_v43, %v1785_v21  ;;  %v1799_v48 = vrot.slane %v1798_v44, 4 }
 0x135   :  { %v1762_v49 = vrot.slane %v1761_v45, 2  ;;  %v1774_v50 = vadd.f32 %v1773_v46, %v1772_v42 }
 0x136   :  { %v1788_v51 = vrot.slane %v1787_v47, 2  ;;  %v1800_v52 = vadd.f32 %v1799_v48, %v1798_v44 }
 0x137   :  { %v1763_v53 = vadd.f32 %v1762_v49, %v1761_v45  ;;  %v1775_v54 = vrot.slane %v1774_v50, 2 }
 0x138   :  { %v1789_v55 = vadd.f32 %v1788_v51, %v1787_v47  ;;  %v1801_v16 = vrot.slane %v1800_v52, 2 }
 0x139   :  { %v1764_v56 = vrot.slane %v1763_v53, 1  ;;  %v1776_v57 = vadd.f32 %v1775_v54, %v1774_v50 }
 0x13a   :  { %v1790_v58 = vrot.slane %v1789_v55, 1  ;;  %v1802_v59 = vadd.f32 %v1801_v16, %v1800_v52 }
 0x13b   :  { %v1765_v60 = vadd.f32 %v1764_v56, %v1763_v53  ;;  %v1777_v61 = vrot.slane %v1776_v57, 1 }
 0x13c   :  { %v1791_v62 = vadd.f32 %v1790_v58, %v1789_v55  ;;  %v1803_v63 = vrot.slane %v1802_v59, 1 }
 0x13d   :  { %v1778_v0 = vadd.f32 %v1777_v61, %v1776_v57 }
 0x13e   :  { %v1804_v1 = vadd.f32 %v1803_v63, %v1802_v59  ;;  %v1805_v11 = vadd.f32 %v1791_v62, %v1765_v60 }
 0x140   :  { %v1806_v17 = vadd.f32 %v1804_v1, %v1778_v0 }
 0x175   :  { %v3374_v6 = vpop.f32.mrb[4].mxu0 }
 0x176   :  { %v3376_v8 = vpop.f32.mrb[4].mxu1  ;;  %v3378_v23 = vpop.f32.mrb[5].mxu0  ;;  %v1809_v30 = vmul.f32 %v3374_v6, %v3326_v2 }
 0x177   :  { %v1807_v24 = vmul.f32 %v3328_v3, %v3378_v23  ;;  %v3382_v25 = vpop.f32.mrb[5].mxu1  ;;  %v3384_v26 = vpop.f32.mrb[6].mxu0  ;;  %v1837_v33 = vmul.f32 %v3376_v8, %v3326_v2 }
 0x178   :  { %v1835_v27 = vmul.f32 %v3328_v3, %v3382_v25  ;;  %v3388_v28 = vpop.f32.mrb[6].mxu1  ;;  %v3390_v29 = vpop.f32.mrb[7].mxu0  ;;  %v1810_v36 = vmul.f32 %v3384_v26, %v3330_v4  ;;  %v1822_v2 = vmul.f32 %v3374_v6, %v1809_v30 }
 0x179   :  { %v1808_v31 = vmul.f32 %v3334_v5, %v3390_v29  ;;  %v3396_v32 = vpop.f32.mrb[7].mxu1  ;;  %v1820_v3 = vmul.f32 %v1807_v24, %v3378_v23  ;;  %v1838_v38 = vmul.f32 %v3388_v28, %v3330_v4  ;;  %v1850_v21 = vmul.f32 %v3376_v8, %v1837_v33 }
 0x17a   :  { %v1836_v34 = vmul.f32 %v3334_v5, %v3396_v32  ;;  %v1848_v35 = vmul.f32 %v1835_v27, %v3382_v25  ;;  %v1823_v42 = vmul.f32 %v3384_v26, %v1810_v36 }
 0x17b   :  { %v1811_v37 = vadd.f32 %v1808_v31, %v1807_v24  ;;  %v1821_v39 = vmul.f32 %v1808_v31, %v3390_v29  ;;  %v1851_v45 = vmul.f32 %v3388_v28, %v1838_v38 }
 0x17c   :  { %v1839_v40 = vadd.f32 %v1836_v34, %v1835_v27  ;;  %v1849_v14 = vmul.f32 %v1836_v34, %v3396_v32 }
 0x17d   :  { %v1812_v15 = vadd.f32 %v1811_v37, %v1809_v30  ;;  %v1824_v5 = vadd.f32 %v1821_v39, %v1820_v3 }
 0x17e   :  { %v1840_v19 = vadd.f32 %v1839_v40, %v1837_v33  ;;  %v1852_v41 = vadd.f32 %v1849_v14, %v1848_v35 }
 0x17f   :  { %v1813_v43 = vadd.f32 %v1812_v15, %v1810_v36  ;;  %v1825_v44 = vadd.f32 %v1824_v5, %v1822_v2  ;;  %v1875_v5 = vlaneseq }
 0x180   :  { %v1841_v46 = vadd.f32 %v1840_v19, %v1838_v38  ;;  %v1853_v47 = vadd.f32 %v1852_v41, %v1850_v21  ;;  %v1868_v19 = vld [vmem:[%s3463_s3] sm:$0x1] }
 0x181   :  { %v1814_v4 = vrot.slane %v1813_v43, 4  ;;  %v1826_v48 = vadd.f32 %v1825_v44, %v1823_v42  ;;  %v1876_v21 = vshrl.u32 %v1875_v5, 7 }
 0x182   :  { %v1842_v49 = vrot.slane %v1841_v46, 4  ;;  %v1854_v50 = vadd.f32 %v1853_v47, %v1851_v45 }
 0x183   :  { %v1815_v51 = vadd.f32 %v1814_v4, %v1813_v43  ;;  %v1827_v52 = vrot.slane %v1826_v48, 4  ;;  %v1877_v41 = vsub.s32 0, %v1876_v21 }
 0x184   :  { %v1843_v53 = vadd.f32 %v1842_v49, %v1841_v46  ;;  %v1855_v54 = vrot.slane %v1854_v50, 4 }
 0x185   :  { %v1816_v55 = vrot.slane %v1815_v51, 2  ;;  %v1828_v16 = vadd.f32 %v1827_v52, %v1826_v48 }
 0x186   :  { %v1844_v56 = vrot.slane %v1843_v53, 2  ;;  %v1856_v57 = vadd.f32 %v1855_v54, %v1854_v50 }
 0x187   :  { %v1817_v58 = vadd.f32 %v1816_v55, %v1815_v51  ;;  %v1829_v59 = vrot.slane %v1828_v16, 2 }
 0x188   :  { %v1845_v60 = vadd.f32 %v1844_v56, %v1843_v53  ;;  %v1857_v61 = vrot.slane %v1856_v57, 2 }
 0x189   :  { %v1818_v62 = vrot.slane %v1817_v58, 1  ;;  %v1830_v63 = vadd.f32 %v1829_v59, %v1828_v16 }
 0x18a   :  { %v1846_v0 = vrot.slane %v1845_v60, 1  ;;  %v1858_v1 = vadd.f32 %v1857_v61, %v1856_v57 }
 0x18b   :  { %v1819_v24 = vadd.f32 %v1818_v62, %v1817_v58  ;;  %v1831_v27 = vrot.slane %v1830_v63, 1 }
 0x18c   :  { %v1859_v30 = vrot.slane %v1858_v1, 1  ;;  %v1847_v34 = vadd.f32 %v1846_v0, %v1845_v60 }
 0x18d   :  { %v1832_v31 = vadd.f32 %v1831_v27, %v1830_v63  ;;  %v1833_v33 = vadd.f32 %v1819_v24, %v1805_v11 }
 0x18e   :  { %v1860_v36 = vadd.f32 %v1859_v30, %v1858_v1 }
 0x18f   :  { %v1834_v3 = vadd.f32 %v1832_v31, %v1806_v17  ;;  %v1861_v37 = vadd.f32 %v1847_v34, %v1833_v33  ;;  %v1872_v17 = vld [vmem:[%s3463_s3 + $0x1] sm:$0x1] }
 0x191   :  { %v1862_v39 = vadd.f32 %v1860_v36, %v1834_v3  ;;  %v1863_v35 = vmul.f32 0.03125, %v1861_v37 }
 0x193   :  { %v1864_v38 = vmul.f32 0.03125, %v1862_v39  ;;  %v1865_v40 = vmul.f32 %v1863_v35, %v1863_v35 }
 0x195   :  { %v1866_v14 = vsub.f32 %v1864_v38, %v1865_v40 }
 0x197   :  { %v1867_v2 = vmax.f32 %v1866_v14, 0.0 }
 0x199   :  { %v1869_v15 = vadd.f32 1e-05, %v1867_v2 }
 0x19b   :  { %2867 = vrsqrt.f32 %v1869_v15 }
 0x1a5   :  { %v2868_v11 = vpop.eup %2867 }
 0x1a6   :  { %v1871_v42 = vmul.f32 %v2868_v11, %v1868_v19 }
 0x1a8   :  { %v1873_v43 = vmul.f32 %v1871_v42, %v1863_v35  ;;  %v1878_v44 = vrot.slane %v1871_v42, %v1877_v41 }
 0x1aa   :  { %v1874_v45 = vsub.f32 %v1872_v17, %v1873_v43  ;;  %v1879_v46 = vmul.f32 %v1878_v44, %v3338_v9  ;;  %v1880_v47 = vmul.f32 %v1878_v44, %v3350_v20  ;;  %v1881_v4 = vmul.f32 %v3332_v10, %v1878_v44 }
 0x1ab   :  { %v1882_v48 = vmul.f32 %v3344_v13, %v1878_v44  ;;  %v1915_v49 = vmul.f32 %v1878_v44, %v3342_v12  ;;  %v1916_v50 = vmul.f32 %v1878_v44, %v3356_v22  ;;  %v1917_v51 = vmul.f32 %v3336_v7, %v1878_v44 }
 0x1ac   :  { %v1886_v52 = vrot.slane %v1874_v45, %v1877_v41  ;;  %v1918_v53 = vmul.f32 %v3348_v18, %v1878_v44  ;;  %v1948_v54 = vmul.f32 %v1878_v44, %v3378_v23  ;;  %v1949_v55 = vmul.f32 %v1878_v44, %v3390_v29 }
 0x1ad   :  { %v1950_v9 = vmul.f32 %v3374_v6, %v1878_v44  ;;  %v1951_v20 = vmul.f32 %v3384_v26, %v1878_v44  ;;  %v1981_v10 = vmul.f32 %v1878_v44, %v3382_v25  ;;  %v1982_v13 = vmul.f32 %v1878_v44, %v3396_v32 }
 0x1ae   :  { %v1887_v12 = vadd.f32 %v1886_v52, %v1879_v46  ;;  %v1888_v16 = vadd.f32 %v1886_v52, %v1880_v47  ;;  %v1889_v22 = vadd.f32 %v1886_v52, %v1881_v4  ;;  %v1890_v56 = vadd.f32 %v1886_v52, %v1882_v48 }
 0x1af   :  { %v1919_v7 = vadd.f32 %v1915_v49, %v1886_v52  ;;  %v1920_v57 = vadd.f32 %v1916_v50, %v1886_v52  ;;  %v1921_v58 = vadd.f32 %v1917_v51, %v1886_v52  ;;  %v1922_v18 = vadd.f32 %v1918_v53, %v1886_v52 }
 0x1b0   :  { %v1891_v59 = vmax.f32 %v1887_v12, 0.0  ;;  %v1892_v23 = vmax.f32 %v1888_v16, 0.0  ;;  %v1893_v60 = vmax.f32 %v1889_v22, 0.0  ;;  %v1894_v29 = vmax.f32 %v1890_v56, 0.0 }
 0x1b1   :  { %v1923_v61 = vmax.f32 %v1919_v7, 0.0  ;;  %v1924_v6 = vmax.f32 %v1920_v57, 0.0  ;;  %v1925_v62 = vmax.f32 %v1921_v58, 0.0  ;;  %v1926_v26 = vmax.f32 %v1922_v18, 0.0 }
 0x1b2   :  { %v2341_v63 = vpack.c.bf16 %v1892_v23, %v1891_v59  ;;  %v2346_v25 = vpack.c.bf16 %v1894_v29, %v1893_v60  ;;  %v1952_v0 = vadd.f32 %v1948_v54, %v1886_v52  ;;  %v1953_v32 = vadd.f32 %v1949_v55, %v1886_v52 }
 0x1b3   :  { %v2351_v1 = vpack.c.bf16 %v1924_v6, %v1923_v61  ;;  %v2356_v24 = vpack.c.bf16 %v1926_v26, %v1925_v62  ;;  %v1954_v27 = vadd.f32 %v1950_v9, %v1886_v52  ;;  %v1955_v30 = vadd.f32 %v1951_v20, %v1886_v52 }
 0x1b4   :  { %2342 = vst [vmem:[%s3464_s4] sm:$0xff] %v2341_v63   ;;  %2378 = vst [vmem:[%s3464_s4 + $0x8] sm:$0xff] %v2346_v25   ;;  %v1956_v31 = vmax.f32 %v1952_v0, 0.0  ;;  %v1957_v33 = vmax.f32 %v1953_v32, 0.0  ;;  %v1983_v34 = vmul.f32 %v3376_v8, %v1878_v44  ;;  %v1984_v3 = vmul.f32 %v3388_v28, %v1878_v44 }
 0x1b5   :  { %2379 = vst [vmem:[%s3464_s4 + $0x10] sm:$0xff] %v2351_v1   ;;  %2380 = vst [vmem:[%s3464_s4 + $0x18] sm:$0xff] %v2356_v24   ;;  %v1958_v36 = vmax.f32 %v1954_v27, 0.0  ;;  %v1959_v37 = vmax.f32 %v1955_v30, 0.0  ;;  %v1985_v39 = vadd.f32 %v1981_v10, %v1886_v52  ;;  %v1986_v35 = vadd.f32 %v1982_v13, %v1886_v52 }
 0x1b6   :  { %v2361_v38 = vpack.c.bf16 %v1957_v33, %v1956_v31  ;;  %v1987_v40 = vadd.f32 %v1983_v34, %v1886_v52  ;;  %v1988_v14 = vadd.f32 %v1984_v3, %v1886_v52 }
 0x1b7   :  { %v2366_v2 = vpack.c.bf16 %v1959_v37, %v1958_v36  ;;  %v1989_v15 = vmax.f32 %v1985_v39, 0.0  ;;  %v1990_v8 = vmax.f32 %v1986_v35, 0.0 }
 0x1b8   :  { %2381 = vst [vmem:[%s3464_s4 + $0x20] sm:$0xff] %v2361_v38   ;;  %v1991_v28 = vmax.f32 %v1987_v40, 0.0  ;;  %v1992_v5 = vmax.f32 %v1988_v14, 0.0 }
 0x1b9   :  { %2382 = vst [vmem:[%s3464_s4 + $0x28] sm:$0xff] %v2366_v2   ;;  %v2371_v21 = vpack.c.bf16 %v1990_v8, %v1989_v15 }
 0x1ba   :  { %v2376_v19 = vpack.c.bf16 %v1992_v5, %v1991_v28 }
 0x1bb   :  { %2383 = vst [vmem:[%s3464_s4 + $0x30] sm:$0xff] %v2371_v21  }
 0x1bc   :  { %2384 = vst [vmem:[%s3464_s4 + $0x38] sm:$0xff] %v2376_v19  }

// kernel: attgan_forward.10
= control target key start
LH: loop header
LB: loop body
LE: loop exit
PB: predicated region body
PF: predicated region fallthrough
CT: control target
= control target key end

     0   :  { %v4874_v0 = vmov 0.0   ;;  %vm4875_vm0 = vmmov 0   ;;  %vm179_vm1 = vcmask 1045504   ;;  %vm180_vm2 = vcmask 1046528   ;;  %s6318_s1 = inlined_call_operand.vmem [shape: bf16[16,109,128], index: 1, kind: input, shape index: {}]   ;;  %s6319_s0 = inlined_call_operand.vmem [shape: bf16[96,109], index: 0, kind: input, shape index: {}]   ;;  %s6320_s2 = inlined_call_operand.vmem [shape: f32[72,1], index: 2, kind: input, shape index: {}]   ;;  %s6321_s3 = inlined_call_operand.vmem [shape: f32[2,128], index: 3, kind: input, shape index: {}]   ;;  %s6322_s4 = inlined_call_operand.vmem [shape: bf16[4,72,128], index: 4, kind: output, shape index: {}]  }
   0x1   :  { %3948 = vmatprep.subr.bf16.mxu0 %v4874_v0  ;;  %4084 = vmatprep.subr.bf16.mxu1 %v4874_v0  ;;  %v4738_v1 = vld [vmem:[%s6318_s1 + $0x38] sm:$0xff]   ;;  %v4740_v3 = vld [vmem:[%s6318_s1 + $0x40] sm:$0xff]   ;;  %v4742_v5 = vld [vmem:[%s6318_s1 + $0x48] sm:$0xff]   ;;  %v4876_v9 = vmov 65535   ;;  %vm82_vm3 = vsmask.f32 7424 }
   0x2   :  { %v4739_v2 = vld [vmem:[%s6318_s1 + $0x118] sm:$0xff]   ;;  %3949 = vmatpush3.bf16.msra.mxu0 %v4738_v1  ;;  %v4741_v4 = vld [vmem:[%s6318_s1 + $0x120] sm:$0xff]   ;;  %3962 = vmatprep.mubr.msk.bf16.mxu0 %vm4875_vm0, %v4874_v0  ;;  %v4743_v6 = vld [vmem:[%s6318_s1 + $0x128] sm:$0xff]   ;;  %v181_v10 = vsel %vm179_vm1, 4294967295, %v4876_v9  ;;  %vm163_vm4 = vcmask 891904   ;;  %vm409_vm5 = vcmask 1044480  }
   0x3   :  { %4085 = vmatpush3.bf16.msra.mxu1 %v4739_v2  ;;  %3950 = vmatprep.subr.bf16.mxu0 %v4874_v0  ;;  %v4744_v7 = vld [vmem:[%s6318_s1 + $0x50] sm:$0xff]   ;;  %v4746_v11 = vld [vmem:[%s6318_s1 + $0x58] sm:$0xff]   ;;  %v18_v12 = vld [vmem:[%s6319_s0] sm:$0xf]  ;;  %v4959_v16 = vsel %vm180_vm2, %v181_v10, 0 }
   0x4   :  { %4086 = vmatprep.subr.bf16.mxu1 %v4874_v0  ;;  %4098 = vmatprep.mubr.msk.bf16.mxu1 %vm4875_vm0, %v4874_v0  ;;  %v4745_v8 = vld [vmem:[%s6318_s1 + $0x130] sm:$0xff]   ;;  %v4949_v13 = vld [vmem:[%s6319_s0 + $0x4] sm:$0xf]  ;;  %v20_v14 = vld [vmem:[%s6319_s0 + $0x8] sm:$0xf] }
   0x5   :  { %v4747_v15 = vld [vmem:[%s6318_s1 + $0x138] sm:$0xff]   ;;  %v21_v17 = vld [vmem:[%s6319_s0 + $0xc] sm:$0xf]  ;;  %v4965_v18 = vcombine.low %v18_v12, %v4949_v13  ;;  %v763_v21 = vld [vmem:[%s6319_s0] sm:$0xe]  ;;  %v5004_v35 = vcombine.low %v4949_v13, %v20_v14 }
   0x6   :  { %3951 = vmatpush3.bf16.msra.mxu0 %v4740_v3  ;;  %v4750_v19 = vld [vmem:[%s6318_s1 + $0x68] sm:$0x7f]   ;;  %v4971_v20 = vcombine.low %v20_v14, %v21_v17  ;;  %v4748_v22 = vld [vmem:[%s6318_s1 + $0x60] sm:$0xff]   ;;  %v3265_v29 = vcombine.low %v763_v21, %v4949_v13  ;;  %v22_v30 = vld [vmem:[%s6319_s0 + $0x10] sm:$0xf] }
   0x7   :  { %4087 = vmatpush3.bf16.msra.mxu1 %v4741_v4  ;;  %3952 = vmatprep.subr.bf16.mxu0 %v4874_v0  ;;  %v86_v23 = vshll.u32 %v4965_v18, 16  ;;  %v4751_v24 = vld [vmem:[%s6318_s1 + $0x148] sm:$0x7f]   ;;  %v84_v25 = vshrl.u32 %v4965_v18, 16  ;;  %v4749_v27 = vld [vmem:[%s6318_s1 + $0x140] sm:$0xff]   ;;  %v184_v36 = vand.u32 %v4750_v19, %v4959_v16  ;;  %v5034_v51 = vcombine.low %v21_v17, %v22_v30  ;;  %v4760_v60 = vld [vmem:[%s6318_s1 + $0x10] sm:$0xff]  }
   0x8   :  { %4088 = vmatprep.subr.bf16.mxu1 %v4874_v0  ;;  %v91_v26 = vshll.u32 %v4971_v20, 16  ;;  %v4997_v32 = vld [vmem:[%s6319_s0 + $0x14] sm:$0xf]  ;;  %v95_v33 = vshrl.u32 %v4971_v20, 16  ;;  %v849_v40 = vand.u32 %v4751_v24, %v4959_v16  ;;  %v783_v41 = vrot.slane %v3265_v29, 1  ;;  %v4755_v44 = vld [vmem:[%s6318_s1] sm:$0xff]  }
   0x9   :  { %v88_v28 = vrot.slane %v86_v23, 1  ;;  %v5001_v34 = vcombine.low %v22_v30, %v4997_v32  ;;  %v784_v42 = vrot.slane %v4971_v20, 1  ;;  %v24_v47 = vld [vmem:[%s6319_s0 + $0x18] sm:$0xf]  ;;  %v5026_v48 = vld [vmem:[%s6319_s0 + $0x1c] sm:$0xf] }
   0xa   :  { %3953 = vmatpush3.bf16.msra.mxu0 %v4742_v5  ;;  %v588_v31 = vrot.slane %v91_v26, 4  ;;  %v93_v38 = vrot.slane %v91_v26, 1  ;;  %v587_v39 = vrot.slane %v95_v33, 3  ;;  %v4756_v50 = vld [vmem:[%s6318_s1 + $0xe0] sm:$0xff]   ;;  %v5039_v52 = vcombine.low %v24_v47, %v5026_v48  ;;  %v4757_v53 = vld [vmem:[%s6318_s1 + $0x8] sm:$0xff]   ;;  %v4761_v5 = vld [vmem:[%s6318_s1 + $0xf0] sm:$0xff]  }
   0xb   :  { %4089 = vmatpush3.bf16.msra.mxu1 %v4743_v6  ;;  %3954 = vmatprep.subr.bf16.mxu0 %v4874_v0  ;;  %v89_v37 = vor.u32 %v88_v28, %v84_v25  ;;  %v99_v45 = vshll.u32 %v5001_v34, 16  ;;  %v785_v49 = vsel %vm180_vm2, %v783_v41, %v784_v42  ;;  %v786_v56 = vrot.slane %v5001_v34, 1  ;;  %v4759_v57 = vld [vmem:[%s6318_s1 + $0xe8] sm:$0xff]   ;;  %v5062_v61 = vld [vmem:[%s6319_s0 + $0x20] sm:$0xf]  ;;  %v4763_v10 = vld [vmem:[%s6318_s1 + $0x18] sm:$0xff]  }
   0xc   :  { %4090 = vmatprep.subr.bf16.mxu1 %v4874_v0  ;;  %v5011_v43 = vor.u32 %v588_v31, %v587_v39  ;;  %v97_v54 = vor.u32 %v95_v33, %v93_v38  ;;  %v411_v58 = vrot.slane %v4971_v20, 3  ;;  %v413_v59 = vrot.slane %v5001_v34, 3  ;;  %v41_v3 = vld [vmem:[%s6319_s0 + $0x24] sm:$0x1]  ;;  %v386_v39 = vld [vmem:[%s6319_s0] sm:$0x8] }
   0xd   :  { %v5018_v46 = vsel %vm82_vm3, %v89_v37, %v93_v38  ;;  %v101_v55 = vrot.slane %v99_v45, 1  ;;  %v103_v62 = vshrl.u32 %v5001_v34, 16  ;;  %v107_v63 = vshll.u32 %v5039_v52, 16  ;;  %v4767_v29 = vld [vmem:[%s6318_s1 + $0x100] sm:$0xff]   ;;  %v4770_v37 = vld [vmem:[%s6318_s1 + $0x30] sm:$0x7f]  }
   0xe   :  { %3955 = vmatpush3.bf16.msra.mxu0 %v4744_v7  ;;  %v5072_v1 = vsel %vm409_vm5, %v411_v58, %v413_v59  ;;  %v787_v4 = vsel %vm180_vm2, %v784_v42, %v786_v56  ;;  %v111_v7 = vshrl.u32 %v5039_v52, 16  ;;  %v5088_v9 = vcombine.low %v4997_v32, %v24_v47  ;;  %v4768_v32 = vld [vmem:[%s6318_s1 + $0x28] sm:$0xff]   ;;  %v4771_v38 = vld [vmem:[%s6318_s1 + $0x110] sm:$0x7f]  }
   0xf   :  { %4091 = vmatpush3.bf16.msra.mxu1 %v4745_v8  ;;  %3956 = vmatprep.subr.bf16.mxu0 %v4874_v0  ;;  %v5075_v2 = vsel %vm82_vm3, %v97_v54, %v101_v55  ;;  %v591_v6 = vrot.slane %v103_v62, 3  ;;  %v592_v8 = vrot.slane %v99_v45, 4  ;;  %v105_v12 = vor.u32 %v103_v62, %v101_v55  ;;  %v4772_v62 = vld [vmem:[%s6318_s1 + $0x70] sm:$0xff]  }
  0x10   :  { %4092 = vmatprep.subr.bf16.mxu1 %v4874_v0  ;;  %v109_v14 = vrot.slane %v107_v63, 1  ;;  %v595_v17 = vrot.slane %v111_v7, 3  ;;  %v788_v19 = vrot.slane %v5039_v52, 1  ;;  %v596_v21 = vrot.slane %v107_v63, 4  ;;  %v4774_v63 = vld [vmem:[%s6318_s1 + $0x78] sm:$0xff]  }
  0x11   :  { %v5126_v30 = vcombine.low %v5026_v48, %v5062_v61  ;;  %vm578_vm6 = vsmask.f32 4352  ;;  %v312_v47 = vand.u32 %v4770_v37, %v4959_v16  ;;  %v2579_v37 = vld [vmem:[%s6320_s2 + $0x20] sm:$0xff]  ;;  %vm1820_vm7 = vsmask.f32 5376 }
  0x12   :  { %3957 = vmatpush3.bf16.msra.mxu0 %v4746_v11  ;;  %v5096_v11 = vcombine.low %v5062_v61, %v41_v3  ;;  %v5110_v24 = vor.u32 %v596_v21, %v595_v17  ;;  %v5113_v25 = vsel %vm82_vm3, %v105_v12, %v109_v14  ;;  %v789_v26 = vsel %vm180_vm2, %v786_v56, %v788_v19  ;;  %v4775_v3 = vld [vmem:[%s6318_s1 + $0x158] sm:$0xff]   ;;  %v2575_v17 = vld [vmem:[%s6320_s2] sm:$0xff]  ;;  %v2576_v21 = vld [vmem:[%s6320_s2 + $0x8] sm:$0xff] }
  0x13   :  { %4093 = vmatpush3.bf16.msra.mxu1 %v4747_v15  ;;  %3958 = vmatprep.subr.bf16.mxu0 %v4874_v0  ;;  %v593_v15 = vor.u32 %v592_v8, %v591_v6  ;;  %v113_v33 = vor.u32 %v111_v7, %v109_v14  ;;  %v4782_v6 = vld [vmem:[%s6318_s1 + $0x98] sm:$0xff]   ;;  %v4785_v8 = vld [vmem:[%s6318_s1 + $0xa0] sm:$0x7f]   ;;  %v3169_v14 = vcombine.low %v5062_v61, %v5062_v61 }
  0x14   :  { %4094 = vmatprep.subr.bf16.mxu1 %v4874_v0  ;;  %v115_v23 = vshll.u32 %v5096_v11, 16  ;;  %v790_v28 = vrot.slane %v5096_v11, 1  ;;  %v4784_v7 = vld [vmem:[%s6318_s1 + $0x178] sm:$0xff]  }
  0x15   :  { %v5156_v41 = vsel %vm578_vm6, %v5011_v43, %v593_v15  ;;  %v5160_v42 = vsel %vm578_vm6, %v593_v15, %v5110_v24  ;;  %v4877_v15 = vmov 0  }
  0x16   :  { %3959 = vmatpush3.bf16.msra.mxu0 %v4748_v22  ;;  %v4764_v22 = vld [vmem:[%s6318_s1 + $0xf8] sm:$0xff]   ;;  %v117_v31 = vrot.slane %v115_v23, 1  ;;  %v791_v45 = vsel %vm180_vm2, %v788_v19, %v790_v28  ;;  %4736 = vset.pattern.permute.xlu0 %v4877_v15  ;;  %v4788_v19 = vld [vmem:[%s6318_s1 + $0xa8] sm:$0xff]   ;;  %v4790_v23 = vld [vmem:[%s6318_s1 + $0xb0] sm:$0xff]  }
  0x17   :  { %4095 = vmatpush3.bf16.msra.mxu1 %v4749_v27  ;;  %3960 = vmatprep.subr.bf16.mxu0 %v4874_v0  ;;  %v4766_v27 = vld [vmem:[%s6318_s1 + $0x20] sm:$0xff]  }
  0x18   :  { %4096 = vmatprep.subr.bf16.mxu1 %v4874_v0  ;;  %2586 = vperm.xlu0 %4736, %v2575_v17  }
  0x19   :  { %4737 = vset.pattern.permute.xlu1 %v4877_v15  ;;  %v4822_v15 = vld [vmem:[%s6318_s1 + $0x308] sm:$0x7f]  }
  0x1a   :  { %3961 = vmatpush3.bf16.msra.mxu0 %v184_v36  ;;  %v4769_v36 = vld [vmem:[%s6318_s1 + $0x108] sm:$0xff]  }
  0x1b   :  { %4097 = vmatpush3.bf16.msra.mxu1 %v849_v40  ;;  %3982 = vmatprep.subr.bf16.mxu0 %v4874_v0  ;;  %v3196_v40 = vcombine.low %v386_v39, %v4949_v13  ;;  %v119_v13 = vshrl.u32 %v5096_v11, 16  ;;  %v476_v11 = vand.u32 %v4785_v8, %v4959_v16  ;;  %v4816_v8 = vld [vmem:[%s6318_s1 + $0x218] sm:$0xff]  }
  0x1c   :  { %4118 = vmatprep.subr.bf16.mxu1 %v4874_v0  ;;  %2591 = vperm.xlu0 %4736, %v2576_v21  }
  0x1d   :  { %3963 = vmatmul.mubr.msk.bf16.vlgmr.msra.gmra.mrb[0].mxu0 %vm163_vm4, %v5018_v46  ;;  %v410_v48 = vrot.slane %v3196_v40, 3 }
  0x1e   :  { %4099 = vmatmul.mubr.msk.bf16.vlgmr.msra.gmra.mrb[0].mxu1 %vm163_vm4, %v785_v49  ;;  %3983 = vmatpush3.bf16.msra.mxu0 %v4755_v44  ;;  %v5163_v44 = vsel %vm82_vm3, %v113_v33, %v117_v31  ;;  %v580_v49 = vshrl.u32 %v3196_v40, 16  ;;  %v415_v33 = vrot.slane %v5039_v52, 3 }
  0x1f   :  { %4119 = vmatpush3.bf16.msra.mxu1 %v4756_v50  ;;  %3984 = vmatprep.subr.bf16.mxu0 %v4874_v0  ;;  %v583_v50 = vshll.u32 %v3196_v40, 16  ;;  %v5176_v54 = vsel %vm409_vm5, %v410_v48, %v411_v58  ;;  %v2580_v40 = vld [vmem:[%s6320_s2 + $0x28] sm:$0xff] }
  0x20   :  { %3966 = vmatprep.mubr.msk.bf16.mxu0 %vm4875_vm0, %v4874_v0  ;;  %4102 = vmatprep.mubr.msk.bf16.mxu1 %vm4875_vm0, %v4874_v0  ;;  %v582_v55 = vrot.slane %v580_v49, 3  ;;  %v4797_v48 = vld [vmem:[%s6318_s1 + $0xc8] sm:$0xff]  }
  0x21   :  { %4120 = vmatprep.subr.bf16.mxu1 %v4874_v0  ;;  %v585_v56 = vrot.slane %v583_v50, 4  ;;  %2606 = vperm.xlu0 %4736, %v2579_v37  }
  0x22   :  { %3985 = vmatpush3.bf16.msra.mxu0 %v4757_v53  ;;  %v965_v53 = vand.u32 %v4771_v38, %v4959_v16  ;;  %v387_v38 = vld [vmem:[%s6319_s0 + $0x24] sm:$0x7] }
  0x23   :  { %4121 = vmatpush3.bf16.msra.mxu1 %v4759_v57  ;;  %3986 = vmatprep.subr.bf16.mxu0 %v4874_v0  ;;  %v586_v57 = vor.u32 %v585_v56, %v582_v55  ;;  %v4802_v55 = vld [vmem:[%s6318_s1 + $0xd8] sm:$0x7f]  }
  0x24   :  { %4122 = vmatprep.subr.bf16.mxu1 %v4874_v0  ;;  %v2582_v56 = vld [vmem:[%s6320_s2 + $0x38] sm:$0xff] }
  0x25   :  { %3967 = vmatmul.mubr.msk.bf16.gmra.mrb[4].mxu0 %vm163_vm4, %v5075_v2  ;;  %v5189_v58 = vsel %vm578_vm6, %v586_v57, %v5011_v43  ;;  %v4773_v43 = vld [vmem:[%s6318_s1 + $0x150] sm:$0xff]  }
  0x26   :  { %4103 = vmatmul.mubr.msk.bf16.gmra.mrb[4].mxu1 %vm163_vm4, %v787_v4  ;;  %3987 = vmatpush3.bf16.msra.mxu0 %v4760_v60  ;;  %v5184_v60 = vor.u32 %v119_v13, %v117_v31  ;;  %v4778_v4 = vld [vmem:[%s6318_s1 + $0x88] sm:$0xff]   ;;  %v4801_v57 = vld [vmem:[%s6318_s1 + $0x1b0] sm:$0xff]  }
  0x27   :  { %3970 = vmatprep.mubr.msk.bf16.mxu0 %vm4875_vm0, %v4874_v0  ;;  %4106 = vmatprep.mubr.msk.bf16.mxu1 %vm4875_vm0, %v4874_v0 }
  0x28   :  { %4123 = vmatpush3.bf16.msra.mxu1 %v4761_v5  ;;  %3988 = vmatprep.subr.bf16.mxu0 %v4874_v0  ;;  %v4781_v5 = vld [vmem:[%s6318_s1 + $0x170] sm:$0xff]  }
  0x29   :  { %4124 = vmatprep.subr.bf16.mxu1 %v4874_v0 }
  0x2a   :  { %3989 = vmatpush3.bf16.msra.mxu0 %v4763_v10  ;;  %v4786_v10 = vld [vmem:[%s6318_s1 + $0x180] sm:$0x7f]  }
  0x2b   :  { %3990 = vmatprep.subr.bf16.mxu0 %v4874_v0  ;;  %v1096_v12 = vand.u32 %v4786_v10, %v4959_v16  ;;  %v4817_v10 = vld [vmem:[%s6318_s1 + $0x2f8] sm:$0xff]  }
  0x2c   :  { %4125 = vmatpush3.bf16.msra.mxu1 %v4764_v22  ;;  %v4789_v22 = vld [vmem:[%s6318_s1 + $0x188] sm:$0xff]  }
  0x2d   :  { %3971 = vmatmul.mubr.msk.bf16.gmra.mrb[8].mxu0 %vm163_vm4, %v5113_v25  ;;  %4126 = vmatprep.subr.bf16.mxu1 %v4874_v0 }
  0x2e   :  { %4107 = vmatmul.mubr.msk.bf16.gmra.mrb[8].mxu1 %vm163_vm4, %v789_v26  ;;  %3974 = vmatprep.mubr.msk.bf16.mxu0 %vm4875_vm0, %v4874_v0  ;;  %v4791_v26 = vld [vmem:[%s6318_s1 + $0x190] sm:$0xff]  }
  0x2f   :  { %4110 = vmatprep.mubr.msk.bf16.mxu1 %vm4875_vm0, %v4874_v0  ;;  %3991 = vmatpush3.bf16.msra.mxu0 %v4766_v27  ;;  %v5326_v27 = vld [vmem:[%s6319_s0 + $0x24] sm:$0xf] }
  0x30   :  { %4127 = vmatpush3.bf16.msra.mxu1 %v4767_v29  ;;  %3992 = vmatprep.subr.bf16.mxu0 %v4874_v0  ;;  %v2578_v29 = vld [vmem:[%s6320_s2 + $0x18] sm:$0xff]  ;;  %v3224_v31 = vcombine.low %v5062_v61, %v5326_v27  ;;  %v5544_v21 = vcombine.low %v5326_v27, %v5326_v27  ;;  %v4828_v27 = vld [vmem:[%s6318_s1 + $0x2b0] sm:$0xff]  }
  0x31   :  { %4128 = vmatprep.subr.bf16.mxu1 %v4874_v0 }
  0x32   :  { %v600_v39 = vshrl.u32 %v3224_v31, 16 }
  0x33   :  { %3993 = vmatpush3.bf16.msra.mxu0 %v4768_v32  ;;  %v4793_v32 = vld [vmem:[%s6318_s1 + $0x198] sm:$0xff]  }
  0x34   :  { %4129 = vmatpush3.bf16.msra.mxu1 %v4769_v36  ;;  %3994 = vmatprep.subr.bf16.mxu0 %v4874_v0  ;;  %v4794_v36 = vld [vmem:[%s6318_s1 + $0xc0] sm:$0xff]   ;;  %v602_v49 = vrot.slane %v600_v39, 3  ;;  %v4838_v39 = vld [vmem:[%s6318_s1 + $0x310] sm:$0xff]  }
  0x35   :  { %3975 = vmatmul.mubr.msk.bf16.gmra.mrb[12].mxu0 %vm163_vm4, %v5163_v44  ;;  %4130 = vmatprep.subr.bf16.mxu1 %v4874_v0 }
  0x36   :  { %4111 = vmatmul.mubr.msk.bf16.gmra.mrb[12].mxu1 %vm163_vm4, %v791_v45  ;;  %3978 = vmatprep.mubr.msk.bf16.mxu0 %vm4875_vm0, %v4874_v0  ;;  %v5375_v45 = vsel %vm409_vm5, %v413_v59, %v415_v33 }
  0x37   :  { %4114 = vmatprep.mubr.msk.bf16.mxu1 %vm4875_vm0, %v4874_v0  ;;  %3995 = vmatpush3.bf16.msra.mxu0 %v312_v47  ;;  %v3197_v47 = vcombine.low %v5062_v61, %v387_v38  ;;  %v2581_v61 = vld [vmem:[%s6320_s2 + $0x30] sm:$0xff] }
  0x38   :  { %4131 = vmatpush3.bf16.msra.mxu1 %v965_v53  ;;  %4016 = vmatprep.subr.bf16.mxu0 %v4874_v0  ;;  %v4800_v53 = vld [vmem:[%s6318_s1 + $0xd0] sm:$0xff]  }
  0x39   :  { %4152 = vmatprep.subr.bf16.mxu1 %v4874_v0  ;;  %v5392_v59 = vrot.slane %v3197_v47, 3  ;;  %2616 = vperm.xlu0 %4736, %v2581_v61   ;;  %v4846_v47 = vld [vmem:[%s6318_s1 + $0x330] sm:$0xff]  }
  0x3d   :  { %3979 = vmatmul.mubr.msk.bf16.gmra.mrb[16].mxu0 %vm163_vm4, %v5184_v60 }
  0x3e   :  { %4115 = vmatmul.mubr.msk.bf16.gmra.mrb[16].mxu1 %vm163_vm4, %v790_v28  ;;  %3996 = vmatprep.mubr.msk.bf16.mxu0 %vm4875_vm0, %v4874_v0  ;;  %v4792_v28 = vld [vmem:[%s6318_s1 + $0xb8] sm:$0xff]  }
  0x3f   :  { %4132 = vmatprep.mubr.msk.bf16.mxu1 %vm4875_vm0, %v4874_v0 }
  0x45   :  { %3997 = vmatmul.mubr.msk.bf16.vlgmr.msra.gmra.mrb[0].mxu0 %vm163_vm4, %v4965_v18  ;;  %v4776_v18 = vld [vmem:[%s6318_s1 + $0x80] sm:$0xff]  }
  0x46   :  { %4133 = vmatmul.mubr.msk.bf16.vlgmr.msra.gmra.mrb[0].mxu1 %vm163_vm4, %v5018_v46  ;;  %4017 = vmatpush3.bf16.msra.mxu0 %v4772_v62  ;;  %v4777_v46 = vld [vmem:[%s6318_s1 + $0x160] sm:$0xff]   ;;  %v5420_v62 = vsel %vm409_vm5, %v415_v33, %v5392_v59  ;;  %v4835_v33 = vld [vmem:[%s6318_s1 + $0x1f0] sm:$0x7f]  }
  0x47   :  { %4153 = vmatpush3.bf16.msra.mxu1 %v4773_v43  ;;  %4018 = vmatprep.subr.bf16.mxu0 %v4874_v0  ;;  %v1527_v37 = vand.u32 %v4835_v33, %v4959_v16 }
  0x48   :  { %4000 = vmatprep.mubr.msk.bf16.mxu0 %vm4875_vm0, %v4874_v0  ;;  %4136 = vmatprep.mubr.msk.bf16.mxu1 %vm4875_vm0, %v4874_v0 }
  0x49   :  { %4154 = vmatprep.subr.bf16.mxu1 %v4874_v0 }
  0x4a   :  { %4019 = vmatpush3.bf16.msra.mxu0 %v4774_v63  ;;  %v665_v63 = vand.u32 %v4802_v55, %v4959_v16  ;;  %v5741_v55 = vld [vmem:[%s6319_s0 + $0xc] sm:$0xff]  }
  0x4b   :  { %4155 = vmatpush3.bf16.msra.mxu1 %v4775_v3  ;;  %4020 = vmatprep.subr.bf16.mxu0 %v4874_v0 }
  0x4c   :  { %4156 = vmatprep.subr.bf16.mxu1 %v4874_v0 }
  0x4d   :  { %4001 = vmatmul.mubr.msk.bf16.gmra.mrb[4].mxu0 %vm163_vm4, %v4971_v20  ;;  %v4779_v20 = vld [vmem:[%s6318_s1 + $0x168] sm:$0xff]  }
  0x4e   :  { %4137 = vmatmul.mubr.msk.bf16.gmra.mrb[4].mxu1 %vm163_vm4, %v5075_v2  ;;  %4021 = vmatpush3.bf16.msra.mxu0 %v4776_v18  ;;  %v4780_v2 = vld [vmem:[%s6318_s1 + $0x90] sm:$0xff]   ;;  %v4805_v18 = vld [vmem:[%s6318_s1 + $0x1f8] sm:$0xff]  }
  0x4f   :  { %4004 = vmatprep.mubr.msk.bf16.mxu0 %vm4875_vm0, %v4874_v0  ;;  %4140 = vmatprep.mubr.msk.bf16.mxu1 %vm4875_vm0, %v4874_v0 }
  0x50   :  { %4157 = vmatpush3.bf16.msra.mxu1 %v4777_v46  ;;  %4022 = vmatprep.subr.bf16.mxu0 %v4874_v0  ;;  %v4806_v46 = vld [vmem:[%s6318_s1 + $0x2d8] sm:$0xff]  }
  0x51   :  { %4158 = vmatprep.subr.bf16.mxu1 %v4874_v0 }
  0x52   :  { %4023 = vmatpush3.bf16.msra.mxu0 %v4778_v4  ;;  %v4807_v4 = vld [vmem:[%s6318_s1 + $0x200] sm:$0xff]  }
  0x53   :  { %4024 = vmatprep.subr.bf16.mxu0 %v4874_v0 }
  0x54   :  { %4159 = vmatpush3.bf16.msra.mxu1 %v4779_v20  ;;  %v4809_v20 = vld [vmem:[%s6318_s1 + $0x2e0] sm:$0xff]  }
  0x55   :  { %4005 = vmatmul.mubr.msk.bf16.gmra.mrb[8].mxu0 %vm163_vm4, %v5001_v34  ;;  %4160 = vmatprep.subr.bf16.mxu1 %v4874_v0  ;;  %v4799_v34 = vld [vmem:[%s6318_s1 + $0x1a8] sm:$0xff]  }
  0x56   :  { %4141 = vmatmul.mubr.msk.bf16.gmra.mrb[8].mxu1 %vm163_vm4, %v5113_v25  ;;  %4008 = vmatprep.mubr.msk.bf16.mxu0 %vm4875_vm0, %v4874_v0  ;;  %v2577_v25 = vld [vmem:[%s6320_s2 + $0x10] sm:$0xff] }
  0x57   :  { %4144 = vmatprep.mubr.msk.bf16.mxu1 %vm4875_vm0, %v4874_v0  ;;  %4025 = vmatpush3.bf16.msra.mxu0 %v4780_v2  ;;  %v4810_v2 = vld [vmem:[%s6318_s1 + $0x208] sm:$0xff]  }
  0x58   :  { %4161 = vmatpush3.bf16.msra.mxu1 %v4781_v5  ;;  %4026 = vmatprep.subr.bf16.mxu0 %v4874_v0  ;;  %v4811_v5 = vld [vmem:[%s6318_s1 + $0x2e8] sm:$0xff]  }
  0x59   :  { %4162 = vmatprep.subr.bf16.mxu1 %v4874_v0  ;;  %2596 = vperm.xlu1 %4737, %v2577_v25   ;;  %v4825_v25 = vld [vmem:[%s6318_s1 + $0x1c8] sm:$0xff]  }
  0x5b   :  { %4027 = vmatpush3.bf16.msra.mxu0 %v4782_v6  ;;  %v4813_v6 = vld [vmem:[%s6318_s1 + $0x210] sm:$0xff]  }
  0x5c   :  { %4163 = vmatpush3.bf16.msra.mxu1 %v4784_v7  ;;  %4028 = vmatprep.subr.bf16.mxu0 %v4874_v0  ;;  %v4814_v7 = vld [vmem:[%s6318_s1 + $0x2f0] sm:$0xff]  }
  0x5d   :  { %4009 = vmatmul.mubr.msk.bf16.gmra.mrb[12].mxu0 %vm163_vm4, %v5039_v52  ;;  %4164 = vmatprep.subr.bf16.mxu1 %v4874_v0  ;;  %v603_v52 = vshll.u32 %v3224_v31, 16  ;;  %v4832_v31 = vld [vmem:[%s6318_s1 + $0x2c0] sm:$0xff]  }
  0x5e   :  { %4145 = vmatmul.mubr.msk.bf16.gmra.mrb[12].mxu1 %vm163_vm4, %v5163_v44  ;;  %4012 = vmatprep.mubr.msk.bf16.mxu0 %vm4875_vm0, %v4874_v0  ;;  %v4795_v44 = vld [vmem:[%s6318_s1 + $0x1a0] sm:$0xff]  }
  0x5f   :  { %4148 = vmatprep.mubr.msk.bf16.mxu1 %vm4875_vm0, %v4874_v0  ;;  %4029 = vmatpush3.bf16.msra.mxu0 %v476_v11  ;;  %v605_v50 = vrot.slane %v603_v52, 4  ;;  %v4818_v11 = vld [vmem:[%s6318_s1 + $0x220] sm:$0xff]   ;;  %v4839_v52 = vld [vmem:[%s6318_s1 + $0x238] sm:$0xff]  }
  0x60   :  { %4165 = vmatpush3.bf16.msra.mxu1 %v1096_v12  ;;  %4050 = vmatprep.subr.bf16.mxu0 %v4874_v0  ;;  %v4821_v12 = vld [vmem:[%s6318_s1 + $0x228] sm:$0x7f]  }
  0x61   :  { %4186 = vmatprep.subr.bf16.mxu1 %v4874_v0  ;;  %2601 = vperm.xlu1 %4737, %v2578_v29   ;;  %v5399_v13 = vor.u32 %v605_v50, %v602_v49  ;;  %v1411_v17 = vand.u32 %v4821_v12, %v4959_v16  ;;  %v4830_v29 = vld [vmem:[%s6318_s1 + $0x2b8] sm:$0xff]   ;;  %v1601_v49 = vld [vmem:[%s6319_s0 + $0x4] sm:$0xc] }
  0x62   :  { %v4850_v50 = vld [vmem:[%s6318_s1 + $0x340] sm:$0x7f]  }
  0x63   :  { %v5425_v43 = vsel %vm578_vm6, %v5110_v24, %v5399_v13  ;;  %v2583_v24 = vld [vmem:[%s6320_s2 + $0x40] sm:$0xff] }
  0x64   :  { %2626 = vperm.xlu0 %4736, %v2583_v24  }
  0x65   :  { %4013 = vmatmul.mubr.msk.bf16.gmra.mrb[16].mxu0 %vm163_vm4, %v3169_v14  ;;  %2611 = vperm.xlu1 %4737, %v2580_v40   ;;  %v4820_v14 = vld [vmem:[%s6318_s1 + $0x300] sm:$0xff]   ;;  %v4840_v40 = vld [vmem:[%s6318_s1 + $0x318] sm:$0xff]  }
  0x66   :  { %4149 = vmatmul.mubr.msk.bf16.gmra.mrb[16].mxu1 %vm163_vm4, %v5184_v60  ;;  %4030 = vmatprep.mubr.msk.bf16.mxu0 %vm4875_vm0, %v4874_v0  ;;  %v4803_v60 = vld [vmem:[%s6318_s1 + $0x1b8] sm:$0x7f]  }
  0x67   :  { %4166 = vmatprep.mubr.msk.bf16.mxu1 %vm4875_vm0, %v4874_v0  ;;  %v1256_v3 = vand.u32 %v4803_v60, %v4959_v16 }
  0x69   :  { %2621 = vperm.xlu1 %4737, %v2582_v56   ;;  %v2324_v56 = vand.u32 %v4850_v50, %v4959_v16  ;;  %v4870_v50 = vld [vmem:[%s6318_s1 + $0x378] sm:$0x7f]  }
  0x6d   :  { %4031 = vmatmul.mubr.msk.bf16.vlgmr.msra.gmra.mrb[0].mxu0 %vm163_vm4, %v5176_v54 }
  0x6e   :  { %4167 = vmatmul.mubr.msk.bf16.vlgmr.msra.gmra.mrb[0].mxu1 %vm163_vm4, %v5189_v58  ;;  %4051 = vmatpush3.bf16.msra.mxu0 %v4788_v19  ;;  %v2077_v19 = vand.u32 %v4822_v15, %v4959_v16  ;;  %v4855_v15 = vld [vmem:[%s6318_s1 + $0x270] sm:$0xff]  }
  0x6f   :  { %4187 = vmatpush3.bf16.msra.mxu1 %v4789_v22  ;;  %4052 = vmatprep.subr.bf16.mxu0 %v4874_v0  ;;  %v4823_v22 = vld [vmem:[%s6318_s1 + $0x1c0] sm:$0xff]  }
  0x70   :  { %4034 = vmatprep.mubr.msk.bf16.mxu0 %vm4875_vm0, %v4874_v0  ;;  %4170 = vmatprep.mubr.msk.bf16.mxu1 %vm4875_vm0, %v4874_v0 }
  0x71   :  { %4188 = vmatprep.subr.bf16.mxu1 %v4874_v0 }
  0x72   :  { %4053 = vmatpush3.bf16.msra.mxu0 %v4790_v23  ;;  %v4824_v23 = vld [vmem:[%s6318_s1 + $0x2a0] sm:$0xff]  }
  0x73   :  { %4189 = vmatpush3.bf16.msra.mxu1 %v4791_v26  ;;  %4054 = vmatprep.subr.bf16.mxu0 %v4874_v0  ;;  %v4826_v26 = vld [vmem:[%s6318_s1 + $0x2a8] sm:$0xff]  }
  0x74   :  { %4190 = vmatprep.subr.bf16.mxu1 %v4874_v0 }
  0x75   :  { %4035 = vmatmul.mubr.msk.bf16.gmra.mrb[4].mxu0 %vm163_vm4, %v5072_v1 }
  0x76   :  { %4171 = vmatmul.mubr.msk.bf16.gmra.mrb[4].mxu1 %vm163_vm4, %v5156_v41  ;;  %4055 = vmatpush3.bf16.msra.mxu0 %v4792_v28  ;;  %v4829_v28 = vld [vmem:[%s6318_s1 + $0x1d8] sm:$0xff]  }
  0x77   :  { %4038 = vmatprep.mubr.msk.bf16.mxu0 %vm4875_vm0, %v4874_v0  ;;  %4174 = vmatprep.mubr.msk.bf16.mxu1 %vm4875_vm0, %v4874_v0 }
  0x78   :  { %4191 = vmatpush3.bf16.msra.mxu1 %v4793_v32  ;;  %4056 = vmatprep.subr.bf16.mxu0 %v4874_v0  ;;  %v4833_v32 = vld [vmem:[%s6318_s1 + $0x1e8] sm:$0xff]  }
  0x79   :  { %4192 = vmatprep.subr.bf16.mxu1 %v4874_v0 }
  0x7a   :  { %4057 = vmatpush3.bf16.msra.mxu0 %v4794_v36  ;;  %v4836_v36 = vld [vmem:[%s6318_s1 + $0x2d0] sm:$0x7f]  }
  0x7b   :  { %4058 = vmatprep.subr.bf16.mxu0 %v4874_v0  ;;  %v2193_v38 = vand.u32 %v4836_v36, %v4959_v16 }
  0x7c   :  { %4193 = vmatpush3.bf16.msra.mxu1 %v4795_v44  ;;  %v4843_v44 = vld [vmem:[%s6318_s1 + $0x248] sm:$0xff]  }
  0x7d   :  { %4039 = vmatmul.mubr.msk.bf16.gmra.mrb[8].mxu0 %vm163_vm4, %v5375_v45  ;;  %4194 = vmatprep.subr.bf16.mxu1 %v4874_v0 }
  0x7e   :  { %4175 = vmatmul.mubr.msk.bf16.gmra.mrb[8].mxu1 %vm163_vm4, %v5160_v42  ;;  %4042 = vmatprep.mubr.msk.bf16.mxu0 %vm4875_vm0, %v4874_v0 }
  0x7f   :  { %4178 = vmatprep.mubr.msk.bf16.mxu1 %vm4875_vm0, %v4874_v0  ;;  %4059 = vmatpush3.bf16.msra.mxu0 %v4797_v48  ;;  %v4847_v48 = vld [vmem:[%s6318_s1 + $0x258] sm:$0xff]  }
  0x80   :  { %4195 = vmatpush3.bf16.msra.mxu1 %v4799_v34  ;;  %4060 = vmatprep.subr.bf16.mxu0 %v4874_v0  ;;  %v5733_v34 = vld [vmem:[%s6319_s0 + $0x8] sm:$0xf] }
  0x81   :  { %4196 = vmatprep.subr.bf16.mxu1 %v4874_v0 }
  0x83   :  { %4061 = vmatpush3.bf16.msra.mxu0 %v4800_v53  ;;  %v3413_v53 = vcombine.low %v1601_v49, %v5733_v34  ;;  %v4869_v49 = vld [vmem:[%s6318_s1 + $0x298] sm:$0x7f]  }
  0x84   :  { %4197 = vmatpush3.bf16.msra.mxu1 %v4801_v57  ;;  %4062 = vmatprep.subr.bf16.mxu0 %v4874_v0 }
  0x85   :  { %4043 = vmatmul.mubr.msk.bf16.gmra.mrb[12].mxu0 %vm163_vm4, %v5420_v62  ;;  %4198 = vmatprep.subr.bf16.mxu1 %v4874_v0  ;;  %v1822_v57 = vshrl.u32 %v3413_v53, 16  ;;  %v1825_v60 = vshll.u32 %v3413_v53, 16 }
  0x86   :  { %4179 = vmatmul.mubr.msk.bf16.gmra.mrb[12].mxu1 %vm163_vm4, %v5425_v43  ;;  %4046 = vmatprep.mubr.msk.bf16.mxu0 %vm4875_vm0, %v4874_v0 }
  0x87   :  { %4182 = vmatprep.mubr.msk.bf16.mxu1 %vm4875_vm0, %v4874_v0  ;;  %4063 = vmatpush3.bf16.msra.mxu0 %v665_v63  ;;  %v1830_v63 = vshrl.u32 %v5741_v55, 16 }
  0x88   :  { %4199 = vmatpush3.bf16.msra.mxu1 %v1256_v3  ;;  %4220 = vmatprep.subr.bf16.mxu0 %v4874_v0  ;;  %v1833_v3 = vshll.u32 %v5741_v55, 16 }
  0x89   :  { %4356 = vmatprep.subr.bf16.mxu1 %v4874_v0  ;;  %v1832_v24 = vrot.slane %v1830_v63, 2 }
  0x8d   :  { %4047 = vmatmul.mubr.msk.bf16.gmra.mrb[16].mxu0 %vm163_vm4, %v5392_v59 }
  0x8e   :  { %4183 = vmatmul.mubr.msk.bf16.gmra.mrb[16].mxu1 %vm163_vm4, %v5399_v13  ;;  %4064 = vmatprep.mubr.msk.bf16.mxu0 %vm4875_vm0, %v4874_v0 }
  0x8f   :  { %4200 = vmatprep.mubr.msk.bf16.mxu1 %vm4875_vm0, %v4874_v0 }
  0x95   :  { %4065 = vmatmul.mubr.msk.bf16.vlgmr.msra.gmra.mrb[0].mxu0 %vm163_vm4, %v5189_v58 }
  0x96   :  { %4201 = vmatmul.mubr.msk.bf16.vlgmr.msra.gmra.mrb[0].mxu1 %vm163_vm4, %v5004_v35  ;;  %4221 = vmatpush3.bf16.msra.mxu0 %v4805_v18  ;;  %v1835_v18 = vrot.slane %v1833_v3, 3  ;;  %v2427_v3 = vrot.slane %v5741_v55, 3 }
  0x97   :  { %4357 = vmatpush3.bf16.msra.mxu1 %v4806_v46  ;;  %4222 = vmatprep.subr.bf16.mxu0 %v4874_v0  ;;  %v5761_v46 = vld [vmem:[%s6319_s0 + $0x14] sm:$0xff]  }
  0x98   :  { %4068 = vmatprep.mubr.msk.bf16.mxu0 %vm4875_vm0, %v4874_v0  ;;  %4204 = vmatprep.mubr.msk.bf16.mxu1 %vm4875_vm0, %v4874_v0 }
  0x99   :  { %4358 = vmatprep.subr.bf16.mxu1 %v4874_v0 }
  0x9a   :  { %4223 = vmatpush3.bf16.msra.mxu0 %v4807_v4  ;;  %v1652_v4 = vrot.slane %v3413_v53, 2 }
  0x9b   :  { %4359 = vmatpush3.bf16.msra.mxu1 %v4809_v20  ;;  %4224 = vmatprep.subr.bf16.mxu0 %v4874_v0  ;;  %v1653_v20 = vrot.slane %v5741_v55, 2 }
  0x9c   :  { %4360 = vmatprep.subr.bf16.mxu1 %v4874_v0 }
  0x9d   :  { %4069 = vmatmul.mubr.msk.bf16.gmra.mrb[4].mxu0 %vm163_vm4, %v5156_v41 }
  0x9e   :  { %4205 = vmatmul.mubr.msk.bf16.gmra.mrb[4].mxu1 %vm163_vm4, %v5034_v51  ;;  %4225 = vmatpush3.bf16.msra.mxu0 %v4810_v2 }
  0x9f   :  { %4072 = vmatprep.mubr.msk.bf16.mxu0 %vm4875_vm0, %v4874_v0  ;;  %4208 = vmatprep.mubr.msk.bf16.mxu1 %vm4875_vm0, %v4874_v0 }
  0xa0   :  { %4361 = vmatpush3.bf16.msra.mxu1 %v4811_v5  ;;  %4226 = vmatprep.subr.bf16.mxu0 %v4874_v0  ;;  %v1836_v5 = vor.u32 %v1835_v18, %v1832_v24 }
  0xa1   :  { %4362 = vmatprep.subr.bf16.mxu1 %v4874_v0 }
  0xa2   :  { %4227 = vmatpush3.bf16.msra.mxu0 %v4813_v6  ;;  %v1839_v6 = vshrl.u32 %v5761_v46, 16 }
  0xa3   :  { %4228 = vmatprep.subr.bf16.mxu0 %v4874_v0 }
  0xa4   :  { %4363 = vmatpush3.bf16.msra.mxu1 %v4814_v7  ;;  %v1842_v7 = vshll.u32 %v5761_v46, 16 }
  0xa5   :  { %4073 = vmatmul.mubr.msk.bf16.gmra.mrb[8].mxu0 %vm163_vm4, %v5160_v42  ;;  %4364 = vmatprep.subr.bf16.mxu1 %v4874_v0 }
  0xa6   :  { %4209 = vmatmul.mubr.msk.bf16.gmra.mrb[8].mxu1 %vm163_vm4, %v5088_v9  ;;  %4076 = vmatprep.mubr.msk.bf16.mxu0 %vm4875_vm0, %v4874_v0  ;;  %v1844_v12 = vrot.slane %v1842_v7, 3 }
  0xa7   :  { %4212 = vmatprep.mubr.msk.bf16.mxu1 %vm4875_vm0, %v4874_v0  ;;  %4229 = vmatpush3.bf16.msra.mxu0 %v4816_v8 }
  0xa8   :  { %4365 = vmatpush3.bf16.msra.mxu1 %v4817_v10  ;;  %4230 = vmatprep.subr.bf16.mxu0 %v4874_v0  ;;  %v4854_v10 = vld [vmem:[%s6318_s1 + $0x348] sm:$0xff]  }
  0xa9   :  { %4366 = vmatprep.subr.bf16.mxu1 %v4874_v0 }
  0xab   :  { %4231 = vmatpush3.bf16.msra.mxu0 %v4818_v11  ;;  %v1841_v11 = vrot.slane %v1839_v6, 2 }
  0xac   :  { %4367 = vmatpush3.bf16.msra.mxu1 %v4820_v14  ;;  %4232 = vmatprep.subr.bf16.mxu0 %v4874_v0  ;;  %v5787_v14 = vld [vmem:[%s6319_s0 + $0x1c] sm:$0xff]  }
  0xad   :  { %4077 = vmatmul.mubr.msk.bf16.gmra.mrb[12].mxu0 %vm163_vm4, %v5425_v43  ;;  %4368 = vmatprep.subr.bf16.mxu1 %v4874_v0  ;;  %v1657_v33 = vrot.slane %v5787_v14, 2  ;;  %v2431_v55 = vrot.slane %v5787_v14, 3 }
  0xae   :  { %4213 = vmatmul.mubr.msk.bf16.gmra.mrb[12].mxu1 %vm163_vm4, %v5126_v30  ;;  %4080 = vmatprep.mubr.msk.bf16.mxu0 %vm4875_vm0, %v4874_v0 }
  0xaf   :  { %4216 = vmatprep.mubr.msk.bf16.mxu1 %vm4875_vm0, %v4874_v0  ;;  %4233 = vmatpush3.bf16.msra.mxu0 %v1411_v17  ;;  %v1655_v17 = vrot.slane %v5761_v46, 2 }
  0xb0   :  { %4369 = vmatpush3.bf16.msra.mxu1 %v2077_v19  ;;  %4254 = vmatprep.subr.bf16.mxu0 %v4874_v0  ;;  %v1845_v19 = vor.u32 %v1844_v12, %v1841_v11 }
  0xb1   :  { %4390 = vmatprep.subr.bf16.mxu1 %v4874_v0 }
  0xb5   :  { %4081 = vmatmul.mubr.msk.bf16.gmra.mrb[16].mxu0 %vm163_vm4, %v5399_v13 }
  0xb6   :  { %4217 = vmatmul.mubr.msk.bf16.gmra.mrb[16].mxu1 %vm163_vm4, %v5544_v21  ;;  %4234 = vmatprep.mubr.msk.bf16.mxu0 %vm4875_vm0, %v4874_v0 }
  0xb7   :  { %4370 = vmatprep.mubr.msk.bf16.mxu1 %vm4875_vm0, %v4874_v0 }
  0xbd   :  { %4235 = vmatmul.mubr.msk.bf16.vlgmr.msra.gmra.mrb[20].mxu0 %vm163_vm4, %v5189_v58 }
  0xbe   :  { %4371 = vmatmul.mubr.msk.bf16.vlgmr.msra.gmra.mrb[20].mxu1 %vm163_vm4, %v5004_v35  ;;  %4255 = vmatpush3.bf16.msra.mxu0 %v4823_v22  ;;  %v4827_v35 = vld [vmem:[%s6318_s1 + $0x1d0] sm:$0xff]   ;;  %v1848_v22 = vshrl.u32 %v5787_v14, 16 }
  0xbf   :  { %4391 = vmatpush3.bf16.msra.mxu1 %v4824_v23  ;;  %4256 = vmatprep.subr.bf16.mxu0 %v4874_v0  ;;  %v1851_v23 = vshll.u32 %v5787_v14, 16 }
  0xc0   :  { %4238 = vmatprep.mubr.msk.bf16.mxu0 %vm4875_vm0, %v4874_v0  ;;  %4374 = vmatprep.mubr.msk.bf16.mxu1 %vm4875_vm0, %v4874_v0 }
  0xc1   :  { %4392 = vmatprep.subr.bf16.mxu1 %v4874_v0 }
  0xc2   :  { %4257 = vmatpush3.bf16.msra.mxu0 %v4825_v25  ;;  %v1609_v25 = vld [vmem:[%s6319_s0 + $0x24] sm:$0xf] }
  0xc3   :  { %4393 = vmatpush3.bf16.msra.mxu1 %v4826_v26  ;;  %4258 = vmatprep.subr.bf16.mxu0 %v4874_v0  ;;  %v1801_v26 = vld [vmem:[%s6319_s0 + $0x28] sm:$0x7] }
  0xc4   :  { %4394 = vmatprep.subr.bf16.mxu1 %v4874_v0 }
  0xc5   :  { %4239 = vmatmul.mubr.msk.bf16.gmra.mrb[24].mxu0 %vm163_vm4, %v5156_v41 }
  0xc6   :  { %4375 = vmatmul.mubr.msk.bf16.gmra.mrb[24].mxu1 %vm163_vm4, %v5034_v51  ;;  %4259 = vmatpush3.bf16.msra.mxu0 %v4827_v35  ;;  %v4831_v51 = vld [vmem:[%s6318_s1 + $0x1e0] sm:$0xff]   ;;  %v1656_v35 = vsel %vm179_vm1, %v1653_v20, %v1655_v17 }
  0xc7   :  { %4242 = vmatprep.mubr.msk.bf16.mxu0 %vm4875_vm0, %v4874_v0  ;;  %4378 = vmatprep.mubr.msk.bf16.mxu1 %vm4875_vm0, %v4874_v0 }
  0xc8   :  { %4395 = vmatpush3.bf16.msra.mxu1 %v4828_v27  ;;  %4260 = vmatprep.subr.bf16.mxu0 %v4874_v0  ;;  %v4858_v27 = vld [vmem:[%s6318_s1 + $0x278] sm:$0xff]  }
  0xc9   :  { %4396 = vmatprep.subr.bf16.mxu1 %v4874_v0 }
  0xca   :  { %4261 = vmatpush3.bf16.msra.mxu0 %v4829_v28  ;;  %v5818_v28 = vsel %vm1820_vm7, %v1836_v5, %v1845_v19 }
  0xcb   :  { %4262 = vmatprep.subr.bf16.mxu0 %v4874_v0 }
  0xcc   :  { %4397 = vmatpush3.bf16.msra.mxu1 %v4830_v29  ;;  %v1850_v29 = vrot.slane %v1848_v22, 2 }
  0xcd   :  { %4243 = vmatmul.mubr.msk.bf16.gmra.mrb[28].mxu0 %vm163_vm4, %v5160_v42  ;;  %4398 = vmatprep.subr.bf16.mxu1 %v4874_v0 }
  0xce   :  { %4379 = vmatmul.mubr.msk.bf16.gmra.mrb[28].mxu1 %vm163_vm4, %v5088_v9  ;;  %4246 = vmatprep.mubr.msk.bf16.mxu0 %vm4875_vm0, %v4874_v0  ;;  %v4834_v9 = vld [vmem:[%s6318_s1 + $0x2c8] sm:$0xff]  }
  0xcf   :  { %4382 = vmatprep.mubr.msk.bf16.mxu1 %vm4875_vm0, %v4874_v0  ;;  %4263 = vmatpush3.bf16.msra.mxu0 %v4831_v51  ;;  %v1853_v51 = vrot.slane %v1851_v23, 3 }
  0xd0   :  { %4399 = vmatpush3.bf16.msra.mxu1 %v4832_v31  ;;  %4264 = vmatprep.subr.bf16.mxu0 %v4874_v0  ;;  %v5821_v31 = vcombine.low %v1609_v25, %v1801_v26 }
  0xd1   :  { %4400 = vmatprep.subr.bf16.mxu1 %v4874_v0  ;;  %v1854_v36 = vor.u32 %v1853_v51, %v1850_v29 }
  0xd2   :  { %v2433_v18 = vrot.slane %v5821_v31, 3 }
  0xd3   :  { %4265 = vmatpush3.bf16.msra.mxu0 %v4833_v32  ;;  %v4859_v32 = vld [vmem:[%s6318_s1 + $0x358] sm:$0xff]  }
  0xd4   :  { %4401 = vmatpush3.bf16.msra.mxu1 %v4834_v9  ;;  %4266 = vmatprep.subr.bf16.mxu0 %v4874_v0  ;;  %v4861_v9 = vld [vmem:[%s6318_s1 + $0x280] sm:$0xff]  }
  0xd5   :  { %4247 = vmatmul.mubr.msk.bf16.gmra.mrb[32].mxu0 %vm163_vm4, %v5425_v43  ;;  %4402 = vmatprep.subr.bf16.mxu1 %v4874_v0 }
  0xd6   :  { %4383 = vmatmul.mubr.msk.bf16.gmra.mrb[32].mxu1 %vm163_vm4, %v5126_v30  ;;  %4250 = vmatprep.mubr.msk.bf16.mxu0 %vm4875_vm0, %v4874_v0  ;;  %v4837_v30 = vld [vmem:[%s6318_s1 + $0x230] sm:$0xff]  }
  0xd7   :  { %4386 = vmatprep.mubr.msk.bf16.mxu1 %vm4875_vm0, %v4874_v0  ;;  %4267 = vmatpush3.bf16.msra.mxu0 %v1527_v37  ;;  %v1610_v37 = vld [vmem:[%s6319_s0 + $0x28] sm:$0x3] }
  0xd8   :  { %4403 = vmatpush3.bf16.msra.mxu1 %v2193_v38  ;;  %4288 = vmatprep.subr.bf16.mxu0 %v4874_v0  ;;  %v1857_v38 = vshrl.u32 %v5821_v31, 16 }
  0xd9   :  { %4424 = vmatprep.subr.bf16.mxu1 %v4874_v0 }
  0xdd   :  { %4251 = vmatmul.mubr.msk.bf16.gmra.mrb[36].mxu0 %vm163_vm4, %v5399_v13 }
  0xde   :  { %4387 = vmatmul.mubr.msk.bf16.gmra.mrb[36].mxu1 %vm163_vm4, %v5544_v21  ;;  %4268 = vmatprep.mubr.msk.bf16.mxu0 %vm4875_vm0, %v4874_v0  ;;  %v4857_v21 = vld [vmem:[%s6318_s1 + $0x350] sm:$0xff]  }
  0xdf   :  { %4404 = vmatprep.mubr.msk.bf16.mxu1 %vm4875_vm0, %v4874_v0 }
  0xe5   :  { %4269 = vmatmul.mubr.msk.bf16.vlgmr.msra.gmra.mrb[20].mxu0 %vm163_vm4, %v5176_v54  ;;  %v4841_v54 = vld [vmem:[%s6318_s1 + $0x240] sm:$0xff]  }
  0xe6   :  { %4405 = vmatmul.mubr.msk.bf16.vlgmr.msra.gmra.mrb[20].mxu1 %vm163_vm4, %v5189_v58  ;;  %4289 = vmatpush3.bf16.msra.mxu0 %v4837_v30  ;;  %v4842_v58 = vld [vmem:[%s6318_s1 + $0x320] sm:$0xff]   ;;  %v1860_v30 = vshll.u32 %v5821_v31, 16 }
  0xe7   :  { %4425 = vmatpush3.bf16.msra.mxu1 %v4838_v39  ;;  %4290 = vmatprep.subr.bf16.mxu0 %v4874_v0  ;;  %v4862_v39 = vld [vmem:[%s6318_s1 + $0x360] sm:$0xff]  }
  0xe8   :  { %4272 = vmatprep.mubr.msk.bf16.mxu0 %vm4875_vm0, %v4874_v0  ;;  %4408 = vmatprep.mubr.msk.bf16.mxu1 %vm4875_vm0, %v4874_v0 }
  0xe9   :  { %4426 = vmatprep.subr.bf16.mxu1 %v4874_v0 }
  0xea   :  { %4291 = vmatpush3.bf16.msra.mxu0 %v4839_v52  ;;  %v1658_v52 = vsel %vm179_vm1, %v1655_v17, %v1657_v33 }
  0xeb   :  { %4427 = vmatpush3.bf16.msra.mxu1 %v4840_v40  ;;  %4292 = vmatprep.subr.bf16.mxu0 %v4874_v0  ;;  %v3417_v40 = vcombine.low %v1609_v25, %v1610_v37 }
  0xec   :  { %4428 = vmatprep.subr.bf16.mxu1 %v4874_v0 }
  0xed   :  { %4273 = vmatmul.mubr.msk.bf16.gmra.mrb[24].mxu0 %vm163_vm4, %v5072_v1  ;;  %v4844_v1 = vld [vmem:[%s6318_s1 + $0x328] sm:$0xff]  }
  0xee   :  { %4409 = vmatmul.mubr.msk.bf16.gmra.mrb[24].mxu1 %vm163_vm4, %v5156_v41  ;;  %4293 = vmatpush3.bf16.msra.mxu0 %v4841_v54  ;;  %v4845_v41 = vld [vmem:[%s6318_s1 + $0x250] sm:$0xff]   ;;  %v1855_v54 = vsel %vm1820_vm7, %v1845_v19, %v1854_v36 }
  0xef   :  { %4276 = vmatprep.mubr.msk.bf16.mxu0 %vm4875_vm0, %v4874_v0  ;;  %4412 = vmatprep.mubr.msk.bf16.mxu1 %vm4875_vm0, %v4874_v0 }
  0xf0   :  { %4429 = vmatpush3.bf16.msra.mxu1 %v4842_v58  ;;  %4294 = vmatprep.subr.bf16.mxu0 %v4874_v0  ;;  %v4865_v58 = vld [vmem:[%s6318_s1 + $0x288] sm:$0xff]  }
  0xf1   :  { %4430 = vmatprep.subr.bf16.mxu1 %v4874_v0 }
  0xf2   :  { %4295 = vmatpush3.bf16.msra.mxu0 %v4843_v44  ;;  %v1859_v44 = vrot.slane %v1857_v38, 2 }
  0xf3   :  { %4296 = vmatprep.subr.bf16.mxu0 %v4874_v0 }
  0xf4   :  { %4431 = vmatpush3.bf16.msra.mxu1 %v4844_v1  ;;  %v1862_v1 = vrot.slane %v1860_v30, 3 }
  0xf5   :  { %4277 = vmatmul.mubr.msk.bf16.gmra.mrb[28].mxu0 %vm163_vm4, %v5375_v45  ;;  %4432 = vmatprep.subr.bf16.mxu1 %v4874_v0  ;;  %v4849_v45 = vld [vmem:[%s6318_s1 + $0x260] sm:$0x7f]  }
  0xf6   :  { %4413 = vmatmul.mubr.msk.bf16.gmra.mrb[28].mxu1 %vm163_vm4, %v5160_v42  ;;  %4280 = vmatprep.mubr.msk.bf16.mxu0 %vm4875_vm0, %v4874_v0  ;;  %v4848_v42 = vld [vmem:[%s6318_s1 + $0x338] sm:$0xff]   ;;  %v1718_v61 = vand.u32 %v4849_v45, %v4959_v16  ;;  %v4867_v45 = vld [vmem:[%s6318_s1 + $0x290] sm:$0xff]  }
  0xf7   :  { %4416 = vmatprep.mubr.msk.bf16.mxu1 %vm4875_vm0, %v4874_v0  ;;  %4297 = vmatpush3.bf16.msra.mxu0 %v4845_v41  ;;  %v4866_v41 = vld [vmem:[%s6318_s1 + $0x368] sm:$0xff]  }
  0xf8   :  { %4433 = vmatpush3.bf16.msra.mxu1 %v4846_v47  ;;  %4298 = vmatprep.subr.bf16.mxu0 %v4874_v0  ;;  %v1659_v47 = vrot.slane %v3417_v40, 2 }
  0xf9   :  { %4434 = vmatprep.subr.bf16.mxu1 %v4874_v0 }
  0xfb   :  { %4299 = vmatpush3.bf16.msra.mxu0 %v4847_v48  ;;  %v1863_v48 = vor.u32 %v1862_v1, %v1859_v44 }
  0xfc   :  { %4435 = vmatpush3.bf16.msra.mxu1 %v4848_v42  ;;  %4300 = vmatprep.subr.bf16.mxu0 %v4874_v0  ;;  %v4868_v42 = vld [vmem:[%s6318_s1 + $0x370] sm:$0xff]  }
  0xfd   :  { %4281 = vmatmul.mubr.msk.bf16.gmra.mrb[32].mxu0 %vm163_vm4, %v5420_v62  ;;  %4436 = vmatprep.subr.bf16.mxu1 %v4874_v0  ;;  %v1824_v62 = vrot.slane %v1822_v57, 2  ;;  %v1864_v53 = vsel %vm1820_vm7, %v1854_v36, %v1863_v48  ;;  %v2492_v57 = vand.u32 %v4870_v50, %v4959_v16 }
  0xfe   :  { %4417 = vmatmul.mubr.msk.bf16.gmra.mrb[32].mxu1 %vm163_vm4, %v5425_v43  ;;  %4284 = vmatprep.mubr.msk.bf16.mxu0 %vm4875_vm0, %v4874_v0  ;;  %v1827_v43 = vrot.slane %v1825_v60, 3  ;;  %v2407_v60 = vld [vmem:[%s6319_s0 + $0x4] sm:$0x8] }
  0xff   :  { %4420 = vmatprep.mubr.msk.bf16.mxu1 %vm4875_vm0, %v4874_v0  ;;  %4301 = vmatpush3.bf16.msra.mxu0 %v1718_v61  ;;  %v1660_v61 = vsel %vm179_vm1, %v1657_v33, %v1659_v47 }
 0x100   :  { %4437 = vmatpush3.bf16.msra.mxu1 %v2324_v56  ;;  %4322 = vmatprep.subr.bf16.mxu0 %v4874_v0  ;;  %v1828_v2 = vor.u32 %v1827_v43, %v1824_v62  ;;  %v1922_v56 = vand.u32 %v4869_v49, %v4959_v16  ;;  %v3549_v16 = vcombine.low %v2407_v60, %v5733_v34  ;;  %v2429_v34 = vrot.slane %v5761_v46, 3 }
 0x101   :  { %4458 = vmatprep.subr.bf16.mxu1 %v4874_v0  ;;  %v2434_v46 = vsel %vm409_vm5, %v2431_v55, %v2433_v18 }
 0x102   :  { %v5779_v8 = vsel %vm1820_vm7, %v1828_v2, %v1836_v5  ;;  %v2426_v63 = vrot.slane %v3549_v16, 3  ;;  %v2430_v43 = vsel %vm409_vm5, %v2427_v3, %v2429_v34  ;;  %v2432_v24 = vsel %vm409_vm5, %v2429_v34, %v2431_v55  ;;  %v5942_v5 = vpop.permute.xlu1 %2596 }
 0x104   :  { %v2428_v62 = vsel %vm409_vm5, %v2426_v63, %v2427_v3 }
 0x105   :  { %4285 = vmatmul.mubr.msk.bf16.gmra.mrb[36].mxu0 %vm163_vm4, %v5392_v59  ;;  %v1654_v59 = vsel %vm179_vm1, %v1652_v4, %v1653_v20  ;;  %v5936_v4 = vpop.permute.xlu0 %2586 }
 0x106   :  { %4421 = vmatmul.mubr.msk.bf16.gmra.mrb[36].mxu1 %vm163_vm4, %v5399_v13  ;;  %4302 = vmatprep.mubr.msk.bf16.mxu0 %vm4875_vm0, %v4874_v0  ;;  %v4853_v13 = vld [vmem:[%s6318_s1 + $0x268] sm:$0xff]  }
 0x107   :  { %4438 = vmatprep.mubr.msk.bf16.mxu1 %vm4875_vm0, %v4874_v0 }
 0x109   :  { %v5938_v20 = vpop.permute.xlu0 %2591 }
 0x10d   :  { %4303 = vmatmul.mubr.msk.bf16.vlgmr.msra.gmra.mrb[20].mxu0 %vm163_vm4, %v1654_v59  ;;  %v5984_v49 = vpop.permute.xlu0 %2606 }
 0x10e   :  { %4439 = vmatmul.mubr.msk.bf16.vlgmr.msra.gmra.mrb[20].mxu1 %vm163_vm4, %v5779_v8  ;;  %4323 = vmatpush3.bf16.msra.mxu0 %v4853_v13 }
 0x10f   :  { %4459 = vmatpush3.bf16.msra.mxu1 %v4854_v10  ;;  %4324 = vmatprep.subr.bf16.mxu0 %v4874_v0 }
 0x110   :  { %4306 = vmatprep.mubr.msk.bf16.mxu0 %vm4875_vm0, %v4874_v0  ;;  %4442 = vmatprep.mubr.msk.bf16.mxu1 %vm4875_vm0, %v4874_v0 }
 0x111   :  { %4460 = vmatprep.subr.bf16.mxu1 %v4874_v0 }
 0x112   :  { %4325 = vmatpush3.bf16.msra.mxu0 %v4855_v15 }
 0x113   :  { %4461 = vmatpush3.bf16.msra.mxu1 %v4857_v21  ;;  %4326 = vmatprep.subr.bf16.mxu0 %v4874_v0 }
 0x114   :  { %4462 = vmatprep.subr.bf16.mxu1 %v4874_v0 }
 0x115   :  { %4307 = vmatmul.mubr.msk.bf16.gmra.mrb[24].mxu0 %vm163_vm4, %v1656_v35 }
 0x116   :  { %4443 = vmatmul.mubr.msk.bf16.gmra.mrb[24].mxu1 %vm163_vm4, %v5818_v28  ;;  %4327 = vmatpush3.bf16.msra.mxu0 %v4858_v27 }
 0x117   :  { %4310 = vmatprep.mubr.msk.bf16.mxu0 %vm4875_vm0, %v4874_v0  ;;  %4446 = vmatprep.mubr.msk.bf16.mxu1 %vm4875_vm0, %v4874_v0 }
 0x118   :  { %4463 = vmatpush3.bf16.msra.mxu1 %v4859_v32  ;;  %4328 = vmatprep.subr.bf16.mxu0 %v4874_v0 }
 0x119   :  { %4464 = vmatprep.subr.bf16.mxu1 %v4874_v0 }
 0x11a   :  { %4329 = vmatpush3.bf16.msra.mxu0 %v4861_v9 }
 0x11b   :  { %4330 = vmatprep.subr.bf16.mxu0 %v4874_v0 }
 0x11c   :  { %4465 = vmatpush3.bf16.msra.mxu1 %v4862_v39 }
 0x11d   :  { %4311 = vmatmul.mubr.msk.bf16.gmra.mrb[28].mxu0 %vm163_vm4, %v1658_v52  ;;  %4466 = vmatprep.subr.bf16.mxu1 %v4874_v0 }
 0x11e   :  { %4447 = vmatmul.mubr.msk.bf16.gmra.mrb[28].mxu1 %vm163_vm4, %v1855_v54  ;;  %4314 = vmatprep.mubr.msk.bf16.mxu0 %vm4875_vm0, %v4874_v0 }
 0x11f   :  { %4450 = vmatprep.mubr.msk.bf16.mxu1 %vm4875_vm0, %v4874_v0  ;;  %4331 = vmatpush3.bf16.msra.mxu0 %v4865_v58 }
 0x120   :  { %4467 = vmatpush3.bf16.msra.mxu1 %v4866_v41  ;;  %4332 = vmatprep.subr.bf16.mxu0 %v4874_v0 }
 0x121   :  { %4468 = vmatprep.subr.bf16.mxu1 %v4874_v0 }
 0x123   :  { %4333 = vmatpush3.bf16.msra.mxu0 %v4867_v45 }
 0x124   :  { %4469 = vmatpush3.bf16.msra.mxu1 %v4868_v42  ;;  %4334 = vmatprep.subr.bf16.mxu0 %v4874_v0 }
 0x125   :  { %4315 = vmatmul.mubr.msk.bf16.gmra.mrb[32].mxu0 %vm163_vm4, %v1660_v61  ;;  %4470 = vmatprep.subr.bf16.mxu1 %v4874_v0 }
 0x126   :  { %4451 = vmatmul.mubr.msk.bf16.gmra.mrb[32].mxu1 %vm163_vm4, %v1864_v53  ;;  %4318 = vmatprep.mubr.msk.bf16.mxu0 %vm4875_vm0, %v4874_v0 }
 0x127   :  { %4454 = vmatprep.mubr.msk.bf16.mxu1 %vm4875_vm0, %v4874_v0  ;;  %4335 = vmatpush3.bf16.msra.mxu0 %v1922_v56 }
 0x128   :  { %4471 = vmatpush3.bf16.msra.mxu1 %v2492_v57 }
 0x12d   :  { %4319 = vmatmul.mubr.msk.bf16.gmra.mrb[36].mxu0 %vm163_vm4, %v1659_v47 }
 0x12e   :  { %4455 = vmatmul.mubr.msk.bf16.gmra.mrb[36].mxu1 %vm163_vm4, %v1863_v48  ;;  %4336 = vmatprep.mubr.msk.bf16.mxu0 %vm4875_vm0, %v4874_v0 }
 0x12f   :  { %4472 = vmatprep.mubr.msk.bf16.mxu1 %vm4875_vm0, %v4874_v0 }
 0x135   :  { %4337 = vmatmul.mubr.msk.bf16.vlgmr.msra.gmra.mrb[20].mxu0 %vm163_vm4, %v5779_v8 }
 0x136   :  { %4473 = vmatmul.mubr.msk.bf16.vlgmr.msra.gmra.mrb[20].mxu1 %vm163_vm4, %v2428_v62  ;;  %4340 = vmatprep.mubr.msk.bf16.mxu0 %vm4875_vm0, %v4874_v0 }
 0x137   :  { %4476 = vmatprep.mubr.msk.bf16.mxu1 %vm4875_vm0, %v4874_v0 }
 0x13d   :  { %4341 = vmatmul.mubr.msk.bf16.gmra.mrb[24].mxu0 %vm163_vm4, %v5818_v28  ;;  %v5964_v28 = vpop.permute.xlu1 %2601 }
 0x13e   :  { %4477 = vmatmul.mubr.msk.bf16.gmra.mrb[24].mxu1 %vm163_vm4, %v2430_v43  ;;  %4344 = vmatprep.mubr.msk.bf16.mxu0 %vm4875_vm0, %v4874_v0 }
 0x13f   :  { %4480 = vmatprep.mubr.msk.bf16.mxu1 %vm4875_vm0, %v4874_v0 }
 0x145   :  { %4345 = vmatmul.mubr.msk.bf16.gmra.mrb[28].mxu0 %vm163_vm4, %v1855_v54 }
 0x146   :  { %4481 = vmatmul.mubr.msk.bf16.gmra.mrb[28].mxu1 %vm163_vm4, %v2432_v24  ;;  %4348 = vmatprep.mubr.msk.bf16.mxu0 %vm4875_vm0, %v4874_v0 }
 0x147   :  { %4484 = vmatprep.mubr.msk.bf16.mxu1 %vm4875_vm0, %v4874_v0 }
 0x14d   :  { %4349 = vmatmul.mubr.msk.bf16.gmra.mrb[32].mxu0 %vm163_vm4, %v1864_v53  ;;  %v5988_v53 = vpop.permute.xlu1 %2611 }
 0x14e   :  { %4485 = vmatmul.mubr.msk.bf16.gmra.mrb[32].mxu1 %vm163_vm4, %v2434_v46  ;;  %4352 = vmatprep.mubr.msk.bf16.mxu0 %vm4875_vm0, %v4874_v0 }
 0x14f   :  { %4488 = vmatprep.mubr.msk.bf16.mxu1 %vm4875_vm0, %v4874_v0 }
 0x155   :  { %4353 = vmatmul.mubr.msk.bf16.gmra.mrb[36].mxu0 %vm163_vm4, %v1863_v48 }
 0x156   :  { %4489 = vmatmul.mubr.msk.bf16.gmra.mrb[36].mxu1 %vm163_vm4, %v2433_v18 }
 0x168   :  { %v5940_v2 = vpop.f32.mrb[0].mxu0 }
 0x169   :  { %v2629_v6 = vmul.f32 %v5936_v4, %v5940_v2  ;;  %v5946_v7 = vpop.f32.mrb[0].mxu1  ;;  %v4066_v59 = vpop.f32.mrb[1].mxu0 }
 0x16a   :  { %v2675_v0 = vmul.f32 %v5936_v4, %v5946_v7  ;;  %v4202_v13 = vpop.f32.mrb[1].mxu1  ;;  %v5950_v8 = vpop.f32.mrb[2].mxu0 }
 0x16b   :  { %v2630_v10 = vmul.f32 %v5938_v20, %v5950_v8  ;;  %v5954_v11 = vpop.f32.mrb[2].mxu1  ;;  %v4067_v12 = vpop.f32.mrb[3].mxu0  ;;  %v2652_v17 = vmul.f32 %v2629_v6, %v5940_v2 }
 0x16c   :  { %v2676_v14 = vmul.f32 %v5938_v20, %v5954_v11  ;;  %v4203_v15 = vpop.f32.mrb[3].mxu1  ;;  %v2698_v22 = vmul.f32 %v2675_v0, %v5946_v7 }
 0x16d   :  { %v2638_v19 = vadd.f32 %v2630_v10, %v2629_v6  ;;  %v2653_v21 = vmul.f32 %v2630_v10, %v5950_v8 }
 0x16e   :  { %v2684_v23 = vadd.f32 %v2676_v14, %v2675_v0  ;;  %v2699_v25 = vmul.f32 %v2676_v14, %v5954_v11 }
 0x16f   :  { %v2661_v26 = vadd.f32 %v2653_v21, %v2652_v17  ;;  %v6008_v17 = vpop.permute.xlu0 %2616 }
 0x170   :  { %v2707_v35 = vadd.f32 %v2699_v25, %v2698_v22  ;;  %v5962_v27 = vpop.f32.mrb[4].mxu0 }
 0x171   :  { %v2631_v29 = vmul.f32 %v5942_v5, %v5962_v27  ;;  %v5968_v51 = vpop.f32.mrb[4].mxu1  ;;  %v4070_v31 = vpop.f32.mrb[5].mxu0 }
 0x172   :  { %v2677_v32 = vmul.f32 %v5942_v5, %v5968_v51  ;;  %v4206_v33 = vpop.f32.mrb[5].mxu1  ;;  %v5972_v9 = vpop.f32.mrb[6].mxu0 }
 0x173   :  { %v2639_v36 = vadd.f32 %v2638_v19, %v2631_v29  ;;  %v2654_v37 = vmul.f32 %v2631_v29, %v5962_v27  ;;  %v2632_v38 = vmul.f32 %v5964_v28, %v5972_v9  ;;  %v5977_v30 = vpop.f32.mrb[6].mxu1  ;;  %v4071_v39 = vpop.f32.mrb[7].mxu0 }
 0x174   :  { %v2685_v52 = vadd.f32 %v2684_v23, %v2677_v32  ;;  %v2700_v40 = vmul.f32 %v2677_v32, %v5968_v51  ;;  %v2678_v54 = vmul.f32 %v5964_v28, %v5977_v30  ;;  %v4207_v58 = vpop.f32.mrb[7].mxu1  ;;  %v6012_v23 = vpop.permute.xlu1 %2621 }
 0x175   :  { %v2662_v44 = vadd.f32 %v2661_v26, %v2654_v37  ;;  %v2640_v1 = vadd.f32 %v2639_v36, %v2632_v38  ;;  %v2655_v41 = vmul.f32 %v2632_v38, %v5972_v9 }
 0x176   :  { %v2708_v47 = vadd.f32 %v2707_v35, %v2700_v40  ;;  %v2686_v48 = vadd.f32 %v2685_v52, %v2678_v54  ;;  %v2701_v45 = vmul.f32 %v2678_v54, %v5977_v30 }
 0x177   :  { %v2663_v42 = vadd.f32 %v2662_v44, %v2655_v41 }
 0x178   :  { %v2709_v50 = vadd.f32 %v2708_v47, %v2701_v45  ;;  %v5986_v61 = vpop.f32.mrb[8].mxu0 }
 0x179   :  { %v2633_v56 = vmul.f32 %v5984_v49, %v5986_v61  ;;  %v5992_v57 = vpop.f32.mrb[8].mxu1  ;;  %v4074_v60 = vpop.f32.mrb[9].mxu0 }
 0x17a   :  { %v2679_v16 = vmul.f32 %v5984_v49, %v5992_v57  ;;  %v4210_v63 = vpop.f32.mrb[9].mxu1  ;;  %v5996_v3 = vpop.f32.mrb[10].mxu0 }
 0x17b   :  { %v2641_v62 = vadd.f32 %v2640_v1, %v2633_v56  ;;  %v2656_v34 = vmul.f32 %v2633_v56, %v5986_v61  ;;  %v2634_v43 = vmul.f32 %v5988_v53, %v5996_v3  ;;  %v6001_v55 = vpop.f32.mrb[10].mxu1  ;;  %v4075_v24 = vpop.f32.mrb[11].mxu0 }
 0x17c   :  { %v2687_v18 = vadd.f32 %v2686_v48, %v2679_v16  ;;  %v2702_v46 = vmul.f32 %v2679_v16, %v5992_v57  ;;  %v2680_v6 = vmul.f32 %v5988_v53, %v6001_v55  ;;  %v4211_v59 = vpop.f32.mrb[11].mxu1 }
 0x17d   :  { %v2664_v0 = vadd.f32 %v2663_v42, %v2656_v34  ;;  %v2642_v13 = vadd.f32 %v2641_v62, %v2634_v43  ;;  %v2657_v10 = vmul.f32 %v2634_v43, %v5996_v3  ;;  %v6032_v42 = vpop.permute.xlu0 %2626 }
 0x17e   :  { %v2710_v12 = vadd.f32 %v2709_v50, %v2702_v46  ;;  %v2688_v14 = vadd.f32 %v2687_v18, %v2680_v6  ;;  %v2703_v15 = vmul.f32 %v2680_v6, %v6001_v55 }
 0x17f   :  { %v2665_v19 = vadd.f32 %v2664_v0, %v2657_v10 }
 0x180   :  { %v2711_v21 = vadd.f32 %v2710_v12, %v2703_v15  ;;  %v6010_v22 = vpop.f32.mrb[12].mxu0 }
 0x181   :  { %v2635_v25 = vmul.f32 %v6008_v17, %v6010_v22  ;;  %v6016_v26 = vpop.f32.mrb[12].mxu1  ;;  %v4078_v35 = vpop.f32.mrb[13].mxu0 }
 0x182   :  { %v2681_v29 = vmul.f32 %v6008_v17, %v6016_v26  ;;  %v4214_v31 = vpop.f32.mrb[13].mxu1  ;;  %v6020_v32 = vpop.f32.mrb[14].mxu0 }
 0x183   :  { %v2643_v33 = vadd.f32 %v2642_v13, %v2635_v25  ;;  %v2658_v36 = vmul.f32 %v2635_v25, %v6010_v22  ;;  %v2636_v37 = vmul.f32 %v6012_v23, %v6020_v32  ;;  %v6025_v38 = vpop.f32.mrb[14].mxu1  ;;  %v4079_v39 = vpop.f32.mrb[15].mxu0 }
 0x184   :  { %v2689_v52 = vadd.f32 %v2688_v14, %v2681_v29  ;;  %v2704_v40 = vmul.f32 %v2681_v29, %v6016_v26  ;;  %v2682_v54 = vmul.f32 %v6012_v23, %v6025_v38  ;;  %v4215_v58 = vpop.f32.mrb[15].mxu1 }
 0x185   :  { %v2666_v44 = vadd.f32 %v2665_v19, %v2658_v36  ;;  %v2644_v1 = vadd.f32 %v2643_v33, %v2636_v37  ;;  %v2659_v41 = vmul.f32 %v2636_v37, %v6020_v32 }
 0x186   :  { %v2712_v47 = vadd.f32 %v2711_v21, %v2704_v40  ;;  %v2690_v48 = vadd.f32 %v2689_v52, %v2682_v54  ;;  %v2705_v45 = vmul.f32 %v2682_v54, %v6025_v38 }
 0x187   :  { %v2667_v50 = vadd.f32 %v2666_v44, %v2659_v41 }
 0x188   :  { %v2713_v56 = vadd.f32 %v2712_v47, %v2705_v45  ;;  %v6034_v60 = vpop.f32.mrb[16].mxu0 }
 0x189   :  { %v2637_v16 = vmul.f32 %v6032_v42, %v6034_v60  ;;  %v6038_v63 = vpop.f32.mrb[16].mxu1  ;;  %v4082_v62 = vpop.f32.mrb[17].mxu0 }
 0x18a   :  { %v2683_v34 = vmul.f32 %v6032_v42, %v6038_v63  ;;  %v4218_v43 = vpop.f32.mrb[17].mxu1  ;;  %v736_v24 = vpop.f32.mrb[18].mxu0 }
 0x18b   :  { %v2645_v18 = vadd.f32 %v2644_v1, %v2637_v16  ;;  %v2660_v46 = vmul.f32 %v2637_v16, %v6034_v60  ;;  %v1327_v6 = vpop.f32.mrb[18].mxu1  ;;  %v4083_v59 = vpop.f32.mrb[19].mxu0 }
 0x18c   :  { %v2691_v0 = vadd.f32 %v2690_v48, %v2683_v34  ;;  %v2706_v13 = vmul.f32 %v2683_v34, %v6038_v63  ;;  %v4219_v10 = vpop.f32.mrb[19].mxu1 }
 0x18d   :  { %v2646_v12 = vrot.slane %v2645_v18, 4  ;;  %v2668_v14 = vadd.f32 %v2667_v50, %v2660_v46 }
 0x18e   :  { %v2692_v15 = vrot.slane %v2691_v0, 4  ;;  %v2714_v19 = vadd.f32 %v2713_v56, %v2706_v13 }
 0x18f   :  { %v2647_v21 = vadd.f32 %v2646_v12, %v2645_v18  ;;  %v2669_v25 = vrot.slane %v2668_v14, 4 }
 0x190   :  { %v2693_v35 = vadd.f32 %v2692_v15, %v2691_v0  ;;  %v2715_v29 = vrot.slane %v2714_v19, 4 }
 0x191   :  { %v2648_v31 = vrot.slane %v2647_v21, 2  ;;  %v2670_v33 = vadd.f32 %v2669_v25, %v2668_v14 }
 0x192   :  { %v2694_v36 = vrot.slane %v2693_v35, 2  ;;  %v2716_v37 = vadd.f32 %v2715_v29, %v2714_v19 }
 0x193   :  { %v2649_v39 = vadd.f32 %v2648_v31, %v2647_v21  ;;  %v2671_v52 = vrot.slane %v2670_v33, 2 }
 0x194   :  { %v2695_v40 = vadd.f32 %v2694_v36, %v2693_v35  ;;  %v2717_v54 = vrot.slane %v2716_v37, 2 }
 0x195   :  { %v2650_v58 = vrot.slane %v2649_v39, 1  ;;  %v2672_v44 = vadd.f32 %v2671_v52, %v2670_v33 }
 0x196   :  { %v2696_v1 = vrot.slane %v2695_v40, 1  ;;  %v2718_v41 = vadd.f32 %v2717_v54, %v2716_v37 }
 0x197   :  { %v2651_v47 = vadd.f32 %v2650_v58, %v2649_v39  ;;  %v2673_v48 = vrot.slane %v2672_v44, 1 }
 0x198   :  { %v2697_v45 = vadd.f32 %v2696_v1, %v2695_v40  ;;  %v2719_v50 = vrot.slane %v2718_v41, 1 }
 0x199   :  { %v2674_v56 = vadd.f32 %v2673_v48, %v2672_v44 }
 0x19a   :  { %v2720_v16 = vadd.f32 %v2719_v50, %v2718_v41  ;;  %v6044_v62 = vadd.f32 %v2697_v45, %v2651_v47 }
 0x19c   :  { %v6046_v34 = vadd.f32 %v2720_v16, %v2674_v56 }
 0x208   :  { %v6048_v43 = vpop.f32.mrb[20].mxu0 }
 0x209   :  { %v2723_v24 = vmul.f32 %v5936_v4, %v6048_v43  ;;  %v6052_v18 = vpop.f32.mrb[20].mxu1  ;;  %v4338_v46 = vpop.f32.mrb[21].mxu0 }
 0x20a   :  { %v2771_v6 = vmul.f32 %v5936_v4, %v6052_v18  ;;  %v4474_v59 = vpop.f32.mrb[21].mxu1  ;;  %v6056_v0 = vpop.f32.mrb[22].mxu0 }
 0x20b   :  { %v2724_v13 = vmul.f32 %v5938_v20, %v6056_v0  ;;  %v6060_v10 = vpop.f32.mrb[22].mxu1  ;;  %v4339_v12 = vpop.f32.mrb[23].mxu0  ;;  %v2746_v19 = vmul.f32 %v2723_v24, %v6048_v43 }
 0x20c   :  { %v2772_v14 = vmul.f32 %v5938_v20, %v6060_v10  ;;  %v4475_v15 = vpop.f32.mrb[23].mxu1  ;;  %v2794_v4 = vmul.f32 %v2771_v6, %v6052_v18 }
 0x20d   :  { %v2732_v21 = vadd.f32 %v2724_v13, %v2723_v24  ;;  %v2747_v25 = vmul.f32 %v2724_v13, %v6056_v0 }
 0x20e   :  { %v2780_v35 = vadd.f32 %v2772_v14, %v2771_v6  ;;  %v2795_v29 = vmul.f32 %v2772_v14, %v6060_v10 }
 0x20f   :  { %v2755_v31 = vadd.f32 %v2747_v25, %v2746_v19 }
 0x210   :  { %v2803_v33 = vadd.f32 %v2795_v29, %v2794_v4  ;;  %v6068_v36 = vpop.f32.mrb[24].mxu0 }
 0x211   :  { %v2725_v37 = vmul.f32 %v5942_v5, %v6068_v36  ;;  %v6072_v39 = vpop.f32.mrb[24].mxu1  ;;  %v4342_v20 = vpop.f32.mrb[25].mxu0 }
 0x212   :  { %v2773_v52 = vmul.f32 %v5942_v5, %v6072_v39  ;;  %v4478_v40 = vpop.f32.mrb[25].mxu1  ;;  %v6076_v54 = vpop.f32.mrb[26].mxu0 }
 0x213   :  { %v2733_v58 = vadd.f32 %v2732_v21, %v2725_v37  ;;  %v2748_v44 = vmul.f32 %v2725_v37, %v6068_v36  ;;  %v2726_v1 = vmul.f32 %v5964_v28, %v6076_v54  ;;  %v6081_v41 = vpop.f32.mrb[26].mxu1  ;;  %v4343_v47 = vpop.f32.mrb[27].mxu0 }
 0x214   :  { %v2781_v48 = vadd.f32 %v2780_v35, %v2773_v52  ;;  %v2796_v45 = vmul.f32 %v2773_v52, %v6072_v39  ;;  %v2774_v50 = vmul.f32 %v5964_v28, %v6081_v41  ;;  %v4479_v56 = vpop.f32.mrb[27].mxu1 }
 0x215   :  { %v2756_v5 = vadd.f32 %v2755_v31, %v2748_v44  ;;  %v2734_v16 = vadd.f32 %v2733_v58, %v2726_v1  ;;  %v2749_v24 = vmul.f32 %v2726_v1, %v6076_v54 }
 0x216   :  { %v2804_v46 = vadd.f32 %v2803_v33, %v2796_v45  ;;  %v2782_v6 = vadd.f32 %v2781_v48, %v2774_v50  ;;  %v2797_v59 = vmul.f32 %v2774_v50, %v6081_v41 }
 0x217   :  { %v2757_v13 = vadd.f32 %v2756_v5, %v2749_v24 }
 0x218   :  { %v2805_v12 = vadd.f32 %v2804_v46, %v2797_v59  ;;  %v6088_v14 = vpop.f32.mrb[28].mxu0 }
 0x219   :  { %v2727_v15 = vmul.f32 %v5984_v49, %v6088_v14  ;;  %v6092_v19 = vpop.f32.mrb[28].mxu1  ;;  %v4346_v21 = vpop.f32.mrb[29].mxu0 }
 0x21a   :  { %v2775_v28 = vmul.f32 %v5984_v49, %v6092_v19  ;;  %v4482_v25 = vpop.f32.mrb[29].mxu1  ;;  %v6096_v4 = vpop.f32.mrb[30].mxu0 }
 0x21b   :  { %v2735_v35 = vadd.f32 %v2734_v16, %v2727_v15  ;;  %v2750_v29 = vmul.f32 %v2727_v15, %v6088_v14  ;;  %v2728_v31 = vmul.f32 %v5988_v53, %v6096_v4  ;;  %v6101_v33 = vpop.f32.mrb[30].mxu1  ;;  %v4347_v37 = vpop.f32.mrb[31].mxu0 }
 0x21c   :  { %v2783_v20 = vadd.f32 %v2782_v6, %v2775_v28  ;;  %v2798_v52 = vmul.f32 %v2775_v28, %v6092_v19  ;;  %v2776_v40 = vmul.f32 %v5988_v53, %v6101_v33  ;;  %v4483_v58 = vpop.f32.mrb[31].mxu1 }
 0x21d   :  { %v2758_v49 = vadd.f32 %v2757_v13, %v2750_v29  ;;  %v2736_v44 = vadd.f32 %v2735_v35, %v2728_v31  ;;  %v2751_v1 = vmul.f32 %v2728_v31, %v6096_v4 }
 0x21e   :  { %v2806_v47 = vadd.f32 %v2805_v12, %v2798_v52  ;;  %v2784_v48 = vadd.f32 %v2783_v20, %v2776_v40  ;;  %v2799_v45 = vmul.f32 %v2776_v40, %v6101_v33 }
 0x21f   :  { %v2759_v50 = vadd.f32 %v2758_v49, %v2751_v1 }
 0x220   :  { %v2807_v56 = vadd.f32 %v2806_v47, %v2799_v45  ;;  %v6108_v5 = vpop.f32.mrb[32].mxu0 }
 0x221   :  { %v2729_v16 = vmul.f32 %v6008_v17, %v6108_v5  ;;  %v6112_v24 = vpop.f32.mrb[32].mxu1  ;;  %v4350_v46 = vpop.f32.mrb[33].mxu0 }
 0x222   :  { %v2777_v53 = vmul.f32 %v6008_v17, %v6112_v24  ;;  %v4486_v6 = vpop.f32.mrb[33].mxu1  ;;  %v6116_v59 = vpop.f32.mrb[34].mxu0 }
 0x223   :  { %v2737_v13 = vadd.f32 %v2736_v44, %v2729_v16  ;;  %v2752_v12 = vmul.f32 %v2729_v16, %v6108_v5  ;;  %v2730_v15 = vmul.f32 %v6012_v23, %v6116_v59  ;;  %v6121_v21 = vpop.f32.mrb[34].mxu1  ;;  %v4351_v28 = vpop.f32.mrb[35].mxu0 }
 0x224   :  { %v2785_v25 = vadd.f32 %v2784_v48, %v2777_v53  ;;  %v2800_v35 = vmul.f32 %v2777_v53, %v6112_v24  ;;  %v2778_v29 = vmul.f32 %v6012_v23, %v6121_v21  ;;  %v4487_v31 = vpop.f32.mrb[35].mxu1 }
 0x225   :  { %v2760_v17 = vadd.f32 %v2759_v50, %v2752_v12  ;;  %v2738_v37 = vadd.f32 %v2737_v13, %v2730_v15  ;;  %v2753_v20 = vmul.f32 %v2730_v15, %v6116_v59 }
 0x226   :  { %v2808_v52 = vadd.f32 %v2807_v56, %v2800_v35  ;;  %v2786_v40 = vadd.f32 %v2785_v25, %v2778_v29  ;;  %v2801_v58 = vmul.f32 %v2778_v29, %v6121_v21 }
 0x227   :  { %v2761_v49 = vadd.f32 %v2760_v17, %v2753_v20 }
 0x228   :  { %v2809_v44 = vadd.f32 %v2808_v52, %v2801_v58  ;;  %v6128_v1 = vpop.f32.mrb[36].mxu0 }
 0x229   :  { %v2731_v47 = vmul.f32 %v6032_v42, %v6128_v1  ;;  %v6132_v48 = vpop.f32.mrb[36].mxu1  ;;  %v4354_v45 = vpop.f32.mrb[37].mxu0 }
 0x22a   :  { %6324 = vst [vmem:[#allocation2_spill] sm:$0xff] %v6132_v48  ;;  %v2779_v23 = vmul.f32 %v6032_v42, %v6132_v48  ;;  %v4490_v50 = vpop.f32.mrb[37].mxu1  ;;  %v1993_v16 = vpop.f32.mrb[38].mxu0 }
 0x22b   :  { %v2739_v46 = vadd.f32 %v2738_v37, %v2731_v47  ;;  %v2754_v56 = vmul.f32 %v2731_v47, %v6128_v1  ;;  %v2563_v53 = vpop.f32.mrb[38].mxu1  ;;  %v4355_v6 = vpop.f32.mrb[39].mxu0 }
 0x22c   :  { %v2787_v13 = vadd.f32 %v2786_v40, %v2779_v23  ;;  %v2802_v12 = vmul.f32 %v2779_v23, %v6132_v48  ;;  %v4491_v15 = vpop.f32.mrb[39].mxu1 }
 0x22d   :  { %v2740_v28 = vrot.slane %v2739_v46, 4  ;;  %v2762_v25 = vadd.f32 %v2761_v49, %v2754_v56 }
 0x22e   :  { %v2788_v35 = vrot.slane %v2787_v13, 4  ;;  %v2810_v29 = vadd.f32 %v2809_v44, %v2802_v12 }
 0x22f   :  { %v2741_v31 = vadd.f32 %v2740_v28, %v2739_v46  ;;  %v2763_v17 = vrot.slane %v2762_v25, 4 }
 0x230   :  { %v2789_v20 = vadd.f32 %v2788_v35, %v2787_v13  ;;  %v2811_v52 = vrot.slane %v2810_v29, 4 }
 0x231   :  { %v2742_v42 = vrot.slane %v2741_v31, 2  ;;  %v2764_v58 = vadd.f32 %v2763_v17, %v2762_v25 }
 0x232   :  { %v2790_v45 = vrot.slane %v2789_v20, 2  ;;  %v2812_v37 = vadd.f32 %v2811_v52, %v2810_v29 }
 0x233   :  { %v2743_v50 = vadd.f32 %v2742_v42, %v2741_v31  ;;  %v2765_v47 = vrot.slane %v2764_v58, 2 }
 0x234   :  { %v2791_v16 = vadd.f32 %v2790_v45, %v2789_v20  ;;  %v2813_v53 = vrot.slane %v2812_v37, 2 }
 0x235   :  { %v2744_v40 = vrot.slane %v2743_v50, 1  ;;  %v2766_v6 = vadd.f32 %v2765_v47, %v2764_v58  ;;  %v2831_v58 = vlaneseq }
 0x236   :  { %v2792_v23 = vrot.slane %v2791_v16, 1  ;;  %v2814_v15 = vadd.f32 %v2813_v53, %v2812_v37  ;;  %v2824_v37 = vld [vmem:[%s6321_s3] sm:$0x1] }
 0x237   :  { %v2745_v48 = vadd.f32 %v2744_v40, %v2743_v50  ;;  %v2767_v49 = vrot.slane %v2766_v6, 1  ;;  %v2832_v45 = vshrl.u32 %v2831_v58, 7 }
 0x238   :  { %v2815_v56 = vrot.slane %v2814_v15, 1  ;;  %v2793_v13 = vadd.f32 %v2792_v23, %v2791_v16 }
 0x239   :  { %v2768_v44 = vadd.f32 %v2767_v49, %v2766_v6  ;;  %v2769_v46 = vadd.f32 %v2745_v48, %v6044_v62  ;;  %v2833_v62 = vsub.s32 0, %v2832_v45 }
 0x23a   :  { %v2816_v28 = vadd.f32 %v2815_v56, %v2814_v15 }
 0x23b   :  { %v2770_v12 = vadd.f32 %v2768_v44, %v6046_v34  ;;  %v2817_v25 = vadd.f32 %v2793_v13, %v2769_v46  ;;  %v2828_v34 = vld [vmem:[%s6321_s3 + $0x1] sm:$0x1] }
 0x23d   :  { %v2818_v35 = vadd.f32 %v2816_v28, %v2770_v12  ;;  %v2819_v29 = vmul.f32 0.0078125, %v2817_v25 }
 0x23f   :  { %v2820_v31 = vmul.f32 0.0078125, %v2818_v35  ;;  %v2821_v17 = vmul.f32 %v2819_v29, %v2819_v29 }
 0x241   :  { %v2822_v20 = vsub.f32 %v2820_v31, %v2821_v17 }
 0x243   :  { %v2823_v52 = vmax.f32 %v2822_v20, 0.0 }
 0x245   :  { %v2825_v42 = vadd.f32 1e-05, %v2823_v52 }
 0x247   :  { %4872 = vrsqrt.f32 %v2825_v42 }
 0x251   :  { %v4873_v48 = vpop.eup %4872 }
 0x252   :  { %v2827_v50 = vmul.f32 %v4873_v48, %v2824_v37 }
 0x254   :  { %v2829_v47 = vmul.f32 %v2827_v50, %v2819_v29  ;;  %v6146_v16 = vrot.slane %v2827_v50, %v2833_v62 }
 0x256   :  { %v2830_v53 = vsub.f32 %v2828_v34, %v2829_v47  ;;  %v2835_v40 = vmul.f32 %v6146_v16, %v5940_v2  ;;  %v2836_v6 = vmul.f32 %v6146_v16, %v5950_v8  ;;  %v2837_v23 = vmul.f32 %v6146_v16, %v5962_v27 }
 0x257   :  { %v2838_v15 = vmul.f32 %v6146_v16, %v5972_v9  ;;  %v2839_v49 = vmul.f32 %v6146_v16, %v5986_v61  ;;  %v2840_v56 = vmul.f32 %v6146_v16, %v5996_v3  ;;  %v2841_v44 = vmul.f32 %v6146_v16, %v6010_v22 }
 0x258   :  { %v2842_v2 = vmul.f32 %v6146_v16, %v6020_v32  ;;  %v2843_v8 = vmul.f32 %v6146_v16, %v6034_v60  ;;  %v6166_v46 = vrot.slane %v2830_v53, %v2833_v62  ;;  %v2912_v27 = vmul.f32 %v6146_v16, %v5946_v7 }
 0x259   :  { %v2913_v9 = vmul.f32 %v6146_v16, %v5954_v11  ;;  %v2914_v61 = vmul.f32 %v6146_v16, %v5968_v51  ;;  %v2915_v3 = vmul.f32 %v6146_v16, %v5977_v30  ;;  %v2916_v22 = vmul.f32 %v6146_v16, %v5992_v57 }
 0x25a   :  { %v2848_v32 = vadd.f32 %v6166_v46, %v2835_v40  ;;  %v2849_v60 = vadd.f32 %v6166_v46, %v2836_v6  ;;  %v2850_v13 = vadd.f32 %v6166_v46, %v2837_v23  ;;  %v2851_v7 = vadd.f32 %v6166_v46, %v2838_v15 }
 0x25b   :  { %v2852_v12 = vadd.f32 %v6166_v46, %v2839_v49  ;;  %v2853_v11 = vadd.f32 %v6166_v46, %v2840_v56  ;;  %v2854_v51 = vadd.f32 %v6166_v46, %v2841_v44  ;;  %v2855_v28 = vadd.f32 %v6166_v46, %v2842_v2 }
 0x25c   :  { %v2856_v30 = vadd.f32 %v6166_v46, %v2843_v8  ;;  %v2857_v25 = vmax.f32 %v2848_v32, 0.0  ;;  %v2858_v57 = vmax.f32 %v2849_v60, 0.0  ;;  %v2859_v35 = vmax.f32 %v2850_v13, 0.0 }
 0x25d   :  { %v2860_v29 = vmax.f32 %v2851_v7, 0.0  ;;  %v2861_v31 = vmax.f32 %v2852_v12, 0.0  ;;  %v2862_v17 = vmax.f32 %v2853_v11, 0.0  ;;  %v2863_v20 = vmax.f32 %v2854_v51, 0.0 }
 0x25e   :  { %v2864_v52 = vmax.f32 %v2855_v28, 0.0  ;;  %v2865_v42 = vmax.f32 %v2856_v30, 0.0  ;;  %v3664_v58 = vpack.c.bf16 %v2858_v57, %v2857_v25  ;;  %v2917_v45 = vmul.f32 %v6146_v16, %v6001_v55 }
 0x25f   :  { %v3669_v37 = vpack.c.bf16 %v2860_v29, %v2859_v35  ;;  %v3674_v62 = vpack.c.bf16 %v2862_v17, %v2861_v31  ;;  %v2918_v48 = vmul.f32 %v6146_v16, %v6016_v26  ;;  %v2919_v50 = vmul.f32 %v6146_v16, %v6025_v38 }
 0x260   :  { %v3633_v34 = vpack.c.bf16 %v2865_v42, %v2865_v42  ;;  %3665 = vst [vmem:[%s6322_s4] sm:$0xff] %v3664_v58   ;;  %v3679_v47 = vpack.c.bf16 %v2864_v52, %v2863_v20  ;;  %v2920_v53 = vmul.f32 %v6146_v16, %v6038_v63  ;;  %v2921_v40 = vadd.f32 %v2912_v27, %v6166_v46 }
 0x261   :  { %3741 = vst [vmem:[%s6322_s4 + $0x8] sm:$0xff] %v3669_v37   ;;  %3742 = vst [vmem:[%s6322_s4 + $0x10] sm:$0xff] %v3674_v62   ;;  %v2922_v55 = vadd.f32 %v2913_v9, %v6166_v46  ;;  %v2923_v26 = vadd.f32 %v2914_v61, %v6166_v46  ;;  %v2924_v38 = vadd.f32 %v2915_v3, %v6166_v46 }
 0x262   :  { %v2925_v6 = vadd.f32 %v2916_v22, %v6166_v46  ;;  %3743 = vst [vmem:[%s6322_s4 + $0x18] sm:$0xff] %v3679_v47   ;;  %2911 = vst [vmem:[%s6322_s4 + $0x20] sm:$0xf] %v3633_v34  ;;  %v2926_v63 = vadd.f32 %v2917_v45, %v6166_v46  ;;  %v2927_v23 = vadd.f32 %v2918_v48, %v6166_v46  ;;  %v2930_v56 = vmax.f32 %v2921_v40, 0.0 }
 0x263   :  { %v2928_v15 = vadd.f32 %v2919_v50, %v6166_v46  ;;  %v2929_v49 = vadd.f32 %v2920_v53, %v6166_v46  ;;  %v2931_v44 = vmax.f32 %v2922_v55, 0.0  ;;  %v2932_v2 = vmax.f32 %v2923_v26, 0.0 }
 0x264   :  { %v2933_v8 = vmax.f32 %v2924_v38, 0.0  ;;  %v2934_v27 = vmax.f32 %v2925_v6, 0.0  ;;  %v2935_v9 = vmax.f32 %v2926_v63, 0.0  ;;  %v2936_v61 = vmax.f32 %v2927_v23, 0.0  ;;  %v6325_v63 = vld [vmem:[#allocation2_spill] sm:$0xff] }
 0x265   :  { %v2937_v3 = vmax.f32 %v2928_v15, 0.0  ;;  %v2938_v22 = vmax.f32 %v2929_v49, 0.0  ;;  %v3634_v32 = vpack.c.bf16 %v2930_v56, %v2930_v56  ;;  %v3684_v60 = vpack.c.bf16 %v2932_v2, %v2931_v44 }
 0x266   :  { %v2986_v13 = vmul.f32 %v6146_v16, %v6048_v43  ;;  %v3689_v7 = vpack.c.bf16 %v2934_v27, %v2933_v8  ;;  %v3694_v12 = vpack.c.bf16 %v2936_v61, %v2935_v9  ;;  %v2987_v11 = vmul.f32 %v6146_v16, %v6056_v0 }
 0x267   :  { %v2988_v51 = vmul.f32 %v6146_v16, %v6068_v36  ;;  %3580 = vst [vmem:[%s6322_s4 + $0x24] sm:$0xf] %v3634_v32  ;;  %3744 = vst [vmem:[%s6322_s4 + $0x28] sm:$0xff] %v3684_v60   ;;  %v3699_v28 = vpack.c.bf16 %v2938_v22, %v2937_v3  ;;  %v2989_v43 = vmul.f32 %v6146_v16, %v6076_v54 }
 0x268   :  { %v2990_v30 = vmul.f32 %v6146_v16, %v6088_v14  ;;  %v2991_v0 = vmul.f32 %v6146_v16, %v6096_v4  ;;  %3745 = vst [vmem:[%s6322_s4 + $0x30] sm:$0xff] %v3689_v7   ;;  %3746 = vst [vmem:[%s6322_s4 + $0x38] sm:$0xff] %v3694_v12   ;;  %v2992_v36 = vmul.f32 %v6146_v16, %v6108_v5 }
 0x269   :  { %v2993_v54 = vmul.f32 %v6146_v16, %v6116_v59  ;;  %v2994_v14 = vmul.f32 %v6146_v16, %v6128_v1  ;;  %v2995_v25 = vadd.f32 %v2986_v13, %v6166_v46  ;;  %3747 = vst [vmem:[%s6322_s4 + $0x40] sm:$0xff] %v3699_v28   ;;  %v2996_v4 = vadd.f32 %v2987_v11, %v6166_v46 }
 0x26a   :  { %v2997_v57 = vadd.f32 %v2988_v51, %v6166_v46  ;;  %v2998_v35 = vadd.f32 %v2989_v43, %v6166_v46  ;;  %v2999_v5 = vadd.f32 %v2990_v30, %v6166_v46  ;;  %v3000_v29 = vadd.f32 %v2991_v0, %v6166_v46 }
 0x26b   :  { %v3001_v59 = vadd.f32 %v2992_v36, %v6166_v46  ;;  %v3002_v1 = vadd.f32 %v2993_v54, %v6166_v46  ;;  %v3003_v31 = vadd.f32 %v2994_v14, %v6166_v46  ;;  %v3004_v17 = vmax.f32 %v2995_v25, 0.0 }
 0x26c   :  { %v3005_v20 = vmax.f32 %v2996_v4, 0.0  ;;  %v3006_v52 = vmax.f32 %v2997_v57, 0.0  ;;  %v3007_v42 = vmax.f32 %v2998_v35, 0.0  ;;  %v3008_v58 = vmax.f32 %v2999_v5, 0.0 }
 0x26d   :  { %v3009_v45 = vmax.f32 %v3000_v29, 0.0  ;;  %v3010_v37 = vmax.f32 %v3001_v59, 0.0  ;;  %v3011_v62 = vmax.f32 %v3002_v1, 0.0  ;;  %v3012_v48 = vmax.f32 %v3003_v31, 0.0 }
 0x26e   :  { %v3704_v50 = vpack.c.bf16 %v3005_v20, %v3004_v17  ;;  %v3709_v34 = vpack.c.bf16 %v3007_v42, %v3006_v52  ;;  %v3060_v47 = vmul.f32 %v6146_v16, %v6052_v18  ;;  %v3061_v55 = vmul.f32 %v6146_v16, %v6060_v10 }
 0x26f   :  { %v3714_v53 = vpack.c.bf16 %v3009_v45, %v3008_v58  ;;  %v3719_v40 = vpack.c.bf16 %v3011_v62, %v3010_v37  ;;  %v3062_v26 = vmul.f32 %v6146_v16, %v6072_v39  ;;  %v3651_v38 = vpack.c.bf16 %v3012_v48, %v3012_v48 }
 0x270   :  { %3748 = vst [vmem:[%s6322_s4 + $0x48] sm:$0xff] %v3704_v50   ;;  %3749 = vst [vmem:[%s6322_s4 + $0x50] sm:$0xff] %v3709_v34   ;;  %v3063_v18 = vmul.f32 %v6146_v16, %v6081_v41  ;;  %v3064_v6 = vmul.f32 %v6146_v16, %v6092_v19  ;;  %v3065_v10 = vmul.f32 %v6146_v16, %v6101_v33 }
 0x271   :  { %3750 = vst [vmem:[%s6322_s4 + $0x58] sm:$0xff] %v3714_v53   ;;  %3751 = vst [vmem:[%s6322_s4 + $0x60] sm:$0xff] %v3719_v40   ;;  %v3066_v39 = vmul.f32 %v6146_v16, %v6112_v24  ;;  %v3067_v41 = vmul.f32 %v6146_v16, %v6121_v21  ;;  %v3068_v19 = vmul.f32 %v6146_v16, %v6325_v63 }
 0x272   :  { %v3069_v23 = vadd.f32 %v3060_v47, %v6166_v46  ;;  %3606 = vst [vmem:[%s6322_s4 + $0x68] sm:$0xf] %v3651_v38  ;;  %v3070_v33 = vadd.f32 %v3061_v55, %v6166_v46  ;;  %v3071_v15 = vadd.f32 %v3062_v26, %v6166_v46  ;;  %v3072_v49 = vadd.f32 %v3063_v18, %v6166_v46 }
 0x273   :  { %v3073_v24 = vadd.f32 %v3064_v6, %v6166_v46  ;;  %v3074_v56 = vadd.f32 %v3065_v10, %v6166_v46  ;;  %v3075_v21 = vadd.f32 %v3066_v39, %v6166_v46  ;;  %v3076_v16 = vadd.f32 %v3067_v41, %v6166_v46 }
 0x274   :  { %v3077_v44 = vadd.f32 %v3068_v19, %v6166_v46  ;;  %v3078_v2 = vmax.f32 %v3069_v23, 0.0  ;;  %v3079_v8 = vmax.f32 %v3070_v33, 0.0  ;;  %v3080_v27 = vmax.f32 %v3071_v15, 0.0 }
 0x275   :  { %v3081_v9 = vmax.f32 %v3072_v49, 0.0  ;;  %v3082_v61 = vmax.f32 %v3073_v24, 0.0  ;;  %v3083_v3 = vmax.f32 %v3074_v56, 0.0  ;;  %v3084_v22 = vmax.f32 %v3075_v21, 0.0 }
 0x276   :  { %v3085_v32 = vmax.f32 %v3076_v16, 0.0  ;;  %v3086_v60 = vmax.f32 %v3077_v44, 0.0  ;;  %v3652_v13 = vpack.c.bf16 %v3078_v2, %v3078_v2  ;;  %v3724_v7 = vpack.c.bf16 %v3080_v27, %v3079_v8 }
 0x277   :  { %v3729_v12 = vpack.c.bf16 %v3082_v61, %v3081_v9  ;;  %v3734_v11 = vpack.c.bf16 %v3084_v22, %v3083_v3 }
 0x278   :  { %3616 = vst [vmem:[%s6322_s4 + $0x6c] sm:$0xf] %v3652_v13  ;;  %3752 = vst [vmem:[%s6322_s4 + $0x70] sm:$0xff] %v3724_v7   ;;  %v3739_v46 = vpack.c.bf16 %v3086_v60, %v3085_v32 }
 0x279   :  { %3753 = vst [vmem:[%s6322_s4 + $0x78] sm:$0xff] %v3729_v12   ;;  %3754 = vst [vmem:[%s6322_s4 + $0x80] sm:$0xff] %v3734_v11  }
 0x27a   :  { %3755 = vst [vmem:[%s6322_s4 + $0x88] sm:$0xff] %v3739_v46  }

// kernel: attgan_forward.11
= control target key start
LH: loop header
LB: loop body
LE: loop exit
PB: predicated region body
PF: predicated region fallthrough
CT: control target
= control target key end

     0   :  { %v8988_v0 = vmov 0.0   ;;  %vm6820_vm0 = vmmov 0   ;;  %vm118_vm1 = vsmask.f32 7424  ;;  %vm234_vm2 = vcmask 261120   ;;  %s8960_s2 = inlined_call_operand.vmem [shape: f32[200,1], index: 2, kind: input, shape index: {}]   ;;  %s8961_s1 = inlined_call_operand.vmem [shape: bf16[16,32,128], index: 1, kind: input, shape index: {}]   ;;  %s8962_s0 = inlined_call_operand.vmem [shape: bf16[224,32], index: 0, kind: input, shape index: {}]   ;;  %s8963_s3 = inlined_call_operand.vmem [shape: f32[2,128], index: 3, kind: input, shape index: {}]   ;;  %s8964_s4 = inlined_call_operand.vmem [shape: bf16[4,200,128], index: 4, kind: output, shape index: {}]  }
   0x1   :  { %5629 = vmatprep.subr.bf16.mxu0 %v8988_v0  ;;  %5685 = vmatprep.subr.bf16.mxu1 %v8988_v0  ;;  %v6527_v1 = vld [vmem:[%s8961_s1 + $0x10] sm:$0xff]   ;;  %v6528_v2 = vld [vmem:[%s8961_s1] sm:$0xff]   ;;  %v6529_v3 = vld [vmem:[%s8961_s1 + $0x18] sm:$0xff]   ;;  %vm929_vm3 = vsmask.f32 6400  ;;  %vm682_vm4 = vcmask 1046528  }
   0x2   :  { %5633 = vmatprep.mubr.msk.bf16.mxu0 %vm6820_vm0, %v8988_v0  ;;  %5689 = vmatprep.mubr.msk.bf16.mxu1 %vm6820_vm0, %v8988_v0  ;;  %v6530_v4 = vld [vmem:[%s8961_s1 + $0x8] sm:$0xff]   ;;  %v18_v5 = vld [vmem:[%s8962_s0] sm:$0xf]  ;;  %v6872_v6 = vld [vmem:[%s8962_s0 + $0x4] sm:$0xf]  ;;  %vm1819_vm5 = vcmask 1045504  }
   0x3   :  { %5630 = vmatpush3.bf16.msra.mxu0 %v6527_v1  ;;  %5686 = vmatpush3.bf16.msra.mxu1 %v6528_v2  ;;  %v4485_v7 = vcombine.low %v18_v5, %v6872_v6  ;;  %v6878_v8 = vld [vmem:[%s8962_s0 + $0x8] sm:$0xff]   ;;  %v6534_v12 = vld [vmem:[%s8961_s1 + $0x30] sm:$0xff]   ;;  %v6533_v16 = vld [vmem:[%s8961_s1 + $0x20] sm:$0xff]   ;;  %vm2705_vm6 = vsmask.f32 5376  ;;  %vm3527_vm7 = vcmask 1044480  }
   0x4   :  { %5631 = vmatprep.subr.bf16.mxu0 %v8988_v0  ;;  %5687 = vmatprep.subr.bf16.mxu1 %v8988_v0  ;;  %v127_v11 = vshll.u32 %v6878_v8, 16  ;;  %v6889_v13 = vld [vmem:[%s8962_s0 + $0x10] sm:$0xff]   ;;  %v131_v17 = vshrl.u32 %v6878_v8, 16  ;;  %v6910_v23 = vld [vmem:[%s8962_s0 + $0x18] sm:$0xff]   ;;  %v6541_v24 = vld [vmem:[%s8961_s1 + $0x28] sm:$0xff]  }
   0x5   :  { %v120_v9 = vshrl.u32 %v4485_v7, 16  ;;  %v122_v10 = vshll.u32 %v4485_v7, 16  ;;  %v135_v18 = vshll.u32 %v6889_v13, 16  ;;  %v6542_v25 = vld [vmem:[%s8961_s1 + $0x38] sm:$0xff]   ;;  %v139_v27 = vshrl.u32 %v6889_v13, 16  ;;  %v6937_v31 = vld [vmem:[%s8962_s0 + $0x20] sm:$0xff]  }
   0x6   :  { %v129_v15 = vrot.slane %v127_v11, 1  ;;  %v143_v28 = vshll.u32 %v6910_v23, 16  ;;  %v147_v33 = vshrl.u32 %v6910_v23, 16  ;;  %v151_v34 = vshll.u32 %v6937_v31, 16  ;;  %v6955_v37 = vld [vmem:[%s8962_s0 + $0x28] sm:$0xff]   ;;  %v6973_v43 = vld [vmem:[%s8962_s0 + $0x30] sm:$0xff]  }
   0x7   :  { %5632 = vmatpush3.bf16.msra.mxu0 %v6529_v3  ;;  %5688 = vmatpush3.bf16.msra.mxu1 %v6530_v4  ;;  %v124_v14 = vrot.slane %v122_v10, 1  ;;  %v137_v22 = vrot.slane %v135_v18, 1  ;;  %v155_v39 = vshrl.u32 %v6937_v31, 16  ;;  %v159_v40 = vshll.u32 %v6955_v37, 16  ;;  %v6987_v47 = vld [vmem:[%s8962_s0 + $0x38] sm:$0xff]   ;;  %v7005_v53 = vld [vmem:[%s8962_s0 + $0x40] sm:$0xff]  }
   0x8   :  { %5741 = vmatprep.subr.bf16.mxu0 %v8988_v0  ;;  %5797 = vmatprep.subr.bf16.mxu1 %v8988_v0  ;;  %v133_v21 = vor.u32 %v131_v17, %v129_v15  ;;  %v145_v30 = vrot.slane %v143_v28, 1  ;;  %v153_v36 = vrot.slane %v151_v34, 1  ;;  %v163_v45 = vshrl.u32 %v6955_v37, 16  ;;  %v7027_v61 = vld [vmem:[%s8962_s0 + $0x48] sm:$0xff]   ;;  %v7045_v4 = vld [vmem:[%s8962_s0 + $0x50] sm:$0xff]  }
   0x9   :  { %v125_v19 = vor.u32 %v124_v14, %v120_v9  ;;  %v141_v29 = vor.u32 %v139_v27, %v137_v22  ;;  %v161_v42 = vrot.slane %v159_v40, 1  ;;  %v167_v46 = vshll.u32 %v6973_v43, 16  ;;  %v42_v17 = vld [vmem:[%s8962_s0 + $0x60] sm:$0xf]  ;;  %v47_v18 = vld [vmem:[%s8962_s0 + $0x64] sm:$0x1] }
   0xa   :  { %5690 = vmatmul.mubr.msk.bf16.vlgmr.msra.gmra.mrb[0].mxu1 %vm234_vm2, %v4485_v7  ;;  %v6922_v26 = vsel %vm118_vm1, %v133_v21, %v137_v22  ;;  %v149_v35 = vor.u32 %v147_v33, %v145_v30  ;;  %v157_v41 = vor.u32 %v155_v39, %v153_v36  ;;  %v171_v50 = vshrl.u32 %v6973_v43, 16  ;;  %v586_v28 = vld [vmem:[%s8962_s0 + $0x4] sm:$0xe] }
   0xb   :  { %5798 = vmatpush3.bf16.msra.mxu1 %v6534_v12  ;;  %5693 = vmatprep.mubr.msk.bf16.mxu1 %vm6820_vm0, %v8988_v0  ;;  %v6901_v20 = vsel %vm118_vm1, %v125_v19, %v129_v15  ;;  %v6942_v32 = vsel %vm118_vm1, %v141_v29, %v145_v30  ;;  %v165_v48 = vor.u32 %v163_v45, %v161_v42  ;;  %v169_v49 = vrot.slane %v167_v46, 1  ;;  %v7063_v12 = vld [vmem:[%s8962_s0 + $0x58] sm:$0xff]   ;;  %v7101_v29 = vld [vmem:[%s8962_s0 + $0x8] sm:$0xf] }
   0xc   :  { %5799 = vmatprep.subr.bf16.mxu1 %v8988_v0  ;;  %5634 = vmatmul.mubr.msk.bf16.vlgmr.msra.gmra.mrb[0].mxu0 %vm234_vm2, %v6901_v20  ;;  %v6960_v38 = vsel %vm118_vm1, %v149_v35, %v153_v36  ;;  %v6978_v44 = vsel %vm118_vm1, %v157_v41, %v161_v42  ;;  %v175_v51 = vshll.u32 %v6987_v47, 16  ;;  %v179_v56 = vshrl.u32 %v6987_v47, 16  ;;  %v7111_v35 = vld [vmem:[%s8962_s0 + $0xc] sm:$0xff]  }
   0xd   :  { %5742 = vmatpush3.bf16.msra.mxu0 %v6533_v16  ;;  %5637 = vmatprep.mubr.msk.bf16.mxu0 %vm6820_vm0, %v8988_v0  ;;  %v6998_v52 = vsel %vm118_vm1, %v165_v48, %v169_v49  ;;  %v173_v54 = vor.u32 %v171_v50, %v169_v49  ;;  %v183_v57 = vshll.u32 %v7005_v53, 16  ;;  %v187_v63 = vshrl.u32 %v7005_v53, 16 }
   0xe   :  { %5743 = vmatprep.subr.bf16.mxu0 %v8988_v0  ;;  %v177_v55 = vrot.slane %v175_v51, 1  ;;  %v191_v1 = vshll.u32 %v7027_v61, 16  ;;  %v195_v7 = vshrl.u32 %v7027_v61, 16  ;;  %v199_v9 = vshll.u32 %v7045_v4, 16 }
   0xf   :  { %5800 = vmatpush3.bf16.msra.mxu1 %v6542_v25  ;;  %v185_v60 = vrot.slane %v183_v57, 1  ;;  %v203_v15 = vshrl.u32 %v7045_v4, 16  ;;  %v207_v16 = vshll.u32 %v7063_v12, 16  ;;  %v7084_v22 = vcombine.low %v42_v17, %v47_v18 }
  0x10   :  { %5909 = vmatprep.subr.bf16.mxu1 %v8988_v0  ;;  %v7016_v58 = vsel %vm118_vm1, %v173_v54, %v177_v55  ;;  %v181_v59 = vor.u32 %v179_v56, %v177_v55  ;;  %v193_v3 = vrot.slane %v191_v1, 1  ;;  %v201_v11 = vrot.slane %v199_v9, 1  ;;  %v7130_v54 = vld [vmem:[%s8962_s0 + $0x14] sm:$0xff]  }
  0x11   :  { %5744 = vmatpush3.bf16.msra.mxu0 %v6541_v24  ;;  %v189_v2 = vor.u32 %v187_v63, %v185_v60  ;;  %v209_v21 = vrot.slane %v207_v16, 1  ;;  %v211_v25 = vshrl.u32 %v7063_v12, 16  ;;  %v215_v27 = vshll.u32 %v7084_v22, 16 }
  0x12   :  { %5694 = vmatmul.mubr.msk.bf16.gmra.mrb[4].mxu1 %vm234_vm2, %v6878_v8  ;;  %5853 = vmatprep.subr.bf16.mxu0 %v8988_v0  ;;  %v7032_v62 = vsel %vm118_vm1, %v181_v59, %v185_v60  ;;  %v197_v10 = vor.u32 %v195_v7, %v193_v3  ;;  %v205_v19 = vor.u32 %v203_v15, %v201_v11  ;;  %v939_v41 = vshrl.u32 %v7111_v35, 16  ;;  %v6551_v15 = vld [vmem:[%s8961_s1 + $0x50] sm:$0xff]  }
  0x13   :  { %5697 = vmatprep.mubr.msk.bf16.mxu1 %vm6820_vm0, %v8988_v0  ;;  %v7050_v5 = vsel %vm118_vm1, %v189_v2, %v193_v3  ;;  %v4533_v30 = vcombine.low %v586_v28, %v7101_v29  ;;  %v213_v33 = vor.u32 %v211_v25, %v209_v21  ;;  %v217_v34 = vrot.slane %v215_v27, 1  ;;  %v6552_v3 = vld [vmem:[%s8961_s1 + $0x40] sm:$0xff]  }
  0x14   :  { %5638 = vmatmul.mubr.msk.bf16.gmra.mrb[4].mxu0 %vm234_vm2, %v6922_v26  ;;  %v7068_v14 = vsel %vm118_vm1, %v197_v10, %v201_v11  ;;  %v7089_v24 = vsel %vm118_vm1, %v205_v19, %v209_v21  ;;  %v942_v42 = vshll.u32 %v7111_v35, 16  ;;  %v219_v45 = vshrl.u32 %v7084_v22, 16  ;;  %v7153_v10 = vld [vmem:[%s8962_s0 + $0x1c] sm:$0xff]   ;;  %v6560_v19 = vld [vmem:[%s8961_s1 + $0x48] sm:$0xff]  }
  0x15   :  { %5641 = vmatprep.mubr.msk.bf16.mxu0 %vm6820_vm0, %v8988_v0  ;;  %v931_v36 = vshrl.u32 %v4533_v30, 16  ;;  %v7116_v39 = vsel %vm118_vm1, %v213_v33, %v217_v34  ;;  %v934_v40 = vshll.u32 %v4533_v30, 16  ;;  %v4513_v46 = vcombine.low %v42_v17, %v42_v17  ;;  %v6559_v33 = vld [vmem:[%s8961_s1 + $0x58] sm:$0xff]  }
  0x16   :  { %v941_v50 = vrot.slane %v939_v41, 1  ;;  %v944_v51 = vrot.slane %v942_v42, 2  ;;  %v7132_v55 = vor.u32 %v219_v45, %v217_v34  ;;  %v948_v59 = vshrl.u32 %v7130_v54, 16 }
  0x17   :  { %v933_v48 = vrot.slane %v931_v36, 1  ;;  %v936_v49 = vrot.slane %v934_v40, 2  ;;  %v951_v60 = vshll.u32 %v7130_v54, 16  ;;  %v684_v63 = vrot.slane %v7111_v35, 1 }
  0x18   :  { %v945_v57 = vor.u32 %v944_v51, %v941_v50  ;;  %v683_v1 = vrot.slane %v4533_v30, 1  ;;  %v950_v7 = vrot.slane %v948_v59, 1  ;;  %v957_v17 = vshrl.u32 %v7153_v10, 16  ;;  %v7182_v30 = vld [vmem:[%s8962_s0 + $0x24] sm:$0xff]  }
  0x19   :  { %v937_v56 = vor.u32 %v936_v49, %v933_v48  ;;  %v953_v9 = vrot.slane %v951_v60, 2  ;;  %v960_v18 = vshll.u32 %v7153_v10, 16  ;;  %v686_v21 = vrot.slane %v7130_v54, 1  ;;  %v7210_v49 = vld [vmem:[%s8962_s0 + $0x2c] sm:$0xff]  }
  0x1a   :  { %5698 = vmatmul.mubr.msk.bf16.gmra.mrb[8].mxu1 %vm234_vm2, %v6889_v13  ;;  %v7158_v11 = vsel %vm682_vm4, %v683_v1, %v684_v63  ;;  %v959_v27 = vrot.slane %v957_v17, 1  ;;  %v966_v40 = vshrl.u32 %v7182_v30, 16  ;;  %v969_v41 = vshll.u32 %v7182_v30, 16 }
  0x1b   :  { %5701 = vmatprep.mubr.msk.bf16.mxu1 %vm6820_vm0, %v8988_v0  ;;  %v7145_v2 = vsel %vm929_vm3, %v937_v56, %v945_v57  ;;  %8995 = vst [vmem:[#allocation2_spill] sm:$0xff] %v7158_v11  ;;  %v954_v16 = vor.u32 %v953_v9, %v950_v7  ;;  %v962_v28 = vrot.slane %v960_v18, 2  ;;  %v7192_v34 = vsel %vm682_vm4, %v684_v63, %v686_v21 }
  0x1c   :  { %5642 = vmatmul.mubr.msk.bf16.gmra.mrb[8].mxu0 %vm234_vm2, %v6942_v32  ;;  %8996 = vst [vmem:[#allocation3_spill] sm:$0xff] %v7192_v34  ;;  %v688_v42 = vrot.slane %v7153_v10, 1  ;;  %v971_v48 = vrot.slane %v969_v41, 2  ;;  %v975_v56 = vshrl.u32 %v7210_v49, 16  ;;  %v690_v59 = vrot.slane %v7182_v30, 1 }
  0x1d   :  { %5645 = vmatprep.mubr.msk.bf16.mxu0 %vm6820_vm0, %v8988_v0  ;;  %v7177_v25 = vsel %vm929_vm3, %v945_v57, %v954_v16  ;;  %v963_v36 = vor.u32 %v962_v28, %v959_v27  ;;  %v978_v57 = vshll.u32 %v7210_v49, 16  ;;  %v692_v17 = vrot.slane %v7210_v49, 1  ;;  %v7254_v27 = vld [vmem:[%s8962_s0 + $0x3c] sm:$0xff]  }
  0x1e   :  { %v7215_v50 = vsel %vm682_vm4, %v686_v21, %v688_v42  ;;  %v977_v63 = vrot.slane %v975_v56, 1  ;;  %v7237_v7 = vsel %vm682_vm4, %v688_v42, %v690_v59 }
  0x1f   :  { %v7205_v45 = vsel %vm929_vm3, %v954_v16, %v963_v36  ;;  %8997 = vst [vmem:[#allocation4_spill] sm:$0xff] %v7215_v50  ;;  %v980_v1 = vrot.slane %v978_v57, 2  ;;  %8998 = vst [vmem:[#allocation5_spill] sm:$0xff] %v7237_v7  ;;  %v7259_v28 = vsel %vm682_vm4, %v690_v59, %v692_v17 }
  0x20   :  { %8999 = vst [vmem:[#allocation6_spill] sm:$0xff] %v7259_v28 }
  0x21   :  { %v981_v9 = vor.u32 %v980_v1, %v977_v63  ;;  %v696_v1 = vrot.slane %v7254_v27, 1 }
  0x22   :  { %5702 = vmatmul.mubr.msk.bf16.gmra.mrb[12].mxu1 %vm234_vm2, %v6910_v23 }
  0x23   :  { %5705 = vmatprep.mubr.msk.bf16.mxu1 %vm6820_vm0, %v8988_v0 }
  0x24   :  { %5646 = vmatmul.mubr.msk.bf16.gmra.mrb[12].mxu0 %vm234_vm2, %v6960_v38 }
  0x25   :  { %5649 = vmatprep.mubr.msk.bf16.mxu0 %vm6820_vm0, %v8988_v0 }
  0x2a   :  { %5706 = vmatmul.mubr.msk.bf16.gmra.mrb[16].mxu1 %vm234_vm2, %v6937_v31 }
  0x2b   :  { %5709 = vmatprep.mubr.msk.bf16.mxu1 %vm6820_vm0, %v8988_v0 }
  0x2c   :  { %5650 = vmatmul.mubr.msk.bf16.gmra.mrb[16].mxu0 %vm234_vm2, %v6978_v44 }
  0x2d   :  { %5653 = vmatprep.mubr.msk.bf16.mxu0 %vm6820_vm0, %v8988_v0 }
  0x32   :  { %5710 = vmatmul.mubr.msk.bf16.gmra.mrb[20].mxu1 %vm234_vm2, %v6955_v37 }
  0x33   :  { %5713 = vmatprep.mubr.msk.bf16.mxu1 %vm6820_vm0, %v8988_v0 }
  0x34   :  { %5654 = vmatmul.mubr.msk.bf16.gmra.mrb[20].mxu0 %vm234_vm2, %v6998_v52 }
  0x35   :  { %5657 = vmatprep.mubr.msk.bf16.mxu0 %vm6820_vm0, %v8988_v0 }
  0x3a   :  { %5714 = vmatmul.mubr.msk.bf16.gmra.mrb[24].mxu1 %vm234_vm2, %v6973_v43 }
  0x3b   :  { %5717 = vmatprep.mubr.msk.bf16.mxu1 %vm6820_vm0, %v8988_v0 }
  0x3c   :  { %5658 = vmatmul.mubr.msk.bf16.gmra.mrb[24].mxu0 %vm234_vm2, %v7016_v58 }
  0x3d   :  { %5661 = vmatprep.mubr.msk.bf16.mxu0 %vm6820_vm0, %v8988_v0 }
  0x42   :  { %5718 = vmatmul.mubr.msk.bf16.gmra.mrb[28].mxu1 %vm234_vm2, %v6987_v47 }
  0x43   :  { %5721 = vmatprep.mubr.msk.bf16.mxu1 %vm6820_vm0, %v8988_v0 }
  0x44   :  { %5662 = vmatmul.mubr.msk.bf16.gmra.mrb[28].mxu0 %vm234_vm2, %v7032_v62 }
  0x45   :  { %5665 = vmatprep.mubr.msk.bf16.mxu0 %vm6820_vm0, %v8988_v0 }
  0x4a   :  { %5722 = vmatmul.mubr.msk.bf16.gmra.mrb[32].mxu1 %vm234_vm2, %v7005_v53 }
  0x4b   :  { %5725 = vmatprep.mubr.msk.bf16.mxu1 %vm6820_vm0, %v8988_v0 }
  0x4c   :  { %5666 = vmatmul.mubr.msk.bf16.gmra.mrb[32].mxu0 %vm234_vm2, %v7050_v5 }
  0x4d   :  { %5669 = vmatprep.mubr.msk.bf16.mxu0 %vm6820_vm0, %v8988_v0 }
  0x52   :  { %5726 = vmatmul.mubr.msk.bf16.gmra.mrb[36].mxu1 %vm234_vm2, %v7027_v61 }
  0x53   :  { %5729 = vmatprep.mubr.msk.bf16.mxu1 %vm6820_vm0, %v8988_v0 }
  0x54   :  { %5670 = vmatmul.mubr.msk.bf16.gmra.mrb[36].mxu0 %vm234_vm2, %v7068_v14 }
  0x55   :  { %5673 = vmatprep.mubr.msk.bf16.mxu0 %vm6820_vm0, %v8988_v0 }
  0x5a   :  { %5730 = vmatmul.mubr.msk.bf16.gmra.mrb[40].mxu1 %vm234_vm2, %v7045_v4 }
  0x5b   :  { %5733 = vmatprep.mubr.msk.bf16.mxu1 %vm6820_vm0, %v8988_v0 }
  0x5c   :  { %5674 = vmatmul.mubr.msk.bf16.gmra.mrb[40].mxu0 %vm234_vm2, %v7089_v24 }
  0x5d   :  { %5677 = vmatprep.mubr.msk.bf16.mxu0 %vm6820_vm0, %v8988_v0 }
  0x62   :  { %5734 = vmatmul.mubr.msk.bf16.gmra.mrb[44].mxu1 %vm234_vm2, %v7063_v12 }
  0x63   :  { %5737 = vmatprep.mubr.msk.bf16.mxu1 %vm6820_vm0, %v8988_v0 }
  0x64   :  { %5678 = vmatmul.mubr.msk.bf16.gmra.mrb[44].mxu0 %vm234_vm2, %v7116_v39 }
  0x65   :  { %5681 = vmatprep.mubr.msk.bf16.mxu0 %vm6820_vm0, %v8988_v0 }
  0x6a   :  { %5738 = vmatmul.mubr.msk.bf16.gmra.mrb[48].mxu1 %vm234_vm2, %v4513_v46  ;;  %v968_v46 = vrot.slane %v966_v40, 1  ;;  %v996_v40 = vshll.u32 %v7254_v27, 16 }
  0x6b   :  { %5801 = vmatprep.mubr.msk.bf16.mxu1 %vm6820_vm0, %v8988_v0 }
  0x6c   :  { %5682 = vmatmul.mubr.msk.bf16.gmra.mrb[48].mxu0 %vm234_vm2, %v7132_v55  ;;  %v972_v51 = vor.u32 %v971_v48, %v968_v46  ;;  %v998_v48 = vrot.slane %v996_v40, 2 }
  0x6d   :  { %5745 = vmatprep.mubr.msk.bf16.mxu0 %vm6820_vm0, %v8988_v0 }
  0x6e   :  { %v7227_v60 = vsel %vm929_vm3, %v963_v36, %v972_v51  ;;  %v7249_v18 = vsel %vm929_vm3, %v972_v51, %v981_v9  ;;  %v993_v36 = vshrl.u32 %v7254_v27, 16  ;;  %v7276_v51 = vld [vmem:[%s8962_s0 + $0x44] sm:$0xff]  }
  0x6f   :  { %v1002_v59 = vshrl.u32 %v7276_v51, 16  ;;  %v1005_v63 = vshll.u32 %v7276_v51, 16  ;;  %v698_v40 = vrot.slane %v7276_v51, 1 }
  0x70   :  { %v995_v46 = vrot.slane %v993_v36, 1 }
  0x72   :  { %5802 = vmatmul.mubr.msk.bf16.vlgmr.msra.gmra.mrb[52].mxu1 %vm234_vm2, %v7145_v2  ;;  %v999_v57 = vor.u32 %v998_v48, %v995_v46 }
  0x73   :  { %5910 = vmatpush3.bf16.msra.mxu1 %v6552_v3  ;;  %5805 = vmatprep.mubr.msk.bf16.mxu1 %vm6820_vm0, %v8988_v0  ;;  %v7232_v3 = vld [vmem:[%s8962_s0 + $0x34] sm:$0xff]  }
  0x74   :  { %5911 = vmatprep.subr.bf16.mxu1 %v8988_v0  ;;  %5746 = vmatmul.mubr.msk.bf16.vlgmr.msra.gmra.mrb[52].mxu0 %vm234_vm2, %v7158_v11  ;;  %v987_v16 = vshll.u32 %v7232_v3, 16  ;;  %v694_v41 = vrot.slane %v7232_v3, 1 }
  0x75   :  { %5854 = vmatpush3.bf16.msra.mxu0 %v6551_v15  ;;  %5749 = vmatprep.mubr.msk.bf16.mxu0 %vm6820_vm0, %v8988_v0  ;;  %v984_v15 = vshrl.u32 %v7232_v3, 16 }
  0x76   :  { %5855 = vmatprep.subr.bf16.mxu0 %v8988_v0  ;;  %v989_v21 = vrot.slane %v987_v16, 2  ;;  %v7281_v56 = vsel %vm682_vm4, %v692_v17, %v694_v41  ;;  %v1007_v16 = vrot.slane %v1005_v63, 2  ;;  %v7298_v17 = vld [vmem:[%s8962_s0 + $0x4c] sm:$0xff]   ;;  %v7325_v63 = vsel %vm682_vm4, %v696_v1, %v698_v40 }
  0x77   :  { %5912 = vmatpush3.bf16.msra.mxu1 %v6560_v19  ;;  %v986_v19 = vrot.slane %v984_v15, 1  ;;  %9000 = vst [vmem:[#allocation7_spill] sm:$0xff] %v7281_v56  ;;  %v1004_v15 = vrot.slane %v1002_v59, 1  ;;  %v1014_v36 = vshll.u32 %v7298_v17, 16  ;;  %v7320_v59 = vld [vmem:[%s8962_s0 + $0x54] sm:$0xff]   ;;  %9002 = vst [vmem:[#allocation9_spill] sm:$0xff] %v7325_v63 }
  0x78   :  { %6021 = vmatprep.subr.bf16.mxu1 %v8988_v0 }
  0x79   :  { %5856 = vmatpush3.bf16.msra.mxu0 %v6559_v33  ;;  %v990_v33 = vor.u32 %v989_v21, %v986_v19  ;;  %v7303_v19 = vsel %vm682_vm4, %v694_v41, %v696_v1  ;;  %v1008_v21 = vor.u32 %v1007_v16, %v1004_v15  ;;  %v1016_v48 = vrot.slane %v1014_v36, 2 }
  0x7a   :  { %5806 = vmatmul.mubr.msk.bf16.gmra.mrb[56].mxu1 %vm234_vm2, %v7177_v25  ;;  %5965 = vmatprep.subr.bf16.mxu0 %v8988_v0  ;;  %9001 = vst [vmem:[#allocation8_spill] sm:$0xff] %v7303_v19  ;;  %v1023_v16 = vshll.u32 %v7320_v59, 16 }
  0x7b   :  { %5809 = vmatprep.mubr.msk.bf16.mxu1 %vm6820_vm0, %v8988_v0  ;;  %v7271_v42 = vsel %vm929_vm3, %v981_v9, %v990_v33  ;;  %v7293_v9 = vsel %vm929_vm3, %v990_v33, %v999_v57  ;;  %v1011_v33 = vshrl.u32 %v7298_v17, 16  ;;  %v7315_v46 = vsel %vm929_vm3, %v999_v57, %v1008_v21 }
  0x7c   :  { %5750 = vmatmul.mubr.msk.bf16.gmra.mrb[56].mxu0 %vm234_vm2, %v7192_v34  ;;  %v1020_v57 = vshrl.u32 %v7320_v59, 16 }
  0x7d   :  { %5753 = vmatprep.mubr.msk.bf16.mxu0 %vm6820_vm0, %v8988_v0  ;;  %v1013_v41 = vrot.slane %v1011_v33, 1  ;;  %v700_v33 = vrot.slane %v7298_v17, 1 }
  0x7e   :  { %v1022_v1 = vrot.slane %v1020_v57, 1 }
  0x7f   :  { %v1017_v15 = vor.u32 %v1016_v48, %v1013_v41  ;;  %v7342_v41 = vld [vmem:[%s8962_s0 + $0x5c] sm:$0xff]   ;;  %v7347_v48 = vsel %vm682_vm4, %v698_v40, %v700_v33  ;;  %v702_v40 = vrot.slane %v7320_v59, 1 }
  0x80   :  { %9004 = vst [vmem:[#allocation11_spill] sm:$0xff] %v7347_v48  ;;  %v1032_v57 = vshll.u32 %v7342_v41, 16 }
  0x81   :  { %v7337_v36 = vsel %vm929_vm3, %v1008_v21, %v1017_v15  ;;  %v1029_v21 = vshrl.u32 %v7342_v41, 16 }
  0x82   :  { %5810 = vmatmul.mubr.msk.bf16.gmra.mrb[60].mxu1 %vm234_vm2, %v7205_v45  ;;  %9003 = vst [vmem:[#allocation10_spill] sm:$0xff] %v7337_v36 }
  0x83   :  { %5813 = vmatprep.mubr.msk.bf16.mxu1 %vm6820_vm0, %v8988_v0 }
  0x84   :  { %5754 = vmatmul.mubr.msk.bf16.gmra.mrb[60].mxu0 %vm234_vm2, %v7215_v50  ;;  %v7372_v50 = vsel %vm682_vm4, %v700_v33, %v702_v40 }
  0x85   :  { %5757 = vmatprep.mubr.msk.bf16.mxu0 %vm6820_vm0, %v8988_v0  ;;  %9006 = vst [vmem:[#allocation13_spill] sm:$0xff] %v7372_v50 }
  0x8a   :  { %5814 = vmatmul.mubr.msk.bf16.gmra.mrb[64].mxu1 %vm234_vm2, %v7227_v60 }
  0x8b   :  { %5817 = vmatprep.mubr.msk.bf16.mxu1 %vm6820_vm0, %v8988_v0 }
  0x8c   :  { %5758 = vmatmul.mubr.msk.bf16.gmra.mrb[64].mxu0 %vm234_vm2, %v7237_v7 }
  0x8d   :  { %5761 = vmatprep.mubr.msk.bf16.mxu0 %vm6820_vm0, %v8988_v0 }
  0x92   :  { %5818 = vmatmul.mubr.msk.bf16.gmra.mrb[68].mxu1 %vm234_vm2, %v7249_v18 }
  0x93   :  { %5821 = vmatprep.mubr.msk.bf16.mxu1 %vm6820_vm0, %v8988_v0 }
  0x94   :  { %5762 = vmatmul.mubr.msk.bf16.gmra.mrb[68].mxu0 %vm234_vm2, %v7259_v28  ;;  %v1034_v28 = vrot.slane %v1032_v57, 2 }
  0x95   :  { %5765 = vmatprep.mubr.msk.bf16.mxu0 %vm6820_vm0, %v8988_v0 }
  0x9a   :  { %5822 = vmatmul.mubr.msk.bf16.gmra.mrb[72].mxu1 %vm234_vm2, %v7271_v42 }
  0x9b   :  { %5825 = vmatprep.mubr.msk.bf16.mxu1 %vm6820_vm0, %v8988_v0 }
  0x9c   :  { %5766 = vmatmul.mubr.msk.bf16.gmra.mrb[72].mxu0 %vm234_vm2, %v7281_v56  ;;  %v920_v56 = vld [vmem:[%s8962_s0 + $0x68] sm:$0x3] }
  0x9d   :  { %5769 = vmatprep.mubr.msk.bf16.mxu0 %vm6820_vm0, %v8988_v0 }
  0xa2   :  { %5826 = vmatmul.mubr.msk.bf16.gmra.mrb[76].mxu1 %vm234_vm2, %v7293_v9 }
  0xa3   :  { %5829 = vmatprep.mubr.msk.bf16.mxu1 %vm6820_vm0, %v8988_v0 }
  0xa4   :  { %5770 = vmatmul.mubr.msk.bf16.gmra.mrb[76].mxu0 %vm234_vm2, %v7303_v19  ;;  %v1025_v19 = vrot.slane %v1023_v16, 2  ;;  %v610_v16 = vld [vmem:[%s8962_s0 + $0x64] sm:$0xf] }
  0xa5   :  { %5773 = vmatprep.mubr.msk.bf16.mxu0 %vm6820_vm0, %v8988_v0  ;;  %v7367_v7 = vcombine.low %v610_v16, %v920_v56  ;;  %v704_v56 = vrot.slane %v7342_v41, 1 }
  0xa7   :  { %v1038_v34 = vshrl.u32 %v7367_v7, 16  ;;  %v1041_v11 = vshll.u32 %v7367_v7, 16  ;;  %v7392_v57 = vsel %vm682_vm4, %v702_v40, %v704_v56 }
  0xa8   :  { %9008 = vst [vmem:[#allocation15_spill] sm:$0xff] %v7392_v57 }
  0xa9   :  { %v1040_v33 = vrot.slane %v1038_v34, 1 }
  0xaa   :  { %5830 = vmatmul.mubr.msk.bf16.gmra.mrb[80].mxu1 %vm234_vm2, %v7315_v46 }
  0xab   :  { %5833 = vmatprep.mubr.msk.bf16.mxu1 %vm6820_vm0, %v8988_v0 }
  0xac   :  { %5774 = vmatmul.mubr.msk.bf16.gmra.mrb[80].mxu0 %vm234_vm2, %v7325_v63  ;;  %v1026_v63 = vor.u32 %v1025_v19, %v1022_v1  ;;  %v1031_v1 = vrot.slane %v1029_v21, 1  ;;  %v1043_v21 = vrot.slane %v1041_v11, 2 }
  0xad   :  { %5777 = vmatprep.mubr.msk.bf16.mxu0 %vm6820_vm0, %v8988_v0 }
  0xae   :  { %v7365_v19 = vsel %vm929_vm3, %v1017_v15, %v1026_v63 }
  0xaf   :  { %9005 = vst [vmem:[#allocation12_spill] sm:$0xff] %v7365_v19 }
  0xb2   :  { %5834 = vmatmul.mubr.msk.bf16.gmra.mrb[84].mxu1 %vm234_vm2, %v7337_v36 }
  0xb3   :  { %5837 = vmatprep.mubr.msk.bf16.mxu1 %vm6820_vm0, %v8988_v0 }
  0xb4   :  { %5778 = vmatmul.mubr.msk.bf16.gmra.mrb[84].mxu0 %vm234_vm2, %v7347_v48  ;;  %v1035_v48 = vor.u32 %v1034_v28, %v1031_v1  ;;  %v611_v28 = vld [vmem:[%s8962_s0 + $0x68] sm:$0x1] }
  0xb5   :  { %5781 = vmatprep.mubr.msk.bf16.mxu0 %vm6820_vm0, %v8988_v0  ;;  %v4545_v1 = vcombine.low %v610_v16, %v611_v28 }
  0xb6   :  { %v7384_v15 = vsel %vm929_vm3, %v1026_v63, %v1035_v48 }
  0xb7   :  { %9007 = vst [vmem:[#allocation14_spill] sm:$0xff] %v7384_v15  ;;  %v7402_v11 = vrot.slane %v4545_v1, 1 }
  0xb9   :  { %9010 = vst [vmem:[#allocation17_spill] sm:$0xff] %v7402_v11  ;;  %v7412_v63 = vsel %vm682_vm4, %v704_v56, %v7402_v11  ;;  %v1273_v56 = vrot.slane %v6878_v8, 1  ;;  %v6571_v8 = vld [vmem:[%s8961_s1 + $0x78] sm:$0xff]  }
  0xba   :  { %5838 = vmatmul.mubr.msk.bf16.gmra.mrb[88].mxu1 %vm234_vm2, %v7365_v19  ;;  %9012 = vst [vmem:[#allocation19_spill] sm:$0xff] %v7412_v63 }
  0xbb   :  { %5841 = vmatprep.mubr.msk.bf16.mxu1 %vm6820_vm0, %v8988_v0 }
  0xbc   :  { %5782 = vmatmul.mubr.msk.bf16.gmra.mrb[88].mxu0 %vm234_vm2, %v7372_v50  ;;  %v7396_v50 = vor.u32 %v1043_v21, %v1040_v33  ;;  %v6569_v33 = vld [vmem:[%s8961_s1 + $0x70] sm:$0xff]  }
  0xbd   :  { %5785 = vmatprep.mubr.msk.bf16.mxu0 %vm6820_vm0, %v8988_v0 }
  0xbe   :  { %9009 = vst [vmem:[#allocation16_spill] sm:$0xff] %v7396_v50  ;;  %v7406_v34 = vsel %vm929_vm3, %v1035_v48, %v7396_v50  ;;  %v1263_v48 = vld [vmem:[%s8962_s0] sm:$0xe] }
  0xbf   :  { %9011 = vst [vmem:[#allocation18_spill] sm:$0xff] %v7406_v34  ;;  %v4589_v16 = vcombine.low %v1263_v48, %v6872_v6  ;;  %v6568_v6 = vld [vmem:[%s8961_s1 + $0x60] sm:$0xff]   ;;  %v1275_v48 = vrot.slane %v6889_v13, 1 }
  0xc1   :  { %v1272_v40 = vrot.slane %v4589_v16, 1  ;;  %v6570_v16 = vld [vmem:[%s8961_s1 + $0x68] sm:$0xff]   ;;  %v1276_v13 = vsel %vm682_vm4, %v1273_v56, %v1275_v48 }
  0xc2   :  { %5842 = vmatmul.mubr.msk.bf16.gmra.mrb[92].mxu1 %vm234_vm2, %v7384_v15 }
  0xc3   :  { %5845 = vmatprep.mubr.msk.bf16.mxu1 %vm6820_vm0, %v8988_v0  ;;  %v1274_v21 = vsel %vm682_vm4, %v1272_v40, %v1273_v56 }
  0xc4   :  { %5786 = vmatmul.mubr.msk.bf16.gmra.mrb[92].mxu0 %vm234_vm2, %v7392_v57 }
  0xc5   :  { %5789 = vmatprep.mubr.msk.bf16.mxu0 %vm6820_vm0, %v8988_v0 }
  0xca   :  { %5846 = vmatmul.mubr.msk.bf16.gmra.mrb[96].mxu1 %vm234_vm2, %v7406_v34 }
  0xcb   :  { %5849 = vmatprep.mubr.msk.bf16.mxu1 %vm6820_vm0, %v8988_v0 }
  0xcc   :  { %5790 = vmatmul.mubr.msk.bf16.gmra.mrb[96].mxu0 %vm234_vm2, %v7412_v63 }
  0xcd   :  { %5793 = vmatprep.mubr.msk.bf16.mxu0 %vm6820_vm0, %v8988_v0 }
  0xd2   :  { %5850 = vmatmul.mubr.msk.bf16.gmra.mrb[100].mxu1 %vm234_vm2, %v7396_v50 }
  0xd3   :  { %5913 = vmatprep.mubr.msk.bf16.mxu1 %vm6820_vm0, %v8988_v0 }
  0xd4   :  { %5794 = vmatmul.mubr.msk.bf16.gmra.mrb[100].mxu0 %vm234_vm2, %v7402_v11 }
  0xd5   :  { %5857 = vmatprep.mubr.msk.bf16.mxu0 %vm6820_vm0, %v8988_v0 }
  0xda   :  { %5914 = vmatmul.mubr.msk.bf16.vlgmr.msra.gmra.mrb[104].mxu1 %vm234_vm2, %v6901_v20 }
  0xdb   :  { %6022 = vmatpush3.bf16.msra.mxu1 %v6569_v33  ;;  %5917 = vmatprep.mubr.msk.bf16.mxu1 %vm6820_vm0, %v8988_v0 }
  0xdc   :  { %6023 = vmatprep.subr.bf16.mxu1 %v8988_v0  ;;  %5858 = vmatmul.mubr.msk.bf16.vlgmr.msra.gmra.mrb[104].mxu0 %vm234_vm2, %v1274_v21 }
  0xdd   :  { %v484_v28 = vpop.f32.mrb[0].mxu1  ;;  %5966 = vmatpush3.bf16.msra.mxu0 %v6568_v6  ;;  %5861 = vmatprep.mubr.msk.bf16.mxu0 %vm6820_vm0, %v8988_v0 }
  0xde   :  { %v5691_v20 = vpop.f32.mrb[1].mxu1  ;;  %5967 = vmatprep.subr.bf16.mxu0 %v8988_v0 }
  0xdf   :  { %v487_v1 = vpop.f32.mrb[2].mxu1  ;;  %6024 = vmatpush3.bf16.msra.mxu1 %v6571_v8  ;;  %v308_v33 = vpop.f32.mrb[0].mxu0 }
  0xe0   :  { %v5692_v40 = vpop.f32.mrb[3].mxu1  ;;  %6133 = vmatprep.subr.bf16.mxu1 %v8988_v0  ;;  %v7457_v21 = vadd.f32 %v484_v28, %v308_v33  ;;  %v5635_v6 = vpop.f32.mrb[1].mxu0 }
  0xe1   :  { %v311_v20 = vpop.f32.mrb[2].mxu0  ;;  %5968 = vmatpush3.bf16.msra.mxu0 %v6570_v16 }
  0xe2   :  { %5918 = vmatmul.mubr.msk.bf16.gmra.mrb[108].mxu1 %vm234_vm2, %v6922_v26  ;;  %v7464_v40 = vadd.f32 %v487_v1, %v311_v20  ;;  %v5636_v11 = vpop.f32.mrb[3].mxu0  ;;  %6077 = vmatprep.subr.bf16.mxu0 %v8988_v0  ;;  %v1277_v26 = vrot.slane %v6910_v23, 1 }
  0xe3   :  { %5921 = vmatprep.mubr.msk.bf16.mxu1 %vm6820_vm0, %v8988_v0 }
  0xe4   :  { %5862 = vmatmul.mubr.msk.bf16.gmra.mrb[108].mxu0 %vm234_vm2, %v1276_v13  ;;  %v1278_v1 = vsel %vm682_vm4, %v1275_v48, %v1277_v26 }
  0xe5   :  { %v492_v8 = vpop.f32.mrb[4].mxu1  ;;  %5865 = vmatprep.mubr.msk.bf16.mxu0 %vm6820_vm0, %v8988_v0 }
  0xe6   :  { %v5695_v28 = vpop.f32.mrb[5].mxu1 }
  0xe7   :  { %v495_v33 = vpop.f32.mrb[6].mxu1  ;;  %v316_v6 = vpop.f32.mrb[4].mxu0 }
  0xe8   :  { %v5696_v56 = vpop.f32.mrb[7].mxu1  ;;  %v7471_v63 = vadd.f32 %v492_v8, %v316_v6  ;;  %v5639_v16 = vpop.f32.mrb[5].mxu0  ;;  %v1279_v8 = vrot.slane %v6937_v31, 1 }
  0xe9   :  { %v319_v11 = vpop.f32.mrb[6].mxu0 }
  0xea   :  { %5922 = vmatmul.mubr.msk.bf16.gmra.mrb[112].mxu1 %vm234_vm2, %v6942_v32  ;;  %v7478_v20 = vadd.f32 %v495_v33, %v319_v11  ;;  %v5640_v13 = vpop.f32.mrb[7].mxu0  ;;  %v1280_v11 = vsel %vm682_vm4, %v1277_v26, %v1279_v8 }
  0xeb   :  { %5925 = vmatprep.mubr.msk.bf16.mxu1 %vm6820_vm0, %v8988_v0 }
  0xec   :  { %5866 = vmatmul.mubr.msk.bf16.gmra.mrb[112].mxu0 %vm234_vm2, %v1278_v1 }
  0xed   :  { %v500_v28 = vpop.f32.mrb[8].mxu1  ;;  %5869 = vmatprep.mubr.msk.bf16.mxu0 %vm6820_vm0, %v8988_v0 }
  0xee   :  { %v5699_v23 = vpop.f32.mrb[9].mxu1 }
  0xef   :  { %v503_v56 = vpop.f32.mrb[10].mxu1  ;;  %v324_v6 = vpop.f32.mrb[8].mxu0 }
  0xf0   :  { %v5700_v32 = vpop.f32.mrb[11].mxu1  ;;  %v7484_v16 = vadd.f32 %v500_v28, %v324_v6  ;;  %v5643_v48 = vpop.f32.mrb[9].mxu0  ;;  %v1281_v28 = vrot.slane %v6955_v37, 1 }
  0xf1   :  { %v327_v33 = vpop.f32.mrb[10].mxu0 }
  0xf2   :  { %5926 = vmatmul.mubr.msk.bf16.gmra.mrb[116].mxu1 %vm234_vm2, %v6960_v38  ;;  %v7491_v1 = vadd.f32 %v503_v56, %v327_v33  ;;  %v5644_v13 = vpop.f32.mrb[11].mxu0  ;;  %v1282_v33 = vsel %vm682_vm4, %v1279_v8, %v1281_v28 }
  0xf3   :  { %5929 = vmatprep.mubr.msk.bf16.mxu1 %vm6820_vm0, %v8988_v0 }
  0xf4   :  { %5870 = vmatmul.mubr.msk.bf16.gmra.mrb[116].mxu0 %vm234_vm2, %v1280_v11 }
  0xf5   :  { %v508_v23 = vpop.f32.mrb[12].mxu1  ;;  %5873 = vmatprep.mubr.msk.bf16.mxu0 %vm6820_vm0, %v8988_v0 }
  0xf6   :  { %v5703_v31 = vpop.f32.mrb[13].mxu1 }
  0xf7   :  { %v511_v32 = vpop.f32.mrb[14].mxu1  ;;  %v332_v6 = vpop.f32.mrb[12].mxu0 }
  0xf8   :  { %v5704_v38 = vpop.f32.mrb[15].mxu1  ;;  %v7497_v48 = vadd.f32 %v508_v23, %v332_v6  ;;  %v5647_v26 = vpop.f32.mrb[13].mxu0  ;;  %v1283_v23 = vrot.slane %v6973_v43, 1 }
  0xf9   :  { %v335_v56 = vpop.f32.mrb[14].mxu0 }
  0xfa   :  { %5930 = vmatmul.mubr.msk.bf16.gmra.mrb[120].mxu1 %vm234_vm2, %v6978_v44  ;;  %v7504_v11 = vadd.f32 %v511_v32, %v335_v56  ;;  %v5648_v13 = vpop.f32.mrb[15].mxu0  ;;  %v1284_v56 = vsel %vm682_vm4, %v1281_v28, %v1283_v23 }
  0xfb   :  { %5933 = vmatprep.mubr.msk.bf16.mxu1 %vm6820_vm0, %v8988_v0 }
  0xfc   :  { %5874 = vmatmul.mubr.msk.bf16.gmra.mrb[120].mxu0 %vm234_vm2, %v1282_v33 }
  0xfd   :  { %v516_v31 = vpop.f32.mrb[16].mxu1  ;;  %5877 = vmatprep.mubr.msk.bf16.mxu0 %vm6820_vm0, %v8988_v0 }
  0xfe   :  { %v5707_v37 = vpop.f32.mrb[17].mxu1 }
  0xff   :  { %v519_v38 = vpop.f32.mrb[18].mxu1  ;;  %v340_v6 = vpop.f32.mrb[16].mxu0 }
 0x100   :  { %v5708_v44 = vpop.f32.mrb[19].mxu1  ;;  %v7510_v26 = vadd.f32 %v516_v31, %v340_v6  ;;  %v5651_v8 = vpop.f32.mrb[17].mxu0  ;;  %v1285_v31 = vrot.slane %v6987_v47, 1 }
 0x101   :  { %v343_v32 = vpop.f32.mrb[18].mxu0 }
 0x102   :  { %5934 = vmatmul.mubr.msk.bf16.gmra.mrb[124].mxu1 %vm234_vm2, %v6998_v52  ;;  %v7517_v33 = vadd.f32 %v519_v38, %v343_v32  ;;  %v5652_v13 = vpop.f32.mrb[19].mxu0  ;;  %v1286_v32 = vsel %vm682_vm4, %v1283_v23, %v1285_v31 }
 0x103   :  { %5937 = vmatprep.mubr.msk.bf16.mxu1 %vm6820_vm0, %v8988_v0 }
 0x104   :  { %5878 = vmatmul.mubr.msk.bf16.gmra.mrb[124].mxu0 %vm234_vm2, %v1284_v56 }
 0x105   :  { %v524_v37 = vpop.f32.mrb[20].mxu1  ;;  %5881 = vmatprep.mubr.msk.bf16.mxu0 %vm6820_vm0, %v8988_v0 }
 0x106   :  { %v5711_v43 = vpop.f32.mrb[21].mxu1 }
 0x107   :  { %v527_v44 = vpop.f32.mrb[22].mxu1  ;;  %v348_v6 = vpop.f32.mrb[20].mxu0 }
 0x108   :  { %v5712_v52 = vpop.f32.mrb[23].mxu1  ;;  %v7523_v8 = vadd.f32 %v524_v37, %v348_v6  ;;  %v5655_v28 = vpop.f32.mrb[21].mxu0  ;;  %v1287_v37 = vrot.slane %v7005_v53, 1 }
 0x109   :  { %v351_v38 = vpop.f32.mrb[22].mxu0 }
 0x10a   :  { %5938 = vmatmul.mubr.msk.bf16.gmra.mrb[128].mxu1 %vm234_vm2, %v7016_v58  ;;  %v7530_v56 = vadd.f32 %v527_v44, %v351_v38  ;;  %v5656_v13 = vpop.f32.mrb[23].mxu0  ;;  %v1288_v38 = vsel %vm682_vm4, %v1285_v31, %v1287_v37 }
 0x10b   :  { %5941 = vmatprep.mubr.msk.bf16.mxu1 %vm6820_vm0, %v8988_v0 }
 0x10c   :  { %5882 = vmatmul.mubr.msk.bf16.gmra.mrb[128].mxu0 %vm234_vm2, %v1286_v32 }
 0x10d   :  { %v532_v43 = vpop.f32.mrb[24].mxu1  ;;  %5885 = vmatprep.mubr.msk.bf16.mxu0 %vm6820_vm0, %v8988_v0 }
 0x10e   :  { %v5715_v47 = vpop.f32.mrb[25].mxu1 }
 0x10f   :  { %v535_v52 = vpop.f32.mrb[26].mxu1  ;;  %v356_v6 = vpop.f32.mrb[24].mxu0 }
 0x110   :  { %v5716_v58 = vpop.f32.mrb[27].mxu1  ;;  %v7536_v28 = vadd.f32 %v532_v43, %v356_v6  ;;  %v5659_v23 = vpop.f32.mrb[25].mxu0  ;;  %v1289_v43 = vrot.slane %v7027_v61, 1 }
 0x111   :  { %v359_v44 = vpop.f32.mrb[26].mxu0 }
 0x112   :  { %5942 = vmatmul.mubr.msk.bf16.gmra.mrb[132].mxu1 %vm234_vm2, %v7032_v62  ;;  %v7543_v32 = vadd.f32 %v535_v52, %v359_v44  ;;  %v5660_v13 = vpop.f32.mrb[27].mxu0  ;;  %v1290_v44 = vsel %vm682_vm4, %v1287_v37, %v1289_v43 }
 0x113   :  { %5945 = vmatprep.mubr.msk.bf16.mxu1 %vm6820_vm0, %v8988_v0 }
 0x114   :  { %5886 = vmatmul.mubr.msk.bf16.gmra.mrb[132].mxu0 %vm234_vm2, %v1288_v38 }
 0x115   :  { %v540_v47 = vpop.f32.mrb[28].mxu1  ;;  %5889 = vmatprep.mubr.msk.bf16.mxu0 %vm6820_vm0, %v8988_v0 }
 0x116   :  { %v5719_v53 = vpop.f32.mrb[29].mxu1 }
 0x117   :  { %v543_v58 = vpop.f32.mrb[30].mxu1  ;;  %v364_v6 = vpop.f32.mrb[28].mxu0 }
 0x118   :  { %v5720_v62 = vpop.f32.mrb[31].mxu1  ;;  %v7549_v23 = vadd.f32 %v540_v47, %v364_v6  ;;  %v5663_v31 = vpop.f32.mrb[29].mxu0  ;;  %v1291_v47 = vrot.slane %v7045_v4, 1 }
 0x119   :  { %v367_v52 = vpop.f32.mrb[30].mxu0 }
 0x11a   :  { %5946 = vmatmul.mubr.msk.bf16.gmra.mrb[136].mxu1 %vm234_vm2, %v7050_v5  ;;  %v7556_v38 = vadd.f32 %v543_v58, %v367_v52  ;;  %v5664_v13 = vpop.f32.mrb[31].mxu0  ;;  %v1292_v52 = vsel %vm682_vm4, %v1289_v43, %v1291_v47 }
 0x11b   :  { %5949 = vmatprep.mubr.msk.bf16.mxu1 %vm6820_vm0, %v8988_v0 }
 0x11c   :  { %5890 = vmatmul.mubr.msk.bf16.gmra.mrb[136].mxu0 %vm234_vm2, %v1290_v44 }
 0x11d   :  { %v548_v53 = vpop.f32.mrb[32].mxu1  ;;  %5893 = vmatprep.mubr.msk.bf16.mxu0 %vm6820_vm0, %v8988_v0 }
 0x11e   :  { %v5723_v61 = vpop.f32.mrb[33].mxu1 }
 0x11f   :  { %v551_v62 = vpop.f32.mrb[34].mxu1  ;;  %v372_v6 = vpop.f32.mrb[32].mxu0 }
 0x120   :  { %v5724_v5 = vpop.f32.mrb[35].mxu1  ;;  %v7562_v31 = vadd.f32 %v548_v53, %v372_v6  ;;  %v5667_v37 = vpop.f32.mrb[33].mxu0  ;;  %v1293_v53 = vrot.slane %v7063_v12, 1 }
 0x121   :  { %v375_v58 = vpop.f32.mrb[34].mxu0 }
 0x122   :  { %5950 = vmatmul.mubr.msk.bf16.gmra.mrb[140].mxu1 %vm234_vm2, %v7068_v14  ;;  %v7569_v44 = vadd.f32 %v551_v62, %v375_v58  ;;  %v5668_v13 = vpop.f32.mrb[35].mxu0  ;;  %v1294_v58 = vsel %vm682_vm4, %v1291_v47, %v1293_v53 }
 0x123   :  { %5953 = vmatprep.mubr.msk.bf16.mxu1 %vm6820_vm0, %v8988_v0 }
 0x124   :  { %5894 = vmatmul.mubr.msk.bf16.gmra.mrb[140].mxu0 %vm234_vm2, %v1292_v52 }
 0x125   :  { %v556_v61 = vpop.f32.mrb[36].mxu1  ;;  %5897 = vmatprep.mubr.msk.bf16.mxu0 %vm6820_vm0, %v8988_v0 }
 0x126   :  { %v5727_v4 = vpop.f32.mrb[37].mxu1 }
 0x127   :  { %v559_v5 = vpop.f32.mrb[38].mxu1  ;;  %v380_v6 = vpop.f32.mrb[36].mxu0 }
 0x128   :  { %v5728_v14 = vpop.f32.mrb[39].mxu1  ;;  %v7575_v37 = vadd.f32 %v556_v61, %v380_v6  ;;  %v5671_v43 = vpop.f32.mrb[37].mxu0  ;;  %v1295_v61 = vrot.slane %v7084_v22, 1  ;;  %v1810_v22 = vld [vmem:[%s8962_s0 + $0x4] sm:$0xc] }
 0x129   :  { %v383_v62 = vpop.f32.mrb[38].mxu0 }
 0x12a   :  { %5954 = vmatmul.mubr.msk.bf16.gmra.mrb[144].mxu1 %vm234_vm2, %v7089_v24  ;;  %v7582_v52 = vadd.f32 %v559_v5, %v383_v62  ;;  %v5672_v13 = vpop.f32.mrb[39].mxu0  ;;  %v1296_v62 = vsel %vm682_vm4, %v1293_v53, %v1295_v61 }
 0x12b   :  { %5957 = vmatprep.mubr.msk.bf16.mxu1 %vm6820_vm0, %v8988_v0 }
 0x12c   :  { %5898 = vmatmul.mubr.msk.bf16.gmra.mrb[144].mxu0 %vm234_vm2, %v1294_v58 }
 0x12d   :  { %v564_v4 = vpop.f32.mrb[40].mxu1  ;;  %5901 = vmatprep.mubr.msk.bf16.mxu0 %vm6820_vm0, %v8988_v0 }
 0x12e   :  { %v5731_v12 = vpop.f32.mrb[41].mxu1 }
 0x12f   :  { %v567_v14 = vpop.f32.mrb[42].mxu1  ;;  %v388_v6 = vpop.f32.mrb[40].mxu0 }
 0x130   :  { %v5732_v24 = vpop.f32.mrb[43].mxu1  ;;  %v7588_v43 = vadd.f32 %v564_v4, %v388_v6  ;;  %v5675_v47 = vpop.f32.mrb[41].mxu0 }
 0x131   :  { %v391_v5 = vpop.f32.mrb[42].mxu0 }
 0x132   :  { %5958 = vmatmul.mubr.msk.bf16.gmra.mrb[148].mxu1 %vm234_vm2, %v7116_v39  ;;  %v7595_v58 = vadd.f32 %v567_v14, %v391_v5  ;;  %v5676_v13 = vpop.f32.mrb[43].mxu0  ;;  %v4643_v39 = vcombine.low %v1810_v22, %v7101_v29 }
 0x133   :  { %5961 = vmatprep.mubr.msk.bf16.mxu1 %vm6820_vm0, %v8988_v0  ;;  %v1821_v13 = vrot.slane %v7111_v35, 2 }
 0x134   :  { %5902 = vmatmul.mubr.msk.bf16.gmra.mrb[148].mxu0 %vm234_vm2, %v1296_v62  ;;  %v1820_v62 = vrot.slane %v4643_v39, 2  ;;  %v6574_v39 = vld [vmem:[%s8961_s1 + $0x80] sm:$0xff]  }
 0x135   :  { %v572_v12 = vpop.f32.mrb[44].mxu1  ;;  %5905 = vmatprep.mubr.msk.bf16.mxu0 %vm6820_vm0, %v8988_v0 }
 0x136   :  { %v5735_v4 = vpop.f32.mrb[45].mxu1 }
 0x137   :  { %v575_v24 = vpop.f32.mrb[46].mxu1  ;;  %v396_v6 = vpop.f32.mrb[44].mxu0 }
 0x138   :  { %v5736_v53 = vpop.f32.mrb[47].mxu1  ;;  %v7604_v47 = vadd.f32 %v572_v12, %v396_v6  ;;  %v5679_v14 = vpop.f32.mrb[45].mxu0  ;;  %v6573_v6 = vld [vmem:[%s8961_s1 + $0x90] sm:$0xff]  }
 0x139   :  { %v399_v5 = vpop.f32.mrb[46].mxu0  ;;  %v1823_v14 = vrot.slane %v7130_v54, 2  ;;  %v6575_v54 = vld [vmem:[%s8961_s1 + $0x98] sm:$0xff]  }
 0x13a   :  { %5962 = vmatmul.mubr.msk.bf16.gmra.mrb[152].mxu1 %vm234_vm2, %v7132_v55  ;;  %v7611_v4 = vadd.f32 %v575_v24, %v399_v5  ;;  %v5680_v57 = vpop.f32.mrb[47].mxu0  ;;  %v7617_v55 = vsel %vm1819_vm5, %v1820_v62, %v1821_v13  ;;  %v6576_v62 = vld [vmem:[%s8961_s1 + $0x88] sm:$0xff]  }
 0x13b   :  { %6025 = vmatprep.mubr.msk.bf16.mxu1 %vm6820_vm0, %v8988_v0  ;;  %9013 = vst [vmem:[#allocation20_spill] sm:$0xff] %v7617_v55 }
 0x13c   :  { %5906 = vmatmul.mubr.msk.bf16.gmra.mrb[152].mxu0 %vm234_vm2, %v1295_v61 }
 0x13d   :  { %v580_v29 = vpop.f32.mrb[48].mxu1  ;;  %5969 = vmatprep.mubr.msk.bf16.mxu0 %vm6820_vm0, %v8988_v0 }
 0x13e   :  { %v5739_v22 = vpop.f32.mrb[49].mxu1 }
 0x13f   :  { %v583_v12 = vpop.f32.mrb[50].mxu1  ;;  %v404_v24 = vpop.f32.mrb[48].mxu0 }
 0x140   :  { %v5740_v35 = vpop.f32.mrb[51].mxu1  ;;  %v7622_v53 = vadd.f32 %v580_v29, %v404_v24  ;;  %v5683_v57 = vpop.f32.mrb[49].mxu0 }
 0x141   :  { %v407_v61 = vpop.f32.mrb[50].mxu0 }
 0x142   :  { %6026 = vmatmul.mubr.msk.bf16.vlgmr.msra.gmra.mrb[156].mxu1 %vm234_vm2, %v7617_v55  ;;  %v5684_v5 = vpop.f32.mrb[51].mxu0 }
 0x143   :  { %6134 = vmatpush3.bf16.msra.mxu1 %v6574_v39  ;;  %6029 = vmatprep.mubr.msk.bf16.mxu1 %vm6820_vm0, %v8988_v0  ;;  %v7641_v39 = vsel %vm1819_vm5, %v1821_v13, %v1823_v14  ;;  %v7654_v13 = vld [vmem:[%s8963_s3 + $0x1] ss:$0 sm:$0xff]  ;;  %v1825_v5 = vrot.slane %v7153_v10, 2 }
 0x144   :  { %6135 = vmatprep.subr.bf16.mxu1 %v8988_v0  ;;  %5970 = vmatmul.mubr.msk.bf16.vlgmr.msra.gmra.mrb[156].mxu0 %vm234_vm2, %v7145_v2  ;;  %9014 = vst [vmem:[#allocation21_spill] sm:$0xff] %v7641_v39 }
 0x145   :  { %v1131_v29 = vpop.f32.mrb[52].mxu1  ;;  %6078 = vmatpush3.bf16.msra.mxu0 %v6573_v6  ;;  %5973 = vmatprep.mubr.msk.bf16.mxu0 %vm6820_vm0, %v8988_v0  ;;  %v7667_v10 = vsel %vm1819_vm5, %v1823_v14, %v1825_v5 }
 0x146   :  { %v5803_v22 = vpop.f32.mrb[53].mxu1  ;;  %6079 = vmatprep.subr.bf16.mxu0 %v8988_v0 }
 0x147   :  { %v1134_v12 = vpop.f32.mrb[54].mxu1  ;;  %6136 = vmatpush3.bf16.msra.mxu1 %v6576_v62  ;;  %v793_v24 = vpop.f32.mrb[52].mxu0 }
 0x148   :  { %v5804_v35 = vpop.f32.mrb[55].mxu1  ;;  %6245 = vmatprep.subr.bf16.mxu1 %v8988_v0  ;;  %v895_v57 = vadd.f32 %v793_v24, %v7457_v21  ;;  %v5747_v61 = vpop.f32.mrb[53].mxu0 }
 0x149   :  { %v796_v6 = vpop.f32.mrb[54].mxu0  ;;  %6080 = vmatpush3.bf16.msra.mxu0 %v6575_v54 }
 0x14a   :  { %6030 = vmatmul.mubr.msk.bf16.gmra.mrb[160].mxu1 %vm234_vm2, %v7641_v39  ;;  %v1233_v62 = vadd.f32 %v1131_v29, %v895_v57  ;;  %v896_v22 = vadd.f32 %v796_v6, %v7464_v40  ;;  %v5748_v21 = vpop.f32.mrb[55].mxu0  ;;  %6189 = vmatprep.subr.bf16.mxu0 %v8988_v0  ;;  %v1827_v6 = vrot.slane %v7182_v30, 2 }
 0x14b   :  { %6033 = vmatprep.mubr.msk.bf16.mxu1 %vm6820_vm0, %v8988_v0 }
 0x14c   :  { %v3770_v24 = vadd.f32 %v7654_v13, %v1233_v62  ;;  %v1234_v61 = vadd.f32 %v1134_v12, %v896_v22  ;;  %5974 = vmatmul.mubr.msk.bf16.gmra.mrb[160].mxu0 %vm234_vm2, %v7177_v25 }
 0x14d   :  { %v1139_v35 = vpop.f32.mrb[56].mxu1  ;;  %5977 = vmatprep.mubr.msk.bf16.mxu0 %vm6820_vm0, %v8988_v0 }
 0x14e   :  { %v5807_v39 = vpop.f32.mrb[57].mxu1  ;;  %v3771_v40 = vadd.f32 %v7654_v13, %v1234_v61  ;;  %6604 = vtanh.f32 %v3770_v24 }
 0x14f   :  { %v1142_v55 = vpop.f32.mrb[58].mxu1  ;;  %v801_v54 = vpop.f32.mrb[56].mxu0 }
 0x150   :  { %v5808_v29 = vpop.f32.mrb[59].mxu1  ;;  %6606 = vtanh.f32 %v3771_v40  ;;  %v897_v57 = vadd.f32 %v801_v54, %v7471_v63  ;;  %v5751_v12 = vpop.f32.mrb[57].mxu0 }
 0x151   :  { %v804_v39 = vpop.f32.mrb[58].mxu0  ;;  %v7683_v29 = vsel %vm1819_vm5, %v1825_v5, %v1827_v6  ;;  %v1829_v5 = vrot.slane %v7210_v49, 2 }
 0x152   :  { %6034 = vmatmul.mubr.msk.bf16.gmra.mrb[164].mxu1 %vm234_vm2, %v7667_v10  ;;  %v1235_v14 = vadd.f32 %v1139_v35, %v897_v57  ;;  %v898_v62 = vadd.f32 %v804_v39, %v7478_v20  ;;  %v5752_v22 = vpop.f32.mrb[59].mxu0 }
 0x153   :  { %6037 = vmatprep.mubr.msk.bf16.mxu1 %vm6820_vm0, %v8988_v0  ;;  %v7702_v49 = vsel %vm1819_vm5, %v1827_v6, %v1829_v5  ;;  %v1831_v6 = vrot.slane %v7232_v3, 2 }
 0x154   :  { %v3772_v24 = vadd.f32 %v7654_v13, %v1235_v14  ;;  %v1236_v61 = vadd.f32 %v1142_v55, %v898_v62  ;;  %5978 = vmatmul.mubr.msk.bf16.gmra.mrb[164].mxu0 %vm234_vm2, %v7205_v45 }
 0x155   :  { %v1147_v21 = vpop.f32.mrb[60].mxu1  ;;  %5981 = vmatprep.mubr.msk.bf16.mxu0 %vm6820_vm0, %v8988_v0  ;;  %v7721_v3 = vsel %vm1819_vm5, %v1829_v5, %v1831_v6  ;;  %v1833_v5 = vrot.slane %v7254_v27, 2 }
 0x156   :  { %v5811_v63 = vpop.f32.mrb[61].mxu1  ;;  %v3773_v30 = vadd.f32 %v7654_v13, %v1236_v61  ;;  %6608 = vtanh.f32 %v3772_v24 }
 0x157   :  { %v1150_v40 = vpop.f32.mrb[62].mxu1  ;;  %v809_v20 = vpop.f32.mrb[60].mxu0  ;;  %v7740_v27 = vsel %vm1819_vm5, %v1831_v6, %v1833_v5  ;;  %v1835_v6 = vrot.slane %v7276_v51, 2 }
 0x158   :  { %v5812_v35 = vpop.f32.mrb[63].mxu1  ;;  %6610 = vtanh.f32 %v3773_v30  ;;  %v899_v54 = vadd.f32 %v809_v20, %v7484_v16  ;;  %v5755_v55 = vpop.f32.mrb[61].mxu0 }
 0x159   :  { %v6605_v57 = vpop.eup %6604  ;;  %v812_v12 = vpop.f32.mrb[62].mxu0  ;;  %v7759_v51 = vsel %vm1819_vm5, %v1833_v5, %v1835_v6  ;;  %v1837_v5 = vrot.slane %v7298_v17, 2 }
 0x15a   :  { %6038 = vmatmul.mubr.msk.bf16.gmra.mrb[168].mxu1 %vm234_vm2, %v7683_v29  ;;  %v6607_v39 = vpop.eup %6606  ;;  %v1237_v14 = vadd.f32 %v1147_v21, %v899_v54  ;;  %v900_v62 = vadd.f32 %v812_v12, %v7491_v1  ;;  %v5756_v22 = vpop.f32.mrb[63].mxu0 }
 0x15b   :  { %6041 = vmatprep.mubr.msk.bf16.mxu1 %vm6820_vm0, %v8988_v0  ;;  %v5105_v24 = vpack.c.bf16 %v6607_v39, %v6605_v57  ;;  %v7778_v17 = vsel %vm1819_vm5, %v1835_v6, %v1837_v5  ;;  %v1839_v6 = vrot.slane %v7320_v59, 2 }
 0x15c   :  { %v3774_v16 = vadd.f32 %v7654_v13, %v1237_v14  ;;  %v1238_v63 = vadd.f32 %v1150_v40, %v900_v62  ;;  %5982 = vmatmul.mubr.msk.bf16.gmra.mrb[168].mxu0 %vm234_vm2, %v7227_v60  ;;  %9015 = vst [vmem:[#allocation22_spill] sm:$0xff] %v7778_v17 }
 0x15d   :  { %v1155_v61 = vpop.f32.mrb[64].mxu1  ;;  %5106 = vst [vmem:[%s8964_s4] sm:$0xff] %v5105_v24   ;;  %5985 = vmatprep.mubr.msk.bf16.mxu0 %vm6820_vm0, %v8988_v0  ;;  %v7797_v59 = vsel %vm1819_vm5, %v1837_v5, %v1839_v6  ;;  %v1841_v5 = vrot.slane %v7342_v41, 2 }
 0x15e   :  { %v5815_v30 = vpop.f32.mrb[65].mxu1  ;;  %v3775_v1 = vadd.f32 %v7654_v13, %v1238_v63  ;;  %6612 = vtanh.f32 %v3774_v16  ;;  %9016 = vst [vmem:[#allocation23_spill] sm:$0xff] %v7797_v59 }
 0x15f   :  { %v1158_v35 = vpop.f32.mrb[66].mxu1  ;;  %v817_v40 = vpop.f32.mrb[64].mxu0  ;;  %v7816_v41 = vsel %vm1819_vm5, %v1839_v6, %v1841_v5  ;;  %v7825_v6 = vrot.slane %v7367_v7, 2 }
 0x160   :  { %v5816_v21 = vpop.f32.mrb[67].mxu1  ;;  %6614 = vtanh.f32 %v3775_v1  ;;  %v901_v20 = vadd.f32 %v817_v40, %v7497_v48  ;;  %v5759_v54 = vpop.f32.mrb[65].mxu0  ;;  %9017 = vst [vmem:[#allocation24_spill] sm:$0xff] %v7816_v41 }
 0x161   :  { %v6609_v55 = vpop.eup %6608  ;;  %v820_v57 = vpop.f32.mrb[66].mxu0  ;;  %9018 = vst [vmem:[#allocation25_spill] sm:$0xff] %v7825_v6 }
 0x162   :  { %6042 = vmatmul.mubr.msk.bf16.gmra.mrb[172].mxu1 %vm234_vm2, %v7702_v49  ;;  %v6611_v12 = vpop.eup %6610  ;;  %v1239_v39 = vadd.f32 %v1155_v61, %v901_v20  ;;  %v902_v14 = vadd.f32 %v820_v57, %v7504_v11  ;;  %v5760_v62 = vpop.f32.mrb[67].mxu0 }
 0x163   :  { %6045 = vmatprep.mubr.msk.bf16.mxu1 %vm6820_vm0, %v8988_v0  ;;  %v5110_v22 = vpack.c.bf16 %v6611_v12, %v6609_v55 }
 0x164   :  { %v3776_v48 = vadd.f32 %v7654_v13, %v1239_v39  ;;  %v1240_v16 = vadd.f32 %v1158_v35, %v902_v14  ;;  %5986 = vmatmul.mubr.msk.bf16.gmra.mrb[172].mxu0 %vm234_vm2, %v7249_v18 }
 0x165   :  { %v1163_v24 = vpop.f32.mrb[68].mxu1  ;;  %5342 = vst [vmem:[%s8964_s4 + $0x8] sm:$0xff] %v5110_v22   ;;  %5989 = vmatprep.mubr.msk.bf16.mxu0 %vm6820_vm0, %v8988_v0 }
 0x166   :  { %v5819_v63 = vpop.f32.mrb[69].mxu1  ;;  %v3777_v11 = vadd.f32 %v7654_v13, %v1240_v16  ;;  %6616 = vtanh.f32 %v3776_v48 }
 0x167   :  { %v1166_v30 = vpop.f32.mrb[70].mxu1  ;;  %v825_v35 = vpop.f32.mrb[68].mxu0 }
 0x168   :  { %v5820_v61 = vpop.f32.mrb[71].mxu1  ;;  %6618 = vtanh.f32 %v3777_v11  ;;  %v903_v1 = vadd.f32 %v825_v35, %v7510_v26  ;;  %v5763_v21 = vpop.f32.mrb[69].mxu0 }
 0x169   :  { %v6613_v40 = vpop.eup %6612  ;;  %v828_v20 = vpop.f32.mrb[70].mxu0 }
 0x16a   :  { %6046 = vmatmul.mubr.msk.bf16.gmra.mrb[176].mxu1 %vm234_vm2, %v7721_v3  ;;  %v6615_v54 = vpop.eup %6614  ;;  %v1241_v55 = vadd.f32 %v1163_v24, %v903_v1  ;;  %v904_v57 = vadd.f32 %v828_v20, %v7517_v33  ;;  %v5764_v12 = vpop.f32.mrb[71].mxu0 }
 0x16b   :  { %6049 = vmatprep.mubr.msk.bf16.mxu1 %vm6820_vm0, %v8988_v0  ;;  %v5115_v39 = vpack.c.bf16 %v6615_v54, %v6613_v40 }
 0x16c   :  { %v3778_v26 = vadd.f32 %v7654_v13, %v1241_v55  ;;  %v1242_v62 = vadd.f32 %v1166_v30, %v904_v57  ;;  %5990 = vmatmul.mubr.msk.bf16.gmra.mrb[176].mxu0 %vm234_vm2, %v7271_v42 }
 0x16d   :  { %v1171_v14 = vpop.f32.mrb[72].mxu1  ;;  %5343 = vst [vmem:[%s8964_s4 + $0x10] sm:$0xff] %v5115_v39   ;;  %5993 = vmatprep.mubr.msk.bf16.mxu0 %vm6820_vm0, %v8988_v0 }
 0x16e   :  { %v5823_v22 = vpop.f32.mrb[73].mxu1  ;;  %v3779_v33 = vadd.f32 %v7654_v13, %v1242_v62  ;;  %6620 = vtanh.f32 %v3778_v26 }
 0x16f   :  { %v1174_v48 = vpop.f32.mrb[74].mxu1  ;;  %v833_v16 = vpop.f32.mrb[72].mxu0 }
 0x170   :  { %v5824_v24 = vpop.f32.mrb[75].mxu1  ;;  %6622 = vtanh.f32 %v3779_v33  ;;  %v905_v63 = vadd.f32 %v833_v16, %v7523_v8  ;;  %v5767_v30 = vpop.f32.mrb[73].mxu0 }
 0x171   :  { %v6617_v11 = vpop.eup %6616  ;;  %v836_v61 = vpop.f32.mrb[74].mxu0 }
 0x172   :  { %6050 = vmatmul.mubr.msk.bf16.gmra.mrb[180].mxu1 %vm234_vm2, %v7740_v27  ;;  %v6619_v35 = vpop.eup %6618  ;;  %v1243_v1 = vadd.f32 %v1171_v14, %v905_v63  ;;  %v906_v21 = vadd.f32 %v836_v61, %v7530_v56  ;;  %v5768_v40 = vpop.f32.mrb[75].mxu0 }
 0x173   :  { %6053 = vmatprep.mubr.msk.bf16.mxu1 %vm6820_vm0, %v8988_v0  ;;  %v5120_v20 = vpack.c.bf16 %v6619_v35, %v6617_v11 }
 0x174   :  { %v3780_v8 = vadd.f32 %v7654_v13, %v1243_v1  ;;  %v1244_v55 = vadd.f32 %v1174_v48, %v906_v21  ;;  %5994 = vmatmul.mubr.msk.bf16.gmra.mrb[180].mxu0 %vm234_vm2, %v7293_v9 }
 0x175   :  { %v1179_v54 = vpop.f32.mrb[76].mxu1  ;;  %5344 = vst [vmem:[%s8964_s4 + $0x18] sm:$0xff] %v5120_v20   ;;  %5997 = vmatprep.mubr.msk.bf16.mxu0 %vm6820_vm0, %v8988_v0 }
 0x176   :  { %v5827_v57 = vpop.f32.mrb[77].mxu1  ;;  %v3781_v56 = vadd.f32 %v7654_v13, %v1244_v55  ;;  %6624 = vtanh.f32 %v3780_v8 }
 0x177   :  { %v1182_v12 = vpop.f32.mrb[78].mxu1  ;;  %v841_v14 = vpop.f32.mrb[76].mxu0 }
 0x178   :  { %v5828_v39 = vpop.f32.mrb[79].mxu1  ;;  %6626 = vtanh.f32 %v3781_v56  ;;  %v907_v26 = vadd.f32 %v841_v14, %v7536_v28  ;;  %v5771_v62 = vpop.f32.mrb[77].mxu0 }
 0x179   :  { %v6621_v22 = vpop.eup %6620  ;;  %v844_v48 = vpop.f32.mrb[78].mxu0 }
 0x17a   :  { %6054 = vmatmul.mubr.msk.bf16.gmra.mrb[184].mxu1 %vm234_vm2, %v7759_v51  ;;  %v6623_v33 = vpop.eup %6622  ;;  %v1245_v24 = vadd.f32 %v1179_v54, %v907_v26  ;;  %v908_v16 = vadd.f32 %v844_v48, %v7543_v32  ;;  %v5772_v63 = vpop.f32.mrb[79].mxu0 }
 0x17b   :  { %6057 = vmatprep.mubr.msk.bf16.mxu1 %vm6820_vm0, %v8988_v0  ;;  %v5125_v30 = vpack.c.bf16 %v6623_v33, %v6621_v22 }
 0x17c   :  { %v3782_v28 = vadd.f32 %v7654_v13, %v1245_v24  ;;  %v1246_v61 = vadd.f32 %v1182_v12, %v908_v16  ;;  %5998 = vmatmul.mubr.msk.bf16.gmra.mrb[184].mxu0 %vm234_vm2, %v7315_v46 }
 0x17d   :  { %v1187_v11 = vpop.f32.mrb[80].mxu1  ;;  %5345 = vst [vmem:[%s8964_s4 + $0x20] sm:$0xff] %v5125_v30   ;;  %6001 = vmatprep.mubr.msk.bf16.mxu0 %vm6820_vm0, %v8988_v0 }
 0x17e   :  { %v5831_v35 = vpop.f32.mrb[81].mxu1  ;;  %v3783_v32 = vadd.f32 %v7654_v13, %v1246_v61  ;;  %6628 = vtanh.f32 %v3782_v28 }
 0x17f   :  { %v1190_v1 = vpop.f32.mrb[82].mxu1  ;;  %v849_v40 = vpop.f32.mrb[80].mxu0 }
 0x180   :  { %v5832_v21 = vpop.f32.mrb[83].mxu1  ;;  %6630 = vtanh.f32 %v3783_v32  ;;  %v909_v20 = vadd.f32 %v849_v40, %v7549_v23  ;;  %v5775_v54 = vpop.f32.mrb[81].mxu0 }
 0x181   :  { %v6625_v8 = vpop.eup %6624  ;;  %v852_v55 = vpop.f32.mrb[82].mxu0 }
 0x182   :  { %6058 = vmatmul.mubr.msk.bf16.gmra.mrb[188].mxu1 %vm234_vm2, %v7778_v17  ;;  %v6627_v57 = vpop.eup %6626  ;;  %v1247_v12 = vadd.f32 %v1187_v11, %v909_v20  ;;  %v910_v56 = vadd.f32 %v852_v55, %v7556_v38  ;;  %v5776_v39 = vpop.f32.mrb[83].mxu0 }
 0x183   :  { %6061 = vmatprep.mubr.msk.bf16.mxu1 %vm6820_vm0, %v8988_v0  ;;  %v5130_v14 = vpack.c.bf16 %v6627_v57, %v6625_v8 }
 0x184   :  { %v3784_v23 = vadd.f32 %v7654_v13, %v1247_v12  ;;  %v1248_v62 = vadd.f32 %v1190_v1, %v910_v56  ;;  %6002 = vmatmul.mubr.msk.bf16.gmra.mrb[188].mxu0 %vm234_vm2, %v7337_v36 }
 0x185   :  { %v1195_v26 = vpop.f32.mrb[84].mxu1  ;;  %5346 = vst [vmem:[%s8964_s4 + $0x28] sm:$0xff] %v5130_v14   ;;  %6005 = vmatprep.mubr.msk.bf16.mxu0 %vm6820_vm0, %v8988_v0 }
 0x186   :  { %v5835_v22 = vpop.f32.mrb[85].mxu1  ;;  %v3785_v38 = vadd.f32 %v7654_v13, %v1248_v62  ;;  %6632 = vtanh.f32 %v3784_v23 }
 0x187   :  { %v1198_v48 = vpop.f32.mrb[86].mxu1  ;;  %v857_v24 = vpop.f32.mrb[84].mxu0 }
 0x188   :  { %v5836_v33 = vpop.f32.mrb[87].mxu1  ;;  %6634 = vtanh.f32 %v3785_v38  ;;  %v911_v16 = vadd.f32 %v857_v24, %v7562_v31  ;;  %v5779_v63 = vpop.f32.mrb[85].mxu0 }
 0x189   :  { %v6629_v30 = vpop.eup %6628  ;;  %v860_v11 = vpop.f32.mrb[86].mxu0 }
 0x18a   :  { %6062 = vmatmul.mubr.msk.bf16.gmra.mrb[192].mxu1 %vm234_vm2, %v7797_v59  ;;  %v6631_v28 = vpop.eup %6630  ;;  %v1249_v61 = vadd.f32 %v1195_v26, %v911_v16  ;;  %v912_v35 = vadd.f32 %v860_v11, %v7569_v44  ;;  %v5780_v1 = vpop.f32.mrb[87].mxu0 }
 0x18b   :  { %6065 = vmatprep.mubr.msk.bf16.mxu1 %vm6820_vm0, %v8988_v0  ;;  %v5135_v32 = vpack.c.bf16 %v6631_v28, %v6629_v30 }
 0x18c   :  { %v3786_v31 = vadd.f32 %v7654_v13, %v1249_v61  ;;  %v1250_v40 = vadd.f32 %v1198_v48, %v912_v35  ;;  %6006 = vmatmul.mubr.msk.bf16.gmra.mrb[192].mxu0 %vm234_vm2, %v7365_v19 }
 0x18d   :  { %v1203_v21 = vpop.f32.mrb[88].mxu1  ;;  %5347 = vst [vmem:[%s8964_s4 + $0x30] sm:$0xff] %v5135_v32   ;;  %6009 = vmatprep.mubr.msk.bf16.mxu0 %vm6820_vm0, %v8988_v0 }
 0x18e   :  { %v5839_v20 = vpop.f32.mrb[89].mxu1  ;;  %v3787_v44 = vadd.f32 %v7654_v13, %v1250_v40  ;;  %6636 = vtanh.f32 %v3786_v31 }
 0x18f   :  { %v1206_v54 = vpop.f32.mrb[90].mxu1  ;;  %v865_v55 = vpop.f32.mrb[88].mxu0 }
 0x190   :  { %v5840_v8 = vpop.f32.mrb[91].mxu1  ;;  %6638 = vtanh.f32 %v3787_v44  ;;  %v913_v57 = vadd.f32 %v865_v55, %v7575_v37  ;;  %v5783_v12 = vpop.f32.mrb[89].mxu0 }
 0x191   :  { %v6633_v56 = vpop.eup %6632  ;;  %v868_v39 = vpop.f32.mrb[90].mxu0 }
 0x192   :  { %6066 = vmatmul.mubr.msk.bf16.gmra.mrb[196].mxu1 %vm234_vm2, %v7816_v41  ;;  %v6635_v14 = vpop.eup %6634  ;;  %v1251_v26 = vadd.f32 %v1203_v21, %v913_v57  ;;  %v914_v23 = vadd.f32 %v868_v39, %v7582_v52  ;;  %v5784_v62 = vpop.f32.mrb[91].mxu0  ;;  %v7838_v52 = vsel %vm1819_vm5, %v1841_v5, %v7825_v6 }
 0x193   :  { %6069 = vmatprep.mubr.msk.bf16.mxu1 %vm6820_vm0, %v8988_v0  ;;  %v5140_v22 = vpack.c.bf16 %v6635_v14, %v6633_v56  ;;  %9019 = vst [vmem:[#allocation26_spill] sm:$0xff] %v7838_v52 }
 0x194   :  { %v3788_v37 = vadd.f32 %v7654_v13, %v1251_v26  ;;  %v1252_v38 = vadd.f32 %v1206_v54, %v914_v23  ;;  %6010 = vmatmul.mubr.msk.bf16.gmra.mrb[196].mxu0 %vm234_vm2, %v7384_v15 }
 0x195   :  { %v1211_v48 = vpop.f32.mrb[92].mxu1  ;;  %5348 = vst [vmem:[%s8964_s4 + $0x38] sm:$0xff] %v5140_v22   ;;  %6013 = vmatprep.mubr.msk.bf16.mxu0 %vm6820_vm0, %v8988_v0 }
 0x196   :  { %v5843_v33 = vpop.f32.mrb[93].mxu1  ;;  %v3789_v24 = vadd.f32 %v7654_v13, %v1252_v38  ;;  %6640 = vtanh.f32 %v3788_v37 }
 0x197   :  { %v1214_v7 = vpop.f32.mrb[94].mxu1  ;;  %v873_v63 = vpop.f32.mrb[92].mxu0 }
 0x198   :  { %v5844_v16 = vpop.f32.mrb[95].mxu1  ;;  %6642 = vtanh.f32 %v3789_v24  ;;  %v915_v30 = vadd.f32 %v873_v63, %v7588_v43  ;;  %v5787_v11 = vpop.f32.mrb[93].mxu0 }
 0x199   :  { %v6637_v28 = vpop.eup %6636  ;;  %v876_v61 = vpop.f32.mrb[94].mxu0 }
 0x19a   :  { %6070 = vmatmul.mubr.msk.bf16.gmra.mrb[200].mxu1 %vm234_vm2, %v7838_v52  ;;  %v6639_v35 = vpop.eup %6638  ;;  %v1253_v5 = vadd.f32 %v1211_v48, %v915_v30  ;;  %v916_v1 = vadd.f32 %v876_v61, %v7595_v58  ;;  %v5788_v32 = vpop.f32.mrb[95].mxu0  ;;  %v9020_v30 = vld [vmem:[#allocation2_spill] sm:$0xff] }
 0x19b   :  { %6073 = vmatprep.mubr.msk.bf16.mxu1 %vm6820_vm0, %v8988_v0  ;;  %v5145_v21 = vpack.c.bf16 %v6639_v35, %v6637_v28  ;;  %v6577_v61 = vld [vmem:[%s8961_s1 + $0xa0] sm:$0xff]  }
 0x19c   :  { %v3790_v40 = vadd.f32 %v7654_v13, %v1253_v5  ;;  %v1254_v20 = vadd.f32 %v1214_v7, %v916_v1  ;;  %6014 = vmatmul.mubr.msk.bf16.gmra.mrb[200].mxu0 %vm234_vm2, %v7406_v34 }
 0x19d   :  { %v1219_v31 = vpop.f32.mrb[96].mxu1  ;;  %5349 = vst [vmem:[%s8964_s4 + $0x40] sm:$0xff] %v5145_v21   ;;  %6017 = vmatprep.mubr.msk.bf16.mxu0 %vm6820_vm0, %v8988_v0 }
 0x19e   :  { %v5847_v43 = vpop.f32.mrb[97].mxu1  ;;  %v3791_v58 = vadd.f32 %v7654_v13, %v1254_v20  ;;  %6644 = vtanh.f32 %v3790_v40 }
 0x19f   :  { %v1222_v54 = vpop.f32.mrb[98].mxu1  ;;  %v881_v8 = vpop.f32.mrb[96].mxu0  ;;  %v6579_v43 = vld [vmem:[%s8961_s1 + $0xa8] sm:$0xff]  }
 0x1a0   :  { %v5848_v44 = vpop.f32.mrb[99].mxu1  ;;  %6646 = vtanh.f32 %v3791_v58  ;;  %v917_v55 = vadd.f32 %v881_v8, %v7604_v47  ;;  %v5791_v57 = vpop.f32.mrb[97].mxu0  ;;  %v9021_v8 = vld [vmem:[#allocation3_spill] sm:$0xff] }
 0x1a1   :  { %v6641_v12 = vpop.eup %6640  ;;  %v884_v56 = vpop.f32.mrb[98].mxu0 }
 0x1a2   :  { %6074 = vmatmul.mubr.msk.bf16.gmra.mrb[204].mxu1 %vm234_vm2, %v7825_v6  ;;  %v6643_v39 = vpop.eup %6642  ;;  %v1255_v14 = vadd.f32 %v1219_v31, %v917_v55  ;;  %v918_v26 = vadd.f32 %v884_v56, %v7611_v4  ;;  %v5792_v23 = vpop.f32.mrb[99].mxu0  ;;  %v6578_v4 = vld [vmem:[%s8961_s1 + $0xb0] sm:$0xff]   ;;  %v9032_v6 = vld [vmem:[#allocation17_spill] sm:$0xff] }
 0x1a3   :  { %6137 = vmatprep.mubr.msk.bf16.mxu1 %vm6820_vm0, %v8988_v0  ;;  %v5150_v62 = vpack.c.bf16 %v6643_v39, %v6641_v12 }
 0x1a4   :  { %v3792_v48 = vadd.f32 %v7654_v13, %v1255_v14  ;;  %v1256_v37 = vadd.f32 %v1222_v54, %v918_v26  ;;  %6018 = vmatmul.mubr.msk.bf16.gmra.mrb[204].mxu0 %vm234_vm2, %v7396_v50 }
 0x1a5   :  { %v1227_v22 = vpop.f32.mrb[100].mxu1  ;;  %5350 = vst [vmem:[%s8964_s4 + $0x48] sm:$0xff] %v5150_v62   ;;  %6081 = vmatprep.mubr.msk.bf16.mxu0 %vm6820_vm0, %v8988_v0 }
 0x1a6   :  { %v5851_v47 = vpop.f32.mrb[101].mxu1  ;;  %v3793_v33 = vadd.f32 %v7654_v13, %v1256_v37  ;;  %6648 = vtanh.f32 %v3792_v48 }
 0x1a7   :  { %v1230_v38 = vpop.f32.mrb[102].mxu1  ;;  %v889_v24 = vpop.f32.mrb[100].mxu0 }
 0x1a8   :  { %v5852_v7 = vpop.f32.mrb[103].mxu1  ;;  %6650 = vtanh.f32 %v3793_v33  ;;  %v919_v16 = vadd.f32 %v889_v24, %v7622_v53  ;;  %v5795_v63 = vpop.f32.mrb[101].mxu0  ;;  %v6580_v53 = vld [vmem:[%s8961_s1 + $0xb8] sm:$0xff]   ;;  %v9022_v38 = vld [vmem:[#allocation4_spill] sm:$0xff] }
 0x1a9   :  { %v6645_v11 = vpop.eup %6644  ;;  %v892_v28 = vpop.f32.mrb[102].mxu0 }
 0x1aa   :  { %6138 = vmatmul.mubr.msk.bf16.vlgmr.msra.gmra.mrb[208].mxu1 %vm234_vm2, %v9020_v30  ;;  %v6647_v35 = vpop.eup %6646  ;;  %v1257_v5 = vadd.f32 %v1227_v22, %v919_v16  ;;  %v5796_v1 = vpop.f32.mrb[103].mxu0 }
 0x1ab   :  { %6246 = vmatpush3.bf16.msra.mxu1 %v6578_v4  ;;  %6141 = vmatprep.mubr.msk.bf16.mxu1 %vm6820_vm0, %v8988_v0  ;;  %v5155_v32 = vpack.c.bf16 %v6647_v35, %v6645_v11 }
 0x1ac   :  { %6247 = vmatprep.subr.bf16.mxu1 %v8988_v0  ;;  %v3794_v31 = vadd.f32 %v7654_v13, %v1257_v5  ;;  %6082 = vmatmul.mubr.msk.bf16.vlgmr.msra.gmra.mrb[208].mxu0 %vm234_vm2, %v7145_v2  ;;  %v9023_v5 = vld [vmem:[#allocation5_spill] sm:$0xff] }
 0x1ad   :  { %v1530_v21 = vpop.f32.mrb[104].mxu1  ;;  %5351 = vst [vmem:[%s8964_s4 + $0x50] sm:$0xff] %v5155_v32   ;;  %6190 = vmatpush3.bf16.msra.mxu0 %v6577_v61  ;;  %6085 = vmatprep.mubr.msk.bf16.mxu0 %vm6820_vm0, %v8988_v0 }
 0x1ae   :  { %v5915_v40 = vpop.f32.mrb[105].mxu1  ;;  %6652 = vtanh.f32 %v3794_v31  ;;  %6191 = vmatprep.subr.bf16.mxu0 %v8988_v0 }
 0x1af   :  { %v1533_v20 = vpop.f32.mrb[106].mxu1  ;;  %6248 = vmatpush3.bf16.msra.mxu1 %v6580_v53  ;;  %v1382_v13 = vpop.f32.mrb[104].mxu0 }
 0x1b0   :  { %v5916_v54 = vpop.f32.mrb[107].mxu1  ;;  %6357 = vmatprep.subr.bf16.mxu1 %v8988_v0  ;;  %v7899_v58 = vadd.f32 %v1530_v21, %v1382_v13  ;;  %v5859_v44 = vpop.f32.mrb[105].mxu0 }
 0x1b1   :  { %v6649_v55 = vpop.eup %6648  ;;  %v1385_v57 = vpop.f32.mrb[106].mxu0  ;;  %6192 = vmatpush3.bf16.msra.mxu0 %v6579_v43  ;;  %v9024_v44 = vld [vmem:[#allocation6_spill] sm:$0xff] }
 0x1b2   :  { %6142 = vmatmul.mubr.msk.bf16.gmra.mrb[212].mxu1 %vm234_vm2, %v9021_v8  ;;  %v6651_v12 = vpop.eup %6650  ;;  %v7905_v56 = vadd.f32 %v1533_v20, %v1385_v57  ;;  %v5860_v39 = vpop.f32.mrb[107].mxu0  ;;  %6301 = vmatprep.subr.bf16.mxu0 %v8988_v0 }
 0x1b3   :  { %6145 = vmatprep.mubr.msk.bf16.mxu1 %vm6820_vm0, %v8988_v0  ;;  %v5160_v14 = vpack.c.bf16 %v6651_v12, %v6649_v55 }
 0x1b4   :  { %6086 = vmatmul.mubr.msk.bf16.gmra.mrb[212].mxu0 %vm234_vm2, %v7177_v25 }
 0x1b5   :  { %v1538_v26 = vpop.f32.mrb[108].mxu1  ;;  %5352 = vst [vmem:[%s8964_s4 + $0x58] sm:$0xff] %v5160_v14   ;;  %6089 = vmatprep.mubr.msk.bf16.mxu0 %vm6820_vm0, %v8988_v0 }
 0x1b6   :  { %v5919_v23 = vpop.f32.mrb[109].mxu1 }
 0x1b7   :  { %v1541_v62 = vpop.f32.mrb[110].mxu1  ;;  %v1390_v48 = vpop.f32.mrb[108].mxu0 }
 0x1b8   :  { %v5920_v22 = vpop.f32.mrb[111].mxu1  ;;  %v6653_v37 = vpop.eup %6652  ;;  %v7917_v4 = vadd.f32 %v1538_v26, %v1390_v48  ;;  %v9025_v48 = vld [vmem:[#allocation7_spill] sm:$0xff] }
 0x1b9   :  { %v5863_v47 = vpop.f32.mrb[109].mxu0  ;;  %v5026_v33 = vpack.c.bf16 %v6653_v37, %v6653_v37 }
 0x1ba   :  { %6146 = vmatmul.mubr.msk.bf16.gmra.mrb[216].mxu1 %vm234_vm2, %v9022_v38  ;;  %v1393_v7 = vpop.f32.mrb[110].mxu0 }
 0x1bb   :  { %6149 = vmatprep.mubr.msk.bf16.mxu1 %vm6820_vm0, %v8988_v0  ;;  %v5864_v24 = vpop.f32.mrb[111].mxu0  ;;  %v7921_v16 = vadd.f32 %v1541_v62, %v1393_v7  ;;  %3945 = vst [vmem:[%s8964_s4 + $0x60] sm:$0xf] %v5026_v33 }
 0x1bc   :  { %6090 = vmatmul.mubr.msk.bf16.gmra.mrb[216].mxu0 %vm234_vm2, %v7205_v45 }
 0x1bd   :  { %v1546_v63 = vpop.f32.mrb[112].mxu1  ;;  %6093 = vmatprep.mubr.msk.bf16.mxu0 %vm6820_vm0, %v8988_v0 }
 0x1be   :  { %v5923_v30 = vpop.f32.mrb[113].mxu1 }
 0x1bf   :  { %v1549_v11 = vpop.f32.mrb[114].mxu1  ;;  %v1398_v61 = vpop.f32.mrb[112].mxu0 }
 0x1c0   :  { %v5924_v28 = vpop.f32.mrb[115].mxu1  ;;  %v5867_v35 = vpop.f32.mrb[113].mxu0  ;;  %v7932_v1 = vadd.f32 %v1546_v63, %v1398_v61  ;;  %v9026_v61 = vld [vmem:[#allocation8_spill] sm:$0xff] }
 0x1c1   :  { %v1401_v53 = vpop.f32.mrb[114].mxu0 }
 0x1c2   :  { %6150 = vmatmul.mubr.msk.bf16.gmra.mrb[220].mxu1 %vm234_vm2, %v9023_v5  ;;  %v5868_v32 = vpop.f32.mrb[115].mxu0  ;;  %v7936_v21 = vadd.f32 %v1549_v11, %v1401_v53 }
 0x1c3   :  { %6153 = vmatprep.mubr.msk.bf16.mxu1 %vm6820_vm0, %v8988_v0 }
 0x1c4   :  { %6094 = vmatmul.mubr.msk.bf16.gmra.mrb[220].mxu0 %vm234_vm2, %v7227_v60 }
 0x1c5   :  { %v1554_v31 = vpop.f32.mrb[116].mxu1  ;;  %6097 = vmatprep.mubr.msk.bf16.mxu0 %vm6820_vm0, %v8988_v0 }
 0x1c6   :  { %v5927_v40 = vpop.f32.mrb[117].mxu1 }
 0x1c7   :  { %v1557_v20 = vpop.f32.mrb[118].mxu1  ;;  %v1406_v54 = vpop.f32.mrb[116].mxu0 }
 0x1c8   :  { %v5928_v43 = vpop.f32.mrb[119].mxu1  ;;  %v5871_v13 = vpop.f32.mrb[117].mxu0  ;;  %v7944_v8 = vadd.f32 %v1554_v31, %v1406_v54 }
 0x1c9   :  { %v1409_v55 = vpop.f32.mrb[118].mxu0 }
 0x1ca   :  { %6154 = vmatmul.mubr.msk.bf16.gmra.mrb[224].mxu1 %vm234_vm2, %v9024_v44  ;;  %v5872_v57 = vpop.f32.mrb[119].mxu0  ;;  %v7948_v12 = vadd.f32 %v1557_v20, %v1409_v55  ;;  %v9027_v44 = vld [vmem:[#allocation9_spill] sm:$0xff] }
 0x1cb   :  { %6157 = vmatprep.mubr.msk.bf16.mxu1 %vm6820_vm0, %v8988_v0 }
 0x1cc   :  { %6098 = vmatmul.mubr.msk.bf16.gmra.mrb[224].mxu0 %vm234_vm2, %v7249_v18 }
 0x1cd   :  { %v1562_v39 = vpop.f32.mrb[120].mxu1  ;;  %6101 = vmatprep.mubr.msk.bf16.mxu0 %vm6820_vm0, %v8988_v0 }
 0x1ce   :  { %v5931_v14 = vpop.f32.mrb[121].mxu1 }
 0x1cf   :  { %v1565_v26 = vpop.f32.mrb[122].mxu1  ;;  %v1414_v62 = vpop.f32.mrb[120].mxu0 }
 0x1d0   :  { %v5932_v23 = vpop.f32.mrb[123].mxu1  ;;  %v5875_v22 = vpop.f32.mrb[121].mxu0  ;;  %v7956_v37 = vadd.f32 %v1562_v39, %v1414_v62 }
 0x1d1   :  { %v1417_v47 = vpop.f32.mrb[122].mxu0 }
 0x1d2   :  { %6158 = vmatmul.mubr.msk.bf16.gmra.mrb[228].mxu1 %vm234_vm2, %v9025_v48  ;;  %v5876_v38 = vpop.f32.mrb[123].mxu0  ;;  %v7960_v33 = vadd.f32 %v1565_v26, %v1417_v47 }
 0x1d3   :  { %6161 = vmatprep.mubr.msk.bf16.mxu1 %vm6820_vm0, %v8988_v0  ;;  %v9028_v38 = vld [vmem:[#allocation11_spill] sm:$0xff] }
 0x1d4   :  { %6102 = vmatmul.mubr.msk.bf16.gmra.mrb[228].mxu0 %vm234_vm2, %v7271_v42 }
 0x1d5   :  { %v1570_v7 = vpop.f32.mrb[124].mxu1  ;;  %6105 = vmatprep.mubr.msk.bf16.mxu0 %vm6820_vm0, %v8988_v0 }
 0x1d6   :  { %v5935_v24 = vpop.f32.mrb[125].mxu1 }
 0x1d7   :  { %v1573_v63 = vpop.f32.mrb[126].mxu1  ;;  %v1422_v11 = vpop.f32.mrb[124].mxu0 }
 0x1d8   :  { %v5936_v30 = vpop.f32.mrb[127].mxu1  ;;  %v5879_v28 = vpop.f32.mrb[125].mxu0  ;;  %v7968_v35 = vadd.f32 %v1570_v7, %v1422_v11 }
 0x1d9   :  { %v1425_v5 = vpop.f32.mrb[126].mxu0 }
 0x1da   :  { %6162 = vmatmul.mubr.msk.bf16.gmra.mrb[232].mxu1 %vm234_vm2, %v9026_v61  ;;  %v5880_v53 = vpop.f32.mrb[127].mxu0  ;;  %v7972_v32 = vadd.f32 %v1573_v63, %v1425_v5 }
 0x1db   :  { %6165 = vmatprep.mubr.msk.bf16.mxu1 %vm6820_vm0, %v8988_v0 }
 0x1dc   :  { %6106 = vmatmul.mubr.msk.bf16.gmra.mrb[232].mxu0 %vm234_vm2, %v7293_v9 }
 0x1dd   :  { %v1578_v31 = vpop.f32.mrb[128].mxu1  ;;  %6109 = vmatprep.mubr.msk.bf16.mxu0 %vm6820_vm0, %v8988_v0 }
 0x1de   :  { %v5939_v40 = vpop.f32.mrb[129].mxu1 }
 0x1df   :  { %v1581_v20 = vpop.f32.mrb[130].mxu1  ;;  %v1430_v54 = vpop.f32.mrb[128].mxu0  ;;  %v9029_v40 = vld [vmem:[#allocation13_spill] sm:$0xff] }
 0x1e0   :  { %v5940_v43 = vpop.f32.mrb[131].mxu1  ;;  %v5883_v13 = vpop.f32.mrb[129].mxu0  ;;  %v7980_v55 = vadd.f32 %v1578_v31, %v1430_v54 }
 0x1e1   :  { %v1433_v57 = vpop.f32.mrb[130].mxu0 }
 0x1e2   :  { %6166 = vmatmul.mubr.msk.bf16.gmra.mrb[236].mxu1 %vm234_vm2, %v9027_v44  ;;  %v5884_v39 = vpop.f32.mrb[131].mxu0  ;;  %v7984_v14 = vadd.f32 %v1581_v20, %v1433_v57 }
 0x1e3   :  { %6169 = vmatprep.mubr.msk.bf16.mxu1 %vm6820_vm0, %v8988_v0 }
 0x1e4   :  { %6110 = vmatmul.mubr.msk.bf16.gmra.mrb[236].mxu0 %vm234_vm2, %v7315_v46 }
 0x1e5   :  { %v1586_v26 = vpop.f32.mrb[132].mxu1  ;;  %6113 = vmatprep.mubr.msk.bf16.mxu0 %vm6820_vm0, %v8988_v0 }
 0x1e6   :  { %v5943_v23 = vpop.f32.mrb[133].mxu1 }
 0x1e7   :  { %v1589_v62 = vpop.f32.mrb[134].mxu1  ;;  %v1438_v48 = vpop.f32.mrb[132].mxu0 }
 0x1e8   :  { %v5944_v22 = vpop.f32.mrb[135].mxu1  ;;  %v5887_v47 = vpop.f32.mrb[133].mxu0  ;;  %v7992_v7 = vadd.f32 %v1586_v26, %v1438_v48 }
 0x1e9   :  { %v1441_v24 = vpop.f32.mrb[134].mxu0  ;;  %v9030_v22 = vld [vmem:[#allocation15_spill] sm:$0xff] }
 0x1ea   :  { %6170 = vmatmul.mubr.msk.bf16.gmra.mrb[240].mxu1 %vm234_vm2, %v9028_v38  ;;  %v5888_v63 = vpop.f32.mrb[135].mxu0  ;;  %v7996_v30 = vadd.f32 %v1589_v62, %v1441_v24  ;;  %v2363_v24 = vld [vmem:[%s8962_s0 + $0x8] sm:$0xc] }
 0x1eb   :  { %6173 = vmatprep.mubr.msk.bf16.mxu1 %vm6820_vm0, %v8988_v0  ;;  %v2364_v63 = vld [vmem:[%s8962_s0 + $0xc] sm:$0xf] }
 0x1ec   :  { %6114 = vmatmul.mubr.msk.bf16.gmra.mrb[240].mxu0 %vm234_vm2, %v7337_v36 }
 0x1ed   :  { %v1594_v11 = vpop.f32.mrb[136].mxu1  ;;  %6117 = vmatprep.mubr.msk.bf16.mxu0 %vm6820_vm0, %v8988_v0 }
 0x1ee   :  { %v5947_v28 = vpop.f32.mrb[137].mxu1 }
 0x1ef   :  { %v1597_v61 = vpop.f32.mrb[138].mxu1  ;;  %v1446_v53 = vpop.f32.mrb[136].mxu0 }
 0x1f0   :  { %v5948_v5 = vpop.f32.mrb[139].mxu1  ;;  %v5891_v31 = vpop.f32.mrb[137].mxu0  ;;  %v8004_v20 = vadd.f32 %v1594_v11, %v1446_v53  ;;  %v4701_v53 = vcombine.low %v2363_v24, %v2364_v63 }
 0x1f1   :  { %v1449_v43 = vpop.f32.mrb[138].mxu0  ;;  %v8035_v31 = vld [vmem:[%s8962_s0 + $0x10] sm:$0xff]  }
 0x1f2   :  { %6174 = vmatmul.mubr.msk.bf16.gmra.mrb[244].mxu1 %vm234_vm2, %v9029_v40  ;;  %v5892_v54 = vpop.f32.mrb[139].mxu0  ;;  %v8008_v13 = vadd.f32 %v1597_v61, %v1449_v43 }
 0x1f3   :  { %6177 = vmatprep.mubr.msk.bf16.mxu1 %vm6820_vm0, %v8988_v0 }
 0x1f4   :  { %6118 = vmatmul.mubr.msk.bf16.gmra.mrb[244].mxu0 %vm234_vm2, %v7365_v19 }
 0x1f5   :  { %v1602_v44 = vpop.f32.mrb[140].mxu1  ;;  %6121 = vmatprep.mubr.msk.bf16.mxu0 %vm6820_vm0, %v8988_v0 }
 0x1f6   :  { %v5951_v57 = vpop.f32.mrb[141].mxu1 }
 0x1f7   :  { %v1605_v39 = vpop.f32.mrb[142].mxu1  ;;  %v1454_v23 = vpop.f32.mrb[140].mxu0 }
 0x1f8   :  { %v5952_v26 = vpop.f32.mrb[143].mxu1  ;;  %v5895_v62 = vpop.f32.mrb[141].mxu0  ;;  %v8016_v48 = vadd.f32 %v1602_v44, %v1454_v23  ;;  %v9031_v44 = vld [vmem:[#allocation19_spill] sm:$0xff]  ;;  %v2710_v23 = vshll.u32 %v4701_v53, 16 }
 0x1f9   :  { %v1457_v47 = vpop.f32.mrb[142].mxu0  ;;  %v2707_v26 = vshrl.u32 %v4701_v53, 16  ;;  %v2715_v62 = vshrl.u32 %v8035_v31, 16 }
 0x1fa   :  { %6178 = vmatmul.mubr.msk.bf16.gmra.mrb[248].mxu1 %vm234_vm2, %v9030_v22  ;;  %v5896_v38 = vpop.f32.mrb[143].mxu0  ;;  %v8026_v11 = vadd.f32 %v1605_v39, %v1457_v47  ;;  %v2718_v22 = vshll.u32 %v8035_v31, 16 }
 0x1fb   :  { %6181 = vmatprep.mubr.msk.bf16.mxu1 %vm6820_vm0, %v8988_v0 }
 0x1fc   :  { %6122 = vmatmul.mubr.msk.bf16.gmra.mrb[248].mxu0 %vm234_vm2, %v7384_v15 }
 0x1fd   :  { %v1610_v28 = vpop.f32.mrb[144].mxu1  ;;  %6125 = vmatprep.mubr.msk.bf16.mxu0 %vm6820_vm0, %v8988_v0 }
 0x1fe   :  { %v5955_v61 = vpop.f32.mrb[145].mxu1 }
 0x1ff   :  { %v1613_v5 = vpop.f32.mrb[146].mxu1  ;;  %v1462_v43 = vpop.f32.mrb[144].mxu0  ;;  %v2709_v61 = vrot.slane %v2707_v26, 2 }
 0x200   :  { %v5956_v40 = vpop.f32.mrb[147].mxu1  ;;  %v5899_v54 = vpop.f32.mrb[145].mxu0  ;;  %v8039_v57 = vadd.f32 %v1610_v28, %v1462_v43  ;;  %v2717_v43 = vrot.slane %v2715_v62, 2 }
 0x201   :  { %v1465_v39 = vpop.f32.mrb[146].mxu0  ;;  %v2712_v40 = vrot.slane %v2710_v23, 3  ;;  %v2720_v54 = vrot.slane %v2718_v22, 3 }
 0x202   :  { %6182 = vmatmul.mubr.msk.bf16.gmra.mrb[252].mxu1 %vm234_vm2, %v9031_v44  ;;  %v5900_v47 = vpop.f32.mrb[147].mxu0  ;;  %v8045_v38 = vadd.f32 %v1613_v5, %v1465_v39  ;;  %v8054_v44 = vld [vmem:[%s8962_s0 + $0x18] sm:$0xff]  }
 0x203   :  { %6185 = vmatprep.mubr.msk.bf16.mxu1 %vm6820_vm0, %v8988_v0  ;;  %v2713_v26 = vor.u32 %v2712_v40, %v2709_v61  ;;  %v2721_v23 = vor.u32 %v2720_v54, %v2717_v43  ;;  %v2724_v62 = vshrl.u32 %v8054_v44, 16  ;;  %v2727_v22 = vshll.u32 %v8054_v44, 16  ;;  %v8080_v43 = vld [vmem:[%s8962_s0 + $0x20] sm:$0xff]  }
 0x204   :  { %6126 = vmatmul.mubr.msk.bf16.gmra.mrb[252].mxu0 %vm234_vm2, %v7406_v34  ;;  %v2460_v61 = vrot.slane %v8035_v31, 2 }
 0x205   :  { %v1618_v24 = vpop.f32.mrb[148].mxu1  ;;  %6129 = vmatprep.mubr.msk.bf16.mxu0 %vm6820_vm0, %v8988_v0  ;;  %v8072_v40 = vsel %vm2705_vm6, %v2713_v26, %v2721_v23 }
 0x206   :  { %v5959_v63 = vpop.f32.mrb[149].mxu1  ;;  %9033 = vst [vmem:[#allocation2_spill] sm:$0xff] %v8072_v40 }
 0x207   :  { %v1621_v28 = vpop.f32.mrb[150].mxu1  ;;  %v1470_v39 = vpop.f32.mrb[148].mxu0 }
 0x208   :  { %v5960_v5 = vpop.f32.mrb[151].mxu1  ;;  %v5903_v47 = vpop.f32.mrb[149].mxu0  ;;  %v8058_v63 = vadd.f32 %v1618_v24, %v1470_v39  ;;  %v2459_v24 = vrot.slane %v4701_v53, 2 }
 0x209   :  { %v1473_v52 = vpop.f32.mrb[150].mxu0 }
 0x20a   :  { %6186 = vmatmul.mubr.msk.bf16.gmra.mrb[0].mxu1 %vm234_vm2, %v9032_v6  ;;  %v5904_v34 = vpop.f32.mrb[151].mxu0  ;;  %v8064_v5 = vadd.f32 %v1621_v28, %v1473_v52  ;;  %v2726_v52 = vrot.slane %v2724_v62, 2  ;;  %v2729_v28 = vrot.slane %v2727_v22, 3  ;;  %v6583_v62 = vld [vmem:[%s8961_s1 + $0xd0] sm:$0xff]  }
 0x20b   :  { %6249 = vmatprep.mubr.msk.bf16.mxu1 %vm6820_vm0, %v8988_v0  ;;  %v6584_v34 = vld [vmem:[%s8961_s1 + $0xc0] sm:$0xff]  }
 0x20c   :  { %6130 = vmatmul.mubr.msk.bf16.gmra.mrb[0].mxu0 %vm234_vm2, %v7396_v50  ;;  %v2730_v22 = vor.u32 %v2729_v28, %v2726_v52  ;;  %v2462_v52 = vrot.slane %v8054_v44, 2 }
 0x20d   :  { %v1626_v47 = vpop.f32.mrb[152].mxu1  ;;  %6193 = vmatprep.mubr.msk.bf16.mxu0 %vm6820_vm0, %v8988_v0 }
 0x20e   :  { %v5963_v6 = vpop.f32.mrb[153].mxu1  ;;  %v8103_v28 = vsel %vm2705_vm6, %v2721_v23, %v2730_v22 }
 0x20f   :  { %v1629_v39 = vpop.f32.mrb[154].mxu1  ;;  %v1478_v54 = vpop.f32.mrb[152].mxu0  ;;  %9034 = vst [vmem:[#allocation3_spill] sm:$0xff] %v8103_v28 }
 0x210   :  { %v5964_v53 = vpop.f32.mrb[155].mxu1  ;;  %v5907_v6 = vpop.f32.mrb[153].mxu0  ;;  %v8084_v31 = vadd.f32 %v1626_v47, %v1478_v54  ;;  %v2461_v39 = vsel %vm1819_vm5, %v2459_v24, %v2460_v61  ;;  %v6592_v47 = vld [vmem:[%s8961_s1 + $0xc8] sm:$0xff]  }
 0x211   :  { %v1481_v26 = vpop.f32.mrb[154].mxu0  ;;  %v2733_v53 = vshrl.u32 %v8080_v43, 16  ;;  %v2736_v6 = vshll.u32 %v8080_v43, 16 }
 0x212   :  { %6250 = vmatmul.mubr.msk.bf16.vlgmr.msra.gmra.mrb[4].mxu1 %vm234_vm2, %v8072_v40  ;;  %v5908_v50 = vpop.f32.mrb[155].mxu0  ;;  %v8108_v40 = vld [vmem:[%s8962_s0 + $0x28] sm:$0xff]  }
 0x213   :  { %6358 = vmatpush3.bf16.msra.mxu1 %v6584_v34  ;;  %6253 = vmatprep.mubr.msk.bf16.mxu1 %vm6820_vm0, %v8988_v0  ;;  %v2735_v50 = vrot.slane %v2733_v53, 2  ;;  %v2738_v26 = vrot.slane %v2736_v6, 3  ;;  %v2463_v6 = vsel %vm1819_vm5, %v2460_v61, %v2462_v52  ;;  %v8128_v61 = vld [vmem:[%s8963_s3 + $0x1] ss:$0 sm:$0xff] }
 0x214   :  { %6359 = vmatprep.subr.bf16.mxu1 %v8988_v0  ;;  %6194 = vmatmul.mubr.msk.bf16.vlgmr.msra.gmra.mrb[4].mxu0 %vm234_vm2, %v2461_v39  ;;  %v6591_v39 = vld [vmem:[%s8961_s1 + $0xd8] sm:$0xff]  }
 0x215   :  { %v1930_v24 = vpop.f32.mrb[156].mxu1  ;;  %6302 = vmatpush3.bf16.msra.mxu0 %v6583_v62  ;;  %6197 = vmatprep.mubr.msk.bf16.mxu0 %vm6820_vm0, %v8988_v0  ;;  %v2739_v41 = vor.u32 %v2738_v26, %v2735_v50 }
 0x216   :  { %v6027_v54 = vpop.f32.mrb[157].mxu1  ;;  %6303 = vmatprep.subr.bf16.mxu0 %v8988_v0 }
 0x217   :  { %v1933_v34 = vpop.f32.mrb[158].mxu1  ;;  %6360 = vmatpush3.bf16.msra.mxu1 %v6592_v47  ;;  %v1683_v54 = vpop.f32.mrb[156].mxu0  ;;  %v2745_v47 = vshll.u32 %v8108_v40, 16 }
 0x218   :  { %v6028_v62 = vpop.f32.mrb[159].mxu1  ;;  %6469 = vmatprep.subr.bf16.mxu1 %v8988_v0  ;;  %v1785_v44 = vadd.f32 %v1683_v54, %v7899_v58  ;;  %v5971_v23 = vpop.f32.mrb[157].mxu0 }
 0x219   :  { %v1686_v53 = vpop.f32.mrb[158].mxu0  ;;  %v2742_v62 = vshrl.u32 %v8108_v40, 16  ;;  %6304 = vmatpush3.bf16.msra.mxu0 %v6591_v39  ;;  %v2464_v39 = vrot.slane %v8080_v43, 2 }
 0x21a   :  { %6254 = vmatmul.mubr.msk.bf16.gmra.mrb[8].mxu1 %vm234_vm2, %v8103_v28  ;;  %v2032_v15 = vadd.f32 %v1930_v24, %v1785_v44  ;;  %v1786_v59 = vadd.f32 %v1686_v53, %v7905_v56  ;;  %v5972_v58 = vpop.f32.mrb[159].mxu0  ;;  %6413 = vmatprep.subr.bf16.mxu0 %v8988_v0  ;;  %v8135_v24 = vld [vmem:[%s8962_s0 + $0x30] sm:$0xff]   ;;  %v8141_v44 = vsel %vm2705_vm6, %v2730_v22, %v2739_v41 }
 0x21b   :  { %6257 = vmatprep.mubr.msk.bf16.mxu1 %vm6820_vm0, %v8988_v0  ;;  %9035 = vst [vmem:[#allocation4_spill] sm:$0xff] %v8141_v44  ;;  %v2744_v53 = vrot.slane %v2742_v62, 2  ;;  %v2465_v22 = vsel %vm1819_vm5, %v2462_v52, %v2464_v39  ;;  %v9036_v62 = vmov 0.0  }
 0x21c   :  { %v3946_v23 = vadd.f32 %v8128_v61, %v2032_v15  ;;  %v2033_v50 = vadd.f32 %v1933_v34, %v1786_v59  ;;  %6198 = vmatmul.mubr.msk.bf16.gmra.mrb[8].mxu0 %vm234_vm2, %v2463_v6  ;;  %v2747_v15 = vrot.slane %v2745_v47, 3 }
 0x21d   :  { %v1938_v54 = vpop.f32.mrb[160].mxu1  ;;  %6201 = vmatprep.mubr.msk.bf16.mxu0 %vm6820_vm0, %v8988_v0  ;;  %v2754_v0 = vshll.u32 %v8135_v24, 16 }
 0x21e   :  { %v6031_v26 = vpop.f32.mrb[161].mxu1  ;;  %6654 = vtanh.f32 %v3946_v23  ;;  %v3947_v43 = vadd.f32 %v8128_v61, %v2033_v50  ;;  %v2748_v47 = vor.u32 %v2747_v15, %v2744_v53 }
 0x21f   :  { %v1941_v56 = vpop.f32.mrb[162].mxu1  ;;  %v1691_v34 = vpop.f32.mrb[160].mxu0  ;;  %v2751_v26 = vshrl.u32 %v8135_v24, 16  ;;  %v2756_v36 = vrot.slane %v2754_v0, 3 }
 0x220   :  { %v6032_v59 = vpop.f32.mrb[163].mxu1  ;;  %v1787_v6 = vadd.f32 %v1691_v34, %v7917_v4  ;;  %v5975_v58 = vpop.f32.mrb[161].mxu0  ;;  %6656 = vtanh.f32 %v3947_v43 }
 0x221   :  { %v1694_v28 = vpop.f32.mrb[162].mxu0  ;;  %v2466_v58 = vrot.slane %v8108_v40, 2  ;;  %v2753_v17 = vrot.slane %v2751_v26, 2 }
 0x222   :  { %6258 = vmatmul.mubr.msk.bf16.gmra.mrb[12].mxu1 %vm234_vm2, %v8141_v44  ;;  %v2034_v23 = vadd.f32 %v1938_v54, %v1787_v6  ;;  %v1788_v4 = vadd.f32 %v1694_v28, %v7921_v16  ;;  %v5976_v59 = vpop.f32.mrb[163].mxu0  ;;  %v8159_v54 = vsel %vm2705_vm6, %v2739_v41, %v2748_v47  ;;  %v8164_v16 = vld [vmem:[%s8962_s0 + $0x38] sm:$0xff]  }
 0x223   :  { %6261 = vmatprep.mubr.msk.bf16.mxu1 %vm6820_vm0, %v9036_v62  ;;  %v2467_v15 = vsel %vm1819_vm5, %v2464_v39, %v2466_v58  ;;  %v2757_v6 = vor.u32 %v2756_v36, %v2753_v17  ;;  %v2468_v59 = vrot.slane %v8135_v24, 2 }
 0x224   :  { %v3948_v44 = vadd.f32 %v8128_v61, %v2034_v23  ;;  %v2035_v19 = vadd.f32 %v1941_v56, %v1788_v4  ;;  %6202 = vmatmul.mubr.msk.bf16.gmra.mrb[12].mxu0 %vm234_vm2, %v2465_v22  ;;  %v2763_v22 = vshll.u32 %v8164_v16, 16 }
 0x225   :  { %v1946_v34 = vpop.f32.mrb[164].mxu1  ;;  %6205 = vmatprep.mubr.msk.bf16.mxu0 %vm6820_vm0, %v9036_v62 }
 0x226   :  { %v6035_v50 = vpop.f32.mrb[165].mxu1  ;;  %6658 = vtanh.f32 %v3948_v44  ;;  %v3949_v26 = vadd.f32 %v8128_v61, %v2035_v19  ;;  %v2760_v44 = vshrl.u32 %v8164_v16, 16 }
 0x227   :  { %v1949_v52 = vpop.f32.mrb[166].mxu1  ;;  %v1699_v28 = vpop.f32.mrb[164].mxu0  ;;  %v8190_v50 = vsel %vm2705_vm6, %v2748_v47, %v2757_v6 }
 0x228   :  { %v6036_v40 = vpop.f32.mrb[167].mxu1  ;;  %v6655_v56 = vpop.eup %6654  ;;  %v1789_v53 = vadd.f32 %v1699_v28, %v7932_v1  ;;  %6660 = vtanh.f32 %v3949_v26 }
 0x229   :  { %v5979_v0 = vpop.f32.mrb[165].mxu0  ;;  %v5027_v41 = vpack.c.bf16 %v6655_v56, %v6655_v56  ;;  %v2762_v40 = vrot.slane %v2760_v44, 2 }
 0x22a   :  { %6262 = vmatmul.mubr.msk.bf16.gmra.mrb[16].mxu1 %vm234_vm2, %v8159_v54  ;;  %v1702_v43 = vpop.f32.mrb[166].mxu0  ;;  %v2036_v23 = vadd.f32 %v1946_v34, %v1789_v53  ;;  %v8185_v34 = vld [vmem:[%s8962_s0 + $0x40] sm:$0xff]   ;;  %v6657_v56 = vpop.eup %6656 }
 0x22b   :  { %6265 = vmatprep.mubr.msk.bf16.mxu1 %vm6820_vm0, %v9036_v62  ;;  %v1790_v1 = vadd.f32 %v1702_v43, %v7936_v21  ;;  %v5980_v4 = vpop.f32.mrb[167].mxu0  ;;  %4877 = vst [vmem:[%s8964_s4 + $0x64] sm:$0xf] %v5027_v41  ;;  %v2769_v41 = vshrl.u32 %v8185_v34, 16  ;;  %v2772_v26 = vshll.u32 %v8185_v34, 16 }
 0x22c   :  { %v3950_v17 = vadd.f32 %v8128_v61, %v2036_v23  ;;  %6206 = vmatmul.mubr.msk.bf16.gmra.mrb[16].mxu0 %vm234_vm2, %v2467_v15 }
 0x22d   :  { %v1954_v36 = vpop.f32.mrb[168].mxu1  ;;  %v2037_v19 = vadd.f32 %v1949_v52, %v1790_v1  ;;  %6209 = vmatprep.mubr.msk.bf16.mxu0 %vm6820_vm0, %v9036_v62  ;;  %v2765_v52 = vrot.slane %v2763_v22, 3  ;;  %v2469_v22 = vsel %vm1819_vm5, %v2466_v58, %v2468_v59 }
 0x22e   :  { %v6039_v39 = vpop.f32.mrb[169].mxu1  ;;  %6662 = vtanh.f32 %v3950_v17 }
 0x22f   :  { %v1957_v21 = vpop.f32.mrb[170].mxu1  ;;  %v1707_v53 = vpop.f32.mrb[168].mxu0  ;;  %v3951_v47 = vadd.f32 %v8128_v61, %v2037_v19  ;;  %v2766_v23 = vor.u32 %v2765_v52, %v2762_v40  ;;  %v2470_v39 = vrot.slane %v8164_v16, 2  ;;  %v8216_v16 = vld [vmem:[%s8962_s0 + $0x48] sm:$0xff]  }
 0x230   :  { %v6040_v28 = vpop.f32.mrb[171].mxu1  ;;  %v6659_v24 = vpop.eup %6658  ;;  %v1791_v0 = vadd.f32 %v1707_v53, %v7944_v8  ;;  %v2774_v53 = vrot.slane %v2772_v26, 3 }
 0x231   :  { %v5983_v15 = vpop.f32.mrb[169].mxu0  ;;  %v5165_v43 = vpack.c.bf16 %v6659_v24, %v6657_v56  ;;  %v2771_v56 = vrot.slane %v2769_v41, 2  ;;  %6664 = vtanh.f32 %v3951_v47  ;;  %v2471_v41 = vsel %vm1819_vm5, %v2468_v59, %v2470_v39 }
 0x232   :  { %6266 = vmatmul.mubr.msk.bf16.gmra.mrb[20].mxu1 %vm234_vm2, %v8190_v50  ;;  %v1710_v44 = vpop.f32.mrb[170].mxu0  ;;  %v2038_v1 = vadd.f32 %v1954_v36, %v1791_v0  ;;  %v6661_v40 = vpop.eup %6660 }
 0x233   :  { %6269 = vmatprep.mubr.msk.bf16.mxu1 %vm6820_vm0, %v9036_v62  ;;  %v1792_v8 = vadd.f32 %v1710_v44, %v7948_v12  ;;  %v5984_v4 = vpop.f32.mrb[171].mxu0  ;;  %5353 = vst [vmem:[%s8964_s4 + $0x68] sm:$0xff] %v5165_v43   ;;  %v8211_v12 = vsel %vm2705_vm6, %v2757_v6, %v2766_v23  ;;  %v2775_v6 = vor.u32 %v2774_v53, %v2771_v56  ;;  %v2778_v44 = vshrl.u32 %v8216_v16, 16 }
 0x234   :  { %v3952_v19 = vadd.f32 %v8128_v61, %v2038_v1  ;;  %6210 = vmatmul.mubr.msk.bf16.gmra.mrb[20].mxu0 %vm234_vm2, %v2469_v22  ;;  %v2781_v22 = vshll.u32 %v8216_v16, 16 }
 0x235   :  { %v1962_v17 = vpop.f32.mrb[172].mxu1  ;;  %v2039_v28 = vadd.f32 %v1957_v21, %v1792_v8  ;;  %6213 = vmatprep.mubr.msk.bf16.mxu0 %vm6820_vm0, %v9036_v62  ;;  %v8242_v56 = vsel %vm2705_vm6, %v2766_v23, %v2775_v6  ;;  %v2780_v53 = vrot.slane %v2778_v44, 2 }
 0x236   :  { %v6043_v58 = vpop.f32.mrb[173].mxu1  ;;  %6666 = vtanh.f32 %v3952_v19 }
 0x237   :  { %v1965_v36 = vpop.f32.mrb[174].mxu1  ;;  %v1715_v52 = vpop.f32.mrb[172].mxu0  ;;  %v3953_v43 = vadd.f32 %v8128_v61, %v2039_v28  ;;  %v2472_v58 = vrot.slane %v8185_v34, 2 }
 0x238   :  { %v6044_v21 = vpop.f32.mrb[175].mxu1  ;;  %v6663_v24 = vpop.eup %6662  ;;  %v1793_v0 = vadd.f32 %v1715_v52, %v7956_v37 }
 0x239   :  { %v5987_v15 = vpop.f32.mrb[173].mxu0  ;;  %v5170_v26 = vpack.c.bf16 %v6663_v24, %v6661_v40  ;;  %6668 = vtanh.f32 %v3953_v43 }
 0x23a   :  { %6270 = vmatmul.mubr.msk.bf16.gmra.mrb[24].mxu1 %vm234_vm2, %v8211_v12  ;;  %v1718_v47 = vpop.f32.mrb[174].mxu0  ;;  %v2040_v1 = vadd.f32 %v1962_v17, %v1793_v0  ;;  %v8237_v17 = vld [vmem:[%s8962_s0 + $0x50] sm:$0xff]  }
 0x23b   :  { %6273 = vmatprep.mubr.msk.bf16.mxu1 %vm6820_vm0, %v9036_v62  ;;  %v1794_v37 = vadd.f32 %v1718_v47, %v7960_v33  ;;  %v5988_v8 = vpop.f32.mrb[175].mxu0  ;;  %5354 = vst [vmem:[%s8964_s4 + $0x70] sm:$0xff] %v5170_v26   ;;  %v6665_v40 = vpop.eup %6664  ;;  %v2787_v15 = vshrl.u32 %v8237_v17, 16  ;;  %v2473_v47 = vsel %vm1819_vm5, %v2470_v39, %v2472_v58 }
 0x23c   :  { %v3954_v4 = vadd.f32 %v8128_v61, %v2040_v1  ;;  %6214 = vmatmul.mubr.msk.bf16.gmra.mrb[24].mxu0 %vm234_vm2, %v2471_v41  ;;  %v2790_v41 = vshll.u32 %v8237_v17, 16  ;;  %v2474_v8 = vrot.slane %v8216_v16, 2  ;;  %v8268_v16 = vld [vmem:[%s8962_s0 + $0x58] sm:$0xff]  }
 0x23d   :  { %v1970_v59 = vpop.f32.mrb[176].mxu1  ;;  %v2041_v19 = vadd.f32 %v1965_v36, %v1794_v37  ;;  %6217 = vmatprep.mubr.msk.bf16.mxu0 %vm6820_vm0, %v9036_v62  ;;  %v2783_v36 = vrot.slane %v2781_v22, 3 }
 0x23e   :  { %v6047_v28 = vpop.f32.mrb[177].mxu1  ;;  %6670 = vtanh.f32 %v3954_v4 }
 0x23f   :  { %v1973_v33 = vpop.f32.mrb[178].mxu1  ;;  %v1723_v52 = vpop.f32.mrb[176].mxu0  ;;  %v3955_v23 = vadd.f32 %v8128_v61, %v2041_v19  ;;  %v2784_v44 = vor.u32 %v2783_v36, %v2780_v53  ;;  %v2789_v28 = vrot.slane %v2787_v15, 2 }
 0x240   :  { %v6048_v21 = vpop.f32.mrb[179].mxu1  ;;  %v6667_v34 = vpop.eup %6666  ;;  %v1795_v24 = vadd.f32 %v1723_v52, %v7968_v35 }
 0x241   :  { %v5991_v0 = vpop.f32.mrb[177].mxu0  ;;  %v5175_v26 = vpack.c.bf16 %v6667_v34, %v6665_v40  ;;  %v2792_v21 = vrot.slane %v2790_v41, 3  ;;  %6672 = vtanh.f32 %v3955_v23  ;;  %v2799_v23 = vshll.u32 %v8268_v16, 16 }
 0x242   :  { %6274 = vmatmul.mubr.msk.bf16.gmra.mrb[28].mxu1 %vm234_vm2, %v8242_v56  ;;  %v1726_v43 = vpop.f32.mrb[178].mxu0  ;;  %v2042_v22 = vadd.f32 %v1970_v59, %v1795_v24  ;;  %v2475_v24 = vsel %vm1819_vm5, %v2472_v58, %v2474_v8 }
 0x243   :  { %6277 = vmatprep.mubr.msk.bf16.mxu1 %vm6820_vm0, %v9036_v62  ;;  %v1796_v35 = vadd.f32 %v1726_v43, %v7972_v32  ;;  %v5992_v1 = vpop.f32.mrb[179].mxu0  ;;  %5355 = vst [vmem:[%s8964_s4 + $0x78] sm:$0xff] %v5175_v26   ;;  %v8263_v32 = vsel %vm2705_vm6, %v2775_v6, %v2784_v44  ;;  %v6669_v53 = vpop.eup %6668  ;;  %v2793_v6 = vor.u32 %v2792_v21, %v2789_v28  ;;  %v2796_v26 = vshrl.u32 %v8268_v16, 16 }
 0x244   :  { %v3956_v4 = vadd.f32 %v8128_v61, %v2042_v22  ;;  %6218 = vmatmul.mubr.msk.bf16.gmra.mrb[28].mxu0 %vm234_vm2, %v2473_v47  ;;  %v2801_v28 = vrot.slane %v2799_v23, 3  ;;  %v8309_v23 = vld [vmem:[%s8962_s0 + $0x68] sm:$0xf] }
 0x245   :  { %v1978_v37 = vpop.f32.mrb[180].mxu1  ;;  %v2043_v19 = vadd.f32 %v1973_v33, %v1796_v35  ;;  %6221 = vmatprep.mubr.msk.bf16.mxu0 %vm6820_vm0, %v9036_v62 }
 0x246   :  { %v6051_v39 = vpop.f32.mrb[181].mxu1  ;;  %6674 = vtanh.f32 %v3956_v4  ;;  %v2476_v4 = vrot.slane %v8237_v17, 2 }
 0x247   :  { %v1981_v59 = vpop.f32.mrb[182].mxu1  ;;  %v1731_v36 = vpop.f32.mrb[180].mxu0  ;;  %v3957_v15 = vadd.f32 %v8128_v61, %v2043_v19  ;;  %v8294_v19 = vsel %vm2705_vm6, %v2784_v44, %v2793_v6  ;;  %v2798_v39 = vrot.slane %v2796_v26, 2 }
 0x248   :  { %v6052_v33 = vpop.f32.mrb[183].mxu1  ;;  %v6671_v40 = vpop.eup %6670  ;;  %v1797_v52 = vadd.f32 %v1731_v36, %v7980_v55 }
 0x249   :  { %v5995_v34 = vpop.f32.mrb[181].mxu0  ;;  %v5180_v0 = vpack.c.bf16 %v6671_v40, %v6669_v53  ;;  %6676 = vtanh.f32 %v3957_v15  ;;  %v2802_v15 = vor.u32 %v2801_v28, %v2798_v39 }
 0x24a   :  { %6278 = vmatmul.mubr.msk.bf16.gmra.mrb[32].mxu1 %vm234_vm2, %v8263_v32  ;;  %v1734_v41 = vpop.f32.mrb[182].mxu0  ;;  %v2044_v43 = vadd.f32 %v1978_v37, %v1797_v52  ;;  %v8289_v37 = vld [vmem:[%s8962_s0 + $0x60] sm:$0xff]  }
 0x24b   :  { %6281 = vmatprep.mubr.msk.bf16.mxu1 %vm6820_vm0, %v9036_v62  ;;  %v1798_v55 = vadd.f32 %v1734_v41, %v7984_v14  ;;  %v5996_v47 = vpop.f32.mrb[183].mxu0  ;;  %5356 = vst [vmem:[%s8964_s4 + $0x80] sm:$0xff] %v5180_v0   ;;  %v2805_v40 = vshrl.u32 %v8289_v37, 16  ;;  %v2808_v52 = vshll.u32 %v8289_v37, 16  ;;  %v2477_v0 = vsel %vm1819_vm5, %v2474_v8, %v2476_v4 }
 0x24c   :  { %v3958_v22 = vadd.f32 %v8128_v61, %v2044_v43  ;;  %6222 = vmatmul.mubr.msk.bf16.gmra.mrb[32].mxu0 %vm234_vm2, %v2475_v24  ;;  %v2696_v43 = vld [vmem:[%s8962_s0 + $0x6c] sm:$0x7]  ;;  %v8323_v39 = vsel %vm2705_vm6, %v2793_v6, %v2802_v15 }
 0x24d   :  { %v1986_v58 = vpop.f32.mrb[184].mxu1  ;;  %v2045_v35 = vadd.f32 %v1981_v59, %v1798_v55  ;;  %6225 = vmatprep.mubr.msk.bf16.mxu0 %vm6820_vm0, %v9036_v62  ;;  %v6673_v59 = vpop.eup %6672  ;;  %v2478_v55 = vrot.slane %v8268_v16, 2  ;;  %v8326_v28 = vcombine.low %v8309_v23, %v2696_v43  ;;  %v2480_v43 = vrot.slane %v8289_v37, 2 }
 0x24e   :  { %v6055_v1 = vpop.f32.mrb[185].mxu1  ;;  %6678 = vtanh.f32 %v3958_v22  ;;  %v2807_v22 = vrot.slane %v2805_v40, 2 }
 0x24f   :  { %v1989_v14 = vpop.f32.mrb[186].mxu1  ;;  %v1739_v33 = vpop.f32.mrb[184].mxu0  ;;  %v3959_v44 = vadd.f32 %v8128_v61, %v2045_v35  ;;  %v2810_v35 = vrot.slane %v2808_v52, 3 }
 0x250   :  { %v6056_v21 = vpop.f32.mrb[187].mxu1  ;;  %v6675_v17 = vpop.eup %6674  ;;  %v1799_v53 = vadd.f32 %v1739_v33, %v7992_v7 }
 0x251   :  { %v5999_v36 = vpop.f32.mrb[185].mxu0  ;;  %v5185_v34 = vpack.c.bf16 %v6675_v17, %v6673_v59  ;;  %6680 = vtanh.f32 %v3959_v44  ;;  %v2817_v44 = vshll.u32 %v8326_v28, 16 }
 0x252   :  { %6282 = vmatmul.mubr.msk.bf16.gmra.mrb[36].mxu1 %vm234_vm2, %v8294_v19  ;;  %v1742_v24 = vpop.f32.mrb[186].mxu0  ;;  %v2046_v41 = vadd.f32 %v1986_v58, %v1799_v53  ;;  %v2479_v53 = vsel %vm1819_vm5, %v2476_v4, %v2478_v55  ;;  %v2811_v36 = vor.u32 %v2810_v35, %v2807_v22  ;;  %v2388_v22 = vld [vmem:[%s8962_s0 + $0x6c] sm:$0x3] }
 0x253   :  { %6285 = vmatprep.mubr.msk.bf16.mxu1 %vm6820_vm0, %v9036_v62  ;;  %v1800_v7 = vadd.f32 %v1742_v24, %v7996_v30  ;;  %v6000_v26 = vpop.f32.mrb[187].mxu0  ;;  %5357 = vst [vmem:[%s8964_s4 + $0x88] sm:$0xff] %v5185_v34   ;;  %v6677_v21 = vpop.eup %6676  ;;  %v2814_v34 = vshrl.u32 %v8326_v28, 16 }
 0x254   :  { %v3960_v47 = vadd.f32 %v8128_v61, %v2046_v41  ;;  %6226 = vmatmul.mubr.msk.bf16.gmra.mrb[36].mxu0 %vm234_vm2, %v2477_v0 }
 0x255   :  { %v1994_v8 = vpop.f32.mrb[188].mxu1  ;;  %v2047_v30 = vadd.f32 %v1989_v14, %v1800_v7  ;;  %6229 = vmatprep.mubr.msk.bf16.mxu0 %vm6820_vm0, %v9036_v62 }
 0x256   :  { %v6059_v58 = vpop.f32.mrb[189].mxu1  ;;  %6682 = vtanh.f32 %v3960_v47 }
 0x257   :  { %v1997_v1 = vpop.f32.mrb[190].mxu1  ;;  %v1747_v14 = vpop.f32.mrb[188].mxu0  ;;  %v3961_v6 = vadd.f32 %v8128_v61, %v2047_v30  ;;  %v2819_v30 = vrot.slane %v2817_v44, 3 }
 0x258   :  { %v6060_v16 = vpop.f32.mrb[191].mxu1  ;;  %v6679_v59 = vpop.eup %6678  ;;  %v1801_v33 = vadd.f32 %v1747_v14, %v8004_v20  ;;  %v2481_v14 = vsel %vm1819_vm5, %v2478_v55, %v2480_v43 }
 0x259   :  { %v6003_v17 = vpop.f32.mrb[189].mxu0  ;;  %v5190_v40 = vpack.c.bf16 %v6679_v59, %v6677_v21  ;;  %6684 = vtanh.f32 %v3961_v6 }
 0x25a   :  { %6286 = vmatmul.mubr.msk.bf16.gmra.mrb[40].mxu1 %vm234_vm2, %v8323_v39  ;;  %v1750_v52 = vpop.f32.mrb[190].mxu0  ;;  %v2048_v24 = vadd.f32 %v1994_v8, %v1801_v33  ;;  %v2816_v8 = vrot.slane %v2814_v34, 2  ;;  %v4713_v17 = vcombine.low %v8309_v23, %v2388_v22 }
 0x25b   :  { %6289 = vmatprep.mubr.msk.bf16.mxu1 %vm6820_vm0, %v9036_v62  ;;  %v1802_v20 = vadd.f32 %v1750_v52, %v8008_v13  ;;  %v6004_v0 = vpop.f32.mrb[191].mxu0  ;;  %5358 = vst [vmem:[%s8964_s4 + $0x90] sm:$0xff] %v5190_v40   ;;  %v8347_v13 = vsel %vm2705_vm6, %v2802_v15, %v2811_v36  ;;  %v6681_v35 = vpop.eup %6680 }
 0x25c   :  { %v3962_v41 = vadd.f32 %v8128_v61, %v2048_v24  ;;  %6230 = vmatmul.mubr.msk.bf16.gmra.mrb[40].mxu0 %vm234_vm2, %v2479_v53  ;;  %v8360_v53 = vor.u32 %v2819_v30, %v2816_v8  ;;  %v2482_v23 = vrot.slane %v4713_v17, 2 }
 0x25d   :  { %v2002_v4 = vpop.f32.mrb[192].mxu1  ;;  %v2049_v7 = vadd.f32 %v1997_v1, %v1802_v20  ;;  %6233 = vmatprep.mubr.msk.bf16.mxu0 %vm6820_vm0, %v9036_v62 }
 0x25e   :  { %v6063_v26 = vpop.f32.mrb[193].mxu1  ;;  %6686 = vtanh.f32 %v3962_v41 }
 0x25f   :  { %v2005_v47 = vpop.f32.mrb[194].mxu1  ;;  %v1755_v1 = vpop.f32.mrb[192].mxu0  ;;  %v3963_v59 = vadd.f32 %v8128_v61, %v2049_v7 }
 0x260   :  { %v6064_v58 = vpop.f32.mrb[195].mxu1  ;;  %v6683_v16 = vpop.eup %6682  ;;  %v1803_v37 = vadd.f32 %v1755_v1, %v8016_v48 }
 0x261   :  { %v6007_v21 = vpop.f32.mrb[193].mxu0  ;;  %v5195_v15 = vpack.c.bf16 %v6683_v16, %v6681_v35  ;;  %6688 = vtanh.f32 %v3963_v59  ;;  %v2483_v58 = vsel %vm1819_vm5, %v2480_v43, %v2482_v23 }
 0x262   :  { %6290 = vmatmul.mubr.msk.bf16.gmra.mrb[44].mxu1 %vm234_vm2, %v8347_v13  ;;  %v1758_v33 = vpop.f32.mrb[194].mxu0  ;;  %v2050_v40 = vadd.f32 %v2002_v4, %v1803_v37 }
 0x263   :  { %6293 = vmatprep.mubr.msk.bf16.mxu1 %vm6820_vm0, %v9036_v62  ;;  %v1804_v48 = vadd.f32 %v1758_v33, %v8026_v11  ;;  %v6008_v6 = vpop.f32.mrb[195].mxu0  ;;  %5359 = vst [vmem:[%s8964_s4 + $0x98] sm:$0xff] %v5195_v15   ;;  %v8372_v11 = vsel %vm2705_vm6, %v2811_v36, %v8360_v53  ;;  %v6685_v0 = vpop.eup %6684 }
 0x264   :  { %v3964_v52 = vadd.f32 %v8128_v61, %v2050_v40  ;;  %6234 = vmatmul.mubr.msk.bf16.gmra.mrb[44].mxu0 %vm234_vm2, %v2481_v14 }
 0x265   :  { %v2010_v55 = vpop.f32.mrb[196].mxu1  ;;  %v2051_v34 = vadd.f32 %v2005_v47, %v1804_v48  ;;  %6237 = vmatprep.mubr.msk.bf16.mxu0 %vm6820_vm0, %v9036_v62 }
 0x266   :  { %v6067_v44 = vpop.f32.mrb[197].mxu1  ;;  %6690 = vtanh.f32 %v3964_v52 }
 0x267   :  { %v2013_v24 = vpop.f32.mrb[198].mxu1  ;;  %v1763_v4 = vpop.f32.mrb[196].mxu0  ;;  %v3965_v8 = vadd.f32 %v8128_v61, %v2051_v34 }
 0x268   :  { %v6068_v20 = vpop.f32.mrb[199].mxu1  ;;  %v6687_v41 = vpop.eup %6686  ;;  %v1805_v7 = vadd.f32 %v1763_v4, %v8039_v57 }
 0x269   :  { %v6011_v26 = vpop.f32.mrb[197].mxu0  ;;  %v5200_v47 = vpack.c.bf16 %v6687_v41, %v6685_v0  ;;  %6692 = vtanh.f32 %v3965_v8 }
 0x26a   :  { %6294 = vmatmul.mubr.msk.bf16.gmra.mrb[48].mxu1 %vm234_vm2, %v8372_v11  ;;  %v1766_v30 = vpop.f32.mrb[198].mxu0  ;;  %v2052_v36 = vadd.f32 %v2010_v55, %v1805_v7 }
 0x26b   :  { %6297 = vmatprep.mubr.msk.bf16.mxu1 %vm6820_vm0, %v9036_v62  ;;  %v1806_v22 = vadd.f32 %v1766_v30, %v8045_v38  ;;  %v6012_v35 = vpop.f32.mrb[199].mxu0  ;;  %5360 = vst [vmem:[%s8964_s4 + $0xa0] sm:$0xff] %v5200_v47   ;;  %v6689_v38 = vpop.eup %6688 }
 0x26c   :  { %v3966_v1 = vadd.f32 %v8128_v61, %v2052_v36  ;;  %6238 = vmatmul.mubr.msk.bf16.gmra.mrb[48].mxu0 %vm234_vm2, %v2483_v58  ;;  %v6599_v58 = vld [vmem:[%s8961_s1 + $0xe0] sm:$0xff]  }
 0x26d   :  { %v2018_v57 = vpop.f32.mrb[200].mxu1  ;;  %v2053_v16 = vadd.f32 %v2013_v24, %v1806_v22  ;;  %6241 = vmatprep.mubr.msk.bf16.mxu0 %vm6820_vm0, %v9036_v62 }
 0x26e   :  { %v6071_v37 = vpop.f32.mrb[201].mxu1  ;;  %6694 = vtanh.f32 %v3966_v1 }
 0x26f   :  { %v2021_v43 = vpop.f32.mrb[202].mxu1  ;;  %v1771_v14 = vpop.f32.mrb[200].mxu0  ;;  %v3967_v40 = vadd.f32 %v8128_v61, %v2053_v16  ;;  %v6601_v37 = vld [vmem:[%s8961_s1 + $0xe8] sm:$0xff]  }
 0x270   :  { %v6072_v21 = vpop.f32.mrb[203].mxu1  ;;  %v6691_v15 = vpop.eup %6690  ;;  %v1807_v59 = vadd.f32 %v1771_v14, %v8058_v63 }
 0x271   :  { %v6015_v33 = vpop.f32.mrb[201].mxu0  ;;  %v5205_v17 = vpack.c.bf16 %v6691_v15, %v6689_v38  ;;  %6696 = vtanh.f32 %v3967_v40 }
 0x272   :  { %6298 = vmatmul.mubr.msk.bf16.gmra.mrb[52].mxu1 %vm234_vm2, %v8360_v53  ;;  %v1774_v48 = vpop.f32.mrb[202].mxu0  ;;  %v2054_v6 = vadd.f32 %v2018_v57, %v1807_v59  ;;  %v9037_v57 = vld [vmem:[#allocation20_spill] sm:$0xff] }
 0x273   :  { %6361 = vmatprep.mubr.msk.bf16.mxu1 %vm6820_vm0, %v9036_v62  ;;  %v1808_v55 = vadd.f32 %v1774_v48, %v8064_v5  ;;  %v6016_v52 = vpop.f32.mrb[203].mxu0  ;;  %5361 = vst [vmem:[%s8964_s4 + $0xa8] sm:$0xff] %v5205_v17   ;;  %v6600_v5 = vld [vmem:[%s8961_s1 + $0xf0] sm:$0xff]   ;;  %v6693_v4 = vpop.eup %6692 }
 0x274   :  { %v3968_v34 = vadd.f32 %v8128_v61, %v2054_v6  ;;  %6242 = vmatmul.mubr.msk.bf16.gmra.mrb[52].mxu0 %vm234_vm2, %v2482_v23  ;;  %v9038_v6 = vld [vmem:[#allocation21_spill] sm:$0xff] }
 0x275   :  { %v2026_v63 = vpop.f32.mrb[204].mxu1  ;;  %v2055_v44 = vadd.f32 %v2021_v43, %v1808_v55  ;;  %6305 = vmatprep.mubr.msk.bf16.mxu0 %vm6820_vm0, %v9036_v62 }
 0x276   :  { %v6075_v24 = vpop.f32.mrb[205].mxu1  ;;  %6698 = vtanh.f32 %v3968_v34 }
 0x277   :  { %v2029_v20 = vpop.f32.mrb[206].mxu1  ;;  %v1779_v41 = vpop.f32.mrb[204].mxu0  ;;  %v3969_v8 = vadd.f32 %v8128_v61, %v2055_v44 }
 0x278   :  { %v6076_v0 = vpop.f32.mrb[207].mxu1  ;;  %v6695_v7 = vpop.eup %6694  ;;  %v1809_v26 = vadd.f32 %v1779_v41, %v8084_v31 }
 0x279   :  { %v6019_v47 = vpop.f32.mrb[205].mxu0  ;;  %v5210_v23 = vpack.c.bf16 %v6695_v7, %v6693_v4  ;;  %6700 = vtanh.f32 %v3969_v8 }
 0x27a   :  { %6362 = vmatmul.mubr.msk.bf16.vlgmr.msra.gmra.mrb[56].mxu1 %vm234_vm2, %v7145_v2  ;;  %v1782_v30 = vpop.f32.mrb[206].mxu0  ;;  %v2056_v36 = vadd.f32 %v2026_v63, %v1809_v26  ;;  %v6602_v2 = vld [vmem:[%s8961_s1 + $0xf8] sm:$0xff]  }
 0x27b   :  { %6470 = vmatpush3.bf16.msra.mxu1 %v6600_v5  ;;  %6365 = vmatprep.mubr.msk.bf16.mxu1 %vm6820_vm0, %v9036_v62  ;;  %v6020_v22 = vpop.f32.mrb[207].mxu0  ;;  %5362 = vst [vmem:[%s8964_s4 + $0xb0] sm:$0xff] %v5210_v23  }
 0x27c   :  { %6471 = vmatprep.subr.bf16.mxu1 %v9036_v62  ;;  %v3970_v35 = vadd.f32 %v8128_v61, %v2056_v36  ;;  %6306 = vmatmul.mubr.msk.bf16.vlgmr.msra.gmra.mrb[56].mxu0 %vm234_vm2, %v9037_v57  ;;  %v6697_v61 = vpop.eup %6696 }
 0x27d   :  { %v2261_v31 = vpop.f32.mrb[208].mxu1  ;;  %6414 = vmatpush3.bf16.msra.mxu0 %v6599_v58  ;;  %6309 = vmatprep.mubr.msk.bf16.mxu0 %vm6820_vm0, %v9036_v62 }
 0x27e   :  { %v6139_v1 = vpop.f32.mrb[209].mxu1  ;;  %6702 = vtanh.f32 %v3970_v35  ;;  %6415 = vmatprep.subr.bf16.mxu0 %v9036_v62 }
 0x27f   :  { %v2264_v16 = vpop.f32.mrb[210].mxu1  ;;  %6472 = vmatpush3.bf16.msra.mxu1 %v6602_v2  ;;  %v2113_v21 = vpop.f32.mrb[208].mxu0 }
 0x280   :  { %v6140_v43 = vpop.f32.mrb[211].mxu1  ;;  %v6699_v38 = vpop.eup %6698  ;;  %v8431_v14 = vadd.f32 %v2261_v31, %v2113_v21 }
 0x281   :  { %v6083_v15 = vpop.f32.mrb[209].mxu0  ;;  %v5215_v59 = vpack.c.bf16 %v6699_v38, %v6697_v61  ;;  %6416 = vmatpush3.bf16.msra.mxu0 %v6601_v37 }
 0x282   :  { %6366 = vmatmul.mubr.msk.bf16.gmra.mrb[60].mxu1 %vm234_vm2, %v7177_v25  ;;  %v2116_v33 = vpop.f32.mrb[210].mxu0 }
 0x283   :  { %6369 = vmatprep.mubr.msk.bf16.mxu1 %vm6820_vm0, %v9036_v62  ;;  %v8437_v17 = vadd.f32 %v2264_v16, %v2116_v33  ;;  %v6084_v40 = vpop.f32.mrb[211].mxu0  ;;  %5363 = vst [vmem:[%s8964_s4 + $0xb8] sm:$0xff] %v5215_v59   ;;  %v6701_v63 = vpop.eup %6700 }
 0x284   :  { %6310 = vmatmul.mubr.msk.bf16.gmra.mrb[60].mxu0 %vm234_vm2, %v9038_v6 }
 0x285   :  { %v2269_v48 = vpop.f32.mrb[212].mxu1  ;;  %6313 = vmatprep.mubr.msk.bf16.mxu0 %vm6820_vm0, %v9036_v62 }
 0x286   :  { %v6143_v55 = vpop.f32.mrb[213].mxu1 }
 0x287   :  { %v2272_v52 = vpop.f32.mrb[214].mxu1  ;;  %v2121_v34 = vpop.f32.mrb[212].mxu0 }
 0x288   :  { %v6144_v25 = vpop.f32.mrb[215].mxu1  ;;  %v6703_v44 = vpop.eup %6702  ;;  %v8446_v24 = vadd.f32 %v2269_v48, %v2121_v34 }
 0x289   :  { %v6087_v20 = vpop.f32.mrb[213].mxu0  ;;  %v5220_v5 = vpack.c.bf16 %v6703_v44, %v6701_v63 }
 0x28a   :  { %6370 = vmatmul.mubr.msk.bf16.gmra.mrb[64].mxu1 %vm234_vm2, %v7205_v45  ;;  %v2124_v0 = vpop.f32.mrb[214].mxu0 }
 0x28b   :  { %6373 = vmatprep.mubr.msk.bf16.mxu1 %vm6820_vm0, %v9036_v62  ;;  %v8452_v4 = vadd.f32 %v2272_v52, %v2124_v0  ;;  %v6088_v41 = vpop.f32.mrb[215].mxu0  ;;  %5364 = vst [vmem:[%s8964_s4 + $0xc0] sm:$0xff] %v5220_v5  }
 0x28c   :  { %6314 = vmatmul.mubr.msk.bf16.gmra.mrb[64].mxu0 %vm234_vm2, %v7667_v10 }
 0x28d   :  { %v2277_v7 = vpop.f32.mrb[216].mxu1  ;;  %6317 = vmatprep.mubr.msk.bf16.mxu0 %vm6820_vm0, %v9036_v62 }
 0x28e   :  { %v6147_v26 = vpop.f32.mrb[217].mxu1 }
 0x28f   :  { %v2280_v47 = vpop.f32.mrb[218].mxu1  ;;  %v2129_v23 = vpop.f32.mrb[216].mxu0 }
 0x290   :  { %v6148_v45 = vpop.f32.mrb[219].mxu1  ;;  %v8461_v8 = vadd.f32 %v2277_v7, %v2129_v23  ;;  %v6091_v30 = vpop.f32.mrb[217].mxu0 }
 0x291   :  { %v2132_v58 = vpop.f32.mrb[218].mxu0 }
 0x292   :  { %6374 = vmatmul.mubr.msk.bf16.gmra.mrb[68].mxu1 %vm234_vm2, %v7227_v60  ;;  %v8467_v36 = vadd.f32 %v2280_v47, %v2132_v58  ;;  %v6092_v10 = vpop.f32.mrb[219].mxu0 }
 0x293   :  { %6377 = vmatprep.mubr.msk.bf16.mxu1 %vm6820_vm0, %v9036_v62 }
 0x294   :  { %6318 = vmatmul.mubr.msk.bf16.gmra.mrb[68].mxu0 %vm234_vm2, %v7683_v29 }
 0x295   :  { %v2285_v22 = vpop.f32.mrb[220].mxu1  ;;  %6321 = vmatprep.mubr.msk.bf16.mxu0 %vm6820_vm0, %v9036_v62 }
 0x296   :  { %v6151_v2 = vpop.f32.mrb[221].mxu1 }
 0x297   :  { %v2288_v31 = vpop.f32.mrb[222].mxu1  ;;  %v2137_v57 = vpop.f32.mrb[220].mxu0 }
 0x298   :  { %v6152_v35 = vpop.f32.mrb[223].mxu1  ;;  %v8473_v1 = vadd.f32 %v2285_v22, %v2137_v57  ;;  %v6095_v60 = vpop.f32.mrb[221].mxu0 }
 0x299   :  { %v2140_v16 = vpop.f32.mrb[222].mxu0 }
 0x29a   :  { %6378 = vmatmul.mubr.msk.bf16.gmra.mrb[72].mxu1 %vm234_vm2, %v7249_v18  ;;  %v8479_v37 = vadd.f32 %v2288_v31, %v2140_v16  ;;  %v6096_v29 = vpop.f32.mrb[223].mxu0  ;;  %v9039_v31 = vld [vmem:[#allocation10_spill] sm:$0xff] }
 0x29b   :  { %6381 = vmatprep.mubr.msk.bf16.mxu1 %vm6820_vm0, %v9036_v62  ;;  %v9040_v16 = vld [vmem:[#allocation22_spill] sm:$0xff] }
 0x29c   :  { %6322 = vmatmul.mubr.msk.bf16.gmra.mrb[72].mxu0 %vm234_vm2, %v7702_v49 }
 0x29d   :  { %v2293_v43 = vpop.f32.mrb[224].mxu1  ;;  %6325 = vmatprep.mubr.msk.bf16.mxu0 %vm6820_vm0, %v9036_v62 }
 0x29e   :  { %v6155_v61 = vpop.f32.mrb[225].mxu1 }
 0x29f   :  { %v2296_v21 = vpop.f32.mrb[226].mxu1  ;;  %v2145_v15 = vpop.f32.mrb[224].mxu0 }
 0x2a0   :  { %v6156_v38 = vpop.f32.mrb[227].mxu1  ;;  %v8485_v59 = vadd.f32 %v2293_v43, %v2145_v15  ;;  %v6099_v18 = vpop.f32.mrb[225].mxu0 }
 0x2a1   :  { %v2148_v33 = vpop.f32.mrb[226].mxu0  ;;  %v9041_v18 = vld [vmem:[#allocation12_spill] sm:$0xff] }
 0x2a2   :  { %6382 = vmatmul.mubr.msk.bf16.gmra.mrb[76].mxu1 %vm234_vm2, %v7271_v42  ;;  %v8491_v40 = vadd.f32 %v2296_v21, %v2148_v33  ;;  %v6100_v49 = vpop.f32.mrb[227].mxu0 }
 0x2a3   :  { %6385 = vmatprep.mubr.msk.bf16.mxu1 %vm6820_vm0, %v9036_v62 }
 0x2a4   :  { %6326 = vmatmul.mubr.msk.bf16.gmra.mrb[76].mxu0 %vm234_vm2, %v7721_v3 }
 0x2a5   :  { %v2301_v48 = vpop.f32.mrb[228].mxu1  ;;  %6329 = vmatprep.mubr.msk.bf16.mxu0 %vm6820_vm0, %v9036_v62 }
 0x2a6   :  { %v6159_v6 = vpop.f32.mrb[229].mxu1 }
 0x2a7   :  { %v2304_v55 = vpop.f32.mrb[230].mxu1  ;;  %v2153_v25 = vpop.f32.mrb[228].mxu0 }
 0x2a8   :  { %v6160_v52 = vpop.f32.mrb[231].mxu1  ;;  %v8497_v63 = vadd.f32 %v2301_v48, %v2153_v25  ;;  %v6103_v42 = vpop.f32.mrb[229].mxu0 }
 0x2a9   :  { %v2156_v34 = vpop.f32.mrb[230].mxu0 }
 0x2aa   :  { %6386 = vmatmul.mubr.msk.bf16.gmra.mrb[80].mxu1 %vm234_vm2, %v7293_v9  ;;  %v8503_v44 = vadd.f32 %v2304_v55, %v2156_v34  ;;  %v6104_v3 = vpop.f32.mrb[231].mxu0  ;;  %v9042_v55 = vld [vmem:[#allocation23_spill] sm:$0xff] }
 0x2ab   :  { %6389 = vmatprep.mubr.msk.bf16.mxu1 %vm6820_vm0, %v9036_v62 }
 0x2ac   :  { %6330 = vmatmul.mubr.msk.bf16.gmra.mrb[80].mxu0 %vm234_vm2, %v7740_v27 }
 0x2ad   :  { %v2309_v20 = vpop.f32.mrb[232].mxu1  ;;  %6333 = vmatprep.mubr.msk.bf16.mxu0 %vm6820_vm0, %v9036_v62 }
 0x2ae   :  { %v6163_v5 = vpop.f32.mrb[233].mxu1 }
 0x2af   :  { %v2312_v0 = vpop.f32.mrb[234].mxu1  ;;  %v2161_v7 = vpop.f32.mrb[232].mxu0  ;;  %v9043_v5 = vld [vmem:[#allocation14_spill] sm:$0xff] }
 0x2b0   :  { %v6164_v41 = vpop.f32.mrb[235].mxu1  ;;  %v8509_v26 = vadd.f32 %v2309_v20, %v2161_v7  ;;  %v6107_v9 = vpop.f32.mrb[233].mxu0 }
 0x2b1   :  { %v2164_v47 = vpop.f32.mrb[234].mxu0 }
 0x2b2   :  { %6390 = vmatmul.mubr.msk.bf16.gmra.mrb[84].mxu1 %vm234_vm2, %v7315_v46  ;;  %v8515_v45 = vadd.f32 %v2312_v0, %v2164_v47  ;;  %v6108_v27 = vpop.f32.mrb[235].mxu0  ;;  %v9044_v47 = vld [vmem:[#allocation24_spill] sm:$0xff] }
 0x2b3   :  { %6393 = vmatprep.mubr.msk.bf16.mxu1 %vm6820_vm0, %v9036_v62 }
 0x2b4   :  { %6334 = vmatmul.mubr.msk.bf16.gmra.mrb[84].mxu0 %vm234_vm2, %v7759_v51 }
 0x2b5   :  { %v2317_v23 = vpop.f32.mrb[236].mxu1  ;;  %6337 = vmatprep.mubr.msk.bf16.mxu0 %vm6820_vm0, %v9036_v62 }
 0x2b6   :  { %v6167_v30 = vpop.f32.mrb[237].mxu1 }
 0x2b7   :  { %v2320_v58 = vpop.f32.mrb[238].mxu1  ;;  %v2169_v22 = vpop.f32.mrb[236].mxu0 }
 0x2b8   :  { %v6168_v10 = vpop.f32.mrb[239].mxu1  ;;  %v8521_v2 = vadd.f32 %v2317_v23, %v2169_v22  ;;  %v6111_v46 = vpop.f32.mrb[237].mxu0 }
 0x2b9   :  { %v2172_v35 = vpop.f32.mrb[238].mxu0  ;;  %v9045_v46 = vld [vmem:[#allocation18_spill] sm:$0xff] }
 0x2ba   :  { %6394 = vmatmul.mubr.msk.bf16.gmra.mrb[88].mxu1 %vm234_vm2, %v9039_v31  ;;  %v8527_v57 = vadd.f32 %v2320_v58, %v2172_v35  ;;  %v6112_v51 = vpop.f32.mrb[239].mxu0 }
 0x2bb   :  { %6397 = vmatprep.mubr.msk.bf16.mxu1 %vm6820_vm0, %v9036_v62 }
 0x2bc   :  { %6338 = vmatmul.mubr.msk.bf16.gmra.mrb[88].mxu0 %vm234_vm2, %v9040_v16 }
 0x2bd   :  { %v2325_v60 = vpop.f32.mrb[240].mxu1  ;;  %6341 = vmatprep.mubr.msk.bf16.mxu0 %vm6820_vm0, %v9036_v62 }
 0x2be   :  { %v6171_v29 = vpop.f32.mrb[241].mxu1 }
 0x2bf   :  { %v2328_v43 = vpop.f32.mrb[242].mxu1  ;;  %v2177_v21 = vpop.f32.mrb[240].mxu0  ;;  %v9046_v29 = vld [vmem:[#allocation26_spill] sm:$0xff] }
 0x2c0   :  { %v6172_v61 = vpop.f32.mrb[243].mxu1  ;;  %v8533_v38 = vadd.f32 %v2325_v60, %v2177_v21  ;;  %v6115_v15 = vpop.f32.mrb[241].mxu0  ;;  %v3518_v60 = vld [vmem:[%s8962_s0 + $0x8] sm:$0x8]  ;;  %v6805_v21 = vld [vmem:[%s8962_s0 + $0xc] sm:$0xf] }
 0x2c1   :  { %v2180_v33 = vpop.f32.mrb[242].mxu0  ;;  %v4810_v15 = vcombine.low %v3518_v60, %v6805_v21 }
 0x2c2   :  { %6398 = vmatmul.mubr.msk.bf16.gmra.mrb[92].mxu1 %vm234_vm2, %v9041_v18  ;;  %v8539_v49 = vadd.f32 %v2328_v43, %v2180_v33  ;;  %v6116_v48 = vpop.f32.mrb[243].mxu0 }
 0x2c3   :  { %6401 = vmatprep.mubr.msk.bf16.mxu1 %vm6820_vm0, %v9036_v62 }
 0x2c4   :  { %6342 = vmatmul.mubr.msk.bf16.gmra.mrb[92].mxu0 %vm234_vm2, %v9042_v55  ;;  %v9047_v55 = vld [vmem:[#allocation16_spill] sm:$0xff] }
 0x2c5   :  { %v2333_v6 = vpop.f32.mrb[244].mxu1  ;;  %6345 = vmatprep.mubr.msk.bf16.mxu0 %vm6820_vm0, %v9036_v62 }
 0x2c6   :  { %v6175_v52 = vpop.f32.mrb[245].mxu1 }
 0x2c7   :  { %v2336_v25 = vpop.f32.mrb[246].mxu1  ;;  %v2185_v34 = vpop.f32.mrb[244].mxu0 }
 0x2c8   :  { %v6176_v42 = vpop.f32.mrb[247].mxu1  ;;  %v8545_v3 = vadd.f32 %v2333_v6, %v2185_v34  ;;  %v6119_v20 = vpop.f32.mrb[245].mxu0 }
 0x2c9   :  { %v2188_v0 = vpop.f32.mrb[246].mxu0  ;;  %v6806_v42 = vld [vmem:[%s8962_s0 + $0x10] sm:$0xff]  }
 0x2ca   :  { %6402 = vmatmul.mubr.msk.bf16.gmra.mrb[96].mxu1 %vm234_vm2, %v9043_v5  ;;  %v8551_v41 = vadd.f32 %v2336_v25, %v2188_v0  ;;  %v6120_v7 = vpop.f32.mrb[247].mxu0  ;;  %v3528_v25 = vrot.slane %v4810_v15, 3  ;;  %v3529_v34 = vrot.slane %v6806_v42, 3 }
 0x2cb   :  { %6405 = vmatprep.mubr.msk.bf16.mxu1 %vm6820_vm0, %v9036_v62  ;;  %v9048_v7 = vld [vmem:[#allocation25_spill] sm:$0xff] }
 0x2cc   :  { %6346 = vmatmul.mubr.msk.bf16.gmra.mrb[96].mxu0 %vm234_vm2, %v9044_v47 }
 0x2cd   :  { %v2341_v9 = vpop.f32.mrb[248].mxu1  ;;  %6349 = vmatprep.mubr.msk.bf16.mxu0 %vm6820_vm0, %v9036_v62 }
 0x2ce   :  { %v6179_v27 = vpop.f32.mrb[249].mxu1 }
 0x2cf   :  { %v2344_v23 = vpop.f32.mrb[250].mxu1  ;;  %v2193_v58 = vpop.f32.mrb[248].mxu0  ;;  %v3530_v27 = vsel %vm3527_vm7, %v3528_v25, %v3529_v34 }
 0x2d0   :  { %v6180_v30 = vpop.f32.mrb[251].mxu1  ;;  %v8557_v10 = vadd.f32 %v2341_v9, %v2193_v58  ;;  %v6123_v22 = vpop.f32.mrb[249].mxu0 }
 0x2d1   :  { %v2196_v31 = vpop.f32.mrb[250].mxu0 }
 0x2d2   :  { %6406 = vmatmul.mubr.msk.bf16.gmra.mrb[100].mxu1 %vm234_vm2, %v9045_v46  ;;  %v8563_v35 = vadd.f32 %v2344_v23, %v2196_v31  ;;  %v6124_v51 = vpop.f32.mrb[251].mxu0  ;;  %v6807_v31 = vld [vmem:[%s8962_s0 + $0x18] sm:$0xff]  }
 0x2d3   :  { %6409 = vmatprep.mubr.msk.bf16.mxu1 %vm6820_vm0, %v9036_v62  ;;  %v3531_v51 = vrot.slane %v6807_v31, 3 }
 0x2d4   :  { %6350 = vmatmul.mubr.msk.bf16.gmra.mrb[100].mxu0 %vm234_vm2, %v9046_v29  ;;  %v9049_v29 = vld [vmem:[#allocation2_spill] sm:$0xff] }
 0x2d5   :  { %v2349_v16 = vpop.f32.mrb[252].mxu1  ;;  %6353 = vmatprep.mubr.msk.bf16.mxu0 %vm6820_vm0, %v9036_v62  ;;  %v3532_v21 = vsel %vm3527_vm7, %v3529_v34, %v3531_v51 }
 0x2d6   :  { %v6183_v43 = vpop.f32.mrb[253].mxu1 }
 0x2d7   :  { %v2352_v61 = vpop.f32.mrb[254].mxu1  ;;  %v2201_v33 = vpop.f32.mrb[252].mxu0 }
 0x2d8   :  { %v6184_v18 = vpop.f32.mrb[255].mxu1  ;;  %v8575_v48 = vadd.f32 %v2349_v16, %v2201_v33  ;;  %v6127_v6 = vpop.f32.mrb[253].mxu0 }
 0x2d9   :  { %v2204_v52 = vpop.f32.mrb[254].mxu0 }
 0x2da   :  { %6410 = vmatmul.mubr.msk.bf16.gmra.mrb[104].mxu1 %vm234_vm2, %v9047_v55  ;;  %v8584_v20 = vadd.f32 %v2352_v61, %v2204_v52  ;;  %v6128_v5 = vpop.f32.mrb[255].mxu0  ;;  %v6808_v52 = vld [vmem:[%s8962_s0 + $0x20] sm:$0xff]  }
 0x2db   :  { %6473 = vmatprep.mubr.msk.bf16.mxu1 %vm6820_vm0, %v9036_v62  ;;  %v3533_v25 = vrot.slane %v6808_v52, 3 }
 0x2dc   :  { %6354 = vmatmul.mubr.msk.bf16.gmra.mrb[104].mxu0 %vm234_vm2, %v9048_v7 }
 0x2dd   :  { %v2357_v0 = vpop.f32.mrb[0].mxu1  ;;  %6417 = vmatprep.mubr.msk.bf16.mxu0 %vm6820_vm0, %v9036_v62 }
 0x2de   :  { %v6187_v9 = vpop.f32.mrb[1].mxu1 }
 0x2df   :  { %v2360_v47 = vpop.f32.mrb[2].mxu1  ;;  %v2209_v30 = vpop.f32.mrb[0].mxu0 }
 0x2e0   :  { %v6188_v23 = vpop.f32.mrb[3].mxu1  ;;  %v8591_v58 = vadd.f32 %v2357_v0, %v2209_v30  ;;  %v6131_v22 = vpop.f32.mrb[1].mxu0  ;;  %v9050_v47 = vld [vmem:[#allocation3_spill] sm:$0xff] }
 0x2e1   :  { %v2212_v46 = vpop.f32.mrb[2].mxu0 }
 0x2e2   :  { %6474 = vmatmul.mubr.msk.bf16.vlgmr.msra.gmra.mrb[108].mxu1 %vm234_vm2, %v3530_v27  ;;  %v6132_v60 = vpop.f32.mrb[3].mxu0 }
 0x2e3   :  { %6477 = vmatprep.mubr.msk.bf16.mxu1 %vm6820_vm0, %v9036_v62 }
 0x2e4   :  { %6418 = vmatmul.mubr.msk.bf16.vlgmr.msra.gmra.mrb[108].mxu0 %vm234_vm2, %v9049_v29  ;;  %v6810_v29 = vld [vmem:[%s8962_s0 + $0x28] sm:$0xff]  }
 0x2e5   :  { %v2907_v16 = vpop.f32.mrb[4].mxu1  ;;  %6421 = vmatprep.mubr.msk.bf16.mxu0 %vm6820_vm0, %v9036_v62 }
 0x2e6   :  { %v6251_v43 = vpop.f32.mrb[5].mxu1 }
 0x2e7   :  { %v2910_v61 = vpop.f32.mrb[6].mxu1  ;;  %v2569_v18 = vpop.f32.mrb[4].mxu0 }
 0x2e8   :  { %v6252_v15 = vpop.f32.mrb[7].mxu1  ;;  %v2671_v33 = vadd.f32 %v2569_v18, %v8431_v14  ;;  %v6195_v6 = vpop.f32.mrb[5].mxu0  ;;  %v8615_v14 = vld [vmem:[%s8963_s3 + $0x1] ss:$0 sm:$0xff] }
 0x2e9   :  { %v2572_v55 = vpop.f32.mrb[6].mxu0 }
 0x2ea   :  { %6478 = vmatmul.mubr.msk.bf16.gmra.mrb[112].mxu1 %vm234_vm2, %v3532_v21  ;;  %v3009_v42 = vadd.f32 %v2907_v16, %v2671_v33  ;;  %v2672_v5 = vadd.f32 %v2572_v55, %v8437_v17  ;;  %v6196_v34 = vpop.f32.mrb[7].mxu0  ;;  %v3534_v17 = vsel %vm3527_vm7, %v3531_v51, %v3533_v25  ;;  %v3535_v51 = vrot.slane %v6810_v29, 3  ;;  %v9051_v33 = vld [vmem:[#allocation4_spill] sm:$0xff] }
 0x2eb   :  { %6481 = vmatprep.mubr.msk.bf16.mxu1 %vm6820_vm0, %v9036_v62 }
 0x2ec   :  { %v4123_v7 = vadd.f32 %v8615_v14, %v3009_v42  ;;  %v3010_v9 = vadd.f32 %v2910_v61, %v2672_v5  ;;  %6422 = vmatmul.mubr.msk.bf16.gmra.mrb[112].mxu0 %vm234_vm2, %v9050_v47  ;;  %v3536_v52 = vsel %vm3527_vm7, %v3533_v25, %v3535_v51  ;;  %v6811_v25 = vld [vmem:[%s8962_s0 + $0x30] sm:$0xff]  }
 0x2ed   :  { %v2915_v0 = vpop.f32.mrb[8].mxu1  ;;  %6425 = vmatprep.mubr.msk.bf16.mxu0 %vm6820_vm0, %v9036_v62  ;;  %v3537_v47 = vrot.slane %v6811_v25, 3 }
 0x2ee   :  { %v6255_v27 = vpop.f32.mrb[9].mxu1  ;;  %v4124_v30 = vadd.f32 %v8615_v14, %v3010_v9  ;;  %6704 = vtanh.f32 %v4123_v7 }
 0x2ef   :  { %v2918_v23 = vpop.f32.mrb[10].mxu1  ;;  %v2577_v46 = vpop.f32.mrb[8].mxu0 }
 0x2f0   :  { %v6256_v22 = vpop.f32.mrb[11].mxu1  ;;  %6706 = vtanh.f32 %v4124_v30  ;;  %v2673_v31 = vadd.f32 %v2577_v46, %v8446_v24  ;;  %v6199_v60 = vpop.f32.mrb[9].mxu0 }
 0x2f1   :  { %v2580_v16 = vpop.f32.mrb[10].mxu0 }
 0x2f2   :  { %6482 = vmatmul.mubr.msk.bf16.gmra.mrb[116].mxu1 %vm234_vm2, %v3534_v17  ;;  %v3011_v43 = vadd.f32 %v2915_v0, %v2673_v31  ;;  %v2674_v61 = vadd.f32 %v2580_v16, %v8452_v4  ;;  %v6200_v21 = vpop.f32.mrb[11].mxu0 }
 0x2f3   :  { %6485 = vmatprep.mubr.msk.bf16.mxu1 %vm6820_vm0, %v9036_v62 }
 0x2f4   :  { %v4125_v18 = vadd.f32 %v8615_v14, %v3011_v43  ;;  %v3012_v24 = vadd.f32 %v2918_v23, %v2674_v61  ;;  %6426 = vmatmul.mubr.msk.bf16.gmra.mrb[116].mxu0 %vm234_vm2, %v9051_v33 }
 0x2f5   :  { %v2923_v15 = vpop.f32.mrb[12].mxu1  ;;  %6429 = vmatprep.mubr.msk.bf16.mxu0 %vm6820_vm0, %v9036_v62 }
 0x2f6   :  { %v6259_v6 = vpop.f32.mrb[13].mxu1  ;;  %v4126_v42 = vadd.f32 %v8615_v14, %v3012_v24  ;;  %6708 = vtanh.f32 %v4125_v18 }
 0x2f7   :  { %v2926_v55 = vpop.f32.mrb[14].mxu1  ;;  %v2585_v4 = vpop.f32.mrb[12].mxu0 }
 0x2f8   :  { %v6260_v5 = vpop.f32.mrb[15].mxu1  ;;  %6710 = vtanh.f32 %v4126_v42  ;;  %v2675_v34 = vadd.f32 %v2585_v4, %v8461_v8  ;;  %v6203_v0 = vpop.f32.mrb[13].mxu0 }
 0x2f9   :  { %v6705_v7 = vpop.eup %6704  ;;  %v2588_v9 = vpop.f32.mrb[14].mxu0 }
 0x2fa   :  { %6486 = vmatmul.mubr.msk.bf16.gmra.mrb[120].mxu1 %vm234_vm2, %v3536_v52  ;;  %v6707_v27 = vpop.eup %6706  ;;  %v3013_v23 = vadd.f32 %v2923_v15, %v2675_v34  ;;  %v2676_v17 = vadd.f32 %v2588_v9, %v8467_v36  ;;  %v6204_v30 = vpop.f32.mrb[15].mxu0  ;;  %v3538_v36 = vsel %vm3527_vm7, %v3535_v51, %v3537_v47  ;;  %v6812_v51 = vld [vmem:[%s8962_s0 + $0x38] sm:$0xff]  }
 0x2fb   :  { %6489 = vmatprep.mubr.msk.bf16.mxu1 %vm6820_vm0, %v9036_v62  ;;  %v5225_v22 = vpack.c.bf16 %v6707_v27, %v6705_v7  ;;  %v3539_v24 = vrot.slane %v6812_v51, 3 }
 0x2fc   :  { %v4127_v46 = vadd.f32 %v8615_v14, %v3013_v23  ;;  %v3014_v31 = vadd.f32 %v2926_v55, %v2676_v17  ;;  %6430 = vmatmul.mubr.msk.bf16.gmra.mrb[120].mxu0 %vm234_vm2, %v8159_v54 }
 0x2fd   :  { %v2931_v8 = vpop.f32.mrb[16].mxu1  ;;  %5365 = vst [vmem:[%s8964_s4 + $0xc8] sm:$0xff] %v5225_v22   ;;  %6433 = vmatprep.mubr.msk.bf16.mxu0 %vm6820_vm0, %v9036_v62 }
 0x2fe   :  { %v6263_v60 = vpop.f32.mrb[17].mxu1  ;;  %v4128_v29 = vadd.f32 %v8615_v14, %v3014_v31  ;;  %6712 = vtanh.f32 %v4127_v46 }
 0x2ff   :  { %v2934_v16 = vpop.f32.mrb[18].mxu1  ;;  %v2593_v61 = vpop.f32.mrb[16].mxu0 }
 0x300   :  { %v6264_v43 = vpop.f32.mrb[19].mxu1  ;;  %6714 = vtanh.f32 %v4128_v29  ;;  %v2677_v21 = vadd.f32 %v2593_v61, %v8473_v1  ;;  %v6207_v54 = vpop.f32.mrb[17].mxu0 }
 0x301   :  { %v6709_v15 = vpop.eup %6708  ;;  %v2596_v18 = vpop.f32.mrb[18].mxu0 }
 0x302   :  { %6490 = vmatmul.mubr.msk.bf16.gmra.mrb[124].mxu1 %vm234_vm2, %v3538_v36  ;;  %v6711_v33 = vpop.eup %6710  ;;  %v3015_v6 = vadd.f32 %v2931_v8, %v2677_v21  ;;  %v2678_v55 = vadd.f32 %v2596_v18, %v8479_v37  ;;  %v6208_v52 = vpop.f32.mrb[19].mxu0  ;;  %v3540_v37 = vsel %vm3527_vm7, %v3537_v47, %v3539_v24  ;;  %v6813_v47 = vld [vmem:[%s8962_s0 + $0x40] sm:$0xff]  }
 0x303   :  { %6493 = vmatprep.mubr.msk.bf16.mxu1 %vm6820_vm0, %v9036_v62  ;;  %v5230_v42 = vpack.c.bf16 %v6711_v33, %v6709_v15  ;;  %v3541_v30 = vrot.slane %v6813_v47, 3 }
 0x304   :  { %v4129_v5 = vadd.f32 %v8615_v14, %v3015_v6  ;;  %v3016_v4 = vadd.f32 %v2934_v16, %v2678_v55  ;;  %6434 = vmatmul.mubr.msk.bf16.gmra.mrb[124].mxu0 %vm234_vm2, %v8190_v50 }
 0x305   :  { %v2939_v1 = vpop.f32.mrb[20].mxu1  ;;  %5366 = vst [vmem:[%s8964_s4 + $0xd0] sm:$0xff] %v5230_v42   ;;  %6437 = vmatprep.mubr.msk.bf16.mxu0 %vm6820_vm0, %v9036_v62 }
 0x306   :  { %v6267_v34 = vpop.f32.mrb[21].mxu1  ;;  %v4130_v7 = vadd.f32 %v8615_v14, %v3016_v4  ;;  %6716 = vtanh.f32 %v4129_v5 }
 0x307   :  { %v2942_v0 = vpop.f32.mrb[22].mxu1  ;;  %v2601_v25 = vpop.f32.mrb[20].mxu0 }
 0x308   :  { %v6268_v9 = vpop.f32.mrb[23].mxu1  ;;  %6718 = vtanh.f32 %v4130_v7  ;;  %v2679_v27 = vadd.f32 %v2601_v25, %v8485_v59  ;;  %v6211_v50 = vpop.f32.mrb[21].mxu0 }
 0x309   :  { %v6713_v23 = vpop.eup %6712  ;;  %v2604_v17 = vpop.f32.mrb[22].mxu0 }
 0x30a   :  { %6494 = vmatmul.mubr.msk.bf16.gmra.mrb[128].mxu1 %vm234_vm2, %v3540_v37  ;;  %v6715_v22 = vpop.eup %6714  ;;  %v3017_v8 = vadd.f32 %v2939_v1, %v2679_v27  ;;  %v2680_v46 = vadd.f32 %v2604_v17, %v8491_v40  ;;  %v6212_v31 = vpop.f32.mrb[23].mxu0  ;;  %v3542_v40 = vsel %vm3527_vm7, %v3539_v24, %v3541_v30  ;;  %v6814_v24 = vld [vmem:[%s8962_s0 + $0x48] sm:$0xff]  }
 0x30b   :  { %6497 = vmatprep.mubr.msk.bf16.mxu1 %vm6820_vm0, %v9036_v62  ;;  %v5235_v60 = vpack.c.bf16 %v6715_v22, %v6713_v23  ;;  %v3543_v33 = vrot.slane %v6814_v24, 3  ;;  %v6815_v23 = vld [vmem:[%s8962_s0 + $0x50] sm:$0xff]  }
 0x30c   :  { %v4131_v16 = vadd.f32 %v8615_v14, %v3017_v8  ;;  %v3018_v36 = vadd.f32 %v2942_v0, %v2680_v46  ;;  %6438 = vmatmul.mubr.msk.bf16.gmra.mrb[128].mxu0 %vm234_vm2, %v8211_v12  ;;  %v3545_v17 = vrot.slane %v6815_v23, 3 }
 0x30d   :  { %v2947_v59 = vpop.f32.mrb[24].mxu1  ;;  %5367 = vst [vmem:[%s8964_s4 + $0xd8] sm:$0xff] %v5235_v60   ;;  %6441 = vmatprep.mubr.msk.bf16.mxu0 %vm6820_vm0, %v9036_v62 }
 0x30e   :  { %v6271_v29 = vpop.f32.mrb[25].mxu1  ;;  %v4132_v61 = vadd.f32 %v8615_v14, %v3018_v36  ;;  %6720 = vtanh.f32 %v4131_v16 }
 0x30f   :  { %v2950_v43 = vpop.f32.mrb[26].mxu1  ;;  %v2609_v54 = vpop.f32.mrb[24].mxu0 }
 0x310   :  { %v6272_v21 = vpop.f32.mrb[27].mxu1  ;;  %6722 = vtanh.f32 %v4132_v61  ;;  %v2681_v15 = vadd.f32 %v2609_v54, %v8497_v63  ;;  %v6215_v12 = vpop.f32.mrb[25].mxu0  ;;  %v6816_v54 = vld [vmem:[%s8962_s0 + $0x58] sm:$0xff]  }
 0x311   :  { %v6717_v18 = vpop.eup %6716  ;;  %v2612_v51 = vpop.f32.mrb[26].mxu0 }
 0x312   :  { %6498 = vmatmul.mubr.msk.bf16.gmra.mrb[132].mxu1 %vm234_vm2, %v3542_v40  ;;  %v6719_v6 = vpop.eup %6718  ;;  %v3019_v55 = vadd.f32 %v2947_v59, %v2681_v15  ;;  %v2682_v52 = vadd.f32 %v2612_v51, %v8503_v44  ;;  %v6216_v42 = vpop.f32.mrb[27].mxu0  ;;  %v3544_v44 = vsel %vm3527_vm7, %v3541_v30, %v3543_v33  ;;  %v3547_v15 = vrot.slane %v6816_v54, 3 }
 0x313   :  { %6501 = vmatprep.mubr.msk.bf16.mxu1 %vm6820_vm0, %v9036_v62  ;;  %v5240_v1 = vpack.c.bf16 %v6719_v6, %v6717_v18 }
 0x314   :  { %v4133_v5 = vadd.f32 %v8615_v14, %v3019_v55  ;;  %v3020_v4 = vadd.f32 %v2950_v43, %v2682_v52  ;;  %6442 = vmatmul.mubr.msk.bf16.gmra.mrb[132].mxu0 %vm234_vm2, %v8242_v56 }
 0x315   :  { %v2955_v63 = vpop.f32.mrb[28].mxu1  ;;  %5368 = vst [vmem:[%s8964_s4 + $0xe0] sm:$0xff] %v5240_v1   ;;  %6445 = vmatprep.mubr.msk.bf16.mxu0 %vm6820_vm0, %v9036_v62 }
 0x316   :  { %v6275_v34 = vpop.f32.mrb[29].mxu1  ;;  %v4134_v37 = vadd.f32 %v8615_v14, %v3020_v4  ;;  %6724 = vtanh.f32 %v4133_v5 }
 0x317   :  { %v2958_v0 = vpop.f32.mrb[30].mxu1  ;;  %v2617_v9 = vpop.f32.mrb[28].mxu0 }
 0x318   :  { %v6276_v7 = vpop.f32.mrb[31].mxu1  ;;  %6726 = vtanh.f32 %v4134_v37  ;;  %v2683_v25 = vadd.f32 %v2617_v9, %v8509_v26  ;;  %v6219_v56 = vpop.f32.mrb[29].mxu0 }
 0x319   :  { %v6721_v27 = vpop.eup %6720  ;;  %v2620_v50 = vpop.f32.mrb[30].mxu0 }
 0x31a   :  { %6502 = vmatmul.mubr.msk.bf16.gmra.mrb[136].mxu1 %vm234_vm2, %v3544_v44  ;;  %v6723_v47 = vpop.eup %6722  ;;  %v3021_v30 = vadd.f32 %v2955_v63, %v2683_v25  ;;  %v2684_v22 = vadd.f32 %v2620_v50, %v8515_v45  ;;  %v6220_v8 = vpop.f32.mrb[31].mxu0  ;;  %v3546_v45 = vsel %vm3527_vm7, %v3543_v33, %v3545_v17  ;;  %v6817_v44 = vld [vmem:[%s8962_s0 + $0x60] sm:$0xff]  }
 0x31b   :  { %6505 = vmatprep.mubr.msk.bf16.mxu1 %vm6820_vm0, %v9036_v62  ;;  %v5245_v46 = vpack.c.bf16 %v6723_v47, %v6721_v27  ;;  %v3549_v37 = vrot.slane %v6817_v44, 3 }
 0x31c   :  { %v4135_v31 = vadd.f32 %v8615_v14, %v3021_v30  ;;  %v3022_v60 = vadd.f32 %v2958_v0, %v2684_v22  ;;  %6446 = vmatmul.mubr.msk.bf16.gmra.mrb[136].mxu0 %vm234_vm2, %v8263_v32 }
 0x31d   :  { %v2963_v26 = vpop.f32.mrb[32].mxu1  ;;  %5369 = vst [vmem:[%s8964_s4 + $0xe8] sm:$0xff] %v5245_v46   ;;  %6449 = vmatprep.mubr.msk.bf16.mxu0 %vm6820_vm0, %v9036_v62 }
 0x31e   :  { %v6279_v59 = vpop.f32.mrb[33].mxu1  ;;  %v4136_v36 = vadd.f32 %v8615_v14, %v3022_v60  ;;  %6728 = vtanh.f32 %v4135_v31  ;;  %v3551_v60 = vrot.slane %v8326_v28, 3 }
 0x31f   :  { %v2966_v16 = vpop.f32.mrb[34].mxu1  ;;  %v2625_v43 = vpop.f32.mrb[32].mxu0 }
 0x320   :  { %v6280_v29 = vpop.f32.mrb[35].mxu1  ;;  %6730 = vtanh.f32 %v4136_v36  ;;  %v2685_v40 = vadd.f32 %v2625_v43, %v8521_v2  ;;  %v6223_v32 = vpop.f32.mrb[33].mxu0  ;;  %v3552_v28 = vsel %vm3527_vm7, %v3549_v37, %v3551_v60 }
 0x321   :  { %v6725_v61 = vpop.eup %6724  ;;  %v2628_v21 = vpop.f32.mrb[34].mxu0 }
 0x322   :  { %6506 = vmatmul.mubr.msk.bf16.gmra.mrb[140].mxu1 %vm234_vm2, %v3546_v45  ;;  %v6727_v12 = vpop.eup %6726  ;;  %v3023_v18 = vadd.f32 %v2963_v26, %v2685_v40  ;;  %v2686_v51 = vadd.f32 %v2628_v21, %v8527_v57  ;;  %v6224_v24 = vpop.f32.mrb[35].mxu0  ;;  %v3548_v57 = vsel %vm3527_vm7, %v3545_v17, %v3547_v15 }
 0x323   :  { %6509 = vmatprep.mubr.msk.bf16.mxu1 %vm6820_vm0, %v9036_v62  ;;  %v5250_v33 = vpack.c.bf16 %v6727_v12, %v6725_v61 }
 0x324   :  { %v4137_v6 = vadd.f32 %v8615_v14, %v3023_v18  ;;  %v3024_v55 = vadd.f32 %v2966_v16, %v2686_v51  ;;  %6450 = vmatmul.mubr.msk.bf16.gmra.mrb[140].mxu0 %vm234_vm2, %v8294_v19 }
 0x325   :  { %v2971_v2 = vpop.f32.mrb[36].mxu1  ;;  %5370 = vst [vmem:[%s8964_s4 + $0xf0] sm:$0xff] %v5250_v33   ;;  %6453 = vmatprep.mubr.msk.bf16.mxu0 %vm6820_vm0, %v9036_v62 }
 0x326   :  { %v6283_v52 = vpop.f32.mrb[37].mxu1  ;;  %v4138_v1 = vadd.f32 %v8615_v14, %v3024_v55  ;;  %6732 = vtanh.f32 %v4137_v6 }
 0x327   :  { %v2974_v42 = vpop.f32.mrb[38].mxu1  ;;  %v2633_v5 = vpop.f32.mrb[36].mxu0 }
 0x328   :  { %v6284_v63 = vpop.f32.mrb[39].mxu1  ;;  %6734 = vtanh.f32 %v4138_v1  ;;  %v2687_v4 = vadd.f32 %v2633_v5, %v8533_v38  ;;  %v6227_v19 = vpop.f32.mrb[37].mxu0 }
 0x329   :  { %v6729_v34 = vpop.eup %6728  ;;  %v2636_v0 = vpop.f32.mrb[38].mxu0 }
 0x32a   :  { %6510 = vmatmul.mubr.msk.bf16.gmra.mrb[144].mxu1 %vm234_vm2, %v3548_v57  ;;  %v6731_v7 = vpop.eup %6730  ;;  %v3025_v9 = vadd.f32 %v2971_v2, %v2687_v4  ;;  %v2688_v25 = vadd.f32 %v2636_v0, %v8539_v49  ;;  %v6228_v56 = vpop.f32.mrb[39].mxu0  ;;  %v3550_v49 = vsel %vm3527_vm7, %v3547_v15, %v3549_v37 }
 0x32b   :  { %6513 = vmatprep.mubr.msk.bf16.mxu1 %vm6820_vm0, %v9036_v62  ;;  %v5255_v27 = vpack.c.bf16 %v6731_v7, %v6729_v34 }
 0x32c   :  { %v4139_v50 = vadd.f32 %v8615_v14, %v3025_v9  ;;  %v3026_v23 = vadd.f32 %v2974_v42, %v2688_v25  ;;  %6454 = vmatmul.mubr.msk.bf16.gmra.mrb[144].mxu0 %vm234_vm2, %v8323_v39 }
 0x32d   :  { %v2979_v38 = vpop.f32.mrb[40].mxu1  ;;  %5371 = vst [vmem:[%s8964_s4 + $0xf8] sm:$0xff] %v5255_v27   ;;  %6457 = vmatprep.mubr.msk.bf16.mxu0 %vm6820_vm0, %v9036_v62 }
 0x32e   :  { %v6287_v17 = vpop.f32.mrb[41].mxu1  ;;  %v4140_v30 = vadd.f32 %v8615_v14, %v3026_v23  ;;  %6736 = vtanh.f32 %v4139_v50 }
 0x32f   :  { %v2982_v47 = vpop.f32.mrb[42].mxu1  ;;  %v2641_v8 = vpop.f32.mrb[40].mxu0 }
 0x330   :  { %v6288_v22 = vpop.f32.mrb[43].mxu1  ;;  %6738 = vtanh.f32 %v4140_v30  ;;  %v2689_v46 = vadd.f32 %v2641_v8, %v8545_v3  ;;  %v6231_v39 = vpop.f32.mrb[41].mxu0 }
 0x331   :  { %v6733_v26 = vpop.eup %6732  ;;  %v2644_v31 = vpop.f32.mrb[42].mxu0 }
 0x332   :  { %6514 = vmatmul.mubr.msk.bf16.gmra.mrb[148].mxu1 %vm234_vm2, %v3550_v49  ;;  %v6735_v59 = vpop.eup %6734  ;;  %v3027_v16 = vadd.f32 %v2979_v38, %v2689_v46  ;;  %v2690_v45 = vadd.f32 %v2644_v31, %v8551_v41  ;;  %v6232_v36 = vpop.f32.mrb[43].mxu0 }
 0x333   :  { %6517 = vmatprep.mubr.msk.bf16.mxu1 %vm6820_vm0, %v9036_v62  ;;  %v5260_v29 = vpack.c.bf16 %v6735_v59, %v6733_v26 }
 0x334   :  { %v4141_v40 = vadd.f32 %v8615_v14, %v3027_v16  ;;  %v3028_v3 = vadd.f32 %v2982_v47, %v2690_v45  ;;  %6458 = vmatmul.mubr.msk.bf16.gmra.mrb[148].mxu0 %vm234_vm2, %v8347_v13 }
 0x335   :  { %v2987_v43 = vpop.f32.mrb[44].mxu1  ;;  %5372 = vst [vmem:[%s8964_s4 + $0x100] sm:$0xff] %v5260_v29   ;;  %6461 = vmatprep.mubr.msk.bf16.mxu0 %vm6820_vm0, %v9036_v62 }
 0x336   :  { %v6291_v32 = vpop.f32.mrb[45].mxu1  ;;  %v4142_v41 = vadd.f32 %v8615_v14, %v3028_v3  ;;  %6740 = vtanh.f32 %v4141_v40 }
 0x337   :  { %v2990_v61 = vpop.f32.mrb[46].mxu1  ;;  %v2649_v54 = vpop.f32.mrb[44].mxu0 }
 0x338   :  { %v6292_v21 = vpop.f32.mrb[47].mxu1  ;;  %6742 = vtanh.f32 %v4142_v41  ;;  %v2691_v15 = vadd.f32 %v2649_v54, %v8557_v10  ;;  %v6235_v13 = vpop.f32.mrb[45].mxu0 }
 0x339   :  { %v6737_v12 = vpop.eup %6736  ;;  %v2652_v18 = vpop.f32.mrb[46].mxu0 }
 0x33a   :  { %6518 = vmatmul.mubr.msk.bf16.gmra.mrb[152].mxu1 %vm234_vm2, %v3552_v28  ;;  %v6739_v51 = vpop.eup %6738  ;;  %v3029_v24 = vadd.f32 %v2987_v43, %v2691_v15  ;;  %v2692_v33 = vadd.f32 %v2652_v18, %v8563_v35  ;;  %v6236_v2 = vpop.f32.mrb[47].mxu0 }
 0x33b   :  { %6521 = vmatprep.mubr.msk.bf16.mxu1 %vm6820_vm0, %v9036_v62  ;;  %v5265_v6 = vpack.c.bf16 %v6739_v51, %v6737_v12 }
 0x33c   :  { %v4143_v52 = vadd.f32 %v8615_v14, %v3029_v24  ;;  %v3030_v42 = vadd.f32 %v2990_v61, %v2692_v33  ;;  %6462 = vmatmul.mubr.msk.bf16.gmra.mrb[152].mxu0 %vm234_vm2, %v8372_v11 }
 0x33d   :  { %v2995_v55 = vpop.f32.mrb[48].mxu1  ;;  %5373 = vst [vmem:[%s8964_s4 + $0x108] sm:$0xff] %v5265_v6   ;;  %6465 = vmatprep.mubr.msk.bf16.mxu0 %vm6820_vm0, %v9036_v62 }
 0x33e   :  { %v6295_v10 = vpop.f32.mrb[49].mxu1  ;;  %v4144_v35 = vadd.f32 %v8615_v14, %v3030_v42  ;;  %6744 = vtanh.f32 %v4143_v52 }
 0x33f   :  { %v2998_v57 = vpop.f32.mrb[50].mxu1  ;;  %v2657_v63 = vpop.f32.mrb[48].mxu0 }
 0x340   :  { %v6296_v1 = vpop.f32.mrb[51].mxu1  ;;  %6746 = vtanh.f32 %v4144_v35  ;;  %v2693_v5 = vadd.f32 %v2657_v63, %v8575_v48  ;;  %v6239_v4 = vpop.f32.mrb[49].mxu0 }
 0x341   :  { %v6741_v11 = vpop.eup %6740  ;;  %v2660_v19 = vpop.f32.mrb[50].mxu0 }
 0x342   :  { %6522 = vmatmul.mubr.msk.bf16.gmra.mrb[156].mxu1 %vm234_vm2, %v3551_v60  ;;  %v6743_v34 = vpop.eup %6742  ;;  %v3031_v0 = vadd.f32 %v2995_v55, %v2693_v5  ;;  %v2694_v44 = vadd.f32 %v2660_v19, %v8584_v20  ;;  %v6240_v37 = vpop.f32.mrb[51].mxu0 }
 0x343   :  { %v5270_v7 = vpack.c.bf16 %v6743_v34, %v6741_v11 }
 0x344   :  { %v4145_v9 = vadd.f32 %v8615_v14, %v3031_v0  ;;  %v3032_v25 = vadd.f32 %v2998_v57, %v2694_v44  ;;  %6466 = vmatmul.mubr.msk.bf16.gmra.mrb[156].mxu0 %vm234_vm2, %v8360_v53 }
 0x345   :  { %v3003_v62 = vpop.f32.mrb[52].mxu1  ;;  %5374 = vst [vmem:[%s8964_s4 + $0x110] sm:$0xff] %v5270_v7  }
 0x346   :  { %v6299_v56 = vpop.f32.mrb[53].mxu1  ;;  %v4146_v27 = vadd.f32 %v8615_v14, %v3032_v25  ;;  %6748 = vtanh.f32 %v4145_v9 }
 0x347   :  { %v3006_v48 = vpop.f32.mrb[54].mxu1  ;;  %v2665_v20 = vpop.f32.mrb[52].mxu0 }
 0x348   :  { %v6300_v38 = vpop.f32.mrb[55].mxu1  ;;  %6750 = vtanh.f32 %v4146_v27  ;;  %v2695_v50 = vadd.f32 %v2665_v20, %v8591_v58  ;;  %v6243_v23 = vpop.f32.mrb[53].mxu0 }
 0x349   :  { %v6745_v17 = vpop.eup %6744  ;;  %v2668_v47 = vpop.f32.mrb[54].mxu0 }
 0x34a   :  { %v6747_v49 = vpop.eup %6746  ;;  %v3033_v30 = vadd.f32 %v3003_v62, %v2695_v50  ;;  %v6244_v53 = vpop.f32.mrb[55].mxu0 }
 0x34b   :  { %v5275_v22 = vpack.c.bf16 %v6747_v49, %v6745_v17 }
 0x34c   :  { %v4147_v46 = vadd.f32 %v8615_v14, %v3033_v30 }
 0x34d   :  { %v3238_v8 = vpop.f32.mrb[56].mxu1  ;;  %5375 = vst [vmem:[%s8964_s4 + $0x118] sm:$0xff] %v5275_v22  }
 0x34e   :  { %v6363_v39 = vpop.f32.mrb[57].mxu1  ;;  %6752 = vtanh.f32 %v4147_v46 }
 0x34f   :  { %v3241_v26 = vpop.f32.mrb[58].mxu1  ;;  %v3090_v60 = vpop.f32.mrb[56].mxu0 }
 0x350   :  { %v6364_v31 = vpop.f32.mrb[59].mxu1  ;;  %v8810_v58 = vadd.f32 %v3238_v8, %v3090_v60  ;;  %v6307_v59 = vpop.f32.mrb[57].mxu0 }
 0x351   :  { %v6749_v16 = vpop.eup %6748  ;;  %v3093_v45 = vpop.f32.mrb[58].mxu0 }
 0x352   :  { %v6751_v36 = vpop.eup %6750  ;;  %v8812_v29 = vadd.f32 %v3241_v26, %v3093_v45  ;;  %v6308_v43 = vpop.f32.mrb[59].mxu0 }
 0x353   :  { %v5280_v40 = vpack.c.bf16 %v6751_v36, %v6749_v16 }
 0x355   :  { %v3246_v3 = vpop.f32.mrb[60].mxu1  ;;  %5376 = vst [vmem:[%s8964_s4 + $0x120] sm:$0xff] %v5280_v40  }
 0x356   :  { %v6367_v32 = vpop.f32.mrb[61].mxu1 }
 0x357   :  { %v3249_v61 = vpop.f32.mrb[62].mxu1  ;;  %v3098_v41 = vpop.f32.mrb[60].mxu0 }
 0x358   :  { %v6368_v28 = vpop.f32.mrb[63].mxu1  ;;  %v6753_v21 = vpop.eup %6752  ;;  %v8817_v54 = vadd.f32 %v3246_v3, %v3098_v41 }
 0x359   :  { %v6311_v15 = vpop.f32.mrb[61].mxu0  ;;  %v5076_v13 = vpack.c.bf16 %v6753_v21, %v6753_v21 }
 0x35a   :  { %v3101_v12 = vpop.f32.mrb[62].mxu0 }
 0x35b   :  { %v8819_v18 = vadd.f32 %v3249_v61, %v3101_v12  ;;  %v6312_v51 = vpop.f32.mrb[63].mxu0  ;;  %4951 = vst [vmem:[%s8964_s4 + $0x128] sm:$0xf] %v5076_v13 }
 0x35d   :  { %v3254_v24 = vpop.f32.mrb[64].mxu1 }
 0x35e   :  { %v6371_v33 = vpop.f32.mrb[65].mxu1 }
 0x35f   :  { %v3257_v2 = vpop.f32.mrb[66].mxu1  ;;  %v3106_v55 = vpop.f32.mrb[64].mxu0 }
 0x360   :  { %v6372_v6 = vpop.f32.mrb[67].mxu1  ;;  %v8824_v52 = vadd.f32 %v3254_v24, %v3106_v55  ;;  %v6315_v42 = vpop.f32.mrb[65].mxu0 }
 0x361   :  { %v3109_v10 = vpop.f32.mrb[66].mxu0 }
 0x362   :  { %v8826_v57 = vadd.f32 %v3257_v2, %v3109_v10  ;;  %v6316_v35 = vpop.f32.mrb[67].mxu0 }
 0x365   :  { %v3262_v1 = vpop.f32.mrb[68].mxu1 }
 0x366   :  { %v6375_v63 = vpop.f32.mrb[69].mxu1 }
 0x367   :  { %v3265_v5 = vpop.f32.mrb[70].mxu1  ;;  %v3114_v11 = vpop.f32.mrb[68].mxu0 }
 0x368   :  { %v6376_v4 = vpop.f32.mrb[71].mxu1  ;;  %v8828_v19 = vadd.f32 %v3262_v1, %v3114_v11  ;;  %v6319_v34 = vpop.f32.mrb[69].mxu0 }
 0x369   :  { %v3117_v0 = vpop.f32.mrb[70].mxu0 }
 0x36a   :  { %v8830_v44 = vadd.f32 %v3265_v5, %v3117_v0  ;;  %v6320_v37 = vpop.f32.mrb[71].mxu0 }
 0x36d   :  { %v3270_v7 = vpop.f32.mrb[72].mxu1 }
 0x36e   :  { %v6379_v62 = vpop.f32.mrb[73].mxu1 }
 0x36f   :  { %v3273_v9 = vpop.f32.mrb[74].mxu1  ;;  %v3122_v56 = vpop.f32.mrb[72].mxu0 }
 0x370   :  { %v6380_v25 = vpop.f32.mrb[75].mxu1  ;;  %v8832_v48 = vadd.f32 %v3270_v7, %v3122_v56  ;;  %v6323_v27 = vpop.f32.mrb[73].mxu0 }
 0x371   :  { %v3125_v38 = vpop.f32.mrb[74].mxu0 }
 0x372   :  { %v8834_v20 = vadd.f32 %v3273_v9, %v3125_v38  ;;  %v6324_v50 = vpop.f32.mrb[75].mxu0 }
 0x375   :  { %v3278_v23 = vpop.f32.mrb[76].mxu1 }
 0x376   :  { %v6383_v17 = vpop.f32.mrb[77].mxu1 }
 0x377   :  { %v3281_v47 = vpop.f32.mrb[78].mxu1  ;;  %v3130_v30 = vpop.f32.mrb[76].mxu0 }
 0x378   :  { %v6384_v49 = vpop.f32.mrb[79].mxu1  ;;  %v8836_v53 = vadd.f32 %v3278_v23, %v3130_v30  ;;  %v6327_v22 = vpop.f32.mrb[77].mxu0 }
 0x379   :  { %v3133_v8 = vpop.f32.mrb[78].mxu0 }
 0x37a   :  { %v8838_v46 = vadd.f32 %v3281_v47, %v3133_v8  ;;  %v6328_v39 = vpop.f32.mrb[79].mxu0 }
 0x37d   :  { %v3286_v26 = vpop.f32.mrb[80].mxu1 }
 0x37e   :  { %v6387_v31 = vpop.f32.mrb[81].mxu1 }
 0x37f   :  { %v3289_v60 = vpop.f32.mrb[82].mxu1  ;;  %v3138_v16 = vpop.f32.mrb[80].mxu0 }
 0x380   :  { %v6388_v59 = vpop.f32.mrb[83].mxu1  ;;  %v8840_v45 = vadd.f32 %v3286_v26, %v3138_v16  ;;  %v6331_v36 = vpop.f32.mrb[81].mxu0 }
 0x381   :  { %v3141_v43 = vpop.f32.mrb[82].mxu0 }
 0x382   :  { %v8842_v40 = vadd.f32 %v3289_v60, %v3141_v43  ;;  %v6332_v3 = vpop.f32.mrb[83].mxu0 }
 0x385   :  { %v3294_v32 = vpop.f32.mrb[84].mxu1 }
 0x386   :  { %v6391_v61 = vpop.f32.mrb[85].mxu1 }
 0x387   :  { %v3297_v28 = vpop.f32.mrb[86].mxu1  ;;  %v3146_v21 = vpop.f32.mrb[84].mxu0 }
 0x388   :  { %v6392_v41 = vpop.f32.mrb[87].mxu1  ;;  %v8844_v15 = vadd.f32 %v3294_v32, %v3146_v21  ;;  %v6335_v13 = vpop.f32.mrb[85].mxu0 }
 0x389   :  { %v3149_v12 = vpop.f32.mrb[86].mxu0 }
 0x38a   :  { %v8846_v51 = vadd.f32 %v3297_v28, %v3149_v12  ;;  %v6336_v24 = vpop.f32.mrb[87].mxu0 }
 0x38d   :  { %v3302_v33 = vpop.f32.mrb[88].mxu1 }
 0x38e   :  { %v6395_v2 = vpop.f32.mrb[89].mxu1 }
 0x38f   :  { %v3305_v6 = vpop.f32.mrb[90].mxu1  ;;  %v3154_v42 = vpop.f32.mrb[88].mxu0 }
 0x390   :  { %v6396_v55 = vpop.f32.mrb[91].mxu1  ;;  %v8848_v10 = vadd.f32 %v3302_v33, %v3154_v42  ;;  %v6339_v35 = vpop.f32.mrb[89].mxu0 }
 0x391   :  { %v3157_v1 = vpop.f32.mrb[90].mxu0 }
 0x392   :  { %v8850_v63 = vadd.f32 %v3305_v6, %v3157_v1  ;;  %v6340_v5 = vpop.f32.mrb[91].mxu0 }
 0x395   :  { %v3310_v4 = vpop.f32.mrb[92].mxu1 }
 0x396   :  { %v6399_v11 = vpop.f32.mrb[93].mxu1 }
 0x397   :  { %v3313_v34 = vpop.f32.mrb[94].mxu1  ;;  %v3162_v37 = vpop.f32.mrb[92].mxu0 }
 0x398   :  { %v6400_v0 = vpop.f32.mrb[95].mxu1  ;;  %v8852_v7 = vadd.f32 %v3310_v4, %v3162_v37  ;;  %v6343_v62 = vpop.f32.mrb[93].mxu0 }
 0x399   :  { %v3165_v9 = vpop.f32.mrb[94].mxu0 }
 0x39a   :  { %v8854_v25 = vadd.f32 %v3313_v34, %v3165_v9  ;;  %v6344_v56 = vpop.f32.mrb[95].mxu0 }
 0x39d   :  { %v3318_v27 = vpop.f32.mrb[96].mxu1 }
 0x39e   :  { %v6403_v38 = vpop.f32.mrb[97].mxu1 }
 0x39f   :  { %v3321_v50 = vpop.f32.mrb[98].mxu1  ;;  %v3170_v17 = vpop.f32.mrb[96].mxu0 }
 0x3a0   :  { %v6404_v23 = vpop.f32.mrb[99].mxu1  ;;  %v8856_v47 = vadd.f32 %v3318_v27, %v3170_v17  ;;  %v6347_v49 = vpop.f32.mrb[97].mxu0 }
 0x3a1   :  { %v3173_v30 = vpop.f32.mrb[98].mxu0 }
 0x3a2   :  { %v8858_v22 = vadd.f32 %v3321_v50, %v3173_v30  ;;  %v6348_v8 = vpop.f32.mrb[99].mxu0 }
 0x3a5   :  { %v3326_v39 = vpop.f32.mrb[100].mxu1 }
 0x3a6   :  { %v6407_v26 = vpop.f32.mrb[101].mxu1 }
 0x3a7   :  { %v3329_v31 = vpop.f32.mrb[102].mxu1  ;;  %v3178_v59 = vpop.f32.mrb[100].mxu0 }
 0x3a8   :  { %v6408_v60 = vpop.f32.mrb[103].mxu1  ;;  %v8860_v16 = vadd.f32 %v3326_v39, %v3178_v59  ;;  %v6351_v36 = vpop.f32.mrb[101].mxu0 }
 0x3a9   :  { %v3181_v43 = vpop.f32.mrb[102].mxu0 }
 0x3aa   :  { %v8862_v3 = vadd.f32 %v3329_v31, %v3181_v43  ;;  %v6352_v32 = vpop.f32.mrb[103].mxu0 }
 0x3ad   :  { %v3334_v61 = vpop.f32.mrb[104].mxu1 }
 0x3ae   :  { %v6411_v28 = vpop.f32.mrb[105].mxu1 }
 0x3af   :  { %v3337_v41 = vpop.f32.mrb[106].mxu1  ;;  %v3186_v13 = vpop.f32.mrb[104].mxu0 }
 0x3b0   :  { %v6412_v21 = vpop.f32.mrb[107].mxu1  ;;  %v8864_v12 = vadd.f32 %v3334_v61, %v3186_v13  ;;  %v6355_v24 = vpop.f32.mrb[105].mxu0 }
 0x3b1   :  { %v3189_v33 = vpop.f32.mrb[106].mxu0 }
 0x3b2   :  { %v6356_v2 = vpop.f32.mrb[107].mxu0 }
 0x3b5   :  { %v3638_v6 = vpop.f32.mrb[108].mxu1 }
 0x3b6   :  { %v6475_v55 = vpop.f32.mrb[109].mxu1 }
 0x3b7   :  { %v3641_v42 = vpop.f32.mrb[110].mxu1  ;;  %v3391_v1 = vpop.f32.mrb[108].mxu0 }
 0x3b8   :  { %v6476_v35 = vpop.f32.mrb[111].mxu1  ;;  %v3493_v5 = vadd.f32 %v3391_v1, %v8810_v58  ;;  %v6419_v4 = vpop.f32.mrb[109].mxu0 }
 0x3b9   :  { %v3394_v11 = vpop.f32.mrb[110].mxu0 }
 0x3ba   :  { %v3740_v34 = vadd.f32 %v3638_v6, %v3493_v5  ;;  %v3494_v0 = vadd.f32 %v3394_v11, %v8812_v29  ;;  %v6420_v37 = vpop.f32.mrb[111].mxu0 }
 0x3bc   :  { %v4300_v9 = vadd.f32 %v8615_v14, %v3740_v34  ;;  %v3741_v56 = vadd.f32 %v3641_v42, %v3494_v0 }
 0x3bd   :  { %v3646_v62 = vpop.f32.mrb[112].mxu1 }
 0x3be   :  { %v6479_v27 = vpop.f32.mrb[113].mxu1  ;;  %6754 = vtanh.f32 %v4300_v9  ;;  %v4301_v58 = vadd.f32 %v8615_v14, %v3741_v56 }
 0x3bf   :  { %v3649_v38 = vpop.f32.mrb[114].mxu1  ;;  %v3399_v23 = vpop.f32.mrb[112].mxu0 }
 0x3c0   :  { %v6480_v50 = vpop.f32.mrb[115].mxu1  ;;  %v3495_v17 = vadd.f32 %v3399_v23, %v8817_v54  ;;  %v6423_v49 = vpop.f32.mrb[113].mxu0  ;;  %6756 = vtanh.f32 %v4301_v58 }
 0x3c1   :  { %v3402_v30 = vpop.f32.mrb[114].mxu0 }
 0x3c2   :  { %v3742_v8 = vadd.f32 %v3646_v62, %v3495_v17  ;;  %v3496_v39 = vadd.f32 %v3402_v30, %v8819_v18  ;;  %v6424_v29 = vpop.f32.mrb[115].mxu0 }
 0x3c3   :  { %v8891_v29 = vld [vmem:[%s8963_s3 + $0x1] ss:$0 sm:$0xff] }
 0x3c4   :  { %v4302_v31 = vadd.f32 %v8615_v14, %v3742_v8  ;;  %v3743_v60 = vadd.f32 %v3649_v38, %v3496_v39 }
 0x3c5   :  { %v3654_v26 = vpop.f32.mrb[116].mxu1 }
 0x3c6   :  { %v6483_v59 = vpop.f32.mrb[117].mxu1  ;;  %6758 = vtanh.f32 %v4302_v31  ;;  %v4303_v21 = vadd.f32 %v8615_v14, %v3743_v60 }
 0x3c7   :  { %v3657_v36 = vpop.f32.mrb[118].mxu1  ;;  %v3407_v32 = vpop.f32.mrb[116].mxu0 }
 0x3c8   :  { %v6484_v43 = vpop.f32.mrb[119].mxu1  ;;  %v6755_v61 = vpop.eup %6754  ;;  %v3497_v54 = vadd.f32 %v3407_v32, %v8824_v52  ;;  %6760 = vtanh.f32 %v4303_v21 }
 0x3c9   :  { %v6427_v28 = vpop.f32.mrb[117].mxu0  ;;  %v5077_v41 = vpack.c.bf16 %v6755_v61, %v6755_v61 }
 0x3ca   :  { %v3410_v13 = vpop.f32.mrb[118].mxu0  ;;  %v3744_v18 = vadd.f32 %v3654_v26, %v3497_v54  ;;  %v6757_v1 = vpop.eup %6756 }
 0x3cb   :  { %v3498_v24 = vadd.f32 %v3410_v13, %v8826_v57  ;;  %v6428_v33 = vpop.f32.mrb[119].mxu0  ;;  %4977 = vst [vmem:[%s8964_s4 + $0x12c] sm:$0xf] %v5077_v41 }
 0x3cc   :  { %v4304_v6 = vadd.f32 %v8615_v14, %v3744_v18 }
 0x3cd   :  { %v3662_v2 = vpop.f32.mrb[120].mxu1  ;;  %v3745_v55 = vadd.f32 %v3657_v36, %v3498_v24 }
 0x3ce   :  { %v6487_v42 = vpop.f32.mrb[121].mxu1  ;;  %6762 = vtanh.f32 %v4304_v6 }
 0x3cf   :  { %v3665_v52 = vpop.f32.mrb[122].mxu1  ;;  %v3415_v5 = vpop.f32.mrb[120].mxu0  ;;  %v4305_v0 = vadd.f32 %v8615_v14, %v3745_v55 }
 0x3d0   :  { %v6488_v35 = vpop.f32.mrb[123].mxu1  ;;  %v6759_v4 = vpop.eup %6758  ;;  %v3499_v11 = vadd.f32 %v3415_v5, %v8828_v19 }
 0x3d1   :  { %v6431_v57 = vpop.f32.mrb[121].mxu0  ;;  %v5285_v34 = vpack.c.bf16 %v6759_v4, %v6757_v1  ;;  %6764 = vtanh.f32 %v4305_v0 }
 0x3d2   :  { %v3418_v37 = vpop.f32.mrb[122].mxu0  ;;  %v3746_v62 = vadd.f32 %v3662_v2, %v3499_v11  ;;  %v6761_v49 = vpop.eup %6760 }
 0x3d3   :  { %v3500_v9 = vadd.f32 %v3418_v37, %v8830_v44  ;;  %v6432_v56 = vpop.f32.mrb[123].mxu0  ;;  %5377 = vst [vmem:[%s8964_s4 + $0x130] sm:$0xff] %v5285_v34  }
 0x3d4   :  { %v4306_v38 = vadd.f32 %v8615_v14, %v3746_v62 }
 0x3d5   :  { %v3670_v27 = vpop.f32.mrb[124].mxu1  ;;  %v3747_v50 = vadd.f32 %v3665_v52, %v3500_v9 }
 0x3d6   :  { %v6491_v23 = vpop.f32.mrb[125].mxu1  ;;  %6766 = vtanh.f32 %v4306_v38 }
 0x3d7   :  { %v3673_v19 = vpop.f32.mrb[126].mxu1  ;;  %v3423_v58 = vpop.f32.mrb[124].mxu0  ;;  %v4307_v14 = vadd.f32 %v8891_v29, %v3747_v50 }
 0x3d8   :  { %v6492_v17 = vpop.f32.mrb[127].mxu1  ;;  %v6763_v30 = vpop.eup %6762  ;;  %v3501_v8 = vadd.f32 %v3423_v58, %v8832_v48 }
 0x3d9   :  { %v6435_v44 = vpop.f32.mrb[125].mxu0  ;;  %v5290_v39 = vpack.c.bf16 %v6763_v30, %v6761_v49  ;;  %6768 = vtanh.f32 %v4307_v14 }
 0x3da   :  { %v3426_v26 = vpop.f32.mrb[126].mxu0  ;;  %v3748_v31 = vadd.f32 %v3670_v27, %v3501_v8 }
 0x3db   :  { %v3502_v60 = vadd.f32 %v3426_v26, %v8834_v20  ;;  %v6436_v59 = vpop.f32.mrb[127].mxu0  ;;  %5378 = vst [vmem:[%s8964_s4 + $0x138] sm:$0xff] %v5290_v39   ;;  %v6765_v28 = vpop.eup %6764 }
 0x3dc   :  { %v4308_v48 = vadd.f32 %v8891_v29, %v3748_v31 }
 0x3dd   :  { %v3678_v36 = vpop.f32.mrb[128].mxu1  ;;  %v3749_v43 = vadd.f32 %v3673_v19, %v3502_v60 }
 0x3de   :  { %v6495_v32 = vpop.f32.mrb[129].mxu1  ;;  %6770 = vtanh.f32 %v4308_v48 }
 0x3df   :  { %v3681_v61 = vpop.f32.mrb[130].mxu1  ;;  %v3431_v41 = vpop.f32.mrb[128].mxu0  ;;  %v4309_v24 = vadd.f32 %v8891_v29, %v3749_v43 }
 0x3e0   :  { %v6496_v54 = vpop.f32.mrb[131].mxu1  ;;  %v6767_v21 = vpop.eup %6766  ;;  %v3503_v13 = vadd.f32 %v3431_v41, %v8836_v53 }
 0x3e1   :  { %v6439_v20 = vpop.f32.mrb[129].mxu0  ;;  %v5295_v18 = vpack.c.bf16 %v6767_v21, %v6765_v28  ;;  %6772 = vtanh.f32 %v4309_v24 }
 0x3e2   :  { %v3434_v33 = vpop.f32.mrb[130].mxu0  ;;  %v3750_v2 = vadd.f32 %v3678_v36, %v3503_v13 }
 0x3e3   :  { %v3504_v6 = vadd.f32 %v3434_v33, %v8838_v46  ;;  %v6440_v55 = vpop.f32.mrb[131].mxu0  ;;  %5379 = vst [vmem:[%s8964_s4 + $0x140] sm:$0xff] %v5295_v18   ;;  %v6769_v4 = vpop.eup %6768 }
 0x3e4   :  { %v4310_v52 = vadd.f32 %v8891_v29, %v3750_v2 }
 0x3e5   :  { %v3686_v42 = vpop.f32.mrb[132].mxu1  ;;  %v3751_v35 = vadd.f32 %v3681_v61, %v3504_v6 }
 0x3e6   :  { %v6499_v1 = vpop.f32.mrb[133].mxu1  ;;  %6774 = vtanh.f32 %v4310_v52 }
 0x3e7   :  { %v3689_v53 = vpop.f32.mrb[134].mxu1  ;;  %v3439_v11 = vpop.f32.mrb[132].mxu0  ;;  %v4311_v37 = vadd.f32 %v8891_v29, %v3751_v35 }
 0x3e8   :  { %v6500_v5 = vpop.f32.mrb[135].mxu1  ;;  %v6771_v57 = vpop.eup %6770  ;;  %v3505_v34 = vadd.f32 %v3439_v11, %v8840_v45 }
 0x3e9   :  { %v6443_v46 = vpop.f32.mrb[133].mxu0  ;;  %v5300_v0 = vpack.c.bf16 %v6771_v57, %v6769_v4  ;;  %6776 = vtanh.f32 %v4311_v37 }
 0x3ea   :  { %v3442_v62 = vpop.f32.mrb[134].mxu0  ;;  %v3752_v9 = vadd.f32 %v3686_v42, %v3505_v34 }
 0x3eb   :  { %v3506_v56 = vadd.f32 %v3442_v62, %v8842_v40  ;;  %v6444_v27 = vpop.f32.mrb[135].mxu0  ;;  %5380 = vst [vmem:[%s8964_s4 + $0x148] sm:$0xff] %v5300_v0   ;;  %v6773_v49 = vpop.eup %6772 }
 0x3ec   :  { %v4312_v50 = vadd.f32 %v8891_v29, %v3752_v9 }
 0x3ed   :  { %v3694_v38 = vpop.f32.mrb[136].mxu1  ;;  %v3753_v23 = vadd.f32 %v3689_v53, %v3506_v56 }
 0x3ee   :  { %v6503_v19 = vpop.f32.mrb[137].mxu1  ;;  %6778 = vtanh.f32 %v4312_v50 }
 0x3ef   :  { %v3697_v45 = vpop.f32.mrb[138].mxu1  ;;  %v3447_v58 = vpop.f32.mrb[136].mxu0  ;;  %v4313_v39 = vadd.f32 %v8891_v29, %v3753_v23 }
 0x3f0   :  { %v6504_v17 = vpop.f32.mrb[139].mxu1  ;;  %v6775_v30 = vpop.eup %6774  ;;  %v3507_v8 = vadd.f32 %v3447_v58, %v8844_v15 }
 0x3f1   :  { %v6447_v40 = vpop.f32.mrb[137].mxu0  ;;  %v5305_v44 = vpack.c.bf16 %v6775_v30, %v6773_v49  ;;  %6780 = vtanh.f32 %v4313_v39 }
 0x3f2   :  { %v3450_v14 = vpop.f32.mrb[138].mxu0  ;;  %v3754_v26 = vadd.f32 %v3694_v38, %v3507_v8 }
 0x3f3   :  { %v3508_v31 = vadd.f32 %v3450_v14, %v8846_v51  ;;  %v6448_v60 = vpop.f32.mrb[139].mxu0  ;;  %5381 = vst [vmem:[%s8964_s4 + $0x150] sm:$0xff] %v5305_v44   ;;  %v6777_v61 = vpop.eup %6776 }
 0x3f4   :  { %v4314_v36 = vadd.f32 %v8891_v29, %v3754_v26 }
 0x3f5   :  { %v3702_v59 = vpop.f32.mrb[140].mxu1  ;;  %v3755_v48 = vadd.f32 %v3697_v45, %v3508_v31 }
 0x3f6   :  { %v6507_v43 = vpop.f32.mrb[141].mxu1  ;;  %6782 = vtanh.f32 %v4314_v36 }
 0x3f7   :  { %v3705_v15 = vpop.f32.mrb[142].mxu1  ;;  %v3455_v54 = vpop.f32.mrb[140].mxu0  ;;  %v4315_v13 = vadd.f32 %v8891_v29, %v3755_v48 }
 0x3f8   :  { %v6508_v32 = vpop.f32.mrb[143].mxu1  ;;  %v6779_v28 = vpop.eup %6778  ;;  %v3509_v41 = vadd.f32 %v3455_v54, %v8848_v10 }
 0x3f9   :  { %v6451_v51 = vpop.f32.mrb[141].mxu0  ;;  %v5310_v21 = vpack.c.bf16 %v6779_v28, %v6777_v61  ;;  %6784 = vtanh.f32 %v4315_v13 }
 0x3fa   :  { %v3458_v20 = vpop.f32.mrb[142].mxu0  ;;  %v3756_v18 = vadd.f32 %v3702_v59, %v3509_v41 }
 0x3fb   :  { %v3510_v24 = vadd.f32 %v3458_v20, %v8850_v63  ;;  %v6452_v33 = vpop.f32.mrb[143].mxu0  ;;  %5382 = vst [vmem:[%s8964_s4 + $0x158] sm:$0xff] %v5310_v21   ;;  %v6781_v35 = vpop.eup %6780 }
 0x3fc   :  { %v4316_v6 = vadd.f32 %v8891_v29, %v3756_v18 }
 0x3fd   :  { %v3710_v2 = vpop.f32.mrb[144].mxu1  ;;  %v3757_v55 = vadd.f32 %v3705_v15, %v3510_v24 }
 0x3fe   :  { %v6511_v42 = vpop.f32.mrb[145].mxu1  ;;  %6786 = vtanh.f32 %v4316_v6 }
 0x3ff   :  { %v3713_v10 = vpop.f32.mrb[146].mxu1  ;;  %v3463_v1 = vpop.f32.mrb[144].mxu0  ;;  %v4317_v11 = vadd.f32 %v8891_v29, %v3757_v55 }
 0x400   :  { %v6512_v52 = vpop.f32.mrb[147].mxu1  ;;  %v6783_v53 = vpop.eup %6782  ;;  %v3511_v5 = vadd.f32 %v3463_v1, %v8852_v7 }
 0x401   :  { %v6455_v63 = vpop.f32.mrb[145].mxu0  ;;  %v5315_v4 = vpack.c.bf16 %v6783_v53, %v6781_v35  ;;  %6788 = vtanh.f32 %v4317_v11 }
 0x402   :  { %v3466_v57 = vpop.f32.mrb[146].mxu0  ;;  %v3758_v34 = vadd.f32 %v3710_v2, %v3511_v5 }
 0x403   :  { %v3512_v46 = vadd.f32 %v3466_v57, %v8854_v25  ;;  %v6456_v0 = vpop.f32.mrb[147].mxu0  ;;  %5383 = vst [vmem:[%s8964_s4 + $0x160] sm:$0xff] %v5315_v4   ;;  %v6785_v38 = vpop.eup %6784 }
 0x404   :  { %v4318_v62 = vadd.f32 %v8891_v29, %v3758_v34 }
 0x405   :  { %v3718_v37 = vpop.f32.mrb[148].mxu1  ;;  %v3759_v9 = vadd.f32 %v3713_v10, %v3512_v46 }
 0x406   :  { %v6515_v56 = vpop.f32.mrb[149].mxu1  ;;  %6790 = vtanh.f32 %v4318_v62 }
 0x407   :  { %v3721_v7 = vpop.f32.mrb[150].mxu1  ;;  %v3471_v50 = vpop.f32.mrb[148].mxu0  ;;  %v4319_v17 = vadd.f32 %v8891_v29, %v3759_v9 }
 0x408   :  { %v6516_v27 = vpop.f32.mrb[151].mxu1  ;;  %v6787_v23 = vpop.eup %6786  ;;  %v3513_v19 = vadd.f32 %v3471_v50, %v8856_v47 }
 0x409   :  { %v6459_v25 = vpop.f32.mrb[149].mxu0  ;;  %v5320_v45 = vpack.c.bf16 %v6787_v23, %v6785_v38  ;;  %6792 = vtanh.f32 %v4319_v17 }
 0x40a   :  { %v3474_v49 = vpop.f32.mrb[150].mxu0  ;;  %v3760_v58 = vadd.f32 %v3718_v37, %v3513_v19 }
 0x40b   :  { %v3514_v30 = vadd.f32 %v3474_v49, %v8858_v22  ;;  %v6460_v8 = vpop.f32.mrb[151].mxu0  ;;  %5384 = vst [vmem:[%s8964_s4 + $0x168] sm:$0xff] %v5320_v45   ;;  %v6789_v31 = vpop.eup %6788 }
 0x40c   :  { %v4320_v44 = vadd.f32 %v8891_v29, %v3760_v58 }
 0x40d   :  { %v3726_v40 = vpop.f32.mrb[152].mxu1  ;;  %v3761_v39 = vadd.f32 %v3721_v7, %v3514_v30 }
 0x40e   :  { %v6519_v14 = vpop.f32.mrb[153].mxu1  ;;  %6794 = vtanh.f32 %v4320_v44 }
 0x40f   :  { %v3729_v47 = vpop.f32.mrb[154].mxu1  ;;  %v3479_v60 = vpop.f32.mrb[152].mxu0  ;;  %v4321_v43 = vadd.f32 %v8891_v29, %v3761_v39 }
 0x410   :  { %v6520_v26 = vpop.f32.mrb[155].mxu1  ;;  %v6791_v59 = vpop.eup %6790  ;;  %v3515_v36 = vadd.f32 %v3479_v60, %v8860_v16 }
 0x411   :  { %v6463_v22 = vpop.f32.mrb[153].mxu0  ;;  %v5325_v48 = vpack.c.bf16 %v6791_v59, %v6789_v31  ;;  %6796 = vtanh.f32 %v4321_v43 }
 0x412   :  { %v3482_v15 = vpop.f32.mrb[154].mxu0  ;;  %v3762_v32 = vadd.f32 %v3726_v40, %v3515_v36 }
 0x413   :  { %v3516_v61 = vadd.f32 %v3482_v15, %v8862_v3  ;;  %v6464_v54 = vpop.f32.mrb[155].mxu0  ;;  %5385 = vst [vmem:[%s8964_s4 + $0x170] sm:$0xff] %v5325_v48   ;;  %v6793_v20 = vpop.eup %6792 }
 0x414   :  { %v4322_v41 = vadd.f32 %v8891_v29, %v3762_v32 }
 0x415   :  { %v3734_v28 = vpop.f32.mrb[156].mxu1  ;;  %v3763_v51 = vadd.f32 %v3729_v47, %v3516_v61 }
 0x416   :  { %v6523_v21 = vpop.f32.mrb[157].mxu1  ;;  %6798 = vtanh.f32 %v4322_v41 }
 0x417   :  { %v3737_v16 = vpop.f32.mrb[158].mxu1  ;;  %v3487_v18 = vpop.f32.mrb[156].mxu0  ;;  %v4323_v6 = vadd.f32 %v8891_v29, %v3763_v51 }
 0x418   :  { %v6524_v13 = vpop.f32.mrb[159].mxu1  ;;  %v6795_v24 = vpop.eup %6794  ;;  %v3517_v33 = vadd.f32 %v3487_v18, %v8864_v12 }
 0x419   :  { %v6467_v3 = vpop.f32.mrb[157].mxu0  ;;  %v5330_v2 = vpack.c.bf16 %v6795_v24, %v6793_v20  ;;  %6800 = vtanh.f32 %v4323_v6 }
 0x41a   :  { %v3490_v55 = vpop.f32.mrb[158].mxu0  ;;  %v3764_v42 = vadd.f32 %v3734_v28, %v3517_v33 }
 0x41b   :  { %v6468_v10 = vpop.f32.mrb[159].mxu0  ;;  %5386 = vst [vmem:[%s8964_s4 + $0x178] sm:$0xff] %v5330_v2   ;;  %v6797_v35 = vpop.eup %6796 }
 0x41c   :  { %v4324_v52 = vadd.f32 %v8891_v29, %v3764_v42 }
 0x41e   :  { %6802 = vtanh.f32 %v4324_v52 }
 0x420   :  { %v6799_v1 = vpop.eup %6798 }
 0x421   :  { %v5335_v53 = vpack.c.bf16 %v6799_v1, %v6797_v35 }
 0x423   :  { %5387 = vst [vmem:[%s8964_s4 + $0x180] sm:$0xff] %v5335_v53   ;;  %v6801_v12 = vpop.eup %6800 }
 0x428   :  { %v6803_v5 = vpop.eup %6802 }
 0x429   :  { %v5340_v63 = vpack.c.bf16 %v6803_v5, %v6801_v12 }
 0x42b   :  { %5388 = vst [vmem:[%s8964_s4 + $0x188] sm:$0xff] %v5340_v63  }

</bundles_post_ra>
